<compile_context>
chip_gen: v7x
topology: tpu7x:2x2x1
jax: 0.10.0
libtpu: 0.0.40
codegen_flags: <defaults>
</compile_context>

<pallas_src>
import functools

import jax
import jax.numpy as jnp
from jax.experimental import pallas as pl
from jax.experimental.pallas import tpu as pltpu

VMEM = pltpu.MemorySpace.VMEM


# ----------------------------- in-kernel helpers ---------------------------- #

def _lstm_apply(gates, c):
    """Apply LSTM nonlinearities. gates: (B, 4H), c: (B, H). Order i,f,g,o."""
    H = c.shape[-1]
    i = jax.nn.sigmoid(gates[:, 0 * H:1 * H])
    f = jax.nn.sigmoid(gates[:, 1 * H:2 * H])
    g = jnp.tanh(gates[:, 2 * H:3 * H])
    o = jax.nn.sigmoid(gates[:, 3 * H:4 * H])
    c_new = f * c + i * g
    h_new = o * jnp.tanh(c_new)
    return h_new, c_new


def _attend(mem, q):
    """cc = softmax(mem @ q) @ mem, per batch row. mem:(B,S,H) q:(B,H) -> (B,H)."""
    scores = jnp.sum(mem * q[:, None, :], axis=-1)                 # (B, S)
    scores = scores - jnp.max(scores, axis=-1, keepdims=True)
    e = jnp.exp(scores)
    w = e * pl.reciprocal(jnp.sum(e, axis=-1, keepdims=True), approx=True)
    return jnp.sum(w[:, :, None] * mem, axis=1)                    # (B, H)


# ------------------------------- encoder kernel ----------------------------- #

def _encoder_kernel(embs_ref, wihf_ref, whhf_ref, bf_ref,
                    wihb_ref, whhb_ref, bb_ref,
                    encf_ref, encb_ref, hf_ref, cf_ref, hb_ref, cb_ref):
    S = embs_ref.shape[0]
    hf_ref[...] = jnp.zeros_like(hf_ref)
    cf_ref[...] = jnp.zeros_like(cf_ref)
    hb_ref[...] = jnp.zeros_like(hb_ref)
    cb_ref[...] = jnp.zeros_like(cb_ref)

    @pl.loop(0, S, unroll=True)
    def _fwd(t):
        x = embs_ref[t]                                            # (B, hsz)
        h = hf_ref[...]
        c = cf_ref[...]
        gates = (jnp.dot(x, wihf_ref[...], preferred_element_type=jnp.float32)
                 + jnp.dot(h, whhf_ref[...], preferred_element_type=jnp.float32)
                 + bf_ref[...])
        h, c = _lstm_apply(gates, c)
        hf_ref[...] = h
        cf_ref[...] = c
        encf_ref[t] = h

    @pl.loop(0, S, unroll=True)
    def _bwd(i):
        t = S - 1 - i
        x = embs_ref[t]
        h = hb_ref[...]
        c = cb_ref[...]
        gates = (jnp.dot(x, wihb_ref[...], preferred_element_type=jnp.float32)
                 + jnp.dot(h, whhb_ref[...], preferred_element_type=jnp.float32)
                 + bb_ref[...])
        h, c = _lstm_apply(gates, c)
        hb_ref[...] = h
        cb_ref[...] = c
        encb_ref[t] = h


def _encoder(embs, wih_f, whh_f, b_f, wih_b, whh_b, b_b):
    S, B, hsz = embs.shape
    Hh = hsz // 2
    return pl.pallas_call(
        _encoder_kernel,
        out_shape=(jax.ShapeDtypeStruct((S, B, Hh), jnp.float32),   # enc fwd
                   jax.ShapeDtypeStruct((S, B, Hh), jnp.float32),   # enc bwd
                   jax.ShapeDtypeStruct((B, Hh), jnp.float32),      # hf
                   jax.ShapeDtypeStruct((B, Hh), jnp.float32),      # cf
                   jax.ShapeDtypeStruct((B, Hh), jnp.float32),      # hb
                   jax.ShapeDtypeStruct((B, Hh), jnp.float32)),     # cb
        in_specs=[pl.BlockSpec(memory_space=VMEM)] * 7,
        out_specs=(pl.BlockSpec(memory_space=VMEM),) * 6,
    )(embs, wih_f, whh_f, b_f, wih_b, whh_b, b_b)


# ----------------------------- verb decoder kernel -------------------------- #

def _verb_decoder_kernel(vembs_ref, enc_ref, h0_ref, c0_ref,
                         wih_ref, whh_ref, b_ref,
                         wlinin_ref, wlinout_ref, wgen_ref, bgen_ref,
                         vout_ref, venc_ref, h_ref, c_ref,
                         op_s):
    Tv = vembs_ref.shape[0]
    H = h0_ref.shape[1]
    h_ref[...] = h0_ref[...]
    c_ref[...] = c0_ref[...]
    op_s[...] = jnp.zeros_like(op_s)

    @pl.loop(0, Tv, unroll=True)
    def _step(t):
        demb = vembs_ref[t]                                        # (B, H)
        op = op_s[...]
        h = h_ref[...]
        c = c_ref[...]
        # decin = [demb, op]  ->  split wih into row blocks (no in-kernel concat)
        gates = (jnp.dot(demb, wih_ref[0:H, :], preferred_element_type=jnp.float32)
                 + jnp.dot(op, wih_ref[H:2 * H, :], preferred_element_type=jnp.float32)
                 + jnp.dot(h, whh_ref[...], preferred_element_type=jnp.float32)
                 + b_ref[...])
        h, c = _lstm_apply(gates, c)
        h_ref[...] = h
        c_ref[...] = c
        venc_ref[t] = h

        q = jnp.dot(h, wlinin_ref[...], preferred_element_type=jnp.float32)
        cc = _attend(enc_ref[...], q)
        # op = tanh([cc, h] @ vlinout)
        op_new = jnp.tanh(
            jnp.dot(cc, wlinout_ref[0:H, :], preferred_element_type=jnp.float32)
            + jnp.dot(h, wlinout_ref[H:2 * H, :], preferred_element_type=jnp.float32))
        op_s[...] = op_new
        vout_ref[t] = (jnp.dot(op_new, wgen_ref[...],
                               preferred_element_type=jnp.float32) + bgen_ref[...])


def _verb_decoder(vembs, enc, h0, c0, wih, whh, b, wlinin, wlinout, wgen, bgen):
    Tv, B, hsz = vembs.shape
    verbvsz = wgen.shape[1]
    return pl.pallas_call(
        _verb_decoder_kernel,
        out_shape=(jax.ShapeDtypeStruct((Tv, B, verbvsz), jnp.float32),  # voutputs
                   jax.ShapeDtypeStruct((Tv, B, hsz), jnp.float32),      # vencoding
                   jax.ShapeDtypeStruct((B, hsz), jnp.float32),          # h
                   jax.ShapeDtypeStruct((B, hsz), jnp.float32)),         # c
        in_specs=[pl.BlockSpec(memory_space=VMEM)] * 11,
        out_specs=(pl.BlockSpec(memory_space=VMEM),) * 4,
        scratch_shapes=[pltpu.VMEM((B, hsz), jnp.float32)],              # op
    )(vembs, enc, h0, c0, wih, whh, b, wlinin, wlinout, wgen, bgen)


# ----------------------------- main decoder kernel -------------------------- #

def _main_decoder_kernel(dembs_ref, enc_ref, venc_ref, h0_ref, c0_ref,
                         wih_ref, whh_ref, b_ref,
                         wlinin_ref, wdvlinin_ref, wlinout_ref,
                         wgen_ref, bgen_ref,
                         out_ref,
                         h_s, c_s, op_s):
    T = dembs_ref.shape[0]
    H = h0_ref.shape[1]
    h_s[...] = h0_ref[...]
    c_s[...] = c0_ref[...]
    op_s[...] = jnp.zeros_like(op_s)

    @pl.loop(0, T, unroll=True)
    def _step(t):
        demb = dembs_ref[t]                                        # (B, H)
        op = op_s[...]
        h = h_s[...]
        c = c_s[...]
        gates = (jnp.dot(demb, wih_ref[0:H, :], preferred_element_type=jnp.float32)
                 + jnp.dot(op, wih_ref[H:2 * H, :], preferred_element_type=jnp.float32)
                 + jnp.dot(h, whh_ref[...], preferred_element_type=jnp.float32)
                 + b_ref[...])
        h, c = _lstm_apply(gates, c)
        h_s[...] = h
        c_s[...] = c

        q = jnp.dot(h, wlinin_ref[...], preferred_element_type=jnp.float32)
        cc = _attend(enc_ref[...], q)                              # attend encoder
        vq = jnp.dot(h, wdvlinin_ref[...], preferred_element_type=jnp.float32)
        vcc = _attend(venc_ref[...], vq)                           # attend verb enc
        # op = tanh([cc, h, vcc] @ linout)
        op_new = jnp.tanh(
            jnp.dot(cc, wlinout_ref[0:H, :], preferred_element_type=jnp.float32)
            + jnp.dot(h, wlinout_ref[H:2 * H, :], preferred_element_type=jnp.float32)
            + jnp.dot(vcc, wlinout_ref[2 * H:3 * H, :], preferred_element_type=jnp.float32))
        op_s[...] = op_new
        out_ref[t] = (jnp.dot(op_new, wgen_ref[...],
                              preferred_element_type=jnp.float32) + bgen_ref[...])


def _main_decoder(dembs, enc, venc, h0, c0, wih, whh, b,
                  wlinin, wdvlinin, wlinout, wgen, bgen):
    T, B, hsz = dembs.shape
    vsz = wgen.shape[1]
    return pl.pallas_call(
        _main_decoder_kernel,
        out_shape=jax.ShapeDtypeStruct((T, B, vsz), jnp.float32),
        in_specs=[pl.BlockSpec(memory_space=VMEM)] * 13,
        out_specs=pl.BlockSpec(memory_space=VMEM),
        scratch_shapes=[pltpu.VMEM((B, hsz), jnp.float32),   # h
                        pltpu.VMEM((B, hsz), jnp.float32),   # c
                        pltpu.VMEM((B, hsz), jnp.float32)],  # op
    )(dembs, enc, venc, h0, c0, wih, whh, b, wlinin, wdvlinin, wlinout, wgen, bgen)


# --------------------------- parameter creation ----------------------------- #

def _randn(key, shape, scale=0.1):
    return scale * jax.random.normal(key, shape, dtype=jnp.float32)


def init_params(key, svsz, vsz, verbvsz, hsz):
    ks = iter(jax.random.split(key, 40))
    Hh = hsz // 2
    p = {}

    def emb(k, n, d):
        e = _randn(k, (n, d))
        return e.at[0].set(0.0)            # padding_idx=0

    p["encemb"] = emb(next(ks), svsz, hsz)
    p["decemb"] = emb(next(ks), vsz, hsz)
    p["vemb"] = emb(next(ks), verbvsz, hsz)

    # bidirectional encoder (1 layer): per-direction hidden = hsz//2
    for d in ("f", "b"):
        p[f"enc_{d}_wih"] = _randn(next(ks), (hsz, 4 * Hh))
        p[f"enc_{d}_whh"] = _randn(next(ks), (Hh, 4 * Hh))
        p[f"enc_{d}_b"] = _randn(next(ks), (1, 4 * Hh))

    # verb decoder and main decoder LSTMs: input = 2*hsz, hidden = hsz
    for name in ("vdec", "dec"):
        p[f"{name}_wih"] = _randn(next(ks), (2 * hsz, 4 * hsz))
        p[f"{name}_whh"] = _randn(next(ks), (hsz, 4 * hsz))
        p[f"{name}_b"] = _randn(next(ks), (1, 4 * hsz))

    p["gen_w"] = _randn(next(ks), (hsz, vsz))
    p["gen_b"] = _randn(next(ks), (1, vsz))
    p["vgen_w"] = _randn(next(ks), (hsz, verbvsz))
    p["vgen_b"] = _randn(next(ks), (1, verbvsz))

    p["vlinin_w"] = _randn(next(ks), (hsz, hsz))
    p["linin_w"] = _randn(next(ks), (hsz, hsz))
    p["dvlinin_w"] = _randn(next(ks), (hsz, hsz))
    p["vlinout_w"] = _randn(next(ks), (2 * hsz, hsz))
    p["linout_w"] = _randn(next(ks), (3 * hsz, hsz))
    return p


# -------------------------------- forward ----------------------------------- #

@jax.jit
def forward(params, inp, out, verbs):
    """Mirrors model.forward(inp, out, verbs) (teacher forcing, dropout=identity)."""
    B, _ = inp.shape

    # ---- JAX glue: time-major teacher-forced embedding gathers ----
    enc_embs = jnp.take(params["encemb"], jnp.transpose(inp), axis=0)   # (S, B, hsz)

    start = jnp.full((B, 1), 3, dtype=jnp.int32)
    vprev = jnp.concatenate([start, verbs[:, :-1]], axis=1)             # (B, Tv)
    v_embs = jnp.take(params["vemb"], jnp.transpose(vprev), axis=0)     # (Tv, B, hsz)
    dprev = jnp.concatenate([start, out[:, :-1]], axis=1)               # (B, T)
    d_embs = jnp.take(params["decemb"], jnp.transpose(dprev), axis=0)   # (T, B, hsz)

    # ---- encoder: bidirectional single-layer LSTM (one fused kernel) ----
    enc_f, enc_b, hf, cf, hb, cb = _encoder(
        enc_embs,
        params["enc_f_wih"], params["enc_f_whh"], params["enc_f_b"],
        params["enc_b_wih"], params["enc_b_whh"], params["enc_b_b"])

    enc = jnp.transpose(jnp.concatenate([enc_f, enc_b], axis=-1), (1, 0, 2))  # (B,S,hsz)
    h0 = jnp.concatenate([hf, hb], axis=1)                                    # (B,hsz)
    c0 = jnp.concatenate([cf, cb], axis=1)

    # ---- verb decoder (one fused kernel over all Tv steps) ----
    vout_t, venc_t, h1, c1 = _verb_decoder(
        v_embs, enc, h0, c0,
        params["vdec_wih"], params["vdec_whh"], params["vdec_b"],
        params["vlinin_w"], params["vlinout_w"],
        params["vgen_w"], params["vgen_b"])

    voutputs = jnp.transpose(vout_t, (1, 0, 2))       # (B, Tv, verbvsz)
    venc = jnp.transpose(venc_t, (1, 0, 2))           # (B, Tv, hsz)

    # ---- main decoder (one fused kernel over all T steps) ----
    out_t = _main_decoder(
        d_embs, enc, venc, h1, c1,
        params["dec_wih"], params["dec_whh"], params["dec_b"],
        params["linin_w"], params["dvlinin_w"], params["linout_w"],
        params["gen_w"], params["gen_b"])

    outputs = jnp.transpose(out_t, (1, 0, 2))         # (B, T, vsz)
    return outputs, voutputs


# --------------------------------- driver ----------------------------------- #

if __name__ == "__main__":
    # args: svsz=16, vsz=16, verbvsz=16, hsz=32, layers=1, drop=0.0
    B, S, T, Tv = 2, 8, 5, 4
    hsz, svsz, vsz, verbvsz = 32, 16, 16, 16

    key = jax.random.PRNGKey(0)
    kp, k1, k2, k3 = jax.random.split(key, 4)

    params = init_params(kp, svsz, vsz, verbvsz, hsz)
    inp = jax.random.randint(k1, (B, S), 1, svsz, dtype=jnp.int32)
    out = jax.random.randint(k2, (B, T), 1, vsz, dtype=jnp.int32)
    verbs = jax.random.randint(k3, (B, Tv), 1, verbvsz, dtype=jnp.int32)

    outputs, voutputs = forward(params, inp, out, verbs)
    jax.block_until_ready((outputs, voutputs))

    assert outputs.shape == (B, T, vsz), outputs.shape
    assert voutputs.shape == (B, Tv, verbvsz), voutputs.shape
    assert outputs.dtype == jnp.float32 and voutputs.dtype == jnp.float32
    assert bool(jnp.all(jnp.isfinite(outputs))) and bool(jnp.all(jnp.isfinite(voutputs)))
    print("KERNEL_OK")
</pallas_src>

<mosaic_0001>
module attributes {stable_mosaic.version = 11 : i64} {
  func.func @_encoder_kernel(%arg0: memref<8x2x32xf32, #tpu.memory_space<vmem>>, %arg1: memref<32x64xf32, #tpu.memory_space<vmem>>, %arg2: memref<16x64xf32, #tpu.memory_space<vmem>>, %arg3: memref<1x64xf32, #tpu.memory_space<vmem>>, %arg4: memref<32x64xf32, #tpu.memory_space<vmem>>, %arg5: memref<16x64xf32, #tpu.memory_space<vmem>>, %arg6: memref<1x64xf32, #tpu.memory_space<vmem>>, %arg7: memref<8x2x16xf32, #tpu.memory_space<vmem>>, %arg8: memref<8x2x16xf32, #tpu.memory_space<vmem>>, %arg9: memref<2x16xf32, #tpu.memory_space<vmem>>, %arg10: memref<2x16xf32, #tpu.memory_space<vmem>>, %arg11: memref<2x16xf32, #tpu.memory_space<vmem>>, %arg12: memref<2x16xf32, #tpu.memory_space<vmem>>) attributes {dimension_semantics = [], scalar_prefetch = 0 : i64, scratch_operands = 0 : i64, tpu.core_type = #tpu.core_type<tc>} {
    %cst = arith.constant 0.000000e+00 : f32
    %0 = vector.broadcast %cst : f32 to vector<2x16xf32>
    %c0 = arith.constant 0 : index
    %c0_0 = arith.constant 0 : index
    %1 = vector.load %arg9[%c0, %c0_0] : memref<2x16xf32, #tpu.memory_space<vmem>>, vector<2x16xf32>
    tpu.vector_store %arg9[%c0, %c0_0], %0 {strides = array<i32>} : memref<2x16xf32, #tpu.memory_space<vmem>>, vector<2x16xf32>,
    %cst_1 = arith.constant 0.000000e+00 : f32
    %2 = vector.broadcast %cst_1 : f32 to vector<2x16xf32>
    %c0_2 = arith.constant 0 : index
    %c0_3 = arith.constant 0 : index
    %3 = vector.load %arg10[%c0_2, %c0_3] : memref<2x16xf32, #tpu.memory_space<vmem>>, vector<2x16xf32>
    tpu.vector_store %arg10[%c0_2, %c0_3], %2 {strides = array<i32>} : memref<2x16xf32, #tpu.memory_space<vmem>>, vector<2x16xf32>,
    %cst_4 = arith.constant 0.000000e+00 : f32
    %4 = vector.broadcast %cst_4 : f32 to vector<2x16xf32>
    %c0_5 = arith.constant 0 : index
    %c0_6 = arith.constant 0 : index
    %5 = vector.load %arg11[%c0_5, %c0_6] : memref<2x16xf32, #tpu.memory_space<vmem>>, vector<2x16xf32>
    tpu.vector_store %arg11[%c0_5, %c0_6], %4 {strides = array<i32>} : memref<2x16xf32, #tpu.memory_space<vmem>>, vector<2x16xf32>,
    %cst_7 = arith.constant 0.000000e+00 : f32
    %6 = vector.broadcast %cst_7 : f32 to vector<2x16xf32>
    %c0_8 = arith.constant 0 : index
    %c0_9 = arith.constant 0 : index
    %7 = vector.load %arg12[%c0_8, %c0_9] : memref<2x16xf32, #tpu.memory_space<vmem>>, vector<2x16xf32>
    tpu.vector_store %arg12[%c0_8, %c0_9], %6 {strides = array<i32>} : memref<2x16xf32, #tpu.memory_space<vmem>>, vector<2x16xf32>,
    %c0_i32 = arith.constant 0 : i32
    %c1_i32 = arith.constant 1 : i32
    %8 = arith.muli %c0_i32, %c1_i32 : i32
    %c0_i32_10 = arith.constant 0 : i32
    %9 = arith.addi %c0_i32_10, %8 : i32
    %10 = arith.index_cast %9 : i32 to index
    %c0_11 = arith.constant 0 : index
    %c0_12 = arith.constant 0 : index
    %11 = vector.load %arg0[%10, %c0_11, %c0_12] : memref<8x2x32xf32, #tpu.memory_space<vmem>>, vector<1x2x32xf32>
    %12 = vector.shape_cast %11 : vector<1x2x32xf32> to vector<2x32xf32>
    %c0_13 = arith.constant 0 : index
    %c0_14 = arith.constant 0 : index
    %13 = vector.load %arg9[%c0_13, %c0_14] : memref<2x16xf32, #tpu.memory_space<vmem>>, vector<2x16xf32>
    %c0_15 = arith.constant 0 : index
    %c0_16 = arith.constant 0 : index
    %14 = vector.load %arg10[%c0_15, %c0_16] : memref<2x16xf32, #tpu.memory_space<vmem>>, vector<2x16xf32>
    %c0_17 = arith.constant 0 : index
    %c0_18 = arith.constant 0 : index
    %15 = vector.load %arg1[%c0_17, %c0_18] : memref<32x64xf32, #tpu.memory_space<vmem>>, vector<32x64xf32>
    %cst_19 = arith.constant dense<0.000000e+00> : vector<2x64xf32>
    %16 = tpu.matmul %12, %15, %cst_19 {dimension_numbers = #tpu.dot_dimension_numbers<[1], [0], [0], [1], [0, 0, 1, 1], [], []>} : vector<2x32xf32>, vector<32x64xf32>, vector<2x64xf32> -> vector<2x64xf32>
    %c0_20 = arith.constant 0 : index
    %c0_21 = arith.constant 0 : index
    %17 = vector.load %arg2[%c0_20, %c0_21] : memref<16x64xf32, #tpu.memory_space<vmem>>, vector<16x64xf32>
    %cst_22 = arith.constant dense<0.000000e+00> : vector<2x64xf32>
    %18 = tpu.matmul %13, %17, %cst_22 {dimension_numbers = #tpu.dot_dimension_numbers<[1], [0], [0], [1], [0, 0, 1, 1], [], []>} : vector<2x16xf32>, vector<16x64xf32>, vector<2x64xf32> -> vector<2x64xf32>
    %19 = arith.addf %16, %18 : vector<2x64xf32>
    %c0_23 = arith.constant 0 : index
    %c0_24 = arith.constant 0 : index
    %20 = vector.load %arg3[%c0_23, %c0_24] : memref<1x64xf32, #tpu.memory_space<vmem>>, vector<1x64xf32>
    %21 = vector.broadcast %20 : vector<1x64xf32> to vector<2x64xf32>
    %22 = arith.addf %19, %21 : vector<2x64xf32>
    %23 = vector.extract_strided_slice %22 {offsets = [0, 0], sizes = [2, 16], strides = [1, 1]} : vector<2x64xf32> to vector<2x16xf32>
    %24 = arith.negf %23 : vector<2x16xf32>
    %25 = math.exp %24 : vector<2x16xf32>
    %cst_25 = arith.constant 1.000000e+00 : f32
    %26 = vector.broadcast %cst_25 : f32 to vector<2x16xf32>
    %27 = arith.addf %26, %25 : vector<2x16xf32>
    %28 = arith.divf %26, %27 : vector<2x16xf32>
    %29 = vector.extract_strided_slice %22 {offsets = [0, 16], sizes = [2, 16], strides = [1, 1]} : vector<2x64xf32> to vector<2x16xf32>
    %30 = arith.negf %29 : vector<2x16xf32>
    %31 = math.exp %30 : vector<2x16xf32>
    %cst_26 = arith.constant 1.000000e+00 : f32
    %32 = vector.broadcast %cst_26 : f32 to vector<2x16xf32>
    %33 = arith.addf %32, %31 : vector<2x16xf32>
    %34 = arith.divf %32, %33 : vector<2x16xf32>
    %35 = vector.extract_strided_slice %22 {offsets = [0, 32], sizes = [2, 16], strides = [1, 1]} : vector<2x64xf32> to vector<2x16xf32>
    %36 = math.tanh %35 : vector<2x16xf32>
    %37 = vector.extract_strided_slice %22 {offsets = [0, 48], sizes = [2, 16], strides = [1, 1]} : vector<2x64xf32> to vector<2x16xf32>
    %38 = arith.negf %37 : vector<2x16xf32>
    %39 = math.exp %38 : vector<2x16xf32>
    %cst_27 = arith.constant 1.000000e+00 : f32
    %40 = vector.broadcast %cst_27 : f32 to vector<2x16xf32>
    %41 = arith.addf %40, %39 : vector<2x16xf32>
    %42 = arith.divf %40, %41 : vector<2x16xf32>
    %43 = arith.mulf %34, %14 : vector<2x16xf32>
    %44 = arith.mulf %28, %36 : vector<2x16xf32>
    %45 = arith.addf %43, %44 : vector<2x16xf32>
    %46 = math.tanh %45 : vector<2x16xf32>
    %47 = arith.mulf %42, %46 : vector<2x16xf32>
    %c0_28 = arith.constant 0 : index
    %c0_29 = arith.constant 0 : index
    %48 = vector.load %arg9[%c0_28, %c0_29] : memref<2x16xf32, #tpu.memory_space<vmem>>, vector<2x16xf32>
    tpu.vector_store %arg9[%c0_28, %c0_29], %47 {strides = array<i32>} : memref<2x16xf32, #tpu.memory_space<vmem>>, vector<2x16xf32>,
    %c0_30 = arith.constant 0 : index
    %c0_31 = arith.constant 0 : index
    %49 = vector.load %arg10[%c0_30, %c0_31] : memref<2x16xf32, #tpu.memory_space<vmem>>, vector<2x16xf32>
    tpu.vector_store %arg10[%c0_30, %c0_31], %45 {strides = array<i32>} : memref<2x16xf32, #tpu.memory_space<vmem>>, vector<2x16xf32>,
    %50 = arith.index_cast %9 : i32 to index
    %c0_32 = arith.constant 0 : index
    %c0_33 = arith.constant 0 : index
    %51 = vector.load %arg7[%50, %c0_32, %c0_33] : memref<8x2x16xf32, #tpu.memory_space<vmem>>, vector<1x2x16xf32>
    %52 = vector.shape_cast %51 : vector<1x2x16xf32> to vector<2x16xf32>
    %53 = vector.shape_cast %47 : vector<2x16xf32> to vector<1x2x16xf32>
    tpu.vector_store %arg7[%50, %c0_32, %c0_33], %53 {strides = array<i32>} : memref<8x2x16xf32, #tpu.memory_space<vmem>>, vector<1x2x16xf32>,
    %c1_i32_34 = arith.constant 1 : i32
    %c1_i32_35 = arith.constant 1 : i32
    %54 = arith.muli %c1_i32_34, %c1_i32_35 : i32
    %c0_i32_36 = arith.constant 0 : i32
    %55 = arith.addi %c0_i32_36, %54 : i32
    %56 = arith.index_cast %55 : i32 to index
    %c0_37 = arith.constant 0 : index
    %c0_38 = arith.constant 0 : index
    %57 = vector.load %arg0[%56, %c0_37, %c0_38] : memref<8x2x32xf32, #tpu.memory_space<vmem>>, vector<1x2x32xf32>
    %58 = vector.shape_cast %57 : vector<1x2x32xf32> to vector<2x32xf32>
    %c0_39 = arith.constant 0 : index
    %c0_40 = arith.constant 0 : index
    %59 = vector.load %arg9[%c0_39, %c0_40] : memref<2x16xf32, #tpu.memory_space<vmem>>, vector<2x16xf32>
    %c0_41 = arith.constant 0 : index
    %c0_42 = arith.constant 0 : index
    %60 = vector.load %arg10[%c0_41, %c0_42] : memref<2x16xf32, #tpu.memory_space<vmem>>, vector<2x16xf32>
    %c0_43 = arith.constant 0 : index
    %c0_44 = arith.constant 0 : index
    %61 = vector.load %arg1[%c0_43, %c0_44] : memref<32x64xf32, #tpu.memory_space<vmem>>, vector<32x64xf32>
    %cst_45 = arith.constant dense<0.000000e+00> : vector<2x64xf32>
    %62 = tpu.matmul %58, %61, %cst_45 {dimension_numbers = #tpu.dot_dimension_numbers<[1], [0], [0], [1], [0, 0, 1, 1], [], []>} : vector<2x32xf32>, vector<32x64xf32>, vector<2x64xf32> -> vector<2x64xf32>
    %c0_46 = arith.constant 0 : index
    %c0_47 = arith.constant 0 : index
    %63 = vector.load %arg2[%c0_46, %c0_47] : memref<16x64xf32, #tpu.memory_space<vmem>>, vector<16x64xf32>
    %cst_48 = arith.constant dense<0.000000e+00> : vector<2x64xf32>
    %64 = tpu.matmul %59, %63, %cst_48 {dimension_numbers = #tpu.dot_dimension_numbers<[1], [0], [0], [1], [0, 0, 1, 1], [], []>} : vector<2x16xf32>, vector<16x64xf32>, vector<2x64xf32> -> vector<2x64xf32>
    %65 = arith.addf %62, %64 : vector<2x64xf32>
    %c0_49 = arith.constant 0 : index
    %c0_50 = arith.constant 0 : index
    %66 = vector.load %arg3[%c0_49, %c0_50] : memref<1x64xf32, #tpu.memory_space<vmem>>, vector<1x64xf32>
    %67 = vector.broadcast %66 : vector<1x64xf32> to vector<2x64xf32>
    %68 = arith.addf %65, %67 : vector<2x64xf32>
    %69 = vector.extract_strided_slice %68 {offsets = [0, 0], sizes = [2, 16], strides = [1, 1]} : vector<2x64xf32> to vector<2x16xf32>
    %70 = arith.negf %69 : vector<2x16xf32>
    %71 = math.exp %70 : vector<2x16xf32>
    %cst_51 = arith.constant 1.000000e+00 : f32
    %72 = vector.broadcast %cst_51 : f32 to vector<2x16xf32>
    %73 = arith.addf %72, %71 : vector<2x16xf32>
    %74 = arith.divf %72, %73 : vector<2x16xf32>
    %75 = vector.extract_strided_slice %68 {offsets = [0, 16], sizes = [2, 16], strides = [1, 1]} : vector<2x64xf32> to vector<2x16xf32>
    %76 = arith.negf %75 : vector<2x16xf32>
    %77 = math.exp %76 : vector<2x16xf32>
    %cst_52 = arith.constant 1.000000e+00 : f32
    %78 = vector.broadcast %cst_52 : f32 to vector<2x16xf32>
    %79 = arith.addf %78, %77 : vector<2x16xf32>
    %80 = arith.divf %78, %79 : vector<2x16xf32>
    %81 = vector.extract_strided_slice %68 {offsets = [0, 32], sizes = [2, 16], strides = [1, 1]} : vector<2x64xf32> to vector<2x16xf32>
    %82 = math.tanh %81 : vector<2x16xf32>
    %83 = vector.extract_strided_slice %68 {offsets = [0, 48], sizes = [2, 16], strides = [1, 1]} : vector<2x64xf32> to vector<2x16xf32>
    %84 = arith.negf %83 : vector<2x16xf32>
    %85 = math.exp %84 : vector<2x16xf32>
    %cst_53 = arith.constant 1.000000e+00 : f32
    %86 = vector.broadcast %cst_53 : f32 to vector<2x16xf32>
    %87 = arith.addf %86, %85 : vector<2x16xf32>
    %88 = arith.divf %86, %87 : vector<2x16xf32>
    %89 = arith.mulf %80, %60 : vector<2x16xf32>
    %90 = arith.mulf %74, %82 : vector<2x16xf32>
    %91 = arith.addf %89, %90 : vector<2x16xf32>
    %92 = math.tanh %91 : vector<2x16xf32>
    %93 = arith.mulf %88, %92 : vector<2x16xf32>
    %c0_54 = arith.constant 0 : index
    %c0_55 = arith.constant 0 : index
    %94 = vector.load %arg9[%c0_54, %c0_55] : memref<2x16xf32, #tpu.memory_space<vmem>>, vector<2x16xf32>
    tpu.vector_store %arg9[%c0_54, %c0_55], %93 {strides = array<i32>} : memref<2x16xf32, #tpu.memory_space<vmem>>, vector<2x16xf32>,
    %c0_56 = arith.constant 0 : index
    %c0_57 = arith.constant 0 : index
    %95 = vector.load %arg10[%c0_56, %c0_57] : memref<2x16xf32, #tpu.memory_space<vmem>>, vector<2x16xf32>
    tpu.vector_store %arg10[%c0_56, %c0_57], %91 {strides = array<i32>} : memref<2x16xf32, #tpu.memory_space<vmem>>, vector<2x16xf32>,
    %96 = arith.index_cast %55 : i32 to index
    %c0_58 = arith.constant 0 : index
    %c0_59 = arith.constant 0 : index
    %97 = vector.load %arg7[%96, %c0_58, %c0_59] : memref<8x2x16xf32, #tpu.memory_space<vmem>>, vector<1x2x16xf32>
    %98 = vector.shape_cast %97 : vector<1x2x16xf32> to vector<2x16xf32>
    %99 = vector.shape_cast %93 : vector<2x16xf32> to vector<1x2x16xf32>
    tpu.vector_store %arg7[%96, %c0_58, %c0_59], %99 {strides = array<i32>} : memref<8x2x16xf32, #tpu.memory_space<vmem>>, vector<1x2x16xf32>,
    %c2_i32 = arith.constant 2 : i32
    %c1_i32_60 = arith.constant 1 : i32
    %100 = arith.muli %c2_i32, %c1_i32_60 : i32
    %c0_i32_61 = arith.constant 0 : i32
    %101 = arith.addi %c0_i32_61, %100 : i32
    %102 = arith.index_cast %101 : i32 to index
    %c0_62 = arith.constant 0 : index
    %c0_63 = arith.constant 0 : index
    %103 = vector.load %arg0[%102, %c0_62, %c0_63] : memref<8x2x32xf32, #tpu.memory_space<vmem>>, vector<1x2x32xf32>
    %104 = vector.shape_cast %103 : vector<1x2x32xf32> to vector<2x32xf32>
    %c0_64 = arith.constant 0 : index
    %c0_65 = arith.constant 0 : index
    %105 = vector.load %arg9[%c0_64, %c0_65] : memref<2x16xf32, #tpu.memory_space<vmem>>, vector<2x16xf32>
    %c0_66 = arith.constant 0 : index
    %c0_67 = arith.constant 0 : index
    %106 = vector.load %arg10[%c0_66, %c0_67] : memref<2x16xf32, #tpu.memory_space<vmem>>, vector<2x16xf32>
    %c0_68 = arith.constant 0 : index
    %c0_69 = arith.constant 0 : index
    %107 = vector.load %arg1[%c0_68, %c0_69] : memref<32x64xf32, #tpu.memory_space<vmem>>, vector<32x64xf32>
    %cst_70 = arith.constant dense<0.000000e+00> : vector<2x64xf32>
    %108 = tpu.matmul %104, %107, %cst_70 {dimension_numbers = #tpu.dot_dimension_numbers<[1], [0], [0], [1], [0, 0, 1, 1], [], []>} : vector<2x32xf32>, vector<32x64xf32>, vector<2x64xf32> -> vector<2x64xf32>
    %c0_71 = arith.constant 0 : index
    %c0_72 = arith.constant 0 : index
    %109 = vector.load %arg2[%c0_71, %c0_72] : memref<16x64xf32, #tpu.memory_space<vmem>>, vector<16x64xf32>
    %cst_73 = arith.constant dense<0.000000e+00> : vector<2x64xf32>
    %110 = tpu.matmul %105, %109, %cst_73 {dimension_numbers = #tpu.dot_dimension_numbers<[1], [0], [0], [1], [0, 0, 1, 1], [], []>} : vector<2x16xf32>, vector<16x64xf32>, vector<2x64xf32> -> vector<2x64xf32>
    %111 = arith.addf %108, %110 : vector<2x64xf32>
    %c0_74 = arith.constant 0 : index
    %c0_75 = arith.constant 0 : index
    %112 = vector.load %arg3[%c0_74, %c0_75] : memref<1x64xf32, #tpu.memory_space<vmem>>, vector<1x64xf32>
    %113 = vector.broadcast %112 : vector<1x64xf32> to vector<2x64xf32>
    %114 = arith.addf %111, %113 : vector<2x64xf32>
    %115 = vector.extract_strided_slice %114 {offsets = [0, 0], sizes = [2, 16], strides = [1, 1]} : vector<2x64xf32> to vector<2x16xf32>
    %116 = arith.negf %115 : vector<2x16xf32>
    %117 = math.exp %116 : vector<2x16xf32>
    %cst_76 = arith.constant 1.000000e+00 : f32
    %118 = vector.broadcast %cst_76 : f32 to vector<2x16xf32>
    %119 = arith.addf %118, %117 : vector<2x16xf32>
    %120 = arith.divf %118, %119 : vector<2x16xf32>
    %121 = vector.extract_strided_slice %114 {offsets = [0, 16], sizes = [2, 16], strides = [1, 1]} : vector<2x64xf32> to vector<2x16xf32>
    %122 = arith.negf %121 : vector<2x16xf32>
    %123 = math.exp %122 : vector<2x16xf32>
    %cst_77 = arith.constant 1.000000e+00 : f32
    %124 = vector.broadcast %cst_77 : f32 to vector<2x16xf32>
    %125 = arith.addf %124, %123 : vector<2x16xf32>
    %126 = arith.divf %124, %125 : vector<2x16xf32>
    %127 = vector.extract_strided_slice %114 {offsets = [0, 32], sizes = [2, 16], strides = [1, 1]} : vector<2x64xf32> to vector<2x16xf32>
    %128 = math.tanh %127 : vector<2x16xf32>
    %129 = vector.extract_strided_slice %114 {offsets = [0, 48], sizes = [2, 16], strides = [1, 1]} : vector<2x64xf32> to vector<2x16xf32>
    %130 = arith.negf %129 : vector<2x16xf32>
    %131 = math.exp %130 : vector<2x16xf32>
    %cst_78 = arith.constant 1.000000e+00 : f32
    %132 = vector.broadcast %cst_78 : f32 to vector<2x16xf32>
    %133 = arith.addf %132, %131 : vector<2x16xf32>
    %134 = arith.divf %132, %133 : vector<2x16xf32>
    %135 = arith.mulf %126, %106 : vector<2x16xf32>
    %136 = arith.mulf %120, %128 : vector<2x16xf32>
    %137 = arith.addf %135, %136 : vector<2x16xf32>
    %138 = math.tanh %137 : vector<2x16xf32>
    %139 = arith.mulf %134, %138 : vector<2x16xf32>
    %c0_79 = arith.constant 0 : index
    %c0_80 = arith.constant 0 : index
    %140 = vector.load %arg9[%c0_79, %c0_80] : memref<2x16xf32, #tpu.memory_space<vmem>>, vector<2x16xf32>
    tpu.vector_store %arg9[%c0_79, %c0_80], %139 {strides = array<i32>} : memref<2x16xf32, #tpu.memory_space<vmem>>, vector<2x16xf32>,
    %c0_81 = arith.constant 0 : index
    %c0_82 = arith.constant 0 : index
    %141 = vector.load %arg10[%c0_81, %c0_82] : memref<2x16xf32, #tpu.memory_space<vmem>>, vector<2x16xf32>
    tpu.vector_store %arg10[%c0_81, %c0_82], %137 {strides = array<i32>} : memref<2x16xf32, #tpu.memory_space<vmem>>, vector<2x16xf32>,
    %142 = arith.index_cast %101 : i32 to index
    %c0_83 = arith.constant 0 : index
    %c0_84 = arith.constant 0 : index
    %143 = vector.load %arg7[%142, %c0_83, %c0_84] : memref<8x2x16xf32, #tpu.memory_space<vmem>>, vector<1x2x16xf32>
    %144 = vector.shape_cast %143 : vector<1x2x16xf32> to vector<2x16xf32>
    %145 = vector.shape_cast %139 : vector<2x16xf32> to vector<1x2x16xf32>
    tpu.vector_store %arg7[%142, %c0_83, %c0_84], %145 {strides = array<i32>} : memref<8x2x16xf32, #tpu.memory_space<vmem>>, vector<1x2x16xf32>,
    %c3_i32 = arith.constant 3 : i32
    %c1_i32_85 = arith.constant 1 : i32
    %146 = arith.muli %c3_i32, %c1_i32_85 : i32
    %c0_i32_86 = arith.constant 0 : i32
    %147 = arith.addi %c0_i32_86, %146 : i32
    %148 = arith.index_cast %147 : i32 to index
    %c0_87 = arith.constant 0 : index
    %c0_88 = arith.constant 0 : index
    %149 = vector.load %arg0[%148, %c0_87, %c0_88] : memref<8x2x32xf32, #tpu.memory_space<vmem>>, vector<1x2x32xf32>
    %150 = vector.shape_cast %149 : vector<1x2x32xf32> to vector<2x32xf32>
    %c0_89 = arith.constant 0 : index
    %c0_90 = arith.constant 0 : index
    %151 = vector.load %arg9[%c0_89, %c0_90] : memref<2x16xf32, #tpu.memory_space<vmem>>, vector<2x16xf32>
    %c0_91 = arith.constant 0 : index
    %c0_92 = arith.constant 0 : index
    %152 = vector.load %arg10[%c0_91, %c0_92] : memref<2x16xf32, #tpu.memory_space<vmem>>, vector<2x16xf32>
    %c0_93 = arith.constant 0 : index
    %c0_94 = arith.constant 0 : index
    %153 = vector.load %arg1[%c0_93, %c0_94] : memref<32x64xf32, #tpu.memory_space<vmem>>, vector<32x64xf32>
    %cst_95 = arith.constant dense<0.000000e+00> : vector<2x64xf32>
    %154 = tpu.matmul %150, %153, %cst_95 {dimension_numbers = #tpu.dot_dimension_numbers<[1], [0], [0], [1], [0, 0, 1, 1], [], []>} : vector<2x32xf32>, vector<32x64xf32>, vector<2x64xf32> -> vector<2x64xf32>
    %c0_96 = arith.constant 0 : index
    %c0_97 = arith.constant 0 : index
    %155 = vector.load %arg2[%c0_96, %c0_97] : memref<16x64xf32, #tpu.memory_space<vmem>>, vector<16x64xf32>
    %cst_98 = arith.constant dense<0.000000e+00> : vector<2x64xf32>
    %156 = tpu.matmul %151, %155, %cst_98 {dimension_numbers = #tpu.dot_dimension_numbers<[1], [0], [0], [1], [0, 0, 1, 1], [], []>} : vector<2x16xf32>, vector<16x64xf32>, vector<2x64xf32> -> vector<2x64xf32>
    %157 = arith.addf %154, %156 : vector<2x64xf32>
    %c0_99 = arith.constant 0 : index
    %c0_100 = arith.constant 0 : index
    %158 = vector.load %arg3[%c0_99, %c0_100] : memref<1x64xf32, #tpu.memory_space<vmem>>, vector<1x64xf32>
    %159 = vector.broadcast %158 : vector<1x64xf32> to vector<2x64xf32>
    %160 = arith.addf %157, %159 : vector<2x64xf32>
    %161 = vector.extract_strided_slice %160 {offsets = [0, 0], sizes = [2, 16], strides = [1, 1]} : vector<2x64xf32> to vector<2x16xf32>
    %162 = arith.negf %161 : vector<2x16xf32>
    %163 = math.exp %162 : vector<2x16xf32>
    %cst_101 = arith.constant 1.000000e+00 : f32
    %164 = vector.broadcast %cst_101 : f32 to vector<2x16xf32>
    %165 = arith.addf %164, %163 : vector<2x16xf32>
    %166 = arith.divf %164, %165 : vector<2x16xf32>
    %167 = vector.extract_strided_slice %160 {offsets = [0, 16], sizes = [2, 16], strides = [1, 1]} : vector<2x64xf32> to vector<2x16xf32>
    %168 = arith.negf %167 : vector<2x16xf32>
    %169 = math.exp %168 : vector<2x16xf32>
    %cst_102 = arith.constant 1.000000e+00 : f32
    %170 = vector.broadcast %cst_102 : f32 to vector<2x16xf32>
    %171 = arith.addf %170, %169 : vector<2x16xf32>
    %172 = arith.divf %170, %171 : vector<2x16xf32>
    %173 = vector.extract_strided_slice %160 {offsets = [0, 32], sizes = [2, 16], strides = [1, 1]} : vector<2x64xf32> to vector<2x16xf32>
    %174 = math.tanh %173 : vector<2x16xf32>
    %175 = vector.extract_strided_slice %160 {offsets = [0, 48], sizes = [2, 16], strides = [1, 1]} : vector<2x64xf32> to vector<2x16xf32>
    %176 = arith.negf %175 : vector<2x16xf32>
    %177 = math.exp %176 : vector<2x16xf32>
    %cst_103 = arith.constant 1.000000e+00 : f32
    %178 = vector.broadcast %cst_103 : f32 to vector<2x16xf32>
    %179 = arith.addf %178, %177 : vector<2x16xf32>
    %180 = arith.divf %178, %179 : vector<2x16xf32>
    %181 = arith.mulf %172, %152 : vector<2x16xf32>
    %182 = arith.mulf %166, %174 : vector<2x16xf32>
    %183 = arith.addf %181, %182 : vector<2x16xf32>
    %184 = math.tanh %183 : vector<2x16xf32>
    %185 = arith.mulf %180, %184 : vector<2x16xf32>
    %c0_104 = arith.constant 0 : index
    %c0_105 = arith.constant 0 : index
    %186 = vector.load %arg9[%c0_104, %c0_105] : memref<2x16xf32, #tpu.memory_space<vmem>>, vector<2x16xf32>
    tpu.vector_store %arg9[%c0_104, %c0_105], %185 {strides = array<i32>} : memref<2x16xf32, #tpu.memory_space<vmem>>, vector<2x16xf32>,
    %c0_106 = arith.constant 0 : index
    %c0_107 = arith.constant 0 : index
    %187 = vector.load %arg10[%c0_106, %c0_107] : memref<2x16xf32, #tpu.memory_space<vmem>>, vector<2x16xf32>
    tpu.vector_store %arg10[%c0_106, %c0_107], %183 {strides = array<i32>} : memref<2x16xf32, #tpu.memory_space<vmem>>, vector<2x16xf32>,
    %188 = arith.index_cast %147 : i32 to index
    %c0_108 = arith.constant 0 : index
    %c0_109 = arith.constant 0 : index
    %189 = vector.load %arg7[%188, %c0_108, %c0_109] : memref<8x2x16xf32, #tpu.memory_space<vmem>>, vector<1x2x16xf32>
    %190 = vector.shape_cast %189 : vector<1x2x16xf32> to vector<2x16xf32>
    %191 = vector.shape_cast %185 : vector<2x16xf32> to vector<1x2x16xf32>
    tpu.vector_store %arg7[%188, %c0_108, %c0_109], %191 {strides = array<i32>} : memref<8x2x16xf32, #tpu.memory_space<vmem>>, vector<1x2x16xf32>,
    %c4_i32 = arith.constant 4 : i32
    %c1_i32_110 = arith.constant 1 : i32
    %192 = arith.muli %c4_i32, %c1_i32_110 : i32
    %c0_i32_111 = arith.constant 0 : i32
    %193 = arith.addi %c0_i32_111, %192 : i32
    %194 = arith.index_cast %193 : i32 to index
    %c0_112 = arith.constant 0 : index
    %c0_113 = arith.constant 0 : index
    %195 = vector.load %arg0[%194, %c0_112, %c0_113] : memref<8x2x32xf32, #tpu.memory_space<vmem>>, vector<1x2x32xf32>
    %196 = vector.shape_cast %195 : vector<1x2x32xf32> to vector<2x32xf32>
    %c0_114 = arith.constant 0 : index
    %c0_115 = arith.constant 0 : index
    %197 = vector.load %arg9[%c0_114, %c0_115] : memref<2x16xf32, #tpu.memory_space<vmem>>, vector<2x16xf32>
    %c0_116 = arith.constant 0 : index
    %c0_117 = arith.constant 0 : index
    %198 = vector.load %arg10[%c0_116, %c0_117] : memref<2x16xf32, #tpu.memory_space<vmem>>, vector<2x16xf32>
    %c0_118 = arith.constant 0 : index
    %c0_119 = arith.constant 0 : index
    %199 = vector.load %arg1[%c0_118, %c0_119] : memref<32x64xf32, #tpu.memory_space<vmem>>, vector<32x64xf32>
    %cst_120 = arith.constant dense<0.000000e+00> : vector<2x64xf32>
    %200 = tpu.matmul %196, %199, %cst_120 {dimension_numbers = #tpu.dot_dimension_numbers<[1], [0], [0], [1], [0, 0, 1, 1], [], []>} : vector<2x32xf32>, vector<32x64xf32>, vector<2x64xf32> -> vector<2x64xf32>
    %c0_121 = arith.constant 0 : index
    %c0_122 = arith.constant 0 : index
    %201 = vector.load %arg2[%c0_121, %c0_122] : memref<16x64xf32, #tpu.memory_space<vmem>>, vector<16x64xf32>
    %cst_123 = arith.constant dense<0.000000e+00> : vector<2x64xf32>
    %202 = tpu.matmul %197, %201, %cst_123 {dimension_numbers = #tpu.dot_dimension_numbers<[1], [0], [0], [1], [0, 0, 1, 1], [], []>} : vector<2x16xf32>, vector<16x64xf32>, vector<2x64xf32> -> vector<2x64xf32>
    %203 = arith.addf %200, %202 : vector<2x64xf32>
    %c0_124 = arith.constant 0 : index
    %c0_125 = arith.constant 0 : index
    %204 = vector.load %arg3[%c0_124, %c0_125] : memref<1x64xf32, #tpu.memory_space<vmem>>, vector<1x64xf32>
    %205 = vector.broadcast %204 : vector<1x64xf32> to vector<2x64xf32>
    %206 = arith.addf %203, %205 : vector<2x64xf32>
    %207 = vector.extract_strided_slice %206 {offsets = [0, 0], sizes = [2, 16], strides = [1, 1]} : vector<2x64xf32> to vector<2x16xf32>
    %208 = arith.negf %207 : vector<2x16xf32>
    %209 = math.exp %208 : vector<2x16xf32>
    %cst_126 = arith.constant 1.000000e+00 : f32
    %210 = vector.broadcast %cst_126 : f32 to vector<2x16xf32>
    %211 = arith.addf %210, %209 : vector<2x16xf32>
    %212 = arith.divf %210, %211 : vector<2x16xf32>
    %213 = vector.extract_strided_slice %206 {offsets = [0, 16], sizes = [2, 16], strides = [1, 1]} : vector<2x64xf32> to vector<2x16xf32>
    %214 = arith.negf %213 : vector<2x16xf32>
    %215 = math.exp %214 : vector<2x16xf32>
    %cst_127 = arith.constant 1.000000e+00 : f32
    %216 = vector.broadcast %cst_127 : f32 to vector<2x16xf32>
    %217 = arith.addf %216, %215 : vector<2x16xf32>
    %218 = arith.divf %216, %217 : vector<2x16xf32>
    %219 = vector.extract_strided_slice %206 {offsets = [0, 32], sizes = [2, 16], strides = [1, 1]} : vector<2x64xf32> to vector<2x16xf32>
    %220 = math.tanh %219 : vector<2x16xf32>
    %221 = vector.extract_strided_slice %206 {offsets = [0, 48], sizes = [2, 16], strides = [1, 1]} : vector<2x64xf32> to vector<2x16xf32>
    %222 = arith.negf %221 : vector<2x16xf32>
    %223 = math.exp %222 : vector<2x16xf32>
    %cst_128 = arith.constant 1.000000e+00 : f32
    %224 = vector.broadcast %cst_128 : f32 to vector<2x16xf32>
    %225 = arith.addf %224, %223 : vector<2x16xf32>
    %226 = arith.divf %224, %225 : vector<2x16xf32>
    %227 = arith.mulf %218, %198 : vector<2x16xf32>
    %228 = arith.mulf %212, %220 : vector<2x16xf32>
    %229 = arith.addf %227, %228 : vector<2x16xf32>
    %230 = math.tanh %229 : vector<2x16xf32>
    %231 = arith.mulf %226, %230 : vector<2x16xf32>
    %c0_129 = arith.constant 0 : index
    %c0_130 = arith.constant 0 : index
    %232 = vector.load %arg9[%c0_129, %c0_130] : memref<2x16xf32, #tpu.memory_space<vmem>>, vector<2x16xf32>
    tpu.vector_store %arg9[%c0_129, %c0_130], %231 {strides = array<i32>} : memref<2x16xf32, #tpu.memory_space<vmem>>, vector<2x16xf32>,
    %c0_131 = arith.constant 0 : index
    %c0_132 = arith.constant 0 : index
    %233 = vector.load %arg10[%c0_131, %c0_132] : memref<2x16xf32, #tpu.memory_space<vmem>>, vector<2x16xf32>
    tpu.vector_store %arg10[%c0_131, %c0_132], %229 {strides = array<i32>} : memref<2x16xf32, #tpu.memory_space<vmem>>, vector<2x16xf32>,
    %234 = arith.index_cast %193 : i32 to index
    %c0_133 = arith.constant 0 : index
    %c0_134 = arith.constant 0 : index
    %235 = vector.load %arg7[%234, %c0_133, %c0_134] : memref<8x2x16xf32, #tpu.memory_space<vmem>>, vector<1x2x16xf32>
    %236 = vector.shape_cast %235 : vector<1x2x16xf32> to vector<2x16xf32>
    %237 = vector.shape_cast %231 : vector<2x16xf32> to vector<1x2x16xf32>
    tpu.vector_store %arg7[%234, %c0_133, %c0_134], %237 {strides = array<i32>} : memref<8x2x16xf32, #tpu.memory_space<vmem>>, vector<1x2x16xf32>,
    %c5_i32 = arith.constant 5 : i32
    %c1_i32_135 = arith.constant 1 : i32
    %238 = arith.muli %c5_i32, %c1_i32_135 : i32
    %c0_i32_136 = arith.constant 0 : i32
    %239 = arith.addi %c0_i32_136, %238 : i32
    %240 = arith.index_cast %239 : i32 to index
    %c0_137 = arith.constant 0 : index
    %c0_138 = arith.constant 0 : index
    %241 = vector.load %arg0[%240, %c0_137, %c0_138] : memref<8x2x32xf32, #tpu.memory_space<vmem>>, vector<1x2x32xf32>
    %242 = vector.shape_cast %241 : vector<1x2x32xf32> to vector<2x32xf32>
    %c0_139 = arith.constant 0 : index
    %c0_140 = arith.constant 0 : index
    %243 = vector.load %arg9[%c0_139, %c0_140] : memref<2x16xf32, #tpu.memory_space<vmem>>, vector<2x16xf32>
    %c0_141 = arith.constant 0 : index
    %c0_142 = arith.constant 0 : index
    %244 = vector.load %arg10[%c0_141, %c0_142] : memref<2x16xf32, #tpu.memory_space<vmem>>, vector<2x16xf32>
    %c0_143 = arith.constant 0 : index
    %c0_144 = arith.constant 0 : index
    %245 = vector.load %arg1[%c0_143, %c0_144] : memref<32x64xf32, #tpu.memory_space<vmem>>, vector<32x64xf32>
    %cst_145 = arith.constant dense<0.000000e+00> : vector<2x64xf32>
    %246 = tpu.matmul %242, %245, %cst_145 {dimension_numbers = #tpu.dot_dimension_numbers<[1], [0], [0], [1], [0, 0, 1, 1], [], []>} : vector<2x32xf32>, vector<32x64xf32>, vector<2x64xf32> -> vector<2x64xf32>
    %c0_146 = arith.constant 0 : index
    %c0_147 = arith.constant 0 : index
    %247 = vector.load %arg2[%c0_146, %c0_147] : memref<16x64xf32, #tpu.memory_space<vmem>>, vector<16x64xf32>
    %cst_148 = arith.constant dense<0.000000e+00> : vector<2x64xf32>
    %248 = tpu.matmul %243, %247, %cst_148 {dimension_numbers = #tpu.dot_dimension_numbers<[1], [0], [0], [1], [0, 0, 1, 1], [], []>} : vector<2x16xf32>, vector<16x64xf32>, vector<2x64xf32> -> vector<2x64xf32>
    %249 = arith.addf %246, %248 : vector<2x64xf32>
    %c0_149 = arith.constant 0 : index
    %c0_150 = arith.constant 0 : index
    %250 = vector.load %arg3[%c0_149, %c0_150] : memref<1x64xf32, #tpu.memory_space<vmem>>, vector<1x64xf32>
    %251 = vector.broadcast %250 : vector<1x64xf32> to vector<2x64xf32>
    %252 = arith.addf %249, %251 : vector<2x64xf32>
    %253 = vector.extract_strided_slice %252 {offsets = [0, 0], sizes = [2, 16], strides = [1, 1]} : vector<2x64xf32> to vector<2x16xf32>
    %254 = arith.negf %253 : vector<2x16xf32>
    %255 = math.exp %254 : vector<2x16xf32>
    %cst_151 = arith.constant 1.000000e+00 : f32
    %256 = vector.broadcast %cst_151 : f32 to vector<2x16xf32>
    %257 = arith.addf %256, %255 : vector<2x16xf32>
    %258 = arith.divf %256, %257 : vector<2x16xf32>
    %259 = vector.extract_strided_slice %252 {offsets = [0, 16], sizes = [2, 16], strides = [1, 1]} : vector<2x64xf32> to vector<2x16xf32>
    %260 = arith.negf %259 : vector<2x16xf32>
    %261 = math.exp %260 : vector<2x16xf32>
    %cst_152 = arith.constant 1.000000e+00 : f32
    %262 = vector.broadcast %cst_152 : f32 to vector<2x16xf32>
    %263 = arith.addf %262, %261 : vector<2x16xf32>
    %264 = arith.divf %262, %263 : vector<2x16xf32>
    %265 = vector.extract_strided_slice %252 {offsets = [0, 32], sizes = [2, 16], strides = [1, 1]} : vector<2x64xf32> to vector<2x16xf32>
    %266 = math.tanh %265 : vector<2x16xf32>
    %267 = vector.extract_strided_slice %252 {offsets = [0, 48], sizes = [2, 16], strides = [1, 1]} : vector<2x64xf32> to vector<2x16xf32>
    %268 = arith.negf %267 : vector<2x16xf32>
    %269 = math.exp %268 : vector<2x16xf32>
    %cst_153 = arith.constant 1.000000e+00 : f32
    %270 = vector.broadcast %cst_153 : f32 to vector<2x16xf32>
    %271 = arith.addf %270, %269 : vector<2x16xf32>
    %272 = arith.divf %270, %271 : vector<2x16xf32>
    %273 = arith.mulf %264, %244 : vector<2x16xf32>
    %274 = arith.mulf %258, %266 : vector<2x16xf32>
    %275 = arith.addf %273, %274 : vector<2x16xf32>
    %276 = math.tanh %275 : vector<2x16xf32>
    %277 = arith.mulf %272, %276 : vector<2x16xf32>
    %c0_154 = arith.constant 0 : index
    %c0_155 = arith.constant 0 : index
    %278 = vector.load %arg9[%c0_154, %c0_155] : memref<2x16xf32, #tpu.memory_space<vmem>>, vector<2x16xf32>
    tpu.vector_store %arg9[%c0_154, %c0_155], %277 {strides = array<i32>} : memref<2x16xf32, #tpu.memory_space<vmem>>, vector<2x16xf32>,
    %c0_156 = arith.constant 0 : index
    %c0_157 = arith.constant 0 : index
    %279 = vector.load %arg10[%c0_156, %c0_157] : memref<2x16xf32, #tpu.memory_space<vmem>>, vector<2x16xf32>
    tpu.vector_store %arg10[%c0_156, %c0_157], %275 {strides = array<i32>} : memref<2x16xf32, #tpu.memory_space<vmem>>, vector<2x16xf32>,
    %280 = arith.index_cast %239 : i32 to index
    %c0_158 = arith.constant 0 : index
    %c0_159 = arith.constant 0 : index
    %281 = vector.load %arg7[%280, %c0_158, %c0_159] : memref<8x2x16xf32, #tpu.memory_space<vmem>>, vector<1x2x16xf32>
    %282 = vector.shape_cast %281 : vector<1x2x16xf32> to vector<2x16xf32>
    %283 = vector.shape_cast %277 : vector<2x16xf32> to vector<1x2x16xf32>
    tpu.vector_store %arg7[%280, %c0_158, %c0_159], %283 {strides = array<i32>} : memref<8x2x16xf32, #tpu.memory_space<vmem>>, vector<1x2x16xf32>,
    %c6_i32 = arith.constant 6 : i32
    %c1_i32_160 = arith.constant 1 : i32
    %284 = arith.muli %c6_i32, %c1_i32_160 : i32
    %c0_i32_161 = arith.constant 0 : i32
    %285 = arith.addi %c0_i32_161, %284 : i32
    %286 = arith.index_cast %285 : i32 to index
    %c0_162 = arith.constant 0 : index
    %c0_163 = arith.constant 0 : index
    %287 = vector.load %arg0[%286, %c0_162, %c0_163] : memref<8x2x32xf32, #tpu.memory_space<vmem>>, vector<1x2x32xf32>
    %288 = vector.shape_cast %287 : vector<1x2x32xf32> to vector<2x32xf32>
    %c0_164 = arith.constant 0 : index
    %c0_165 = arith.constant 0 : index
    %289 = vector.load %arg9[%c0_164, %c0_165] : memref<2x16xf32, #tpu.memory_space<vmem>>, vector<2x16xf32>
    %c0_166 = arith.constant 0 : index
    %c0_167 = arith.constant 0 : index
    %290 = vector.load %arg10[%c0_166, %c0_167] : memref<2x16xf32, #tpu.memory_space<vmem>>, vector<2x16xf32>
    %c0_168 = arith.constant 0 : index
    %c0_169 = arith.constant 0 : index
    %291 = vector.load %arg1[%c0_168, %c0_169] : memref<32x64xf32, #tpu.memory_space<vmem>>, vector<32x64xf32>
    %cst_170 = arith.constant dense<0.000000e+00> : vector<2x64xf32>
    %292 = tpu.matmul %288, %291, %cst_170 {dimension_numbers = #tpu.dot_dimension_numbers<[1], [0], [0], [1], [0, 0, 1, 1], [], []>} : vector<2x32xf32>, vector<32x64xf32>, vector<2x64xf32> -> vector<2x64xf32>
    %c0_171 = arith.constant 0 : index
    %c0_172 = arith.constant 0 : index
    %293 = vector.load %arg2[%c0_171, %c0_172] : memref<16x64xf32, #tpu.memory_space<vmem>>, vector<16x64xf32>
    %cst_173 = arith.constant dense<0.000000e+00> : vector<2x64xf32>
    %294 = tpu.matmul %289, %293, %cst_173 {dimension_numbers = #tpu.dot_dimension_numbers<[1], [0], [0], [1], [0, 0, 1, 1], [], []>} : vector<2x16xf32>, vector<16x64xf32>, vector<2x64xf32> -> vector<2x64xf32>
    %295 = arith.addf %292, %294 : vector<2x64xf32>
    %c0_174 = arith.constant 0 : index
    %c0_175 = arith.constant 0 : index
    %296 = vector.load %arg3[%c0_174, %c0_175] : memref<1x64xf32, #tpu.memory_space<vmem>>, vector<1x64xf32>
    %297 = vector.broadcast %296 : vector<1x64xf32> to vector<2x64xf32>
    %298 = arith.addf %295, %297 : vector<2x64xf32>
    %299 = vector.extract_strided_slice %298 {offsets = [0, 0], sizes = [2, 16], strides = [1, 1]} : vector<2x64xf32> to vector<2x16xf32>
    %300 = arith.negf %299 : vector<2x16xf32>
    %301 = math.exp %300 : vector<2x16xf32>
    %cst_176 = arith.constant 1.000000e+00 : f32
    %302 = vector.broadcast %cst_176 : f32 to vector<2x16xf32>
    %303 = arith.addf %302, %301 : vector<2x16xf32>
    %304 = arith.divf %302, %303 : vector<2x16xf32>
    %305 = vector.extract_strided_slice %298 {offsets = [0, 16], sizes = [2, 16], strides = [1, 1]} : vector<2x64xf32> to vector<2x16xf32>
    %306 = arith.negf %305 : vector<2x16xf32>
    %307 = math.exp %306 : vector<2x16xf32>
    %cst_177 = arith.constant 1.000000e+00 : f32
    %308 = vector.broadcast %cst_177 : f32 to vector<2x16xf32>
    %309 = arith.addf %308, %307 : vector<2x16xf32>
    %310 = arith.divf %308, %309 : vector<2x16xf32>
    %311 = vector.extract_strided_slice %298 {offsets = [0, 32], sizes = [2, 16], strides = [1, 1]} : vector<2x64xf32> to vector<2x16xf32>
    %312 = math.tanh %311 : vector<2x16xf32>
    %313 = vector.extract_strided_slice %298 {offsets = [0, 48], sizes = [2, 16], strides = [1, 1]} : vector<2x64xf32> to vector<2x16xf32>
    %314 = arith.negf %313 : vector<2x16xf32>
    %315 = math.exp %314 : vector<2x16xf32>
    %cst_178 = arith.constant 1.000000e+00 : f32
    %316 = vector.broadcast %cst_178 : f32 to vector<2x16xf32>
    %317 = arith.addf %316, %315 : vector<2x16xf32>
    %318 = arith.divf %316, %317 : vector<2x16xf32>
    %319 = arith.mulf %310, %290 : vector<2x16xf32>
    %320 = arith.mulf %304, %312 : vector<2x16xf32>
    %321 = arith.addf %319, %320 : vector<2x16xf32>
    %322 = math.tanh %321 : vector<2x16xf32>
    %323 = arith.mulf %318, %322 : vector<2x16xf32>
    %c0_179 = arith.constant 0 : index
    %c0_180 = arith.constant 0 : index
    %324 = vector.load %arg9[%c0_179, %c0_180] : memref<2x16xf32, #tpu.memory_space<vmem>>, vector<2x16xf32>
    tpu.vector_store %arg9[%c0_179, %c0_180], %323 {strides = array<i32>} : memref<2x16xf32, #tpu.memory_space<vmem>>, vector<2x16xf32>,
    %c0_181 = arith.constant 0 : index
    %c0_182 = arith.constant 0 : index
    %325 = vector.load %arg10[%c0_181, %c0_182] : memref<2x16xf32, #tpu.memory_space<vmem>>, vector<2x16xf32>
    tpu.vector_store %arg10[%c0_181, %c0_182], %321 {strides = array<i32>} : memref<2x16xf32, #tpu.memory_space<vmem>>, vector<2x16xf32>,
    %326 = arith.index_cast %285 : i32 to index
    %c0_183 = arith.constant 0 : index
    %c0_184 = arith.constant 0 : index
    %327 = vector.load %arg7[%326, %c0_183, %c0_184] : memref<8x2x16xf32, #tpu.memory_space<vmem>>, vector<1x2x16xf32>
    %328 = vector.shape_cast %327 : vector<1x2x16xf32> to vector<2x16xf32>
    %329 = vector.shape_cast %323 : vector<2x16xf32> to vector<1x2x16xf32>
    tpu.vector_store %arg7[%326, %c0_183, %c0_184], %329 {strides = array<i32>} : memref<8x2x16xf32, #tpu.memory_space<vmem>>, vector<1x2x16xf32>,
    %c7_i32 = arith.constant 7 : i32
    %c1_i32_185 = arith.constant 1 : i32
    %330 = arith.muli %c7_i32, %c1_i32_185 : i32
    %c0_i32_186 = arith.constant 0 : i32
    %331 = arith.addi %c0_i32_186, %330 : i32
    %332 = arith.index_cast %331 : i32 to index
    %c0_187 = arith.constant 0 : index
    %c0_188 = arith.constant 0 : index
    %333 = vector.load %arg0[%332, %c0_187, %c0_188] : memref<8x2x32xf32, #tpu.memory_space<vmem>>, vector<1x2x32xf32>
    %334 = vector.shape_cast %333 : vector<1x2x32xf32> to vector<2x32xf32>
    %c0_189 = arith.constant 0 : index
    %c0_190 = arith.constant 0 : index
    %335 = vector.load %arg9[%c0_189, %c0_190] : memref<2x16xf32, #tpu.memory_space<vmem>>, vector<2x16xf32>
    %c0_191 = arith.constant 0 : index
    %c0_192 = arith.constant 0 : index
    %336 = vector.load %arg10[%c0_191, %c0_192] : memref<2x16xf32, #tpu.memory_space<vmem>>, vector<2x16xf32>
    %c0_193 = arith.constant 0 : index
    %c0_194 = arith.constant 0 : index
    %337 = vector.load %arg1[%c0_193, %c0_194] : memref<32x64xf32, #tpu.memory_space<vmem>>, vector<32x64xf32>
    %cst_195 = arith.constant dense<0.000000e+00> : vector<2x64xf32>
    %338 = tpu.matmul %334, %337, %cst_195 {dimension_numbers = #tpu.dot_dimension_numbers<[1], [0], [0], [1], [0, 0, 1, 1], [], []>} : vector<2x32xf32>, vector<32x64xf32>, vector<2x64xf32> -> vector<2x64xf32>
    %c0_196 = arith.constant 0 : index
    %c0_197 = arith.constant 0 : index
    %339 = vector.load %arg2[%c0_196, %c0_197] : memref<16x64xf32, #tpu.memory_space<vmem>>, vector<16x64xf32>
    %cst_198 = arith.constant dense<0.000000e+00> : vector<2x64xf32>
    %340 = tpu.matmul %335, %339, %cst_198 {dimension_numbers = #tpu.dot_dimension_numbers<[1], [0], [0], [1], [0, 0, 1, 1], [], []>} : vector<2x16xf32>, vector<16x64xf32>, vector<2x64xf32> -> vector<2x64xf32>
    %341 = arith.addf %338, %340 : vector<2x64xf32>
    %c0_199 = arith.constant 0 : index
    %c0_200 = arith.constant 0 : index
    %342 = vector.load %arg3[%c0_199, %c0_200] : memref<1x64xf32, #tpu.memory_space<vmem>>, vector<1x64xf32>
    %343 = vector.broadcast %342 : vector<1x64xf32> to vector<2x64xf32>
    %344 = arith.addf %341, %343 : vector<2x64xf32>
    %345 = vector.extract_strided_slice %344 {offsets = [0, 0], sizes = [2, 16], strides = [1, 1]} : vector<2x64xf32> to vector<2x16xf32>
    %346 = arith.negf %345 : vector<2x16xf32>
    %347 = math.exp %346 : vector<2x16xf32>
    %cst_201 = arith.constant 1.000000e+00 : f32
    %348 = vector.broadcast %cst_201 : f32 to vector<2x16xf32>
    %349 = arith.addf %348, %347 : vector<2x16xf32>
    %350 = arith.divf %348, %349 : vector<2x16xf32>
    %351 = vector.extract_strided_slice %344 {offsets = [0, 16], sizes = [2, 16], strides = [1, 1]} : vector<2x64xf32> to vector<2x16xf32>
    %352 = arith.negf %351 : vector<2x16xf32>
    %353 = math.exp %352 : vector<2x16xf32>
    %cst_202 = arith.constant 1.000000e+00 : f32
    %354 = vector.broadcast %cst_202 : f32 to vector<2x16xf32>
    %355 = arith.addf %354, %353 : vector<2x16xf32>
    %356 = arith.divf %354, %355 : vector<2x16xf32>
    %357 = vector.extract_strided_slice %344 {offsets = [0, 32], sizes = [2, 16], strides = [1, 1]} : vector<2x64xf32> to vector<2x16xf32>
    %358 = math.tanh %357 : vector<2x16xf32>
    %359 = vector.extract_strided_slice %344 {offsets = [0, 48], sizes = [2, 16], strides = [1, 1]} : vector<2x64xf32> to vector<2x16xf32>
    %360 = arith.negf %359 : vector<2x16xf32>
    %361 = math.exp %360 : vector<2x16xf32>
    %cst_203 = arith.constant 1.000000e+00 : f32
    %362 = vector.broadcast %cst_203 : f32 to vector<2x16xf32>
    %363 = arith.addf %362, %361 : vector<2x16xf32>
    %364 = arith.divf %362, %363 : vector<2x16xf32>
    %365 = arith.mulf %356, %336 : vector<2x16xf32>
    %366 = arith.mulf %350, %358 : vector<2x16xf32>
    %367 = arith.addf %365, %366 : vector<2x16xf32>
    %368 = math.tanh %367 : vector<2x16xf32>
    %369 = arith.mulf %364, %368 : vector<2x16xf32>
    %c0_204 = arith.constant 0 : index
    %c0_205 = arith.constant 0 : index
    %370 = vector.load %arg9[%c0_204, %c0_205] : memref<2x16xf32, #tpu.memory_space<vmem>>, vector<2x16xf32>
    tpu.vector_store %arg9[%c0_204, %c0_205], %369 {strides = array<i32>} : memref<2x16xf32, #tpu.memory_space<vmem>>, vector<2x16xf32>,
    %c0_206 = arith.constant 0 : index
    %c0_207 = arith.constant 0 : index
    %371 = vector.load %arg10[%c0_206, %c0_207] : memref<2x16xf32, #tpu.memory_space<vmem>>, vector<2x16xf32>
    tpu.vector_store %arg10[%c0_206, %c0_207], %367 {strides = array<i32>} : memref<2x16xf32, #tpu.memory_space<vmem>>, vector<2x16xf32>,
    %372 = arith.index_cast %331 : i32 to index
    %c0_208 = arith.constant 0 : index
    %c0_209 = arith.constant 0 : index
    %373 = vector.load %arg7[%372, %c0_208, %c0_209] : memref<8x2x16xf32, #tpu.memory_space<vmem>>, vector<1x2x16xf32>
    %374 = vector.shape_cast %373 : vector<1x2x16xf32> to vector<2x16xf32>
    %375 = vector.shape_cast %369 : vector<2x16xf32> to vector<1x2x16xf32>
    tpu.vector_store %arg7[%372, %c0_208, %c0_209], %375 {strides = array<i32>} : memref<8x2x16xf32, #tpu.memory_space<vmem>>, vector<1x2x16xf32>,
    %c8_i32 = arith.constant 8 : i32
    %c0_i32_210 = arith.constant 0 : i32
    %c1_i32_211 = arith.constant 1 : i32
    %376 = arith.muli %c0_i32_210, %c1_i32_211 : i32
    %c0_i32_212 = arith.constant 0 : i32
    %377 = arith.addi %c0_i32_212, %376 : i32
    %c7_i32_213 = arith.constant 7 : i32
    %378 = arith.subi %c7_i32_213, %377 : i32
    %379 = arith.index_cast %378 : i32 to index
    %c0_214 = arith.constant 0 : index
    %c0_215 = arith.constant 0 : index
    %380 = vector.load %arg0[%379, %c0_214, %c0_215] : memref<8x2x32xf32, #tpu.memory_space<vmem>>, vector<1x2x32xf32>
    %381 = vector.shape_cast %380 : vector<1x2x32xf32> to vector<2x32xf32>
    %c0_216 = arith.constant 0 : index
    %c0_217 = arith.constant 0 : index
    %382 = vector.load %arg11[%c0_216, %c0_217] : memref<2x16xf32, #tpu.memory_space<vmem>>, vector<2x16xf32>
    %c0_218 = arith.constant 0 : index
    %c0_219 = arith.constant 0 : index
    %383 = vector.load %arg12[%c0_218, %c0_219] : memref<2x16xf32, #tpu.memory_space<vmem>>, vector<2x16xf32>
    %c0_220 = arith.constant 0 : index
    %c0_221 = arith.constant 0 : index
    %384 = vector.load %arg4[%c0_220, %c0_221] : memref<32x64xf32, #tpu.memory_space<vmem>>, vector<32x64xf32>
    %cst_222 = arith.constant dense<0.000000e+00> : vector<2x64xf32>
    %385 = tpu.matmul %381, %384, %cst_222 {dimension_numbers = #tpu.dot_dimension_numbers<[1], [0], [0], [1], [0, 0, 1, 1], [], []>} : vector<2x32xf32>, vector<32x64xf32>, vector<2x64xf32> -> vector<2x64xf32>
    %c0_223 = arith.constant 0 : index
    %c0_224 = arith.constant 0 : index
    %386 = vector.load %arg5[%c0_223, %c0_224] : memref<16x64xf32, #tpu.memory_space<vmem>>, vector<16x64xf32>
    %cst_225 = arith.constant dense<0.000000e+00> : vector<2x64xf32>
    %387 = tpu.matmul %382, %386, %cst_225 {dimension_numbers = #tpu.dot_dimension_numbers<[1], [0], [0], [1], [0, 0, 1, 1], [], []>} : vector<2x16xf32>, vector<16x64xf32>, vector<2x64xf32> -> vector<2x64xf32>
    %388 = arith.addf %385, %387 : vector<2x64xf32>
    %c0_226 = arith.constant 0 : index
    %c0_227 = arith.constant 0 : index
    %389 = vector.load %arg6[%c0_226, %c0_227] : memref<1x64xf32, #tpu.memory_space<vmem>>, vector<1x64xf32>
    %390 = vector.broadcast %389 : vector<1x64xf32> to vector<2x64xf32>
    %391 = arith.addf %388, %390 : vector<2x64xf32>
    %392 = vector.extract_strided_slice %391 {offsets = [0, 0], sizes = [2, 16], strides = [1, 1]} : vector<2x64xf32> to vector<2x16xf32>
    %393 = arith.negf %392 : vector<2x16xf32>
    %394 = math.exp %393 : vector<2x16xf32>
    %cst_228 = arith.constant 1.000000e+00 : f32
    %395 = vector.broadcast %cst_228 : f32 to vector<2x16xf32>
    %396 = arith.addf %395, %394 : vector<2x16xf32>
    %397 = arith.divf %395, %396 : vector<2x16xf32>
    %398 = vector.extract_strided_slice %391 {offsets = [0, 16], sizes = [2, 16], strides = [1, 1]} : vector<2x64xf32> to vector<2x16xf32>
    %399 = arith.negf %398 : vector<2x16xf32>
    %400 = math.exp %399 : vector<2x16xf32>
    %cst_229 = arith.constant 1.000000e+00 : f32
    %401 = vector.broadcast %cst_229 : f32 to vector<2x16xf32>
    %402 = arith.addf %401, %400 : vector<2x16xf32>
    %403 = arith.divf %401, %402 : vector<2x16xf32>
    %404 = vector.extract_strided_slice %391 {offsets = [0, 32], sizes = [2, 16], strides = [1, 1]} : vector<2x64xf32> to vector<2x16xf32>
    %405 = math.tanh %404 : vector<2x16xf32>
    %406 = vector.extract_strided_slice %391 {offsets = [0, 48], sizes = [2, 16], strides = [1, 1]} : vector<2x64xf32> to vector<2x16xf32>
    %407 = arith.negf %406 : vector<2x16xf32>
    %408 = math.exp %407 : vector<2x16xf32>
    %cst_230 = arith.constant 1.000000e+00 : f32
    %409 = vector.broadcast %cst_230 : f32 to vector<2x16xf32>
    %410 = arith.addf %409, %408 : vector<2x16xf32>
    %411 = arith.divf %409, %410 : vector<2x16xf32>
    %412 = arith.mulf %403, %383 : vector<2x16xf32>
    %413 = arith.mulf %397, %405 : vector<2x16xf32>
    %414 = arith.addf %412, %413 : vector<2x16xf32>
    %415 = math.tanh %414 : vector<2x16xf32>
    %416 = arith.mulf %411, %415 : vector<2x16xf32>
    %c0_231 = arith.constant 0 : index
    %c0_232 = arith.constant 0 : index
    %417 = vector.load %arg11[%c0_231, %c0_232] : memref<2x16xf32, #tpu.memory_space<vmem>>, vector<2x16xf32>
    tpu.vector_store %arg11[%c0_231, %c0_232], %416 {strides = array<i32>} : memref<2x16xf32, #tpu.memory_space<vmem>>, vector<2x16xf32>,
    %c0_233 = arith.constant 0 : index
    %c0_234 = arith.constant 0 : index
    %418 = vector.load %arg12[%c0_233, %c0_234] : memref<2x16xf32, #tpu.memory_space<vmem>>, vector<2x16xf32>
    tpu.vector_store %arg12[%c0_233, %c0_234], %414 {strides = array<i32>} : memref<2x16xf32, #tpu.memory_space<vmem>>, vector<2x16xf32>,
    %419 = arith.index_cast %378 : i32 to index
    %c0_235 = arith.constant 0 : index
    %c0_236 = arith.constant 0 : index
    %420 = vector.load %arg8[%419, %c0_235, %c0_236] : memref<8x2x16xf32, #tpu.memory_space<vmem>>, vector<1x2x16xf32>
    %421 = vector.shape_cast %420 : vector<1x2x16xf32> to vector<2x16xf32>
    %422 = vector.shape_cast %416 : vector<2x16xf32> to vector<1x2x16xf32>
    tpu.vector_store %arg8[%419, %c0_235, %c0_236], %422 {strides = array<i32>} : memref<8x2x16xf32, #tpu.memory_space<vmem>>, vector<1x2x16xf32>,
    %c1_i32_237 = arith.constant 1 : i32
    %c1_i32_238 = arith.constant 1 : i32
    %423 = arith.muli %c1_i32_237, %c1_i32_238 : i32
    %c0_i32_239 = arith.constant 0 : i32
    %424 = arith.addi %c0_i32_239, %423 : i32
    %c7_i32_240 = arith.constant 7 : i32
    %425 = arith.subi %c7_i32_240, %424 : i32
    %426 = arith.index_cast %425 : i32 to index
    %c0_241 = arith.constant 0 : index
    %c0_242 = arith.constant 0 : index
    %427 = vector.load %arg0[%426, %c0_241, %c0_242] : memref<8x2x32xf32, #tpu.memory_space<vmem>>, vector<1x2x32xf32>
    %428 = vector.shape_cast %427 : vector<1x2x32xf32> to vector<2x32xf32>
    %c0_243 = arith.constant 0 : index
    %c0_244 = arith.constant 0 : index
    %429 = vector.load %arg11[%c0_243, %c0_244] : memref<2x16xf32, #tpu.memory_space<vmem>>, vector<2x16xf32>
    %c0_245 = arith.constant 0 : index
    %c0_246 = arith.constant 0 : index
    %430 = vector.load %arg12[%c0_245, %c0_246] : memref<2x16xf32, #tpu.memory_space<vmem>>, vector<2x16xf32>
    %c0_247 = arith.constant 0 : index
    %c0_248 = arith.constant 0 : index
    %431 = vector.load %arg4[%c0_247, %c0_248] : memref<32x64xf32, #tpu.memory_space<vmem>>, vector<32x64xf32>
    %cst_249 = arith.constant dense<0.000000e+00> : vector<2x64xf32>
    %432 = tpu.matmul %428, %431, %cst_249 {dimension_numbers = #tpu.dot_dimension_numbers<[1], [0], [0], [1], [0, 0, 1, 1], [], []>} : vector<2x32xf32>, vector<32x64xf32>, vector<2x64xf32> -> vector<2x64xf32>
    %c0_250 = arith.constant 0 : index
    %c0_251 = arith.constant 0 : index
    %433 = vector.load %arg5[%c0_250, %c0_251] : memref<16x64xf32, #tpu.memory_space<vmem>>, vector<16x64xf32>
    %cst_252 = arith.constant dense<0.000000e+00> : vector<2x64xf32>
    %434 = tpu.matmul %429, %433, %cst_252 {dimension_numbers = #tpu.dot_dimension_numbers<[1], [0], [0], [1], [0, 0, 1, 1], [], []>} : vector<2x16xf32>, vector<16x64xf32>, vector<2x64xf32> -> vector<2x64xf32>
    %435 = arith.addf %432, %434 : vector<2x64xf32>
    %c0_253 = arith.constant 0 : index
    %c0_254 = arith.constant 0 : index
    %436 = vector.load %arg6[%c0_253, %c0_254] : memref<1x64xf32, #tpu.memory_space<vmem>>, vector<1x64xf32>
    %437 = vector.broadcast %436 : vector<1x64xf32> to vector<2x64xf32>
    %438 = arith.addf %435, %437 : vector<2x64xf32>
    %439 = vector.extract_strided_slice %438 {offsets = [0, 0], sizes = [2, 16], strides = [1, 1]} : vector<2x64xf32> to vector<2x16xf32>
    %440 = arith.negf %439 : vector<2x16xf32>
    %441 = math.exp %440 : vector<2x16xf32>
    %cst_255 = arith.constant 1.000000e+00 : f32
    %442 = vector.broadcast %cst_255 : f32 to vector<2x16xf32>
    %443 = arith.addf %442, %441 : vector<2x16xf32>
    %444 = arith.divf %442, %443 : vector<2x16xf32>
    %445 = vector.extract_strided_slice %438 {offsets = [0, 16], sizes = [2, 16], strides = [1, 1]} : vector<2x64xf32> to vector<2x16xf32>
    %446 = arith.negf %445 : vector<2x16xf32>
    %447 = math.exp %446 : vector<2x16xf32>
    %cst_256 = arith.constant 1.000000e+00 : f32
    %448 = vector.broadcast %cst_256 : f32 to vector<2x16xf32>
    %449 = arith.addf %448, %447 : vector<2x16xf32>
    %450 = arith.divf %448, %449 : vector<2x16xf32>
    %451 = vector.extract_strided_slice %438 {offsets = [0, 32], sizes = [2, 16], strides = [1, 1]} : vector<2x64xf32> to vector<2x16xf32>
    %452 = math.tanh %451 : vector<2x16xf32>
    %453 = vector.extract_strided_slice %438 {offsets = [0, 48], sizes = [2, 16], strides = [1, 1]} : vector<2x64xf32> to vector<2x16xf32>
    %454 = arith.negf %453 : vector<2x16xf32>
    %455 = math.exp %454 : vector<2x16xf32>
    %cst_257 = arith.constant 1.000000e+00 : f32
    %456 = vector.broadcast %cst_257 : f32 to vector<2x16xf32>
    %457 = arith.addf %456, %455 : vector<2x16xf32>
    %458 = arith.divf %456, %457 : vector<2x16xf32>
    %459 = arith.mulf %450, %430 : vector<2x16xf32>
    %460 = arith.mulf %444, %452 : vector<2x16xf32>
    %461 = arith.addf %459, %460 : vector<2x16xf32>
    %462 = math.tanh %461 : vector<2x16xf32>
    %463 = arith.mulf %458, %462 : vector<2x16xf32>
    %c0_258 = arith.constant 0 : index
    %c0_259 = arith.constant 0 : index
    %464 = vector.load %arg11[%c0_258, %c0_259] : memref<2x16xf32, #tpu.memory_space<vmem>>, vector<2x16xf32>
    tpu.vector_store %arg11[%c0_258, %c0_259], %463 {strides = array<i32>} : memref<2x16xf32, #tpu.memory_space<vmem>>, vector<2x16xf32>,
    %c0_260 = arith.constant 0 : index
    %c0_261 = arith.constant 0 : index
    %465 = vector.load %arg12[%c0_260, %c0_261] : memref<2x16xf32, #tpu.memory_space<vmem>>, vector<2x16xf32>
    tpu.vector_store %arg12[%c0_260, %c0_261], %461 {strides = array<i32>} : memref<2x16xf32, #tpu.memory_space<vmem>>, vector<2x16xf32>,
    %466 = arith.index_cast %425 : i32 to index
    %c0_262 = arith.constant 0 : index
    %c0_263 = arith.constant 0 : index
    %467 = vector.load %arg8[%466, %c0_262, %c0_263] : memref<8x2x16xf32, #tpu.memory_space<vmem>>, vector<1x2x16xf32>
    %468 = vector.shape_cast %467 : vector<1x2x16xf32> to vector<2x16xf32>
    %469 = vector.shape_cast %463 : vector<2x16xf32> to vector<1x2x16xf32>
    tpu.vector_store %arg8[%466, %c0_262, %c0_263], %469 {strides = array<i32>} : memref<8x2x16xf32, #tpu.memory_space<vmem>>, vector<1x2x16xf32>,
    %c2_i32_264 = arith.constant 2 : i32
    %c1_i32_265 = arith.constant 1 : i32
    %470 = arith.muli %c2_i32_264, %c1_i32_265 : i32
    %c0_i32_266 = arith.constant 0 : i32
    %471 = arith.addi %c0_i32_266, %470 : i32
    %c7_i32_267 = arith.constant 7 : i32
    %472 = arith.subi %c7_i32_267, %471 : i32
    %473 = arith.index_cast %472 : i32 to index
    %c0_268 = arith.constant 0 : index
    %c0_269 = arith.constant 0 : index
    %474 = vector.load %arg0[%473, %c0_268, %c0_269] : memref<8x2x32xf32, #tpu.memory_space<vmem>>, vector<1x2x32xf32>
    %475 = vector.shape_cast %474 : vector<1x2x32xf32> to vector<2x32xf32>
    %c0_270 = arith.constant 0 : index
    %c0_271 = arith.constant 0 : index
    %476 = vector.load %arg11[%c0_270, %c0_271] : memref<2x16xf32, #tpu.memory_space<vmem>>, vector<2x16xf32>
    %c0_272 = arith.constant 0 : index
    %c0_273 = arith.constant 0 : index
    %477 = vector.load %arg12[%c0_272, %c0_273] : memref<2x16xf32, #tpu.memory_space<vmem>>, vector<2x16xf32>
    %c0_274 = arith.constant 0 : index
    %c0_275 = arith.constant 0 : index
    %478 = vector.load %arg4[%c0_274, %c0_275] : memref<32x64xf32, #tpu.memory_space<vmem>>, vector<32x64xf32>
    %cst_276 = arith.constant dense<0.000000e+00> : vector<2x64xf32>
    %479 = tpu.matmul %475, %478, %cst_276 {dimension_numbers = #tpu.dot_dimension_numbers<[1], [0], [0], [1], [0, 0, 1, 1], [], []>} : vector<2x32xf32>, vector<32x64xf32>, vector<2x64xf32> -> vector<2x64xf32>
    %c0_277 = arith.constant 0 : index
    %c0_278 = arith.constant 0 : index
    %480 = vector.load %arg5[%c0_277, %c0_278] : memref<16x64xf32, #tpu.memory_space<vmem>>, vector<16x64xf32>
    %cst_279 = arith.constant dense<0.000000e+00> : vector<2x64xf32>
    %481 = tpu.matmul %476, %480, %cst_279 {dimension_numbers = #tpu.dot_dimension_numbers<[1], [0], [0], [1], [0, 0, 1, 1], [], []>} : vector<2x16xf32>, vector<16x64xf32>, vector<2x64xf32> -> vector<2x64xf32>
    %482 = arith.addf %479, %481 : vector<2x64xf32>
    %c0_280 = arith.constant 0 : index
    %c0_281 = arith.constant 0 : index
    %483 = vector.load %arg6[%c0_280, %c0_281] : memref<1x64xf32, #tpu.memory_space<vmem>>, vector<1x64xf32>
    %484 = vector.broadcast %483 : vector<1x64xf32> to vector<2x64xf32>
    %485 = arith.addf %482, %484 : vector<2x64xf32>
    %486 = vector.extract_strided_slice %485 {offsets = [0, 0], sizes = [2, 16], strides = [1, 1]} : vector<2x64xf32> to vector<2x16xf32>
    %487 = arith.negf %486 : vector<2x16xf32>
    %488 = math.exp %487 : vector<2x16xf32>
    %cst_282 = arith.constant 1.000000e+00 : f32
    %489 = vector.broadcast %cst_282 : f32 to vector<2x16xf32>
    %490 = arith.addf %489, %488 : vector<2x16xf32>
    %491 = arith.divf %489, %490 : vector<2x16xf32>
    %492 = vector.extract_strided_slice %485 {offsets = [0, 16], sizes = [2, 16], strides = [1, 1]} : vector<2x64xf32> to vector<2x16xf32>
    %493 = arith.negf %492 : vector<2x16xf32>
    %494 = math.exp %493 : vector<2x16xf32>
    %cst_283 = arith.constant 1.000000e+00 : f32
    %495 = vector.broadcast %cst_283 : f32 to vector<2x16xf32>
    %496 = arith.addf %495, %494 : vector<2x16xf32>
    %497 = arith.divf %495, %496 : vector<2x16xf32>
    %498 = vector.extract_strided_slice %485 {offsets = [0, 32], sizes = [2, 16], strides = [1, 1]} : vector<2x64xf32> to vector<2x16xf32>
    %499 = math.tanh %498 : vector<2x16xf32>
    %500 = vector.extract_strided_slice %485 {offsets = [0, 48], sizes = [2, 16], strides = [1, 1]} : vector<2x64xf32> to vector<2x16xf32>
    %501 = arith.negf %500 : vector<2x16xf32>
    %502 = math.exp %501 : vector<2x16xf32>
    %cst_284 = arith.constant 1.000000e+00 : f32
    %503 = vector.broadcast %cst_284 : f32 to vector<2x16xf32>
    %504 = arith.addf %503, %502 : vector<2x16xf32>
    %505 = arith.divf %503, %504 : vector<2x16xf32>
    %506 = arith.mulf %497, %477 : vector<2x16xf32>
    %507 = arith.mulf %491, %499 : vector<2x16xf32>
    %508 = arith.addf %506, %507 : vector<2x16xf32>
    %509 = math.tanh %508 : vector<2x16xf32>
    %510 = arith.mulf %505, %509 : vector<2x16xf32>
    %c0_285 = arith.constant 0 : index
    %c0_286 = arith.constant 0 : index
    %511 = vector.load %arg11[%c0_285, %c0_286] : memref<2x16xf32, #tpu.memory_space<vmem>>, vector<2x16xf32>
    tpu.vector_store %arg11[%c0_285, %c0_286], %510 {strides = array<i32>} : memref<2x16xf32, #tpu.memory_space<vmem>>, vector<2x16xf32>,
    %c0_287 = arith.constant 0 : index
    %c0_288 = arith.constant 0 : index
    %512 = vector.load %arg12[%c0_287, %c0_288] : memref<2x16xf32, #tpu.memory_space<vmem>>, vector<2x16xf32>
    tpu.vector_store %arg12[%c0_287, %c0_288], %508 {strides = array<i32>} : memref<2x16xf32, #tpu.memory_space<vmem>>, vector<2x16xf32>,
    %513 = arith.index_cast %472 : i32 to index
    %c0_289 = arith.constant 0 : index
    %c0_290 = arith.constant 0 : index
    %514 = vector.load %arg8[%513, %c0_289, %c0_290] : memref<8x2x16xf32, #tpu.memory_space<vmem>>, vector<1x2x16xf32>
    %515 = vector.shape_cast %514 : vector<1x2x16xf32> to vector<2x16xf32>
    %516 = vector.shape_cast %510 : vector<2x16xf32> to vector<1x2x16xf32>
    tpu.vector_store %arg8[%513, %c0_289, %c0_290], %516 {strides = array<i32>} : memref<8x2x16xf32, #tpu.memory_space<vmem>>, vector<1x2x16xf32>,
    %c3_i32_291 = arith.constant 3 : i32
    %c1_i32_292 = arith.constant 1 : i32
    %517 = arith.muli %c3_i32_291, %c1_i32_292 : i32
    %c0_i32_293 = arith.constant 0 : i32
    %518 = arith.addi %c0_i32_293, %517 : i32
    %c7_i32_294 = arith.constant 7 : i32
    %519 = arith.subi %c7_i32_294, %518 : i32
    %520 = arith.index_cast %519 : i32 to index
    %c0_295 = arith.constant 0 : index
    %c0_296 = arith.constant 0 : index
    %521 = vector.load %arg0[%520, %c0_295, %c0_296] : memref<8x2x32xf32, #tpu.memory_space<vmem>>, vector<1x2x32xf32>
    %522 = vector.shape_cast %521 : vector<1x2x32xf32> to vector<2x32xf32>
    %c0_297 = arith.constant 0 : index
    %c0_298 = arith.constant 0 : index
    %523 = vector.load %arg11[%c0_297, %c0_298] : memref<2x16xf32, #tpu.memory_space<vmem>>, vector<2x16xf32>
    %c0_299 = arith.constant 0 : index
    %c0_300 = arith.constant 0 : index
    %524 = vector.load %arg12[%c0_299, %c0_300] : memref<2x16xf32, #tpu.memory_space<vmem>>, vector<2x16xf32>
    %c0_301 = arith.constant 0 : index
    %c0_302 = arith.constant 0 : index
    %525 = vector.load %arg4[%c0_301, %c0_302] : memref<32x64xf32, #tpu.memory_space<vmem>>, vector<32x64xf32>
    %cst_303 = arith.constant dense<0.000000e+00> : vector<2x64xf32>
    %526 = tpu.matmul %522, %525, %cst_303 {dimension_numbers = #tpu.dot_dimension_numbers<[1], [0], [0], [1], [0, 0, 1, 1], [], []>} : vector<2x32xf32>, vector<32x64xf32>, vector<2x64xf32> -> vector<2x64xf32>
    %c0_304 = arith.constant 0 : index
    %c0_305 = arith.constant 0 : index
    %527 = vector.load %arg5[%c0_304, %c0_305] : memref<16x64xf32, #tpu.memory_space<vmem>>, vector<16x64xf32>
    %cst_306 = arith.constant dense<0.000000e+00> : vector<2x64xf32>
    %528 = tpu.matmul %523, %527, %cst_306 {dimension_numbers = #tpu.dot_dimension_numbers<[1], [0], [0], [1], [0, 0, 1, 1], [], []>} : vector<2x16xf32>, vector<16x64xf32>, vector<2x64xf32> -> vector<2x64xf32>
    %529 = arith.addf %526, %528 : vector<2x64xf32>
    %c0_307 = arith.constant 0 : index
    %c0_308 = arith.constant 0 : index
    %530 = vector.load %arg6[%c0_307, %c0_308] : memref<1x64xf32, #tpu.memory_space<vmem>>, vector<1x64xf32>
    %531 = vector.broadcast %530 : vector<1x64xf32> to vector<2x64xf32>
    %532 = arith.addf %529, %531 : vector<2x64xf32>
    %533 = vector.extract_strided_slice %532 {offsets = [0, 0], sizes = [2, 16], strides = [1, 1]} : vector<2x64xf32> to vector<2x16xf32>
    %534 = arith.negf %533 : vector<2x16xf32>
    %535 = math.exp %534 : vector<2x16xf32>
    %cst_309 = arith.constant 1.000000e+00 : f32
    %536 = vector.broadcast %cst_309 : f32 to vector<2x16xf32>
    %537 = arith.addf %536, %535 : vector<2x16xf32>
    %538 = arith.divf %536, %537 : vector<2x16xf32>
    %539 = vector.extract_strided_slice %532 {offsets = [0, 16], sizes = [2, 16], strides = [1, 1]} : vector<2x64xf32> to vector<2x16xf32>
    %540 = arith.negf %539 : vector<2x16xf32>
    %541 = math.exp %540 : vector<2x16xf32>
    %cst_310 = arith.constant 1.000000e+00 : f32
    %542 = vector.broadcast %cst_310 : f32 to vector<2x16xf32>
    %543 = arith.addf %542, %541 : vector<2x16xf32>
    %544 = arith.divf %542, %543 : vector<2x16xf32>
    %545 = vector.extract_strided_slice %532 {offsets = [0, 32], sizes = [2, 16], strides = [1, 1]} : vector<2x64xf32> to vector<2x16xf32>
    %546 = math.tanh %545 : vector<2x16xf32>
    %547 = vector.extract_strided_slice %532 {offsets = [0, 48], sizes = [2, 16], strides = [1, 1]} : vector<2x64xf32> to vector<2x16xf32>
    %548 = arith.negf %547 : vector<2x16xf32>
    %549 = math.exp %548 : vector<2x16xf32>
    %cst_311 = arith.constant 1.000000e+00 : f32
    %550 = vector.broadcast %cst_311 : f32 to vector<2x16xf32>
    %551 = arith.addf %550, %549 : vector<2x16xf32>
    %552 = arith.divf %550, %551 : vector<2x16xf32>
    %553 = arith.mulf %544, %524 : vector<2x16xf32>
    %554 = arith.mulf %538, %546 : vector<2x16xf32>
    %555 = arith.addf %553, %554 : vector<2x16xf32>
    %556 = math.tanh %555 : vector<2x16xf32>
    %557 = arith.mulf %552, %556 : vector<2x16xf32>
    %c0_312 = arith.constant 0 : index
    %c0_313 = arith.constant 0 : index
    %558 = vector.load %arg11[%c0_312, %c0_313] : memref<2x16xf32, #tpu.memory_space<vmem>>, vector<2x16xf32>
    tpu.vector_store %arg11[%c0_312, %c0_313], %557 {strides = array<i32>} : memref<2x16xf32, #tpu.memory_space<vmem>>, vector<2x16xf32>,
    %c0_314 = arith.constant 0 : index
    %c0_315 = arith.constant 0 : index
    %559 = vector.load %arg12[%c0_314, %c0_315] : memref<2x16xf32, #tpu.memory_space<vmem>>, vector<2x16xf32>
    tpu.vector_store %arg12[%c0_314, %c0_315], %555 {strides = array<i32>} : memref<2x16xf32, #tpu.memory_space<vmem>>, vector<2x16xf32>,
    %560 = arith.index_cast %519 : i32 to index
    %c0_316 = arith.constant 0 : index
    %c0_317 = arith.constant 0 : index
    %561 = vector.load %arg8[%560, %c0_316, %c0_317] : memref<8x2x16xf32, #tpu.memory_space<vmem>>, vector<1x2x16xf32>
    %562 = vector.shape_cast %561 : vector<1x2x16xf32> to vector<2x16xf32>
    %563 = vector.shape_cast %557 : vector<2x16xf32> to vector<1x2x16xf32>
    tpu.vector_store %arg8[%560, %c0_316, %c0_317], %563 {strides = array<i32>} : memref<8x2x16xf32, #tpu.memory_space<vmem>>, vector<1x2x16xf32>,
    %c4_i32_318 = arith.constant 4 : i32
    %c1_i32_319 = arith.constant 1 : i32
    %564 = arith.muli %c4_i32_318, %c1_i32_319 : i32
    %c0_i32_320 = arith.constant 0 : i32
    %565 = arith.addi %c0_i32_320, %564 : i32
    %c7_i32_321 = arith.constant 7 : i32
    %566 = arith.subi %c7_i32_321, %565 : i32
    %567 = arith.index_cast %566 : i32 to index
    %c0_322 = arith.constant 0 : index
    %c0_323 = arith.constant 0 : index
    %568 = vector.load %arg0[%567, %c0_322, %c0_323] : memref<8x2x32xf32, #tpu.memory_space<vmem>>, vector<1x2x32xf32>
    %569 = vector.shape_cast %568 : vector<1x2x32xf32> to vector<2x32xf32>
    %c0_324 = arith.constant 0 : index
    %c0_325 = arith.constant 0 : index
    %570 = vector.load %arg11[%c0_324, %c0_325] : memref<2x16xf32, #tpu.memory_space<vmem>>, vector<2x16xf32>
    %c0_326 = arith.constant 0 : index
    %c0_327 = arith.constant 0 : index
    %571 = vector.load %arg12[%c0_326, %c0_327] : memref<2x16xf32, #tpu.memory_space<vmem>>, vector<2x16xf32>
    %c0_328 = arith.constant 0 : index
    %c0_329 = arith.constant 0 : index
    %572 = vector.load %arg4[%c0_328, %c0_329] : memref<32x64xf32, #tpu.memory_space<vmem>>, vector<32x64xf32>
    %cst_330 = arith.constant dense<0.000000e+00> : vector<2x64xf32>
    %573 = tpu.matmul %569, %572, %cst_330 {dimension_numbers = #tpu.dot_dimension_numbers<[1], [0], [0], [1], [0, 0, 1, 1], [], []>} : vector<2x32xf32>, vector<32x64xf32>, vector<2x64xf32> -> vector<2x64xf32>
    %c0_331 = arith.constant 0 : index
    %c0_332 = arith.constant 0 : index
    %574 = vector.load %arg5[%c0_331, %c0_332] : memref<16x64xf32, #tpu.memory_space<vmem>>, vector<16x64xf32>
    %cst_333 = arith.constant dense<0.000000e+00> : vector<2x64xf32>
    %575 = tpu.matmul %570, %574, %cst_333 {dimension_numbers = #tpu.dot_dimension_numbers<[1], [0], [0], [1], [0, 0, 1, 1], [], []>} : vector<2x16xf32>, vector<16x64xf32>, vector<2x64xf32> -> vector<2x64xf32>
    %576 = arith.addf %573, %575 : vector<2x64xf32>
    %c0_334 = arith.constant 0 : index
    %c0_335 = arith.constant 0 : index
    %577 = vector.load %arg6[%c0_334, %c0_335] : memref<1x64xf32, #tpu.memory_space<vmem>>, vector<1x64xf32>
    %578 = vector.broadcast %577 : vector<1x64xf32> to vector<2x64xf32>
    %579 = arith.addf %576, %578 : vector<2x64xf32>
    %580 = vector.extract_strided_slice %579 {offsets = [0, 0], sizes = [2, 16], strides = [1, 1]} : vector<2x64xf32> to vector<2x16xf32>
    %581 = arith.negf %580 : vector<2x16xf32>
    %582 = math.exp %581 : vector<2x16xf32>
    %cst_336 = arith.constant 1.000000e+00 : f32
    %583 = vector.broadcast %cst_336 : f32 to vector<2x16xf32>
    %584 = arith.addf %583, %582 : vector<2x16xf32>
    %585 = arith.divf %583, %584 : vector<2x16xf32>
    %586 = vector.extract_strided_slice %579 {offsets = [0, 16], sizes = [2, 16], strides = [1, 1]} : vector<2x64xf32> to vector<2x16xf32>
    %587 = arith.negf %586 : vector<2x16xf32>
    %588 = math.exp %587 : vector<2x16xf32>
    %cst_337 = arith.constant 1.000000e+00 : f32
    %589 = vector.broadcast %cst_337 : f32 to vector<2x16xf32>
    %590 = arith.addf %589, %588 : vector<2x16xf32>
    %591 = arith.divf %589, %590 : vector<2x16xf32>
    %592 = vector.extract_strided_slice %579 {offsets = [0, 32], sizes = [2, 16], strides = [1, 1]} : vector<2x64xf32> to vector<2x16xf32>
    %593 = math.tanh %592 : vector<2x16xf32>
    %594 = vector.extract_strided_slice %579 {offsets = [0, 48], sizes = [2, 16], strides = [1, 1]} : vector<2x64xf32> to vector<2x16xf32>
    %595 = arith.negf %594 : vector<2x16xf32>
    %596 = math.exp %595 : vector<2x16xf32>
    %cst_338 = arith.constant 1.000000e+00 : f32
    %597 = vector.broadcast %cst_338 : f32 to vector<2x16xf32>
    %598 = arith.addf %597, %596 : vector<2x16xf32>
    %599 = arith.divf %597, %598 : vector<2x16xf32>
    %600 = arith.mulf %591, %571 : vector<2x16xf32>
    %601 = arith.mulf %585, %593 : vector<2x16xf32>
    %602 = arith.addf %600, %601 : vector<2x16xf32>
    %603 = math.tanh %602 : vector<2x16xf32>
    %604 = arith.mulf %599, %603 : vector<2x16xf32>
    %c0_339 = arith.constant 0 : index
    %c0_340 = arith.constant 0 : index
    %605 = vector.load %arg11[%c0_339, %c0_340] : memref<2x16xf32, #tpu.memory_space<vmem>>, vector<2x16xf32>
    tpu.vector_store %arg11[%c0_339, %c0_340], %604 {strides = array<i32>} : memref<2x16xf32, #tpu.memory_space<vmem>>, vector<2x16xf32>,
    %c0_341 = arith.constant 0 : index
    %c0_342 = arith.constant 0 : index
    %606 = vector.load %arg12[%c0_341, %c0_342] : memref<2x16xf32, #tpu.memory_space<vmem>>, vector<2x16xf32>
    tpu.vector_store %arg12[%c0_341, %c0_342], %602 {strides = array<i32>} : memref<2x16xf32, #tpu.memory_space<vmem>>, vector<2x16xf32>,
    %607 = arith.index_cast %566 : i32 to index
    %c0_343 = arith.constant 0 : index
    %c0_344 = arith.constant 0 : index
    %608 = vector.load %arg8[%607, %c0_343, %c0_344] : memref<8x2x16xf32, #tpu.memory_space<vmem>>, vector<1x2x16xf32>
    %609 = vector.shape_cast %608 : vector<1x2x16xf32> to vector<2x16xf32>
    %610 = vector.shape_cast %604 : vector<2x16xf32> to vector<1x2x16xf32>
    tpu.vector_store %arg8[%607, %c0_343, %c0_344], %610 {strides = array<i32>} : memref<8x2x16xf32, #tpu.memory_space<vmem>>, vector<1x2x16xf32>,
    %c5_i32_345 = arith.constant 5 : i32
    %c1_i32_346 = arith.constant 1 : i32
    %611 = arith.muli %c5_i32_345, %c1_i32_346 : i32
    %c0_i32_347 = arith.constant 0 : i32
    %612 = arith.addi %c0_i32_347, %611 : i32
    %c7_i32_348 = arith.constant 7 : i32
    %613 = arith.subi %c7_i32_348, %612 : i32
    %614 = arith.index_cast %613 : i32 to index
    %c0_349 = arith.constant 0 : index
    %c0_350 = arith.constant 0 : index
    %615 = vector.load %arg0[%614, %c0_349, %c0_350] : memref<8x2x32xf32, #tpu.memory_space<vmem>>, vector<1x2x32xf32>
    %616 = vector.shape_cast %615 : vector<1x2x32xf32> to vector<2x32xf32>
    %c0_351 = arith.constant 0 : index
    %c0_352 = arith.constant 0 : index
    %617 = vector.load %arg11[%c0_351, %c0_352] : memref<2x16xf32, #tpu.memory_space<vmem>>, vector<2x16xf32>
    %c0_353 = arith.constant 0 : index
    %c0_354 = arith.constant 0 : index
    %618 = vector.load %arg12[%c0_353, %c0_354] : memref<2x16xf32, #tpu.memory_space<vmem>>, vector<2x16xf32>
    %c0_355 = arith.constant 0 : index
    %c0_356 = arith.constant 0 : index
    %619 = vector.load %arg4[%c0_355, %c0_356] : memref<32x64xf32, #tpu.memory_space<vmem>>, vector<32x64xf32>
    %cst_357 = arith.constant dense<0.000000e+00> : vector<2x64xf32>
    %620 = tpu.matmul %616, %619, %cst_357 {dimension_numbers = #tpu.dot_dimension_numbers<[1], [0], [0], [1], [0, 0, 1, 1], [], []>} : vector<2x32xf32>, vector<32x64xf32>, vector<2x64xf32> -> vector<2x64xf32>
    %c0_358 = arith.constant 0 : index
    %c0_359 = arith.constant 0 : index
    %621 = vector.load %arg5[%c0_358, %c0_359] : memref<16x64xf32, #tpu.memory_space<vmem>>, vector<16x64xf32>
    %cst_360 = arith.constant dense<0.000000e+00> : vector<2x64xf32>
    %622 = tpu.matmul %617, %621, %cst_360 {dimension_numbers = #tpu.dot_dimension_numbers<[1], [0], [0], [1], [0, 0, 1, 1], [], []>} : vector<2x16xf32>, vector<16x64xf32>, vector<2x64xf32> -> vector<2x64xf32>
    %623 = arith.addf %620, %622 : vector<2x64xf32>
    %c0_361 = arith.constant 0 : index
    %c0_362 = arith.constant 0 : index
    %624 = vector.load %arg6[%c0_361, %c0_362] : memref<1x64xf32, #tpu.memory_space<vmem>>, vector<1x64xf32>
    %625 = vector.broadcast %624 : vector<1x64xf32> to vector<2x64xf32>
    %626 = arith.addf %623, %625 : vector<2x64xf32>
    %627 = vector.extract_strided_slice %626 {offsets = [0, 0], sizes = [2, 16], strides = [1, 1]} : vector<2x64xf32> to vector<2x16xf32>
    %628 = arith.negf %627 : vector<2x16xf32>
    %629 = math.exp %628 : vector<2x16xf32>
    %cst_363 = arith.constant 1.000000e+00 : f32
    %630 = vector.broadcast %cst_363 : f32 to vector<2x16xf32>
    %631 = arith.addf %630, %629 : vector<2x16xf32>
    %632 = arith.divf %630, %631 : vector<2x16xf32>
    %633 = vector.extract_strided_slice %626 {offsets = [0, 16], sizes = [2, 16], strides = [1, 1]} : vector<2x64xf32> to vector<2x16xf32>
    %634 = arith.negf %633 : vector<2x16xf32>
    %635 = math.exp %634 : vector<2x16xf32>
    %cst_364 = arith.constant 1.000000e+00 : f32
    %636 = vector.broadcast %cst_364 : f32 to vector<2x16xf32>
    %637 = arith.addf %636, %635 : vector<2x16xf32>
    %638 = arith.divf %636, %637 : vector<2x16xf32>
    %639 = vector.extract_strided_slice %626 {offsets = [0, 32], sizes = [2, 16], strides = [1, 1]} : vector<2x64xf32> to vector<2x16xf32>
    %640 = math.tanh %639 : vector<2x16xf32>
    %641 = vector.extract_strided_slice %626 {offsets = [0, 48], sizes = [2, 16], strides = [1, 1]} : vector<2x64xf32> to vector<2x16xf32>
    %642 = arith.negf %641 : vector<2x16xf32>
    %643 = math.exp %642 : vector<2x16xf32>
    %cst_365 = arith.constant 1.000000e+00 : f32
    %644 = vector.broadcast %cst_365 : f32 to vector<2x16xf32>
    %645 = arith.addf %644, %643 : vector<2x16xf32>
    %646 = arith.divf %644, %645 : vector<2x16xf32>
    %647 = arith.mulf %638, %618 : vector<2x16xf32>
    %648 = arith.mulf %632, %640 : vector<2x16xf32>
    %649 = arith.addf %647, %648 : vector<2x16xf32>
    %650 = math.tanh %649 : vector<2x16xf32>
    %651 = arith.mulf %646, %650 : vector<2x16xf32>
    %c0_366 = arith.constant 0 : index
    %c0_367 = arith.constant 0 : index
    %652 = vector.load %arg11[%c0_366, %c0_367] : memref<2x16xf32, #tpu.memory_space<vmem>>, vector<2x16xf32>
    tpu.vector_store %arg11[%c0_366, %c0_367], %651 {strides = array<i32>} : memref<2x16xf32, #tpu.memory_space<vmem>>, vector<2x16xf32>,
    %c0_368 = arith.constant 0 : index
    %c0_369 = arith.constant 0 : index
    %653 = vector.load %arg12[%c0_368, %c0_369] : memref<2x16xf32, #tpu.memory_space<vmem>>, vector<2x16xf32>
    tpu.vector_store %arg12[%c0_368, %c0_369], %649 {strides = array<i32>} : memref<2x16xf32, #tpu.memory_space<vmem>>, vector<2x16xf32>,
    %654 = arith.index_cast %613 : i32 to index
    %c0_370 = arith.constant 0 : index
    %c0_371 = arith.constant 0 : index
    %655 = vector.load %arg8[%654, %c0_370, %c0_371] : memref<8x2x16xf32, #tpu.memory_space<vmem>>, vector<1x2x16xf32>
    %656 = vector.shape_cast %655 : vector<1x2x16xf32> to vector<2x16xf32>
    %657 = vector.shape_cast %651 : vector<2x16xf32> to vector<1x2x16xf32>
    tpu.vector_store %arg8[%654, %c0_370, %c0_371], %657 {strides = array<i32>} : memref<8x2x16xf32, #tpu.memory_space<vmem>>, vector<1x2x16xf32>,
    %c6_i32_372 = arith.constant 6 : i32
    %c1_i32_373 = arith.constant 1 : i32
    %658 = arith.muli %c6_i32_372, %c1_i32_373 : i32
    %c0_i32_374 = arith.constant 0 : i32
    %659 = arith.addi %c0_i32_374, %658 : i32
    %c7_i32_375 = arith.constant 7 : i32
    %660 = arith.subi %c7_i32_375, %659 : i32
    %661 = arith.index_cast %660 : i32 to index
    %c0_376 = arith.constant 0 : index
    %c0_377 = arith.constant 0 : index
    %662 = vector.load %arg0[%661, %c0_376, %c0_377] : memref<8x2x32xf32, #tpu.memory_space<vmem>>, vector<1x2x32xf32>
    %663 = vector.shape_cast %662 : vector<1x2x32xf32> to vector<2x32xf32>
    %c0_378 = arith.constant 0 : index
    %c0_379 = arith.constant 0 : index
    %664 = vector.load %arg11[%c0_378, %c0_379] : memref<2x16xf32, #tpu.memory_space<vmem>>, vector<2x16xf32>
    %c0_380 = arith.constant 0 : index
    %c0_381 = arith.constant 0 : index
    %665 = vector.load %arg12[%c0_380, %c0_381] : memref<2x16xf32, #tpu.memory_space<vmem>>, vector<2x16xf32>
    %c0_382 = arith.constant 0 : index
    %c0_383 = arith.constant 0 : index
    %666 = vector.load %arg4[%c0_382, %c0_383] : memref<32x64xf32, #tpu.memory_space<vmem>>, vector<32x64xf32>
    %cst_384 = arith.constant dense<0.000000e+00> : vector<2x64xf32>
    %667 = tpu.matmul %663, %666, %cst_384 {dimension_numbers = #tpu.dot_dimension_numbers<[1], [0], [0], [1], [0, 0, 1, 1], [], []>} : vector<2x32xf32>, vector<32x64xf32>, vector<2x64xf32> -> vector<2x64xf32>
    %c0_385 = arith.constant 0 : index
    %c0_386 = arith.constant 0 : index
    %668 = vector.load %arg5[%c0_385, %c0_386] : memref<16x64xf32, #tpu.memory_space<vmem>>, vector<16x64xf32>
    %cst_387 = arith.constant dense<0.000000e+00> : vector<2x64xf32>
    %669 = tpu.matmul %664, %668, %cst_387 {dimension_numbers = #tpu.dot_dimension_numbers<[1], [0], [0], [1], [0, 0, 1, 1], [], []>} : vector<2x16xf32>, vector<16x64xf32>, vector<2x64xf32> -> vector<2x64xf32>
    %670 = arith.addf %667, %669 : vector<2x64xf32>
    %c0_388 = arith.constant 0 : index
    %c0_389 = arith.constant 0 : index
    %671 = vector.load %arg6[%c0_388, %c0_389] : memref<1x64xf32, #tpu.memory_space<vmem>>, vector<1x64xf32>
    %672 = vector.broadcast %671 : vector<1x64xf32> to vector<2x64xf32>
    %673 = arith.addf %670, %672 : vector<2x64xf32>
    %674 = vector.extract_strided_slice %673 {offsets = [0, 0], sizes = [2, 16], strides = [1, 1]} : vector<2x64xf32> to vector<2x16xf32>
    %675 = arith.negf %674 : vector<2x16xf32>
    %676 = math.exp %675 : vector<2x16xf32>
    %cst_390 = arith.constant 1.000000e+00 : f32
    %677 = vector.broadcast %cst_390 : f32 to vector<2x16xf32>
    %678 = arith.addf %677, %676 : vector<2x16xf32>
    %679 = arith.divf %677, %678 : vector<2x16xf32>
    %680 = vector.extract_strided_slice %673 {offsets = [0, 16], sizes = [2, 16], strides = [1, 1]} : vector<2x64xf32> to vector<2x16xf32>
    %681 = arith.negf %680 : vector<2x16xf32>
    %682 = math.exp %681 : vector<2x16xf32>
    %cst_391 = arith.constant 1.000000e+00 : f32
    %683 = vector.broadcast %cst_391 : f32 to vector<2x16xf32>
    %684 = arith.addf %683, %682 : vector<2x16xf32>
    %685 = arith.divf %683, %684 : vector<2x16xf32>
    %686 = vector.extract_strided_slice %673 {offsets = [0, 32], sizes = [2, 16], strides = [1, 1]} : vector<2x64xf32> to vector<2x16xf32>
    %687 = math.tanh %686 : vector<2x16xf32>
    %688 = vector.extract_strided_slice %673 {offsets = [0, 48], sizes = [2, 16], strides = [1, 1]} : vector<2x64xf32> to vector<2x16xf32>
    %689 = arith.negf %688 : vector<2x16xf32>
    %690 = math.exp %689 : vector<2x16xf32>
    %cst_392 = arith.constant 1.000000e+00 : f32
    %691 = vector.broadcast %cst_392 : f32 to vector<2x16xf32>
    %692 = arith.addf %691, %690 : vector<2x16xf32>
    %693 = arith.divf %691, %692 : vector<2x16xf32>
    %694 = arith.mulf %685, %665 : vector<2x16xf32>
    %695 = arith.mulf %679, %687 : vector<2x16xf32>
    %696 = arith.addf %694, %695 : vector<2x16xf32>
    %697 = math.tanh %696 : vector<2x16xf32>
    %698 = arith.mulf %693, %697 : vector<2x16xf32>
    %c0_393 = arith.constant 0 : index
    %c0_394 = arith.constant 0 : index
    %699 = vector.load %arg11[%c0_393, %c0_394] : memref<2x16xf32, #tpu.memory_space<vmem>>, vector<2x16xf32>
    tpu.vector_store %arg11[%c0_393, %c0_394], %698 {strides = array<i32>} : memref<2x16xf32, #tpu.memory_space<vmem>>, vector<2x16xf32>,
    %c0_395 = arith.constant 0 : index
    %c0_396 = arith.constant 0 : index
    %700 = vector.load %arg12[%c0_395, %c0_396] : memref<2x16xf32, #tpu.memory_space<vmem>>, vector<2x16xf32>
    tpu.vector_store %arg12[%c0_395, %c0_396], %696 {strides = array<i32>} : memref<2x16xf32, #tpu.memory_space<vmem>>, vector<2x16xf32>,
    %701 = arith.index_cast %660 : i32 to index
    %c0_397 = arith.constant 0 : index
    %c0_398 = arith.constant 0 : index
    %702 = vector.load %arg8[%701, %c0_397, %c0_398] : memref<8x2x16xf32, #tpu.memory_space<vmem>>, vector<1x2x16xf32>
    %703 = vector.shape_cast %702 : vector<1x2x16xf32> to vector<2x16xf32>
    %704 = vector.shape_cast %698 : vector<2x16xf32> to vector<1x2x16xf32>
    tpu.vector_store %arg8[%701, %c0_397, %c0_398], %704 {strides = array<i32>} : memref<8x2x16xf32, #tpu.memory_space<vmem>>, vector<1x2x16xf32>,
    %c7_i32_399 = arith.constant 7 : i32
    %c1_i32_400 = arith.constant 1 : i32
    %705 = arith.muli %c7_i32_399, %c1_i32_400 : i32
    %c0_i32_401 = arith.constant 0 : i32
    %706 = arith.addi %c0_i32_401, %705 : i32
    %c7_i32_402 = arith.constant 7 : i32
    %707 = arith.subi %c7_i32_402, %706 : i32
    %708 = arith.index_cast %707 : i32 to index
    %c0_403 = arith.constant 0 : index
    %c0_404 = arith.constant 0 : index
    %709 = vector.load %arg0[%708, %c0_403, %c0_404] : memref<8x2x32xf32, #tpu.memory_space<vmem>>, vector<1x2x32xf32>
    %710 = vector.shape_cast %709 : vector<1x2x32xf32> to vector<2x32xf32>
    %c0_405 = arith.constant 0 : index
    %c0_406 = arith.constant 0 : index
    %711 = vector.load %arg11[%c0_405, %c0_406] : memref<2x16xf32, #tpu.memory_space<vmem>>, vector<2x16xf32>
    %c0_407 = arith.constant 0 : index
    %c0_408 = arith.constant 0 : index
    %712 = vector.load %arg12[%c0_407, %c0_408] : memref<2x16xf32, #tpu.memory_space<vmem>>, vector<2x16xf32>
    %c0_409 = arith.constant 0 : index
    %c0_410 = arith.constant 0 : index
    %713 = vector.load %arg4[%c0_409, %c0_410] : memref<32x64xf32, #tpu.memory_space<vmem>>, vector<32x64xf32>
    %cst_411 = arith.constant dense<0.000000e+00> : vector<2x64xf32>
    %714 = tpu.matmul %710, %713, %cst_411 {dimension_numbers = #tpu.dot_dimension_numbers<[1], [0], [0], [1], [0, 0, 1, 1], [], []>} : vector<2x32xf32>, vector<32x64xf32>, vector<2x64xf32> -> vector<2x64xf32>
    %c0_412 = arith.constant 0 : index
    %c0_413 = arith.constant 0 : index
    %715 = vector.load %arg5[%c0_412, %c0_413] : memref<16x64xf32, #tpu.memory_space<vmem>>, vector<16x64xf32>
    %cst_414 = arith.constant dense<0.000000e+00> : vector<2x64xf32>
    %716 = tpu.matmul %711, %715, %cst_414 {dimension_numbers = #tpu.dot_dimension_numbers<[1], [0], [0], [1], [0, 0, 1, 1], [], []>} : vector<2x16xf32>, vector<16x64xf32>, vector<2x64xf32> -> vector<2x64xf32>
    %717 = arith.addf %714, %716 : vector<2x64xf32>
    %c0_415 = arith.constant 0 : index
    %c0_416 = arith.constant 0 : index
    %718 = vector.load %arg6[%c0_415, %c0_416] : memref<1x64xf32, #tpu.memory_space<vmem>>, vector<1x64xf32>
    %719 = vector.broadcast %718 : vector<1x64xf32> to vector<2x64xf32>
    %720 = arith.addf %717, %719 : vector<2x64xf32>
    %721 = vector.extract_strided_slice %720 {offsets = [0, 0], sizes = [2, 16], strides = [1, 1]} : vector<2x64xf32> to vector<2x16xf32>
    %722 = arith.negf %721 : vector<2x16xf32>
    %723 = math.exp %722 : vector<2x16xf32>
    %cst_417 = arith.constant 1.000000e+00 : f32
    %724 = vector.broadcast %cst_417 : f32 to vector<2x16xf32>
    %725 = arith.addf %724, %723 : vector<2x16xf32>
    %726 = arith.divf %724, %725 : vector<2x16xf32>
    %727 = vector.extract_strided_slice %720 {offsets = [0, 16], sizes = [2, 16], strides = [1, 1]} : vector<2x64xf32> to vector<2x16xf32>
    %728 = arith.negf %727 : vector<2x16xf32>
    %729 = math.exp %728 : vector<2x16xf32>
    %cst_418 = arith.constant 1.000000e+00 : f32
    %730 = vector.broadcast %cst_418 : f32 to vector<2x16xf32>
    %731 = arith.addf %730, %729 : vector<2x16xf32>
    %732 = arith.divf %730, %731 : vector<2x16xf32>
    %733 = vector.extract_strided_slice %720 {offsets = [0, 32], sizes = [2, 16], strides = [1, 1]} : vector<2x64xf32> to vector<2x16xf32>
    %734 = math.tanh %733 : vector<2x16xf32>
    %735 = vector.extract_strided_slice %720 {offsets = [0, 48], sizes = [2, 16], strides = [1, 1]} : vector<2x64xf32> to vector<2x16xf32>
    %736 = arith.negf %735 : vector<2x16xf32>
    %737 = math.exp %736 : vector<2x16xf32>
    %cst_419 = arith.constant 1.000000e+00 : f32
    %738 = vector.broadcast %cst_419 : f32 to vector<2x16xf32>
    %739 = arith.addf %738, %737 : vector<2x16xf32>
    %740 = arith.divf %738, %739 : vector<2x16xf32>
    %741 = arith.mulf %732, %712 : vector<2x16xf32>
    %742 = arith.mulf %726, %734 : vector<2x16xf32>
    %743 = arith.addf %741, %742 : vector<2x16xf32>
    %744 = math.tanh %743 : vector<2x16xf32>
    %745 = arith.mulf %740, %744 : vector<2x16xf32>
    %c0_420 = arith.constant 0 : index
    %c0_421 = arith.constant 0 : index
    %746 = vector.load %arg11[%c0_420, %c0_421] : memref<2x16xf32, #tpu.memory_space<vmem>>, vector<2x16xf32>
    tpu.vector_store %arg11[%c0_420, %c0_421], %745 {strides = array<i32>} : memref<2x16xf32, #tpu.memory_space<vmem>>, vector<2x16xf32>,
    %c0_422 = arith.constant 0 : index
    %c0_423 = arith.constant 0 : index
    %747 = vector.load %arg12[%c0_422, %c0_423] : memref<2x16xf32, #tpu.memory_space<vmem>>, vector<2x16xf32>
    tpu.vector_store %arg12[%c0_422, %c0_423], %743 {strides = array<i32>} : memref<2x16xf32, #tpu.memory_space<vmem>>, vector<2x16xf32>,
    %748 = arith.index_cast %707 : i32 to index
    %c0_424 = arith.constant 0 : index
    %c0_425 = arith.constant 0 : index
    %749 = vector.load %arg8[%748, %c0_424, %c0_425] : memref<8x2x16xf32, #tpu.memory_space<vmem>>, vector<1x2x16xf32>
    %750 = vector.shape_cast %749 : vector<1x2x16xf32> to vector<2x16xf32>
    %751 = vector.shape_cast %745 : vector<2x16xf32> to vector<1x2x16xf32>
    tpu.vector_store %arg8[%748, %c0_424, %c0_425], %751 {strides = array<i32>} : memref<8x2x16xf32, #tpu.memory_space<vmem>>, vector<1x2x16xf32>,
    %c8_i32_426 = arith.constant 8 : i32
    return
  }
}

module attributes {stable_mosaic.version = 11 : i64} {
  func.func @_verb_decoder_kernel(%arg0: memref<4x2x32xf32, #tpu.memory_space<vmem>>, %arg1: memref<2x8x32xf32, #tpu.memory_space<vmem>>, %arg2: memref<2x32xf32, #tpu.memory_space<vmem>>, %arg3: memref<2x32xf32, #tpu.memory_space<vmem>>, %arg4: memref<64x128xf32, #tpu.memory_space<vmem>>, %arg5: memref<32x128xf32, #tpu.memory_space<vmem>>, %arg6: memref<1x128xf32, #tpu.memory_space<vmem>>, %arg7: memref<32x32xf32, #tpu.memory_space<vmem>>, %arg8: memref<64x32xf32, #tpu.memory_space<vmem>>, %arg9: memref<32x16xf32, #tpu.memory_space<vmem>>, %arg10: memref<1x16xf32, #tpu.memory_space<vmem>>, %arg11: memref<4x2x16xf32, #tpu.memory_space<vmem>>, %arg12: memref<4x2x32xf32, #tpu.memory_space<vmem>>, %arg13: memref<2x32xf32, #tpu.memory_space<vmem>>, %arg14: memref<2x32xf32, #tpu.memory_space<vmem>>, %arg15: memref<2x32xf32, #tpu.memory_space<vmem>>) attributes {dimension_semantics = [], scalar_prefetch = 0 : i64, scratch_operands = 1 : i64, tpu.core_type = #tpu.core_type<tc>} {
    %c0 = arith.constant 0 : index
    %c0_0 = arith.constant 0 : index
    %0 = vector.load %arg2[%c0, %c0_0] : memref<2x32xf32, #tpu.memory_space<vmem>>, vector<2x32xf32>
    %c0_1 = arith.constant 0 : index
    %c0_2 = arith.constant 0 : index
    %1 = vector.load %arg13[%c0_1, %c0_2] : memref<2x32xf32, #tpu.memory_space<vmem>>, vector<2x32xf32>
    tpu.vector_store %arg13[%c0_1, %c0_2], %0 {strides = array<i32>} : memref<2x32xf32, #tpu.memory_space<vmem>>, vector<2x32xf32>,
    %c0_3 = arith.constant 0 : index
    %c0_4 = arith.constant 0 : index
    %2 = vector.load %arg3[%c0_3, %c0_4] : memref<2x32xf32, #tpu.memory_space<vmem>>, vector<2x32xf32>
    %c0_5 = arith.constant 0 : index
    %c0_6 = arith.constant 0 : index
    %3 = vector.load %arg14[%c0_5, %c0_6] : memref<2x32xf32, #tpu.memory_space<vmem>>, vector<2x32xf32>
    tpu.vector_store %arg14[%c0_5, %c0_6], %2 {strides = array<i32>} : memref<2x32xf32, #tpu.memory_space<vmem>>, vector<2x32xf32>,
    %cst = arith.constant 0.000000e+00 : f32
    %4 = vector.broadcast %cst : f32 to vector<2x32xf32>
    %c0_7 = arith.constant 0 : index
    %c0_8 = arith.constant 0 : index
    %5 = vector.load %arg15[%c0_7, %c0_8] : memref<2x32xf32, #tpu.memory_space<vmem>>, vector<2x32xf32>
    tpu.vector_store %arg15[%c0_7, %c0_8], %4 {strides = array<i32>} : memref<2x32xf32, #tpu.memory_space<vmem>>, vector<2x32xf32>,
    %c0_i32 = arith.constant 0 : i32
    %c1_i32 = arith.constant 1 : i32
    %6 = arith.muli %c0_i32, %c1_i32 : i32
    %c0_i32_9 = arith.constant 0 : i32
    %7 = arith.addi %c0_i32_9, %6 : i32
    %8 = arith.index_cast %7 : i32 to index
    %c0_10 = arith.constant 0 : index
    %c0_11 = arith.constant 0 : index
    %9 = vector.load %arg0[%8, %c0_10, %c0_11] : memref<4x2x32xf32, #tpu.memory_space<vmem>>, vector<1x2x32xf32>
    %10 = vector.shape_cast %9 : vector<1x2x32xf32> to vector<2x32xf32>
    %c0_12 = arith.constant 0 : index
    %c0_13 = arith.constant 0 : index
    %11 = vector.load %arg15[%c0_12, %c0_13] : memref<2x32xf32, #tpu.memory_space<vmem>>, vector<2x32xf32>
    %c0_14 = arith.constant 0 : index
    %c0_15 = arith.constant 0 : index
    %12 = vector.load %arg13[%c0_14, %c0_15] : memref<2x32xf32, #tpu.memory_space<vmem>>, vector<2x32xf32>
    %c0_16 = arith.constant 0 : index
    %c0_17 = arith.constant 0 : index
    %13 = vector.load %arg14[%c0_16, %c0_17] : memref<2x32xf32, #tpu.memory_space<vmem>>, vector<2x32xf32>
    %c0_18 = arith.constant 0 : index
    %c0_19 = arith.constant 0 : index
    %14 = vector.load %arg4[%c0_18, %c0_19] : memref<64x128xf32, #tpu.memory_space<vmem>>, vector<32x128xf32>
    %cst_20 = arith.constant dense<0.000000e+00> : vector<2x128xf32>
    %15 = tpu.matmul %10, %14, %cst_20 {dimension_numbers = #tpu.dot_dimension_numbers<[1], [0], [0], [1], [0, 0, 1, 1], [], []>} : vector<2x32xf32>, vector<32x128xf32>, vector<2x128xf32> -> vector<2x128xf32>
    %c32 = arith.constant 32 : index
    %c0_21 = arith.constant 0 : index
    %16 = vector.load %arg4[%c32, %c0_21] : memref<64x128xf32, #tpu.memory_space<vmem>>, vector<32x128xf32>
    %cst_22 = arith.constant dense<0.000000e+00> : vector<2x128xf32>
    %17 = tpu.matmul %11, %16, %cst_22 {dimension_numbers = #tpu.dot_dimension_numbers<[1], [0], [0], [1], [0, 0, 1, 1], [], []>} : vector<2x32xf32>, vector<32x128xf32>, vector<2x128xf32> -> vector<2x128xf32>
    %18 = arith.addf %15, %17 : vector<2x128xf32>
    %c0_23 = arith.constant 0 : index
    %c0_24 = arith.constant 0 : index
    %19 = vector.load %arg5[%c0_23, %c0_24] : memref<32x128xf32, #tpu.memory_space<vmem>>, vector<32x128xf32>
    %cst_25 = arith.constant dense<0.000000e+00> : vector<2x128xf32>
    %20 = tpu.matmul %12, %19, %cst_25 {dimension_numbers = #tpu.dot_dimension_numbers<[1], [0], [0], [1], [0, 0, 1, 1], [], []>} : vector<2x32xf32>, vector<32x128xf32>, vector<2x128xf32> -> vector<2x128xf32>
    %21 = arith.addf %18, %20 : vector<2x128xf32>
    %c0_26 = arith.constant 0 : index
    %c0_27 = arith.constant 0 : index
    %22 = vector.load %arg6[%c0_26, %c0_27] : memref<1x128xf32, #tpu.memory_space<vmem>>, vector<1x128xf32>
    %23 = vector.broadcast %22 : vector<1x128xf32> to vector<2x128xf32>
    %24 = arith.addf %21, %23 : vector<2x128xf32>
    %25 = vector.extract_strided_slice %24 {offsets = [0, 0], sizes = [2, 32], strides = [1, 1]} : vector<2x128xf32> to vector<2x32xf32>
    %26 = arith.negf %25 : vector<2x32xf32>
    %27 = math.exp %26 : vector<2x32xf32>
    %cst_28 = arith.constant 1.000000e+00 : f32
    %28 = vector.broadcast %cst_28 : f32 to vector<2x32xf32>
    %29 = arith.addf %28, %27 : vector<2x32xf32>
    %30 = arith.divf %28, %29 : vector<2x32xf32>
    %31 = vector.extract_strided_slice %24 {offsets = [0, 32], sizes = [2, 32], strides = [1, 1]} : vector<2x128xf32> to vector<2x32xf32>
    %32 = arith.negf %31 : vector<2x32xf32>
    %33 = math.exp %32 : vector<2x32xf32>
    %cst_29 = arith.constant 1.000000e+00 : f32
    %34 = vector.broadcast %cst_29 : f32 to vector<2x32xf32>
    %35 = arith.addf %34, %33 : vector<2x32xf32>
    %36 = arith.divf %34, %35 : vector<2x32xf32>
    %37 = vector.extract_strided_slice %24 {offsets = [0, 64], sizes = [2, 32], strides = [1, 1]} : vector<2x128xf32> to vector<2x32xf32>
    %38 = math.tanh %37 : vector<2x32xf32>
    %39 = vector.extract_strided_slice %24 {offsets = [0, 96], sizes = [2, 32], strides = [1, 1]} : vector<2x128xf32> to vector<2x32xf32>
    %40 = arith.negf %39 : vector<2x32xf32>
    %41 = math.exp %40 : vector<2x32xf32>
    %cst_30 = arith.constant 1.000000e+00 : f32
    %42 = vector.broadcast %cst_30 : f32 to vector<2x32xf32>
    %43 = arith.addf %42, %41 : vector<2x32xf32>
    %44 = arith.divf %42, %43 : vector<2x32xf32>
    %45 = arith.mulf %36, %13 : vector<2x32xf32>
    %46 = arith.mulf %30, %38 : vector<2x32xf32>
    %47 = arith.addf %45, %46 : vector<2x32xf32>
    %48 = math.tanh %47 : vector<2x32xf32>
    %49 = arith.mulf %44, %48 : vector<2x32xf32>
    %c0_31 = arith.constant 0 : index
    %c0_32 = arith.constant 0 : index
    %50 = vector.load %arg13[%c0_31, %c0_32] : memref<2x32xf32, #tpu.memory_space<vmem>>, vector<2x32xf32>
    tpu.vector_store %arg13[%c0_31, %c0_32], %49 {strides = array<i32>} : memref<2x32xf32, #tpu.memory_space<vmem>>, vector<2x32xf32>,
    %c0_33 = arith.constant 0 : index
    %c0_34 = arith.constant 0 : index
    %51 = vector.load %arg14[%c0_33, %c0_34] : memref<2x32xf32, #tpu.memory_space<vmem>>, vector<2x32xf32>
    tpu.vector_store %arg14[%c0_33, %c0_34], %47 {strides = array<i32>} : memref<2x32xf32, #tpu.memory_space<vmem>>, vector<2x32xf32>,
    %52 = arith.index_cast %7 : i32 to index
    %c0_35 = arith.constant 0 : index
    %c0_36 = arith.constant 0 : index
    %53 = vector.load %arg12[%52, %c0_35, %c0_36] : memref<4x2x32xf32, #tpu.memory_space<vmem>>, vector<1x2x32xf32>
    %54 = vector.shape_cast %53 : vector<1x2x32xf32> to vector<2x32xf32>
    %55 = vector.shape_cast %49 : vector<2x32xf32> to vector<1x2x32xf32>
    tpu.vector_store %arg12[%52, %c0_35, %c0_36], %55 {strides = array<i32>} : memref<4x2x32xf32, #tpu.memory_space<vmem>>, vector<1x2x32xf32>,
    %c0_37 = arith.constant 0 : index
    %c0_38 = arith.constant 0 : index
    %56 = vector.load %arg7[%c0_37, %c0_38] : memref<32x32xf32, #tpu.memory_space<vmem>>, vector<32x32xf32>
    %cst_39 = arith.constant dense<0.000000e+00> : vector<2x32xf32>
    %57 = tpu.matmul %49, %56, %cst_39 {dimension_numbers = #tpu.dot_dimension_numbers<[1], [0], [0], [1], [0, 0, 1, 1], [], []>} : vector<2x32xf32>, vector<32x32xf32>, vector<2x32xf32> -> vector<2x32xf32>
    %c0_40 = arith.constant 0 : index
    %c0_41 = arith.constant 0 : index
    %c0_42 = arith.constant 0 : index
    %58 = vector.load %arg1[%c0_40, %c0_41, %c0_42] : memref<2x8x32xf32, #tpu.memory_space<vmem>>, vector<2x8x32xf32>
    %59 = vector.shape_cast %57 : vector<2x32xf32> to vector<2x1x32xf32>
    %60 = vector.broadcast %59 : vector<2x1x32xf32> to vector<2x8x32xf32>
    %61 = arith.mulf %58, %60 : vector<2x8x32xf32>
    %cst_43 = arith.constant dense<0.000000e+00> : vector<2x8xf32>
    %62 = vector.multi_reduction <add>, %61, %cst_43 [2] : vector<2x8x32xf32> to vector<2x8xf32>
    %cst_44 = arith.constant dense<0xFF800000> : vector<2xf32>
    %63 = vector.multi_reduction <maximumf>, %62, %cst_44 [1] : vector<2x8xf32> to vector<2xf32>
    %64 = vector.shape_cast %63 : vector<2xf32> to vector<2x1xf32>
    %65 = vector.broadcast %64 : vector<2x1xf32> to vector<2x8xf32>
    %66 = arith.subf %62, %65 : vector<2x8xf32>
    %67 = math.exp %66 : vector<2x8xf32>
    %cst_45 = arith.constant dense<0.000000e+00> : vector<2xf32>
    %68 = vector.multi_reduction <add>, %67, %cst_45 [1] : vector<2x8xf32> to vector<2xf32>
    %69 = vector.shape_cast %68 : vector<2xf32> to vector<2x1xf32>
    %70 = tpu.reciprocal %69 {approx = true} : vector<2x1xf32> -> vector<2x1xf32>
    %71 = vector.broadcast %70 : vector<2x1xf32> to vector<2x8xf32>
    %72 = arith.mulf %67, %71 : vector<2x8xf32>
    %73 = vector.shape_cast %72 : vector<2x8xf32> to vector<2x8x1xf32>
    %74 = vector.broadcast %73 : vector<2x8x1xf32> to vector<2x8x32xf32>
    %75 = arith.mulf %74, %58 : vector<2x8x32xf32>
    %cst_46 = arith.constant dense<0.000000e+00> : vector<2x32xf32>
    %76 = vector.multi_reduction <add>, %75, %cst_46 [1] : vector<2x8x32xf32> to vector<2x32xf32>
    %c0_47 = arith.constant 0 : index
    %c0_48 = arith.constant 0 : index
    %77 = vector.load %arg8[%c0_47, %c0_48] : memref<64x32xf32, #tpu.memory_space<vmem>>, vector<32x32xf32>
    %cst_49 = arith.constant dense<0.000000e+00> : vector<2x32xf32>
    %78 = tpu.matmul %76, %77, %cst_49 {dimension_numbers = #tpu.dot_dimension_numbers<[1], [0], [0], [1], [0, 0, 1, 1], [], []>} : vector<2x32xf32>, vector<32x32xf32>, vector<2x32xf32> -> vector<2x32xf32>
    %c32_50 = arith.constant 32 : index
    %c0_51 = arith.constant 0 : index
    %79 = vector.load %arg8[%c32_50, %c0_51] : memref<64x32xf32, #tpu.memory_space<vmem>>, vector<32x32xf32>
    %cst_52 = arith.constant dense<0.000000e+00> : vector<2x32xf32>
    %80 = tpu.matmul %49, %79, %cst_52 {dimension_numbers = #tpu.dot_dimension_numbers<[1], [0], [0], [1], [0, 0, 1, 1], [], []>} : vector<2x32xf32>, vector<32x32xf32>, vector<2x32xf32> -> vector<2x32xf32>
    %81 = arith.addf %78, %80 : vector<2x32xf32>
    %82 = math.tanh %81 : vector<2x32xf32>
    %c0_53 = arith.constant 0 : index
    %c0_54 = arith.constant 0 : index
    %83 = vector.load %arg15[%c0_53, %c0_54] : memref<2x32xf32, #tpu.memory_space<vmem>>, vector<2x32xf32>
    tpu.vector_store %arg15[%c0_53, %c0_54], %82 {strides = array<i32>} : memref<2x32xf32, #tpu.memory_space<vmem>>, vector<2x32xf32>,
    %c0_55 = arith.constant 0 : index
    %c0_56 = arith.constant 0 : index
    %84 = vector.load %arg9[%c0_55, %c0_56] : memref<32x16xf32, #tpu.memory_space<vmem>>, vector<32x16xf32>
    %cst_57 = arith.constant dense<0.000000e+00> : vector<2x16xf32>
    %85 = tpu.matmul %82, %84, %cst_57 {dimension_numbers = #tpu.dot_dimension_numbers<[1], [0], [0], [1], [0, 0, 1, 1], [], []>} : vector<2x32xf32>, vector<32x16xf32>, vector<2x16xf32> -> vector<2x16xf32>
    %c0_58 = arith.constant 0 : index
    %c0_59 = arith.constant 0 : index
    %86 = vector.load %arg10[%c0_58, %c0_59] : memref<1x16xf32, #tpu.memory_space<vmem>>, vector<1x16xf32>
    %87 = vector.broadcast %86 : vector<1x16xf32> to vector<2x16xf32>
    %88 = arith.addf %85, %87 : vector<2x16xf32>
    %89 = arith.index_cast %7 : i32 to index
    %c0_60 = arith.constant 0 : index
    %c0_61 = arith.constant 0 : index
    %90 = vector.load %arg11[%89, %c0_60, %c0_61] : memref<4x2x16xf32, #tpu.memory_space<vmem>>, vector<1x2x16xf32>
    %91 = vector.shape_cast %90 : vector<1x2x16xf32> to vector<2x16xf32>
    %92 = vector.shape_cast %88 : vector<2x16xf32> to vector<1x2x16xf32>
    tpu.vector_store %arg11[%89, %c0_60, %c0_61], %92 {strides = array<i32>} : memref<4x2x16xf32, #tpu.memory_space<vmem>>, vector<1x2x16xf32>,
    %c1_i32_62 = arith.constant 1 : i32
    %c1_i32_63 = arith.constant 1 : i32
    %93 = arith.muli %c1_i32_62, %c1_i32_63 : i32
    %c0_i32_64 = arith.constant 0 : i32
    %94 = arith.addi %c0_i32_64, %93 : i32
    %95 = arith.index_cast %94 : i32 to index
    %c0_65 = arith.constant 0 : index
    %c0_66 = arith.constant 0 : index
    %96 = vector.load %arg0[%95, %c0_65, %c0_66] : memref<4x2x32xf32, #tpu.memory_space<vmem>>, vector<1x2x32xf32>
    %97 = vector.shape_cast %96 : vector<1x2x32xf32> to vector<2x32xf32>
    %c0_67 = arith.constant 0 : index
    %c0_68 = arith.constant 0 : index
    %98 = vector.load %arg15[%c0_67, %c0_68] : memref<2x32xf32, #tpu.memory_space<vmem>>, vector<2x32xf32>
    %c0_69 = arith.constant 0 : index
    %c0_70 = arith.constant 0 : index
    %99 = vector.load %arg13[%c0_69, %c0_70] : memref<2x32xf32, #tpu.memory_space<vmem>>, vector<2x32xf32>
    %c0_71 = arith.constant 0 : index
    %c0_72 = arith.constant 0 : index
    %100 = vector.load %arg14[%c0_71, %c0_72] : memref<2x32xf32, #tpu.memory_space<vmem>>, vector<2x32xf32>
    %c0_73 = arith.constant 0 : index
    %c0_74 = arith.constant 0 : index
    %101 = vector.load %arg4[%c0_73, %c0_74] : memref<64x128xf32, #tpu.memory_space<vmem>>, vector<32x128xf32>
    %cst_75 = arith.constant dense<0.000000e+00> : vector<2x128xf32>
    %102 = tpu.matmul %97, %101, %cst_75 {dimension_numbers = #tpu.dot_dimension_numbers<[1], [0], [0], [1], [0, 0, 1, 1], [], []>} : vector<2x32xf32>, vector<32x128xf32>, vector<2x128xf32> -> vector<2x128xf32>
    %c32_76 = arith.constant 32 : index
    %c0_77 = arith.constant 0 : index
    %103 = vector.load %arg4[%c32_76, %c0_77] : memref<64x128xf32, #tpu.memory_space<vmem>>, vector<32x128xf32>
    %cst_78 = arith.constant dense<0.000000e+00> : vector<2x128xf32>
    %104 = tpu.matmul %98, %103, %cst_78 {dimension_numbers = #tpu.dot_dimension_numbers<[1], [0], [0], [1], [0, 0, 1, 1], [], []>} : vector<2x32xf32>, vector<32x128xf32>, vector<2x128xf32> -> vector<2x128xf32>
    %105 = arith.addf %102, %104 : vector<2x128xf32>
    %c0_79 = arith.constant 0 : index
    %c0_80 = arith.constant 0 : index
    %106 = vector.load %arg5[%c0_79, %c0_80] : memref<32x128xf32, #tpu.memory_space<vmem>>, vector<32x128xf32>
    %cst_81 = arith.constant dense<0.000000e+00> : vector<2x128xf32>
    %107 = tpu.matmul %99, %106, %cst_81 {dimension_numbers = #tpu.dot_dimension_numbers<[1], [0], [0], [1], [0, 0, 1, 1], [], []>} : vector<2x32xf32>, vector<32x128xf32>, vector<2x128xf32> -> vector<2x128xf32>
    %108 = arith.addf %105, %107 : vector<2x128xf32>
    %c0_82 = arith.constant 0 : index
    %c0_83 = arith.constant 0 : index
    %109 = vector.load %arg6[%c0_82, %c0_83] : memref<1x128xf32, #tpu.memory_space<vmem>>, vector<1x128xf32>
    %110 = vector.broadcast %109 : vector<1x128xf32> to vector<2x128xf32>
    %111 = arith.addf %108, %110 : vector<2x128xf32>
    %112 = vector.extract_strided_slice %111 {offsets = [0, 0], sizes = [2, 32], strides = [1, 1]} : vector<2x128xf32> to vector<2x32xf32>
    %113 = arith.negf %112 : vector<2x32xf32>
    %114 = math.exp %113 : vector<2x32xf32>
    %cst_84 = arith.constant 1.000000e+00 : f32
    %115 = vector.broadcast %cst_84 : f32 to vector<2x32xf32>
    %116 = arith.addf %115, %114 : vector<2x32xf32>
    %117 = arith.divf %115, %116 : vector<2x32xf32>
    %118 = vector.extract_strided_slice %111 {offsets = [0, 32], sizes = [2, 32], strides = [1, 1]} : vector<2x128xf32> to vector<2x32xf32>
    %119 = arith.negf %118 : vector<2x32xf32>
    %120 = math.exp %119 : vector<2x32xf32>
    %cst_85 = arith.constant 1.000000e+00 : f32
    %121 = vector.broadcast %cst_85 : f32 to vector<2x32xf32>
    %122 = arith.addf %121, %120 : vector<2x32xf32>
    %123 = arith.divf %121, %122 : vector<2x32xf32>
    %124 = vector.extract_strided_slice %111 {offsets = [0, 64], sizes = [2, 32], strides = [1, 1]} : vector<2x128xf32> to vector<2x32xf32>
    %125 = math.tanh %124 : vector<2x32xf32>
    %126 = vector.extract_strided_slice %111 {offsets = [0, 96], sizes = [2, 32], strides = [1, 1]} : vector<2x128xf32> to vector<2x32xf32>
    %127 = arith.negf %126 : vector<2x32xf32>
    %128 = math.exp %127 : vector<2x32xf32>
    %cst_86 = arith.constant 1.000000e+00 : f32
    %129 = vector.broadcast %cst_86 : f32 to vector<2x32xf32>
    %130 = arith.addf %129, %128 : vector<2x32xf32>
    %131 = arith.divf %129, %130 : vector<2x32xf32>
    %132 = arith.mulf %123, %100 : vector<2x32xf32>
    %133 = arith.mulf %117, %125 : vector<2x32xf32>
    %134 = arith.addf %132, %133 : vector<2x32xf32>
    %135 = math.tanh %134 : vector<2x32xf32>
    %136 = arith.mulf %131, %135 : vector<2x32xf32>
    %c0_87 = arith.constant 0 : index
    %c0_88 = arith.constant 0 : index
    %137 = vector.load %arg13[%c0_87, %c0_88] : memref<2x32xf32, #tpu.memory_space<vmem>>, vector<2x32xf32>
    tpu.vector_store %arg13[%c0_87, %c0_88], %136 {strides = array<i32>} : memref<2x32xf32, #tpu.memory_space<vmem>>, vector<2x32xf32>,
    %c0_89 = arith.constant 0 : index
    %c0_90 = arith.constant 0 : index
    %138 = vector.load %arg14[%c0_89, %c0_90] : memref<2x32xf32, #tpu.memory_space<vmem>>, vector<2x32xf32>
    tpu.vector_store %arg14[%c0_89, %c0_90], %134 {strides = array<i32>} : memref<2x32xf32, #tpu.memory_space<vmem>>, vector<2x32xf32>,
    %139 = arith.index_cast %94 : i32 to index
    %c0_91 = arith.constant 0 : index
    %c0_92 = arith.constant 0 : index
    %140 = vector.load %arg12[%139, %c0_91, %c0_92] : memref<4x2x32xf32, #tpu.memory_space<vmem>>, vector<1x2x32xf32>
    %141 = vector.shape_cast %140 : vector<1x2x32xf32> to vector<2x32xf32>
    %142 = vector.shape_cast %136 : vector<2x32xf32> to vector<1x2x32xf32>
    tpu.vector_store %arg12[%139, %c0_91, %c0_92], %142 {strides = array<i32>} : memref<4x2x32xf32, #tpu.memory_space<vmem>>, vector<1x2x32xf32>,
    %c0_93 = arith.constant 0 : index
    %c0_94 = arith.constant 0 : index
    %143 = vector.load %arg7[%c0_93, %c0_94] : memref<32x32xf32, #tpu.memory_space<vmem>>, vector<32x32xf32>
    %cst_95 = arith.constant dense<0.000000e+00> : vector<2x32xf32>
    %144 = tpu.matmul %136, %143, %cst_95 {dimension_numbers = #tpu.dot_dimension_numbers<[1], [0], [0], [1], [0, 0, 1, 1], [], []>} : vector<2x32xf32>, vector<32x32xf32>, vector<2x32xf32> -> vector<2x32xf32>
    %c0_96 = arith.constant 0 : index
    %c0_97 = arith.constant 0 : index
    %c0_98 = arith.constant 0 : index
    %145 = vector.load %arg1[%c0_96, %c0_97, %c0_98] : memref<2x8x32xf32, #tpu.memory_space<vmem>>, vector<2x8x32xf32>
    %146 = vector.shape_cast %144 : vector<2x32xf32> to vector<2x1x32xf32>
    %147 = vector.broadcast %146 : vector<2x1x32xf32> to vector<2x8x32xf32>
    %148 = arith.mulf %145, %147 : vector<2x8x32xf32>
    %cst_99 = arith.constant dense<0.000000e+00> : vector<2x8xf32>
    %149 = vector.multi_reduction <add>, %148, %cst_99 [2] : vector<2x8x32xf32> to vector<2x8xf32>
    %cst_100 = arith.constant dense<0xFF800000> : vector<2xf32>
    %150 = vector.multi_reduction <maximumf>, %149, %cst_100 [1] : vector<2x8xf32> to vector<2xf32>
    %151 = vector.shape_cast %150 : vector<2xf32> to vector<2x1xf32>
    %152 = vector.broadcast %151 : vector<2x1xf32> to vector<2x8xf32>
    %153 = arith.subf %149, %152 : vector<2x8xf32>
    %154 = math.exp %153 : vector<2x8xf32>
    %cst_101 = arith.constant dense<0.000000e+00> : vector<2xf32>
    %155 = vector.multi_reduction <add>, %154, %cst_101 [1] : vector<2x8xf32> to vector<2xf32>
    %156 = vector.shape_cast %155 : vector<2xf32> to vector<2x1xf32>
    %157 = tpu.reciprocal %156 {approx = true} : vector<2x1xf32> -> vector<2x1xf32>
    %158 = vector.broadcast %157 : vector<2x1xf32> to vector<2x8xf32>
    %159 = arith.mulf %154, %158 : vector<2x8xf32>
    %160 = vector.shape_cast %159 : vector<2x8xf32> to vector<2x8x1xf32>
    %161 = vector.broadcast %160 : vector<2x8x1xf32> to vector<2x8x32xf32>
    %162 = arith.mulf %161, %145 : vector<2x8x32xf32>
    %cst_102 = arith.constant dense<0.000000e+00> : vector<2x32xf32>
    %163 = vector.multi_reduction <add>, %162, %cst_102 [1] : vector<2x8x32xf32> to vector<2x32xf32>
    %c0_103 = arith.constant 0 : index
    %c0_104 = arith.constant 0 : index
    %164 = vector.load %arg8[%c0_103, %c0_104] : memref<64x32xf32, #tpu.memory_space<vmem>>, vector<32x32xf32>
    %cst_105 = arith.constant dense<0.000000e+00> : vector<2x32xf32>
    %165 = tpu.matmul %163, %164, %cst_105 {dimension_numbers = #tpu.dot_dimension_numbers<[1], [0], [0], [1], [0, 0, 1, 1], [], []>} : vector<2x32xf32>, vector<32x32xf32>, vector<2x32xf32> -> vector<2x32xf32>
    %c32_106 = arith.constant 32 : index
    %c0_107 = arith.constant 0 : index
    %166 = vector.load %arg8[%c32_106, %c0_107] : memref<64x32xf32, #tpu.memory_space<vmem>>, vector<32x32xf32>
    %cst_108 = arith.constant dense<0.000000e+00> : vector<2x32xf32>
    %167 = tpu.matmul %136, %166, %cst_108 {dimension_numbers = #tpu.dot_dimension_numbers<[1], [0], [0], [1], [0, 0, 1, 1], [], []>} : vector<2x32xf32>, vector<32x32xf32>, vector<2x32xf32> -> vector<2x32xf32>
    %168 = arith.addf %165, %167 : vector<2x32xf32>
    %169 = math.tanh %168 : vector<2x32xf32>
    %c0_109 = arith.constant 0 : index
    %c0_110 = arith.constant 0 : index
    %170 = vector.load %arg15[%c0_109, %c0_110] : memref<2x32xf32, #tpu.memory_space<vmem>>, vector<2x32xf32>
    tpu.vector_store %arg15[%c0_109, %c0_110], %169 {strides = array<i32>} : memref<2x32xf32, #tpu.memory_space<vmem>>, vector<2x32xf32>,
    %c0_111 = arith.constant 0 : index
    %c0_112 = arith.constant 0 : index
    %171 = vector.load %arg9[%c0_111, %c0_112] : memref<32x16xf32, #tpu.memory_space<vmem>>, vector<32x16xf32>
    %cst_113 = arith.constant dense<0.000000e+00> : vector<2x16xf32>
    %172 = tpu.matmul %169, %171, %cst_113 {dimension_numbers = #tpu.dot_dimension_numbers<[1], [0], [0], [1], [0, 0, 1, 1], [], []>} : vector<2x32xf32>, vector<32x16xf32>, vector<2x16xf32> -> vector<2x16xf32>
    %c0_114 = arith.constant 0 : index
    %c0_115 = arith.constant 0 : index
    %173 = vector.load %arg10[%c0_114, %c0_115] : memref<1x16xf32, #tpu.memory_space<vmem>>, vector<1x16xf32>
    %174 = vector.broadcast %173 : vector<1x16xf32> to vector<2x16xf32>
    %175 = arith.addf %172, %174 : vector<2x16xf32>
    %176 = arith.index_cast %94 : i32 to index
    %c0_116 = arith.constant 0 : index
    %c0_117 = arith.constant 0 : index
    %177 = vector.load %arg11[%176, %c0_116, %c0_117] : memref<4x2x16xf32, #tpu.memory_space<vmem>>, vector<1x2x16xf32>
    %178 = vector.shape_cast %177 : vector<1x2x16xf32> to vector<2x16xf32>
    %179 = vector.shape_cast %175 : vector<2x16xf32> to vector<1x2x16xf32>
    tpu.vector_store %arg11[%176, %c0_116, %c0_117], %179 {strides = array<i32>} : memref<4x2x16xf32, #tpu.memory_space<vmem>>, vector<1x2x16xf32>,
    %c2_i32 = arith.constant 2 : i32
    %c1_i32_118 = arith.constant 1 : i32
    %180 = arith.muli %c2_i32, %c1_i32_118 : i32
    %c0_i32_119 = arith.constant 0 : i32
    %181 = arith.addi %c0_i32_119, %180 : i32
    %182 = arith.index_cast %181 : i32 to index
    %c0_120 = arith.constant 0 : index
    %c0_121 = arith.constant 0 : index
    %183 = vector.load %arg0[%182, %c0_120, %c0_121] : memref<4x2x32xf32, #tpu.memory_space<vmem>>, vector<1x2x32xf32>
    %184 = vector.shape_cast %183 : vector<1x2x32xf32> to vector<2x32xf32>
    %c0_122 = arith.constant 0 : index
    %c0_123 = arith.constant 0 : index
    %185 = vector.load %arg15[%c0_122, %c0_123] : memref<2x32xf32, #tpu.memory_space<vmem>>, vector<2x32xf32>
    %c0_124 = arith.constant 0 : index
    %c0_125 = arith.constant 0 : index
    %186 = vector.load %arg13[%c0_124, %c0_125] : memref<2x32xf32, #tpu.memory_space<vmem>>, vector<2x32xf32>
    %c0_126 = arith.constant 0 : index
    %c0_127 = arith.constant 0 : index
    %187 = vector.load %arg14[%c0_126, %c0_127] : memref<2x32xf32, #tpu.memory_space<vmem>>, vector<2x32xf32>
    %c0_128 = arith.constant 0 : index
    %c0_129 = arith.constant 0 : index
    %188 = vector.load %arg4[%c0_128, %c0_129] : memref<64x128xf32, #tpu.memory_space<vmem>>, vector<32x128xf32>
    %cst_130 = arith.constant dense<0.000000e+00> : vector<2x128xf32>
    %189 = tpu.matmul %184, %188, %cst_130 {dimension_numbers = #tpu.dot_dimension_numbers<[1], [0], [0], [1], [0, 0, 1, 1], [], []>} : vector<2x32xf32>, vector<32x128xf32>, vector<2x128xf32> -> vector<2x128xf32>
    %c32_131 = arith.constant 32 : index
    %c0_132 = arith.constant 0 : index
    %190 = vector.load %arg4[%c32_131, %c0_132] : memref<64x128xf32, #tpu.memory_space<vmem>>, vector<32x128xf32>
    %cst_133 = arith.constant dense<0.000000e+00> : vector<2x128xf32>
    %191 = tpu.matmul %185, %190, %cst_133 {dimension_numbers = #tpu.dot_dimension_numbers<[1], [0], [0], [1], [0, 0, 1, 1], [], []>} : vector<2x32xf32>, vector<32x128xf32>, vector<2x128xf32> -> vector<2x128xf32>
    %192 = arith.addf %189, %191 : vector<2x128xf32>
    %c0_134 = arith.constant 0 : index
    %c0_135 = arith.constant 0 : index
    %193 = vector.load %arg5[%c0_134, %c0_135] : memref<32x128xf32, #tpu.memory_space<vmem>>, vector<32x128xf32>
    %cst_136 = arith.constant dense<0.000000e+00> : vector<2x128xf32>
    %194 = tpu.matmul %186, %193, %cst_136 {dimension_numbers = #tpu.dot_dimension_numbers<[1], [0], [0], [1], [0, 0, 1, 1], [], []>} : vector<2x32xf32>, vector<32x128xf32>, vector<2x128xf32> -> vector<2x128xf32>
    %195 = arith.addf %192, %194 : vector<2x128xf32>
    %c0_137 = arith.constant 0 : index
    %c0_138 = arith.constant 0 : index
    %196 = vector.load %arg6[%c0_137, %c0_138] : memref<1x128xf32, #tpu.memory_space<vmem>>, vector<1x128xf32>
    %197 = vector.broadcast %196 : vector<1x128xf32> to vector<2x128xf32>
    %198 = arith.addf %195, %197 : vector<2x128xf32>
    %199 = vector.extract_strided_slice %198 {offsets = [0, 0], sizes = [2, 32], strides = [1, 1]} : vector<2x128xf32> to vector<2x32xf32>
    %200 = arith.negf %199 : vector<2x32xf32>
    %201 = math.exp %200 : vector<2x32xf32>
    %cst_139 = arith.constant 1.000000e+00 : f32
    %202 = vector.broadcast %cst_139 : f32 to vector<2x32xf32>
    %203 = arith.addf %202, %201 : vector<2x32xf32>
    %204 = arith.divf %202, %203 : vector<2x32xf32>
    %205 = vector.extract_strided_slice %198 {offsets = [0, 32], sizes = [2, 32], strides = [1, 1]} : vector<2x128xf32> to vector<2x32xf32>
    %206 = arith.negf %205 : vector<2x32xf32>
    %207 = math.exp %206 : vector<2x32xf32>
    %cst_140 = arith.constant 1.000000e+00 : f32
    %208 = vector.broadcast %cst_140 : f32 to vector<2x32xf32>
    %209 = arith.addf %208, %207 : vector<2x32xf32>
    %210 = arith.divf %208, %209 : vector<2x32xf32>
    %211 = vector.extract_strided_slice %198 {offsets = [0, 64], sizes = [2, 32], strides = [1, 1]} : vector<2x128xf32> to vector<2x32xf32>
    %212 = math.tanh %211 : vector<2x32xf32>
    %213 = vector.extract_strided_slice %198 {offsets = [0, 96], sizes = [2, 32], strides = [1, 1]} : vector<2x128xf32> to vector<2x32xf32>
    %214 = arith.negf %213 : vector<2x32xf32>
    %215 = math.exp %214 : vector<2x32xf32>
    %cst_141 = arith.constant 1.000000e+00 : f32
    %216 = vector.broadcast %cst_141 : f32 to vector<2x32xf32>
    %217 = arith.addf %216, %215 : vector<2x32xf32>
    %218 = arith.divf %216, %217 : vector<2x32xf32>
    %219 = arith.mulf %210, %187 : vector<2x32xf32>
    %220 = arith.mulf %204, %212 : vector<2x32xf32>
    %221 = arith.addf %219, %220 : vector<2x32xf32>
    %222 = math.tanh %221 : vector<2x32xf32>
    %223 = arith.mulf %218, %222 : vector<2x32xf32>
    %c0_142 = arith.constant 0 : index
    %c0_143 = arith.constant 0 : index
    %224 = vector.load %arg13[%c0_142, %c0_143] : memref<2x32xf32, #tpu.memory_space<vmem>>, vector<2x32xf32>
    tpu.vector_store %arg13[%c0_142, %c0_143], %223 {strides = array<i32>} : memref<2x32xf32, #tpu.memory_space<vmem>>, vector<2x32xf32>,
    %c0_144 = arith.constant 0 : index
    %c0_145 = arith.constant 0 : index
    %225 = vector.load %arg14[%c0_144, %c0_145] : memref<2x32xf32, #tpu.memory_space<vmem>>, vector<2x32xf32>
    tpu.vector_store %arg14[%c0_144, %c0_145], %221 {strides = array<i32>} : memref<2x32xf32, #tpu.memory_space<vmem>>, vector<2x32xf32>,
    %226 = arith.index_cast %181 : i32 to index
    %c0_146 = arith.constant 0 : index
    %c0_147 = arith.constant 0 : index
    %227 = vector.load %arg12[%226, %c0_146, %c0_147] : memref<4x2x32xf32, #tpu.memory_space<vmem>>, vector<1x2x32xf32>
    %228 = vector.shape_cast %227 : vector<1x2x32xf32> to vector<2x32xf32>
    %229 = vector.shape_cast %223 : vector<2x32xf32> to vector<1x2x32xf32>
    tpu.vector_store %arg12[%226, %c0_146, %c0_147], %229 {strides = array<i32>} : memref<4x2x32xf32, #tpu.memory_space<vmem>>, vector<1x2x32xf32>,
    %c0_148 = arith.constant 0 : index
    %c0_149 = arith.constant 0 : index
    %230 = vector.load %arg7[%c0_148, %c0_149] : memref<32x32xf32, #tpu.memory_space<vmem>>, vector<32x32xf32>
    %cst_150 = arith.constant dense<0.000000e+00> : vector<2x32xf32>
    %231 = tpu.matmul %223, %230, %cst_150 {dimension_numbers = #tpu.dot_dimension_numbers<[1], [0], [0], [1], [0, 0, 1, 1], [], []>} : vector<2x32xf32>, vector<32x32xf32>, vector<2x32xf32> -> vector<2x32xf32>
    %c0_151 = arith.constant 0 : index
    %c0_152 = arith.constant 0 : index
    %c0_153 = arith.constant 0 : index
    %232 = vector.load %arg1[%c0_151, %c0_152, %c0_153] : memref<2x8x32xf32, #tpu.memory_space<vmem>>, vector<2x8x32xf32>
    %233 = vector.shape_cast %231 : vector<2x32xf32> to vector<2x1x32xf32>
    %234 = vector.broadcast %233 : vector<2x1x32xf32> to vector<2x8x32xf32>
    %235 = arith.mulf %232, %234 : vector<2x8x32xf32>
    %cst_154 = arith.constant dense<0.000000e+00> : vector<2x8xf32>
    %236 = vector.multi_reduction <add>, %235, %cst_154 [2] : vector<2x8x32xf32> to vector<2x8xf32>
    %cst_155 = arith.constant dense<0xFF800000> : vector<2xf32>
    %237 = vector.multi_reduction <maximumf>, %236, %cst_155 [1] : vector<2x8xf32> to vector<2xf32>
    %238 = vector.shape_cast %237 : vector<2xf32> to vector<2x1xf32>
    %239 = vector.broadcast %238 : vector<2x1xf32> to vector<2x8xf32>
    %240 = arith.subf %236, %239 : vector<2x8xf32>
    %241 = math.exp %240 : vector<2x8xf32>
    %cst_156 = arith.constant dense<0.000000e+00> : vector<2xf32>
    %242 = vector.multi_reduction <add>, %241, %cst_156 [1] : vector<2x8xf32> to vector<2xf32>
    %243 = vector.shape_cast %242 : vector<2xf32> to vector<2x1xf32>
    %244 = tpu.reciprocal %243 {approx = true} : vector<2x1xf32> -> vector<2x1xf32>
    %245 = vector.broadcast %244 : vector<2x1xf32> to vector<2x8xf32>
    %246 = arith.mulf %241, %245 : vector<2x8xf32>
    %247 = vector.shape_cast %246 : vector<2x8xf32> to vector<2x8x1xf32>
    %248 = vector.broadcast %247 : vector<2x8x1xf32> to vector<2x8x32xf32>
    %249 = arith.mulf %248, %232 : vector<2x8x32xf32>
    %cst_157 = arith.constant dense<0.000000e+00> : vector<2x32xf32>
    %250 = vector.multi_reduction <add>, %249, %cst_157 [1] : vector<2x8x32xf32> to vector<2x32xf32>
    %c0_158 = arith.constant 0 : index
    %c0_159 = arith.constant 0 : index
    %251 = vector.load %arg8[%c0_158, %c0_159] : memref<64x32xf32, #tpu.memory_space<vmem>>, vector<32x32xf32>
    %cst_160 = arith.constant dense<0.000000e+00> : vector<2x32xf32>
    %252 = tpu.matmul %250, %251, %cst_160 {dimension_numbers = #tpu.dot_dimension_numbers<[1], [0], [0], [1], [0, 0, 1, 1], [], []>} : vector<2x32xf32>, vector<32x32xf32>, vector<2x32xf32> -> vector<2x32xf32>
    %c32_161 = arith.constant 32 : index
    %c0_162 = arith.constant 0 : index
    %253 = vector.load %arg8[%c32_161, %c0_162] : memref<64x32xf32, #tpu.memory_space<vmem>>, vector<32x32xf32>
    %cst_163 = arith.constant dense<0.000000e+00> : vector<2x32xf32>
    %254 = tpu.matmul %223, %253, %cst_163 {dimension_numbers = #tpu.dot_dimension_numbers<[1], [0], [0], [1], [0, 0, 1, 1], [], []>} : vector<2x32xf32>, vector<32x32xf32>, vector<2x32xf32> -> vector<2x32xf32>
    %255 = arith.addf %252, %254 : vector<2x32xf32>
    %256 = math.tanh %255 : vector<2x32xf32>
    %c0_164 = arith.constant 0 : index
    %c0_165 = arith.constant 0 : index
    %257 = vector.load %arg15[%c0_164, %c0_165] : memref<2x32xf32, #tpu.memory_space<vmem>>, vector<2x32xf32>
    tpu.vector_store %arg15[%c0_164, %c0_165], %256 {strides = array<i32>} : memref<2x32xf32, #tpu.memory_space<vmem>>, vector<2x32xf32>,
    %c0_166 = arith.constant 0 : index
    %c0_167 = arith.constant 0 : index
    %258 = vector.load %arg9[%c0_166, %c0_167] : memref<32x16xf32, #tpu.memory_space<vmem>>, vector<32x16xf32>
    %cst_168 = arith.constant dense<0.000000e+00> : vector<2x16xf32>
    %259 = tpu.matmul %256, %258, %cst_168 {dimension_numbers = #tpu.dot_dimension_numbers<[1], [0], [0], [1], [0, 0, 1, 1], [], []>} : vector<2x32xf32>, vector<32x16xf32>, vector<2x16xf32> -> vector<2x16xf32>
    %c0_169 = arith.constant 0 : index
    %c0_170 = arith.constant 0 : index
    %260 = vector.load %arg10[%c0_169, %c0_170] : memref<1x16xf32, #tpu.memory_space<vmem>>, vector<1x16xf32>
    %261 = vector.broadcast %260 : vector<1x16xf32> to vector<2x16xf32>
    %262 = arith.addf %259, %261 : vector<2x16xf32>
    %263 = arith.index_cast %181 : i32 to index
    %c0_171 = arith.constant 0 : index
    %c0_172 = arith.constant 0 : index
    %264 = vector.load %arg11[%263, %c0_171, %c0_172] : memref<4x2x16xf32, #tpu.memory_space<vmem>>, vector<1x2x16xf32>
    %265 = vector.shape_cast %264 : vector<1x2x16xf32> to vector<2x16xf32>
    %266 = vector.shape_cast %262 : vector<2x16xf32> to vector<1x2x16xf32>
    tpu.vector_store %arg11[%263, %c0_171, %c0_172], %266 {strides = array<i32>} : memref<4x2x16xf32, #tpu.memory_space<vmem>>, vector<1x2x16xf32>,
    %c3_i32 = arith.constant 3 : i32
    %c1_i32_173 = arith.constant 1 : i32
    %267 = arith.muli %c3_i32, %c1_i32_173 : i32
    %c0_i32_174 = arith.constant 0 : i32
    %268 = arith.addi %c0_i32_174, %267 : i32
    %269 = arith.index_cast %268 : i32 to index
    %c0_175 = arith.constant 0 : index
    %c0_176 = arith.constant 0 : index
    %270 = vector.load %arg0[%269, %c0_175, %c0_176] : memref<4x2x32xf32, #tpu.memory_space<vmem>>, vector<1x2x32xf32>
    %271 = vector.shape_cast %270 : vector<1x2x32xf32> to vector<2x32xf32>
    %c0_177 = arith.constant 0 : index
    %c0_178 = arith.constant 0 : index
    %272 = vector.load %arg15[%c0_177, %c0_178] : memref<2x32xf32, #tpu.memory_space<vmem>>, vector<2x32xf32>
    %c0_179 = arith.constant 0 : index
    %c0_180 = arith.constant 0 : index
    %273 = vector.load %arg13[%c0_179, %c0_180] : memref<2x32xf32, #tpu.memory_space<vmem>>, vector<2x32xf32>
    %c0_181 = arith.constant 0 : index
    %c0_182 = arith.constant 0 : index
    %274 = vector.load %arg14[%c0_181, %c0_182] : memref<2x32xf32, #tpu.memory_space<vmem>>, vector<2x32xf32>
    %c0_183 = arith.constant 0 : index
    %c0_184 = arith.constant 0 : index
    %275 = vector.load %arg4[%c0_183, %c0_184] : memref<64x128xf32, #tpu.memory_space<vmem>>, vector<32x128xf32>
    %cst_185 = arith.constant dense<0.000000e+00> : vector<2x128xf32>
    %276 = tpu.matmul %271, %275, %cst_185 {dimension_numbers = #tpu.dot_dimension_numbers<[1], [0], [0], [1], [0, 0, 1, 1], [], []>} : vector<2x32xf32>, vector<32x128xf32>, vector<2x128xf32> -> vector<2x128xf32>
    %c32_186 = arith.constant 32 : index
    %c0_187 = arith.constant 0 : index
    %277 = vector.load %arg4[%c32_186, %c0_187] : memref<64x128xf32, #tpu.memory_space<vmem>>, vector<32x128xf32>
    %cst_188 = arith.constant dense<0.000000e+00> : vector<2x128xf32>
    %278 = tpu.matmul %272, %277, %cst_188 {dimension_numbers = #tpu.dot_dimension_numbers<[1], [0], [0], [1], [0, 0, 1, 1], [], []>} : vector<2x32xf32>, vector<32x128xf32>, vector<2x128xf32> -> vector<2x128xf32>
    %279 = arith.addf %276, %278 : vector<2x128xf32>
    %c0_189 = arith.constant 0 : index
    %c0_190 = arith.constant 0 : index
    %280 = vector.load %arg5[%c0_189, %c0_190] : memref<32x128xf32, #tpu.memory_space<vmem>>, vector<32x128xf32>
    %cst_191 = arith.constant dense<0.000000e+00> : vector<2x128xf32>
    %281 = tpu.matmul %273, %280, %cst_191 {dimension_numbers = #tpu.dot_dimension_numbers<[1], [0], [0], [1], [0, 0, 1, 1], [], []>} : vector<2x32xf32>, vector<32x128xf32>, vector<2x128xf32> -> vector<2x128xf32>
    %282 = arith.addf %279, %281 : vector<2x128xf32>
    %c0_192 = arith.constant 0 : index
    %c0_193 = arith.constant 0 : index
    %283 = vector.load %arg6[%c0_192, %c0_193] : memref<1x128xf32, #tpu.memory_space<vmem>>, vector<1x128xf32>
    %284 = vector.broadcast %283 : vector<1x128xf32> to vector<2x128xf32>
    %285 = arith.addf %282, %284 : vector<2x128xf32>
    %286 = vector.extract_strided_slice %285 {offsets = [0, 0], sizes = [2, 32], strides = [1, 1]} : vector<2x128xf32> to vector<2x32xf32>
    %287 = arith.negf %286 : vector<2x32xf32>
    %288 = math.exp %287 : vector<2x32xf32>
    %cst_194 = arith.constant 1.000000e+00 : f32
    %289 = vector.broadcast %cst_194 : f32 to vector<2x32xf32>
    %290 = arith.addf %289, %288 : vector<2x32xf32>
    %291 = arith.divf %289, %290 : vector<2x32xf32>
    %292 = vector.extract_strided_slice %285 {offsets = [0, 32], sizes = [2, 32], strides = [1, 1]} : vector<2x128xf32> to vector<2x32xf32>
    %293 = arith.negf %292 : vector<2x32xf32>
    %294 = math.exp %293 : vector<2x32xf32>
    %cst_195 = arith.constant 1.000000e+00 : f32
    %295 = vector.broadcast %cst_195 : f32 to vector<2x32xf32>
    %296 = arith.addf %295, %294 : vector<2x32xf32>
    %297 = arith.divf %295, %296 : vector<2x32xf32>
    %298 = vector.extract_strided_slice %285 {offsets = [0, 64], sizes = [2, 32], strides = [1, 1]} : vector<2x128xf32> to vector<2x32xf32>
    %299 = math.tanh %298 : vector<2x32xf32>
    %300 = vector.extract_strided_slice %285 {offsets = [0, 96], sizes = [2, 32], strides = [1, 1]} : vector<2x128xf32> to vector<2x32xf32>
    %301 = arith.negf %300 : vector<2x32xf32>
    %302 = math.exp %301 : vector<2x32xf32>
    %cst_196 = arith.constant 1.000000e+00 : f32
    %303 = vector.broadcast %cst_196 : f32 to vector<2x32xf32>
    %304 = arith.addf %303, %302 : vector<2x32xf32>
    %305 = arith.divf %303, %304 : vector<2x32xf32>
    %306 = arith.mulf %297, %274 : vector<2x32xf32>
    %307 = arith.mulf %291, %299 : vector<2x32xf32>
    %308 = arith.addf %306, %307 : vector<2x32xf32>
    %309 = math.tanh %308 : vector<2x32xf32>
    %310 = arith.mulf %305, %309 : vector<2x32xf32>
    %c0_197 = arith.constant 0 : index
    %c0_198 = arith.constant 0 : index
    %311 = vector.load %arg13[%c0_197, %c0_198] : memref<2x32xf32, #tpu.memory_space<vmem>>, vector<2x32xf32>
    tpu.vector_store %arg13[%c0_197, %c0_198], %310 {strides = array<i32>} : memref<2x32xf32, #tpu.memory_space<vmem>>, vector<2x32xf32>,
    %c0_199 = arith.constant 0 : index
    %c0_200 = arith.constant 0 : index
    %312 = vector.load %arg14[%c0_199, %c0_200] : memref<2x32xf32, #tpu.memory_space<vmem>>, vector<2x32xf32>
    tpu.vector_store %arg14[%c0_199, %c0_200], %308 {strides = array<i32>} : memref<2x32xf32, #tpu.memory_space<vmem>>, vector<2x32xf32>,
    %313 = arith.index_cast %268 : i32 to index
    %c0_201 = arith.constant 0 : index
    %c0_202 = arith.constant 0 : index
    %314 = vector.load %arg12[%313, %c0_201, %c0_202] : memref<4x2x32xf32, #tpu.memory_space<vmem>>, vector<1x2x32xf32>
    %315 = vector.shape_cast %314 : vector<1x2x32xf32> to vector<2x32xf32>
    %316 = vector.shape_cast %310 : vector<2x32xf32> to vector<1x2x32xf32>
    tpu.vector_store %arg12[%313, %c0_201, %c0_202], %316 {strides = array<i32>} : memref<4x2x32xf32, #tpu.memory_space<vmem>>, vector<1x2x32xf32>,
    %c0_203 = arith.constant 0 : index
    %c0_204 = arith.constant 0 : index
    %317 = vector.load %arg7[%c0_203, %c0_204] : memref<32x32xf32, #tpu.memory_space<vmem>>, vector<32x32xf32>
    %cst_205 = arith.constant dense<0.000000e+00> : vector<2x32xf32>
    %318 = tpu.matmul %310, %317, %cst_205 {dimension_numbers = #tpu.dot_dimension_numbers<[1], [0], [0], [1], [0, 0, 1, 1], [], []>} : vector<2x32xf32>, vector<32x32xf32>, vector<2x32xf32> -> vector<2x32xf32>
    %c0_206 = arith.constant 0 : index
    %c0_207 = arith.constant 0 : index
    %c0_208 = arith.constant 0 : index
    %319 = vector.load %arg1[%c0_206, %c0_207, %c0_208] : memref<2x8x32xf32, #tpu.memory_space<vmem>>, vector<2x8x32xf32>
    %320 = vector.shape_cast %318 : vector<2x32xf32> to vector<2x1x32xf32>
    %321 = vector.broadcast %320 : vector<2x1x32xf32> to vector<2x8x32xf32>
    %322 = arith.mulf %319, %321 : vector<2x8x32xf32>
    %cst_209 = arith.constant dense<0.000000e+00> : vector<2x8xf32>
    %323 = vector.multi_reduction <add>, %322, %cst_209 [2] : vector<2x8x32xf32> to vector<2x8xf32>
    %cst_210 = arith.constant dense<0xFF800000> : vector<2xf32>
    %324 = vector.multi_reduction <maximumf>, %323, %cst_210 [1] : vector<2x8xf32> to vector<2xf32>
    %325 = vector.shape_cast %324 : vector<2xf32> to vector<2x1xf32>
    %326 = vector.broadcast %325 : vector<2x1xf32> to vector<2x8xf32>
    %327 = arith.subf %323, %326 : vector<2x8xf32>
    %328 = math.exp %327 : vector<2x8xf32>
    %cst_211 = arith.constant dense<0.000000e+00> : vector<2xf32>
    %329 = vector.multi_reduction <add>, %328, %cst_211 [1] : vector<2x8xf32> to vector<2xf32>
    %330 = vector.shape_cast %329 : vector<2xf32> to vector<2x1xf32>
    %331 = tpu.reciprocal %330 {approx = true} : vector<2x1xf32> -> vector<2x1xf32>
    %332 = vector.broadcast %331 : vector<2x1xf32> to vector<2x8xf32>
    %333 = arith.mulf %328, %332 : vector<2x8xf32>
    %334 = vector.shape_cast %333 : vector<2x8xf32> to vector<2x8x1xf32>
    %335 = vector.broadcast %334 : vector<2x8x1xf32> to vector<2x8x32xf32>
    %336 = arith.mulf %335, %319 : vector<2x8x32xf32>
    %cst_212 = arith.constant dense<0.000000e+00> : vector<2x32xf32>
    %337 = vector.multi_reduction <add>, %336, %cst_212 [1] : vector<2x8x32xf32> to vector<2x32xf32>
    %c0_213 = arith.constant 0 : index
    %c0_214 = arith.constant 0 : index
    %338 = vector.load %arg8[%c0_213, %c0_214] : memref<64x32xf32, #tpu.memory_space<vmem>>, vector<32x32xf32>
    %cst_215 = arith.constant dense<0.000000e+00> : vector<2x32xf32>
    %339 = tpu.matmul %337, %338, %cst_215 {dimension_numbers = #tpu.dot_dimension_numbers<[1], [0], [0], [1], [0, 0, 1, 1], [], []>} : vector<2x32xf32>, vector<32x32xf32>, vector<2x32xf32> -> vector<2x32xf32>
    %c32_216 = arith.constant 32 : index
    %c0_217 = arith.constant 0 : index
    %340 = vector.load %arg8[%c32_216, %c0_217] : memref<64x32xf32, #tpu.memory_space<vmem>>, vector<32x32xf32>
    %cst_218 = arith.constant dense<0.000000e+00> : vector<2x32xf32>
    %341 = tpu.matmul %310, %340, %cst_218 {dimension_numbers = #tpu.dot_dimension_numbers<[1], [0], [0], [1], [0, 0, 1, 1], [], []>} : vector<2x32xf32>, vector<32x32xf32>, vector<2x32xf32> -> vector<2x32xf32>
    %342 = arith.addf %339, %341 : vector<2x32xf32>
    %343 = math.tanh %342 : vector<2x32xf32>
    %c0_219 = arith.constant 0 : index
    %c0_220 = arith.constant 0 : index
    %344 = vector.load %arg15[%c0_219, %c0_220] : memref<2x32xf32, #tpu.memory_space<vmem>>, vector<2x32xf32>
    tpu.vector_store %arg15[%c0_219, %c0_220], %343 {strides = array<i32>} : memref<2x32xf32, #tpu.memory_space<vmem>>, vector<2x32xf32>,
    %c0_221 = arith.constant 0 : index
    %c0_222 = arith.constant 0 : index
    %345 = vector.load %arg9[%c0_221, %c0_222] : memref<32x16xf32, #tpu.memory_space<vmem>>, vector<32x16xf32>
    %cst_223 = arith.constant dense<0.000000e+00> : vector<2x16xf32>
    %346 = tpu.matmul %343, %345, %cst_223 {dimension_numbers = #tpu.dot_dimension_numbers<[1], [0], [0], [1], [0, 0, 1, 1], [], []>} : vector<2x32xf32>, vector<32x16xf32>, vector<2x16xf32> -> vector<2x16xf32>
    %c0_224 = arith.constant 0 : index
    %c0_225 = arith.constant 0 : index
    %347 = vector.load %arg10[%c0_224, %c0_225] : memref<1x16xf32, #tpu.memory_space<vmem>>, vector<1x16xf32>
    %348 = vector.broadcast %347 : vector<1x16xf32> to vector<2x16xf32>
    %349 = arith.addf %346, %348 : vector<2x16xf32>
    %350 = arith.index_cast %268 : i32 to index
    %c0_226 = arith.constant 0 : index
    %c0_227 = arith.constant 0 : index
    %351 = vector.load %arg11[%350, %c0_226, %c0_227] : memref<4x2x16xf32, #tpu.memory_space<vmem>>, vector<1x2x16xf32>
    %352 = vector.shape_cast %351 : vector<1x2x16xf32> to vector<2x16xf32>
    %353 = vector.shape_cast %349 : vector<2x16xf32> to vector<1x2x16xf32>
    tpu.vector_store %arg11[%350, %c0_226, %c0_227], %353 {strides = array<i32>} : memref<4x2x16xf32, #tpu.memory_space<vmem>>, vector<1x2x16xf32>,
    %c4_i32 = arith.constant 4 : i32
    return
  }
}

module attributes {stable_mosaic.version = 11 : i64} {
  func.func @_main_decoder_kernel(%arg0: memref<5x2x32xf32, #tpu.memory_space<vmem>>, %arg1: memref<2x8x32xf32, #tpu.memory_space<vmem>>, %arg2: memref<2x4x32xf32, #tpu.memory_space<vmem>>, %arg3: memref<2x32xf32, #tpu.memory_space<vmem>>, %arg4: memref<2x32xf32, #tpu.memory_space<vmem>>, %arg5: memref<64x128xf32, #tpu.memory_space<vmem>>, %arg6: memref<32x128xf32, #tpu.memory_space<vmem>>, %arg7: memref<1x128xf32, #tpu.memory_space<vmem>>, %arg8: memref<32x32xf32, #tpu.memory_space<vmem>>, %arg9: memref<32x32xf32, #tpu.memory_space<vmem>>, %arg10: memref<96x32xf32, #tpu.memory_space<vmem>>, %arg11: memref<32x16xf32, #tpu.memory_space<vmem>>, %arg12: memref<1x16xf32, #tpu.memory_space<vmem>>, %arg13: memref<5x2x16xf32, #tpu.memory_space<vmem>>, %arg14: memref<2x32xf32, #tpu.memory_space<vmem>>, %arg15: memref<2x32xf32, #tpu.memory_space<vmem>>, %arg16: memref<2x32xf32, #tpu.memory_space<vmem>>) attributes {dimension_semantics = [], scalar_prefetch = 0 : i64, scratch_operands = 3 : i64, tpu.core_type = #tpu.core_type<tc>} {
    %c0 = arith.constant 0 : index
    %c0_0 = arith.constant 0 : index
    %0 = vector.load %arg3[%c0, %c0_0] : memref<2x32xf32, #tpu.memory_space<vmem>>, vector<2x32xf32>
    %c0_1 = arith.constant 0 : index
    %c0_2 = arith.constant 0 : index
    %1 = vector.load %arg14[%c0_1, %c0_2] : memref<2x32xf32, #tpu.memory_space<vmem>>, vector<2x32xf32>
    tpu.vector_store %arg14[%c0_1, %c0_2], %0 {strides = array<i32>} : memref<2x32xf32, #tpu.memory_space<vmem>>, vector<2x32xf32>,
    %c0_3 = arith.constant 0 : index
    %c0_4 = arith.constant 0 : index
    %2 = vector.load %arg4[%c0_3, %c0_4] : memref<2x32xf32, #tpu.memory_space<vmem>>, vector<2x32xf32>
    %c0_5 = arith.constant 0 : index
    %c0_6 = arith.constant 0 : index
    %3 = vector.load %arg15[%c0_5, %c0_6] : memref<2x32xf32, #tpu.memory_space<vmem>>, vector<2x32xf32>
    tpu.vector_store %arg15[%c0_5, %c0_6], %2 {strides = array<i32>} : memref<2x32xf32, #tpu.memory_space<vmem>>, vector<2x32xf32>,
    %cst = arith.constant 0.000000e+00 : f32
    %4 = vector.broadcast %cst : f32 to vector<2x32xf32>
    %c0_7 = arith.constant 0 : index
    %c0_8 = arith.constant 0 : index
    %5 = vector.load %arg16[%c0_7, %c0_8] : memref<2x32xf32, #tpu.memory_space<vmem>>, vector<2x32xf32>
    tpu.vector_store %arg16[%c0_7, %c0_8], %4 {strides = array<i32>} : memref<2x32xf32, #tpu.memory_space<vmem>>, vector<2x32xf32>,
    %c0_i32 = arith.constant 0 : i32
    %c1_i32 = arith.constant 1 : i32
    %6 = arith.muli %c0_i32, %c1_i32 : i32
    %c0_i32_9 = arith.constant 0 : i32
    %7 = arith.addi %c0_i32_9, %6 : i32
    %8 = arith.index_cast %7 : i32 to index
    %c0_10 = arith.constant 0 : index
    %c0_11 = arith.constant 0 : index
    %9 = vector.load %arg0[%8, %c0_10, %c0_11] : memref<5x2x32xf32, #tpu.memory_space<vmem>>, vector<1x2x32xf32>
    %10 = vector.shape_cast %9 : vector<1x2x32xf32> to vector<2x32xf32>
    %c0_12 = arith.constant 0 : index
    %c0_13 = arith.constant 0 : index
    %11 = vector.load %arg16[%c0_12, %c0_13] : memref<2x32xf32, #tpu.memory_space<vmem>>, vector<2x32xf32>
    %c0_14 = arith.constant 0 : index
    %c0_15 = arith.constant 0 : index
    %12 = vector.load %arg14[%c0_14, %c0_15] : memref<2x32xf32, #tpu.memory_space<vmem>>, vector<2x32xf32>
    %c0_16 = arith.constant 0 : index
    %c0_17 = arith.constant 0 : index
    %13 = vector.load %arg15[%c0_16, %c0_17] : memref<2x32xf32, #tpu.memory_space<vmem>>, vector<2x32xf32>
    %c0_18 = arith.constant 0 : index
    %c0_19 = arith.constant 0 : index
    %14 = vector.load %arg5[%c0_18, %c0_19] : memref<64x128xf32, #tpu.memory_space<vmem>>, vector<32x128xf32>
    %cst_20 = arith.constant dense<0.000000e+00> : vector<2x128xf32>
    %15 = tpu.matmul %10, %14, %cst_20 {dimension_numbers = #tpu.dot_dimension_numbers<[1], [0], [0], [1], [0, 0, 1, 1], [], []>} : vector<2x32xf32>, vector<32x128xf32>, vector<2x128xf32> -> vector<2x128xf32>
    %c32 = arith.constant 32 : index
    %c0_21 = arith.constant 0 : index
    %16 = vector.load %arg5[%c32, %c0_21] : memref<64x128xf32, #tpu.memory_space<vmem>>, vector<32x128xf32>
    %cst_22 = arith.constant dense<0.000000e+00> : vector<2x128xf32>
    %17 = tpu.matmul %11, %16, %cst_22 {dimension_numbers = #tpu.dot_dimension_numbers<[1], [0], [0], [1], [0, 0, 1, 1], [], []>} : vector<2x32xf32>, vector<32x128xf32>, vector<2x128xf32> -> vector<2x128xf32>
    %18 = arith.addf %15, %17 : vector<2x128xf32>
    %c0_23 = arith.constant 0 : index
    %c0_24 = arith.constant 0 : index
    %19 = vector.load %arg6[%c0_23, %c0_24] : memref<32x128xf32, #tpu.memory_space<vmem>>, vector<32x128xf32>
    %cst_25 = arith.constant dense<0.000000e+00> : vector<2x128xf32>
    %20 = tpu.matmul %12, %19, %cst_25 {dimension_numbers = #tpu.dot_dimension_numbers<[1], [0], [0], [1], [0, 0, 1, 1], [], []>} : vector<2x32xf32>, vector<32x128xf32>, vector<2x128xf32> -> vector<2x128xf32>
    %21 = arith.addf %18, %20 : vector<2x128xf32>
    %c0_26 = arith.constant 0 : index
    %c0_27 = arith.constant 0 : index
    %22 = vector.load %arg7[%c0_26, %c0_27] : memref<1x128xf32, #tpu.memory_space<vmem>>, vector<1x128xf32>
    %23 = vector.broadcast %22 : vector<1x128xf32> to vector<2x128xf32>
    %24 = arith.addf %21, %23 : vector<2x128xf32>
    %25 = vector.extract_strided_slice %24 {offsets = [0, 0], sizes = [2, 32], strides = [1, 1]} : vector<2x128xf32> to vector<2x32xf32>
    %26 = arith.negf %25 : vector<2x32xf32>
    %27 = math.exp %26 : vector<2x32xf32>
    %cst_28 = arith.constant 1.000000e+00 : f32
    %28 = vector.broadcast %cst_28 : f32 to vector<2x32xf32>
    %29 = arith.addf %28, %27 : vector<2x32xf32>
    %30 = arith.divf %28, %29 : vector<2x32xf32>
    %31 = vector.extract_strided_slice %24 {offsets = [0, 32], sizes = [2, 32], strides = [1, 1]} : vector<2x128xf32> to vector<2x32xf32>
    %32 = arith.negf %31 : vector<2x32xf32>
    %33 = math.exp %32 : vector<2x32xf32>
    %cst_29 = arith.constant 1.000000e+00 : f32
    %34 = vector.broadcast %cst_29 : f32 to vector<2x32xf32>
    %35 = arith.addf %34, %33 : vector<2x32xf32>
    %36 = arith.divf %34, %35 : vector<2x32xf32>
    %37 = vector.extract_strided_slice %24 {offsets = [0, 64], sizes = [2, 32], strides = [1, 1]} : vector<2x128xf32> to vector<2x32xf32>
    %38 = math.tanh %37 : vector<2x32xf32>
    %39 = vector.extract_strided_slice %24 {offsets = [0, 96], sizes = [2, 32], strides = [1, 1]} : vector<2x128xf32> to vector<2x32xf32>
    %40 = arith.negf %39 : vector<2x32xf32>
    %41 = math.exp %40 : vector<2x32xf32>
    %cst_30 = arith.constant 1.000000e+00 : f32
    %42 = vector.broadcast %cst_30 : f32 to vector<2x32xf32>
    %43 = arith.addf %42, %41 : vector<2x32xf32>
    %44 = arith.divf %42, %43 : vector<2x32xf32>
    %45 = arith.mulf %36, %13 : vector<2x32xf32>
    %46 = arith.mulf %30, %38 : vector<2x32xf32>
    %47 = arith.addf %45, %46 : vector<2x32xf32>
    %48 = math.tanh %47 : vector<2x32xf32>
    %49 = arith.mulf %44, %48 : vector<2x32xf32>
    %c0_31 = arith.constant 0 : index
    %c0_32 = arith.constant 0 : index
    %50 = vector.load %arg14[%c0_31, %c0_32] : memref<2x32xf32, #tpu.memory_space<vmem>>, vector<2x32xf32>
    tpu.vector_store %arg14[%c0_31, %c0_32], %49 {strides = array<i32>} : memref<2x32xf32, #tpu.memory_space<vmem>>, vector<2x32xf32>,
    %c0_33 = arith.constant 0 : index
    %c0_34 = arith.constant 0 : index
    %51 = vector.load %arg15[%c0_33, %c0_34] : memref<2x32xf32, #tpu.memory_space<vmem>>, vector<2x32xf32>
    tpu.vector_store %arg15[%c0_33, %c0_34], %47 {strides = array<i32>} : memref<2x32xf32, #tpu.memory_space<vmem>>, vector<2x32xf32>,
    %c0_35 = arith.constant 0 : index
    %c0_36 = arith.constant 0 : index
    %52 = vector.load %arg8[%c0_35, %c0_36] : memref<32x32xf32, #tpu.memory_space<vmem>>, vector<32x32xf32>
    %cst_37 = arith.constant dense<0.000000e+00> : vector<2x32xf32>
    %53 = tpu.matmul %49, %52, %cst_37 {dimension_numbers = #tpu.dot_dimension_numbers<[1], [0], [0], [1], [0, 0, 1, 1], [], []>} : vector<2x32xf32>, vector<32x32xf32>, vector<2x32xf32> -> vector<2x32xf32>
    %c0_38 = arith.constant 0 : index
    %c0_39 = arith.constant 0 : index
    %c0_40 = arith.constant 0 : index
    %54 = vector.load %arg1[%c0_38, %c0_39, %c0_40] : memref<2x8x32xf32, #tpu.memory_space<vmem>>, vector<2x8x32xf32>
    %55 = vector.shape_cast %53 : vector<2x32xf32> to vector<2x1x32xf32>
    %56 = vector.broadcast %55 : vector<2x1x32xf32> to vector<2x8x32xf32>
    %57 = arith.mulf %54, %56 : vector<2x8x32xf32>
    %cst_41 = arith.constant dense<0.000000e+00> : vector<2x8xf32>
    %58 = vector.multi_reduction <add>, %57, %cst_41 [2] : vector<2x8x32xf32> to vector<2x8xf32>
    %cst_42 = arith.constant dense<0xFF800000> : vector<2xf32>
    %59 = vector.multi_reduction <maximumf>, %58, %cst_42 [1] : vector<2x8xf32> to vector<2xf32>
    %60 = vector.shape_cast %59 : vector<2xf32> to vector<2x1xf32>
    %61 = vector.broadcast %60 : vector<2x1xf32> to vector<2x8xf32>
    %62 = arith.subf %58, %61 : vector<2x8xf32>
    %63 = math.exp %62 : vector<2x8xf32>
    %cst_43 = arith.constant dense<0.000000e+00> : vector<2xf32>
    %64 = vector.multi_reduction <add>, %63, %cst_43 [1] : vector<2x8xf32> to vector<2xf32>
    %65 = vector.shape_cast %64 : vector<2xf32> to vector<2x1xf32>
    %66 = tpu.reciprocal %65 {approx = true} : vector<2x1xf32> -> vector<2x1xf32>
    %67 = vector.broadcast %66 : vector<2x1xf32> to vector<2x8xf32>
    %68 = arith.mulf %63, %67 : vector<2x8xf32>
    %69 = vector.shape_cast %68 : vector<2x8xf32> to vector<2x8x1xf32>
    %70 = vector.broadcast %69 : vector<2x8x1xf32> to vector<2x8x32xf32>
    %71 = arith.mulf %70, %54 : vector<2x8x32xf32>
    %cst_44 = arith.constant dense<0.000000e+00> : vector<2x32xf32>
    %72 = vector.multi_reduction <add>, %71, %cst_44 [1] : vector<2x8x32xf32> to vector<2x32xf32>
    %c0_45 = arith.constant 0 : index
    %c0_46 = arith.constant 0 : index
    %73 = vector.load %arg9[%c0_45, %c0_46] : memref<32x32xf32, #tpu.memory_space<vmem>>, vector<32x32xf32>
    %cst_47 = arith.constant dense<0.000000e+00> : vector<2x32xf32>
    %74 = tpu.matmul %49, %73, %cst_47 {dimension_numbers = #tpu.dot_dimension_numbers<[1], [0], [0], [1], [0, 0, 1, 1], [], []>} : vector<2x32xf32>, vector<32x32xf32>, vector<2x32xf32> -> vector<2x32xf32>
    %c0_48 = arith.constant 0 : index
    %c0_49 = arith.constant 0 : index
    %c0_50 = arith.constant 0 : index
    %75 = vector.load %arg2[%c0_48, %c0_49, %c0_50] : memref<2x4x32xf32, #tpu.memory_space<vmem>>, vector<2x4x32xf32>
    %76 = vector.shape_cast %74 : vector<2x32xf32> to vector<2x1x32xf32>
    %77 = vector.broadcast %76 : vector<2x1x32xf32> to vector<2x4x32xf32>
    %78 = arith.mulf %75, %77 : vector<2x4x32xf32>
    %cst_51 = arith.constant dense<0.000000e+00> : vector<2x4xf32>
    %79 = vector.multi_reduction <add>, %78, %cst_51 [2] : vector<2x4x32xf32> to vector<2x4xf32>
    %cst_52 = arith.constant dense<0xFF800000> : vector<2xf32>
    %80 = vector.multi_reduction <maximumf>, %79, %cst_52 [1] : vector<2x4xf32> to vector<2xf32>
    %81 = vector.shape_cast %80 : vector<2xf32> to vector<2x1xf32>
    %82 = vector.broadcast %81 : vector<2x1xf32> to vector<2x4xf32>
    %83 = arith.subf %79, %82 : vector<2x4xf32>
    %84 = math.exp %83 : vector<2x4xf32>
    %cst_53 = arith.constant dense<0.000000e+00> : vector<2xf32>
    %85 = vector.multi_reduction <add>, %84, %cst_53 [1] : vector<2x4xf32> to vector<2xf32>
    %86 = vector.shape_cast %85 : vector<2xf32> to vector<2x1xf32>
    %87 = tpu.reciprocal %86 {approx = true} : vector<2x1xf32> -> vector<2x1xf32>
    %88 = vector.broadcast %87 : vector<2x1xf32> to vector<2x4xf32>
    %89 = arith.mulf %84, %88 : vector<2x4xf32>
    %90 = vector.shape_cast %89 : vector<2x4xf32> to vector<2x4x1xf32>
    %91 = vector.broadcast %90 : vector<2x4x1xf32> to vector<2x4x32xf32>
    %92 = arith.mulf %91, %75 : vector<2x4x32xf32>
    %cst_54 = arith.constant dense<0.000000e+00> : vector<2x32xf32>
    %93 = vector.multi_reduction <add>, %92, %cst_54 [1] : vector<2x4x32xf32> to vector<2x32xf32>
    %c0_55 = arith.constant 0 : index
    %c0_56 = arith.constant 0 : index
    %94 = vector.load %arg10[%c0_55, %c0_56] : memref<96x32xf32, #tpu.memory_space<vmem>>, vector<32x32xf32>
    %cst_57 = arith.constant dense<0.000000e+00> : vector<2x32xf32>
    %95 = tpu.matmul %72, %94, %cst_57 {dimension_numbers = #tpu.dot_dimension_numbers<[1], [0], [0], [1], [0, 0, 1, 1], [], []>} : vector<2x32xf32>, vector<32x32xf32>, vector<2x32xf32> -> vector<2x32xf32>
    %c32_58 = arith.constant 32 : index
    %c0_59 = arith.constant 0 : index
    %96 = vector.load %arg10[%c32_58, %c0_59] : memref<96x32xf32, #tpu.memory_space<vmem>>, vector<32x32xf32>
    %cst_60 = arith.constant dense<0.000000e+00> : vector<2x32xf32>
    %97 = tpu.matmul %49, %96, %cst_60 {dimension_numbers = #tpu.dot_dimension_numbers<[1], [0], [0], [1], [0, 0, 1, 1], [], []>} : vector<2x32xf32>, vector<32x32xf32>, vector<2x32xf32> -> vector<2x32xf32>
    %98 = arith.addf %95, %97 : vector<2x32xf32>
    %c64 = arith.constant 64 : index
    %c0_61 = arith.constant 0 : index
    %99 = vector.load %arg10[%c64, %c0_61] : memref<96x32xf32, #tpu.memory_space<vmem>>, vector<32x32xf32>
    %cst_62 = arith.constant dense<0.000000e+00> : vector<2x32xf32>
    %100 = tpu.matmul %93, %99, %cst_62 {dimension_numbers = #tpu.dot_dimension_numbers<[1], [0], [0], [1], [0, 0, 1, 1], [], []>} : vector<2x32xf32>, vector<32x32xf32>, vector<2x32xf32> -> vector<2x32xf32>
    %101 = arith.addf %98, %100 : vector<2x32xf32>
    %102 = math.tanh %101 : vector<2x32xf32>
    %c0_63 = arith.constant 0 : index
    %c0_64 = arith.constant 0 : index
    %103 = vector.load %arg16[%c0_63, %c0_64] : memref<2x32xf32, #tpu.memory_space<vmem>>, vector<2x32xf32>
    tpu.vector_store %arg16[%c0_63, %c0_64], %102 {strides = array<i32>} : memref<2x32xf32, #tpu.memory_space<vmem>>, vector<2x32xf32>,
    %c0_65 = arith.constant 0 : index
    %c0_66 = arith.constant 0 : index
    %104 = vector.load %arg11[%c0_65, %c0_66] : memref<32x16xf32, #tpu.memory_space<vmem>>, vector<32x16xf32>
    %cst_67 = arith.constant dense<0.000000e+00> : vector<2x16xf32>
    %105 = tpu.matmul %102, %104, %cst_67 {dimension_numbers = #tpu.dot_dimension_numbers<[1], [0], [0], [1], [0, 0, 1, 1], [], []>} : vector<2x32xf32>, vector<32x16xf32>, vector<2x16xf32> -> vector<2x16xf32>
    %c0_68 = arith.constant 0 : index
    %c0_69 = arith.constant 0 : index
    %106 = vector.load %arg12[%c0_68, %c0_69] : memref<1x16xf32, #tpu.memory_space<vmem>>, vector<1x16xf32>
    %107 = vector.broadcast %106 : vector<1x16xf32> to vector<2x16xf32>
    %108 = arith.addf %105, %107 : vector<2x16xf32>
    %109 = arith.index_cast %7 : i32 to index
    %c0_70 = arith.constant 0 : index
    %c0_71 = arith.constant 0 : index
    %110 = vector.load %arg13[%109, %c0_70, %c0_71] : memref<5x2x16xf32, #tpu.memory_space<vmem>>, vector<1x2x16xf32>
    %111 = vector.shape_cast %110 : vector<1x2x16xf32> to vector<2x16xf32>
    %112 = vector.shape_cast %108 : vector<2x16xf32> to vector<1x2x16xf32>
    tpu.vector_store %arg13[%109, %c0_70, %c0_71], %112 {strides = array<i32>} : memref<5x2x16xf32, #tpu.memory_space<vmem>>, vector<1x2x16xf32>,
    %c1_i32_72 = arith.constant 1 : i32
    %c1_i32_73 = arith.constant 1 : i32
    %113 = arith.muli %c1_i32_72, %c1_i32_73 : i32
    %c0_i32_74 = arith.constant 0 : i32
    %114 = arith.addi %c0_i32_74, %113 : i32
    %115 = arith.index_cast %114 : i32 to index
    %c0_75 = arith.constant 0 : index
    %c0_76 = arith.constant 0 : index
    %116 = vector.load %arg0[%115, %c0_75, %c0_76] : memref<5x2x32xf32, #tpu.memory_space<vmem>>, vector<1x2x32xf32>
    %117 = vector.shape_cast %116 : vector<1x2x32xf32> to vector<2x32xf32>
    %c0_77 = arith.constant 0 : index
    %c0_78 = arith.constant 0 : index
    %118 = vector.load %arg16[%c0_77, %c0_78] : memref<2x32xf32, #tpu.memory_space<vmem>>, vector<2x32xf32>
    %c0_79 = arith.constant 0 : index
    %c0_80 = arith.constant 0 : index
    %119 = vector.load %arg14[%c0_79, %c0_80] : memref<2x32xf32, #tpu.memory_space<vmem>>, vector<2x32xf32>
    %c0_81 = arith.constant 0 : index
    %c0_82 = arith.constant 0 : index
    %120 = vector.load %arg15[%c0_81, %c0_82] : memref<2x32xf32, #tpu.memory_space<vmem>>, vector<2x32xf32>
    %c0_83 = arith.constant 0 : index
    %c0_84 = arith.constant 0 : index
    %121 = vector.load %arg5[%c0_83, %c0_84] : memref<64x128xf32, #tpu.memory_space<vmem>>, vector<32x128xf32>
    %cst_85 = arith.constant dense<0.000000e+00> : vector<2x128xf32>
    %122 = tpu.matmul %117, %121, %cst_85 {dimension_numbers = #tpu.dot_dimension_numbers<[1], [0], [0], [1], [0, 0, 1, 1], [], []>} : vector<2x32xf32>, vector<32x128xf32>, vector<2x128xf32> -> vector<2x128xf32>
    %c32_86 = arith.constant 32 : index
    %c0_87 = arith.constant 0 : index
    %123 = vector.load %arg5[%c32_86, %c0_87] : memref<64x128xf32, #tpu.memory_space<vmem>>, vector<32x128xf32>
    %cst_88 = arith.constant dense<0.000000e+00> : vector<2x128xf32>
    %124 = tpu.matmul %118, %123, %cst_88 {dimension_numbers = #tpu.dot_dimension_numbers<[1], [0], [0], [1], [0, 0, 1, 1], [], []>} : vector<2x32xf32>, vector<32x128xf32>, vector<2x128xf32> -> vector<2x128xf32>
    %125 = arith.addf %122, %124 : vector<2x128xf32>
    %c0_89 = arith.constant 0 : index
    %c0_90 = arith.constant 0 : index
    %126 = vector.load %arg6[%c0_89, %c0_90] : memref<32x128xf32, #tpu.memory_space<vmem>>, vector<32x128xf32>
    %cst_91 = arith.constant dense<0.000000e+00> : vector<2x128xf32>
    %127 = tpu.matmul %119, %126, %cst_91 {dimension_numbers = #tpu.dot_dimension_numbers<[1], [0], [0], [1], [0, 0, 1, 1], [], []>} : vector<2x32xf32>, vector<32x128xf32>, vector<2x128xf32> -> vector<2x128xf32>
    %128 = arith.addf %125, %127 : vector<2x128xf32>
    %c0_92 = arith.constant 0 : index
    %c0_93 = arith.constant 0 : index
    %129 = vector.load %arg7[%c0_92, %c0_93] : memref<1x128xf32, #tpu.memory_space<vmem>>, vector<1x128xf32>
    %130 = vector.broadcast %129 : vector<1x128xf32> to vector<2x128xf32>
    %131 = arith.addf %128, %130 : vector<2x128xf32>
    %132 = vector.extract_strided_slice %131 {offsets = [0, 0], sizes = [2, 32], strides = [1, 1]} : vector<2x128xf32> to vector<2x32xf32>
    %133 = arith.negf %132 : vector<2x32xf32>
    %134 = math.exp %133 : vector<2x32xf32>
    %cst_94 = arith.constant 1.000000e+00 : f32
    %135 = vector.broadcast %cst_94 : f32 to vector<2x32xf32>
    %136 = arith.addf %135, %134 : vector<2x32xf32>
    %137 = arith.divf %135, %136 : vector<2x32xf32>
    %138 = vector.extract_strided_slice %131 {offsets = [0, 32], sizes = [2, 32], strides = [1, 1]} : vector<2x128xf32> to vector<2x32xf32>
    %139 = arith.negf %138 : vector<2x32xf32>
    %140 = math.exp %139 : vector<2x32xf32>
    %cst_95 = arith.constant 1.000000e+00 : f32
    %141 = vector.broadcast %cst_95 : f32 to vector<2x32xf32>
    %142 = arith.addf %141, %140 : vector<2x32xf32>
    %143 = arith.divf %141, %142 : vector<2x32xf32>
    %144 = vector.extract_strided_slice %131 {offsets = [0, 64], sizes = [2, 32], strides = [1, 1]} : vector<2x128xf32> to vector<2x32xf32>
    %145 = math.tanh %144 : vector<2x32xf32>
    %146 = vector.extract_strided_slice %131 {offsets = [0, 96], sizes = [2, 32], strides = [1, 1]} : vector<2x128xf32> to vector<2x32xf32>
    %147 = arith.negf %146 : vector<2x32xf32>
    %148 = math.exp %147 : vector<2x32xf32>
    %cst_96 = arith.constant 1.000000e+00 : f32
    %149 = vector.broadcast %cst_96 : f32 to vector<2x32xf32>
    %150 = arith.addf %149, %148 : vector<2x32xf32>
    %151 = arith.divf %149, %150 : vector<2x32xf32>
    %152 = arith.mulf %143, %120 : vector<2x32xf32>
    %153 = arith.mulf %137, %145 : vector<2x32xf32>
    %154 = arith.addf %152, %153 : vector<2x32xf32>
    %155 = math.tanh %154 : vector<2x32xf32>
    %156 = arith.mulf %151, %155 : vector<2x32xf32>
    %c0_97 = arith.constant 0 : index
    %c0_98 = arith.constant 0 : index
    %157 = vector.load %arg14[%c0_97, %c0_98] : memref<2x32xf32, #tpu.memory_space<vmem>>, vector<2x32xf32>
    tpu.vector_store %arg14[%c0_97, %c0_98], %156 {strides = array<i32>} : memref<2x32xf32, #tpu.memory_space<vmem>>, vector<2x32xf32>,
    %c0_99 = arith.constant 0 : index
    %c0_100 = arith.constant 0 : index
    %158 = vector.load %arg15[%c0_99, %c0_100] : memref<2x32xf32, #tpu.memory_space<vmem>>, vector<2x32xf32>
    tpu.vector_store %arg15[%c0_99, %c0_100], %154 {strides = array<i32>} : memref<2x32xf32, #tpu.memory_space<vmem>>, vector<2x32xf32>,
    %c0_101 = arith.constant 0 : index
    %c0_102 = arith.constant 0 : index
    %159 = vector.load %arg8[%c0_101, %c0_102] : memref<32x32xf32, #tpu.memory_space<vmem>>, vector<32x32xf32>
    %cst_103 = arith.constant dense<0.000000e+00> : vector<2x32xf32>
    %160 = tpu.matmul %156, %159, %cst_103 {dimension_numbers = #tpu.dot_dimension_numbers<[1], [0], [0], [1], [0, 0, 1, 1], [], []>} : vector<2x32xf32>, vector<32x32xf32>, vector<2x32xf32> -> vector<2x32xf32>
    %c0_104 = arith.constant 0 : index
    %c0_105 = arith.constant 0 : index
    %c0_106 = arith.constant 0 : index
    %161 = vector.load %arg1[%c0_104, %c0_105, %c0_106] : memref<2x8x32xf32, #tpu.memory_space<vmem>>, vector<2x8x32xf32>
    %162 = vector.shape_cast %160 : vector<2x32xf32> to vector<2x1x32xf32>
    %163 = vector.broadcast %162 : vector<2x1x32xf32> to vector<2x8x32xf32>
    %164 = arith.mulf %161, %163 : vector<2x8x32xf32>
    %cst_107 = arith.constant dense<0.000000e+00> : vector<2x8xf32>
    %165 = vector.multi_reduction <add>, %164, %cst_107 [2] : vector<2x8x32xf32> to vector<2x8xf32>
    %cst_108 = arith.constant dense<0xFF800000> : vector<2xf32>
    %166 = vector.multi_reduction <maximumf>, %165, %cst_108 [1] : vector<2x8xf32> to vector<2xf32>
    %167 = vector.shape_cast %166 : vector<2xf32> to vector<2x1xf32>
    %168 = vector.broadcast %167 : vector<2x1xf32> to vector<2x8xf32>
    %169 = arith.subf %165, %168 : vector<2x8xf32>
    %170 = math.exp %169 : vector<2x8xf32>
    %cst_109 = arith.constant dense<0.000000e+00> : vector<2xf32>
    %171 = vector.multi_reduction <add>, %170, %cst_109 [1] : vector<2x8xf32> to vector<2xf32>
    %172 = vector.shape_cast %171 : vector<2xf32> to vector<2x1xf32>
    %173 = tpu.reciprocal %172 {approx = true} : vector<2x1xf32> -> vector<2x1xf32>
    %174 = vector.broadcast %173 : vector<2x1xf32> to vector<2x8xf32>
    %175 = arith.mulf %170, %174 : vector<2x8xf32>
    %176 = vector.shape_cast %175 : vector<2x8xf32> to vector<2x8x1xf32>
    %177 = vector.broadcast %176 : vector<2x8x1xf32> to vector<2x8x32xf32>
    %178 = arith.mulf %177, %161 : vector<2x8x32xf32>
    %cst_110 = arith.constant dense<0.000000e+00> : vector<2x32xf32>
    %179 = vector.multi_reduction <add>, %178, %cst_110 [1] : vector<2x8x32xf32> to vector<2x32xf32>
    %c0_111 = arith.constant 0 : index
    %c0_112 = arith.constant 0 : index
    %180 = vector.load %arg9[%c0_111, %c0_112] : memref<32x32xf32, #tpu.memory_space<vmem>>, vector<32x32xf32>
    %cst_113 = arith.constant dense<0.000000e+00> : vector<2x32xf32>
    %181 = tpu.matmul %156, %180, %cst_113 {dimension_numbers = #tpu.dot_dimension_numbers<[1], [0], [0], [1], [0, 0, 1, 1], [], []>} : vector<2x32xf32>, vector<32x32xf32>, vector<2x32xf32> -> vector<2x32xf32>
    %c0_114 = arith.constant 0 : index
    %c0_115 = arith.constant 0 : index
    %c0_116 = arith.constant 0 : index
    %182 = vector.load %arg2[%c0_114, %c0_115, %c0_116] : memref<2x4x32xf32, #tpu.memory_space<vmem>>, vector<2x4x32xf32>
    %183 = vector.shape_cast %181 : vector<2x32xf32> to vector<2x1x32xf32>
    %184 = vector.broadcast %183 : vector<2x1x32xf32> to vector<2x4x32xf32>
    %185 = arith.mulf %182, %184 : vector<2x4x32xf32>
    %cst_117 = arith.constant dense<0.000000e+00> : vector<2x4xf32>
    %186 = vector.multi_reduction <add>, %185, %cst_117 [2] : vector<2x4x32xf32> to vector<2x4xf32>
    %cst_118 = arith.constant dense<0xFF800000> : vector<2xf32>
    %187 = vector.multi_reduction <maximumf>, %186, %cst_118 [1] : vector<2x4xf32> to vector<2xf32>
    %188 = vector.shape_cast %187 : vector<2xf32> to vector<2x1xf32>
    %189 = vector.broadcast %188 : vector<2x1xf32> to vector<2x4xf32>
    %190 = arith.subf %186, %189 : vector<2x4xf32>
    %191 = math.exp %190 : vector<2x4xf32>
    %cst_119 = arith.constant dense<0.000000e+00> : vector<2xf32>
    %192 = vector.multi_reduction <add>, %191, %cst_119 [1] : vector<2x4xf32> to vector<2xf32>
    %193 = vector.shape_cast %192 : vector<2xf32> to vector<2x1xf32>
    %194 = tpu.reciprocal %193 {approx = true} : vector<2x1xf32> -> vector<2x1xf32>
    %195 = vector.broadcast %194 : vector<2x1xf32> to vector<2x4xf32>
    %196 = arith.mulf %191, %195 : vector<2x4xf32>
    %197 = vector.shape_cast %196 : vector<2x4xf32> to vector<2x4x1xf32>
    %198 = vector.broadcast %197 : vector<2x4x1xf32> to vector<2x4x32xf32>
    %199 = arith.mulf %198, %182 : vector<2x4x32xf32>
    %cst_120 = arith.constant dense<0.000000e+00> : vector<2x32xf32>
    %200 = vector.multi_reduction <add>, %199, %cst_120 [1] : vector<2x4x32xf32> to vector<2x32xf32>
    %c0_121 = arith.constant 0 : index
    %c0_122 = arith.constant 0 : index
    %201 = vector.load %arg10[%c0_121, %c0_122] : memref<96x32xf32, #tpu.memory_space<vmem>>, vector<32x32xf32>
    %cst_123 = arith.constant dense<0.000000e+00> : vector<2x32xf32>
    %202 = tpu.matmul %179, %201, %cst_123 {dimension_numbers = #tpu.dot_dimension_numbers<[1], [0], [0], [1], [0, 0, 1, 1], [], []>} : vector<2x32xf32>, vector<32x32xf32>, vector<2x32xf32> -> vector<2x32xf32>
    %c32_124 = arith.constant 32 : index
    %c0_125 = arith.constant 0 : index
    %203 = vector.load %arg10[%c32_124, %c0_125] : memref<96x32xf32, #tpu.memory_space<vmem>>, vector<32x32xf32>
    %cst_126 = arith.constant dense<0.000000e+00> : vector<2x32xf32>
    %204 = tpu.matmul %156, %203, %cst_126 {dimension_numbers = #tpu.dot_dimension_numbers<[1], [0], [0], [1], [0, 0, 1, 1], [], []>} : vector<2x32xf32>, vector<32x32xf32>, vector<2x32xf32> -> vector<2x32xf32>
    %205 = arith.addf %202, %204 : vector<2x32xf32>
    %c64_127 = arith.constant 64 : index
    %c0_128 = arith.constant 0 : index
    %206 = vector.load %arg10[%c64_127, %c0_128] : memref<96x32xf32, #tpu.memory_space<vmem>>, vector<32x32xf32>
    %cst_129 = arith.constant dense<0.000000e+00> : vector<2x32xf32>
    %207 = tpu.matmul %200, %206, %cst_129 {dimension_numbers = #tpu.dot_dimension_numbers<[1], [0], [0], [1], [0, 0, 1, 1], [], []>} : vector<2x32xf32>, vector<32x32xf32>, vector<2x32xf32> -> vector<2x32xf32>
    %208 = arith.addf %205, %207 : vector<2x32xf32>
    %209 = math.tanh %208 : vector<2x32xf32>
    %c0_130 = arith.constant 0 : index
    %c0_131 = arith.constant 0 : index
    %210 = vector.load %arg16[%c0_130, %c0_131] : memref<2x32xf32, #tpu.memory_space<vmem>>, vector<2x32xf32>
    tpu.vector_store %arg16[%c0_130, %c0_131], %209 {strides = array<i32>} : memref<2x32xf32, #tpu.memory_space<vmem>>, vector<2x32xf32>,
    %c0_132 = arith.constant 0 : index
    %c0_133 = arith.constant 0 : index
    %211 = vector.load %arg11[%c0_132, %c0_133] : memref<32x16xf32, #tpu.memory_space<vmem>>, vector<32x16xf32>
    %cst_134 = arith.constant dense<0.000000e+00> : vector<2x16xf32>
    %212 = tpu.matmul %209, %211, %cst_134 {dimension_numbers = #tpu.dot_dimension_numbers<[1], [0], [0], [1], [0, 0, 1, 1], [], []>} : vector<2x32xf32>, vector<32x16xf32>, vector<2x16xf32> -> vector<2x16xf32>
    %c0_135 = arith.constant 0 : index
    %c0_136 = arith.constant 0 : index
    %213 = vector.load %arg12[%c0_135, %c0_136] : memref<1x16xf32, #tpu.memory_space<vmem>>, vector<1x16xf32>
    %214 = vector.broadcast %213 : vector<1x16xf32> to vector<2x16xf32>
    %215 = arith.addf %212, %214 : vector<2x16xf32>
    %216 = arith.index_cast %114 : i32 to index
    %c0_137 = arith.constant 0 : index
    %c0_138 = arith.constant 0 : index
    %217 = vector.load %arg13[%216, %c0_137, %c0_138] : memref<5x2x16xf32, #tpu.memory_space<vmem>>, vector<1x2x16xf32>
    %218 = vector.shape_cast %217 : vector<1x2x16xf32> to vector<2x16xf32>
    %219 = vector.shape_cast %215 : vector<2x16xf32> to vector<1x2x16xf32>
    tpu.vector_store %arg13[%216, %c0_137, %c0_138], %219 {strides = array<i32>} : memref<5x2x16xf32, #tpu.memory_space<vmem>>, vector<1x2x16xf32>,
    %c2_i32 = arith.constant 2 : i32
    %c1_i32_139 = arith.constant 1 : i32
    %220 = arith.muli %c2_i32, %c1_i32_139 : i32
    %c0_i32_140 = arith.constant 0 : i32
    %221 = arith.addi %c0_i32_140, %220 : i32
    %222 = arith.index_cast %221 : i32 to index
    %c0_141 = arith.constant 0 : index
    %c0_142 = arith.constant 0 : index
    %223 = vector.load %arg0[%222, %c0_141, %c0_142] : memref<5x2x32xf32, #tpu.memory_space<vmem>>, vector<1x2x32xf32>
    %224 = vector.shape_cast %223 : vector<1x2x32xf32> to vector<2x32xf32>
    %c0_143 = arith.constant 0 : index
    %c0_144 = arith.constant 0 : index
    %225 = vector.load %arg16[%c0_143, %c0_144] : memref<2x32xf32, #tpu.memory_space<vmem>>, vector<2x32xf32>
    %c0_145 = arith.constant 0 : index
    %c0_146 = arith.constant 0 : index
    %226 = vector.load %arg14[%c0_145, %c0_146] : memref<2x32xf32, #tpu.memory_space<vmem>>, vector<2x32xf32>
    %c0_147 = arith.constant 0 : index
    %c0_148 = arith.constant 0 : index
    %227 = vector.load %arg15[%c0_147, %c0_148] : memref<2x32xf32, #tpu.memory_space<vmem>>, vector<2x32xf32>
    %c0_149 = arith.constant 0 : index
    %c0_150 = arith.constant 0 : index
    %228 = vector.load %arg5[%c0_149, %c0_150] : memref<64x128xf32, #tpu.memory_space<vmem>>, vector<32x128xf32>
    %cst_151 = arith.constant dense<0.000000e+00> : vector<2x128xf32>
    %229 = tpu.matmul %224, %228, %cst_151 {dimension_numbers = #tpu.dot_dimension_numbers<[1], [0], [0], [1], [0, 0, 1, 1], [], []>} : vector<2x32xf32>, vector<32x128xf32>, vector<2x128xf32> -> vector<2x128xf32>
    %c32_152 = arith.constant 32 : index
    %c0_153 = arith.constant 0 : index
    %230 = vector.load %arg5[%c32_152, %c0_153] : memref<64x128xf32, #tpu.memory_space<vmem>>, vector<32x128xf32>
    %cst_154 = arith.constant dense<0.000000e+00> : vector<2x128xf32>
    %231 = tpu.matmul %225, %230, %cst_154 {dimension_numbers = #tpu.dot_dimension_numbers<[1], [0], [0], [1], [0, 0, 1, 1], [], []>} : vector<2x32xf32>, vector<32x128xf32>, vector<2x128xf32> -> vector<2x128xf32>
    %232 = arith.addf %229, %231 : vector<2x128xf32>
    %c0_155 = arith.constant 0 : index
    %c0_156 = arith.constant 0 : index
    %233 = vector.load %arg6[%c0_155, %c0_156] : memref<32x128xf32, #tpu.memory_space<vmem>>, vector<32x128xf32>
    %cst_157 = arith.constant dense<0.000000e+00> : vector<2x128xf32>
    %234 = tpu.matmul %226, %233, %cst_157 {dimension_numbers = #tpu.dot_dimension_numbers<[1], [0], [0], [1], [0, 0, 1, 1], [], []>} : vector<2x32xf32>, vector<32x128xf32>, vector<2x128xf32> -> vector<2x128xf32>
    %235 = arith.addf %232, %234 : vector<2x128xf32>
    %c0_158 = arith.constant 0 : index
    %c0_159 = arith.constant 0 : index
    %236 = vector.load %arg7[%c0_158, %c0_159] : memref<1x128xf32, #tpu.memory_space<vmem>>, vector<1x128xf32>
    %237 = vector.broadcast %236 : vector<1x128xf32> to vector<2x128xf32>
    %238 = arith.addf %235, %237 : vector<2x128xf32>
    %239 = vector.extract_strided_slice %238 {offsets = [0, 0], sizes = [2, 32], strides = [1, 1]} : vector<2x128xf32> to vector<2x32xf32>
    %240 = arith.negf %239 : vector<2x32xf32>
    %241 = math.exp %240 : vector<2x32xf32>
    %cst_160 = arith.constant 1.000000e+00 : f32
    %242 = vector.broadcast %cst_160 : f32 to vector<2x32xf32>
    %243 = arith.addf %242, %241 : vector<2x32xf32>
    %244 = arith.divf %242, %243 : vector<2x32xf32>
    %245 = vector.extract_strided_slice %238 {offsets = [0, 32], sizes = [2, 32], strides = [1, 1]} : vector<2x128xf32> to vector<2x32xf32>
    %246 = arith.negf %245 : vector<2x32xf32>
    %247 = math.exp %246 : vector<2x32xf32>
    %cst_161 = arith.constant 1.000000e+00 : f32
    %248 = vector.broadcast %cst_161 : f32 to vector<2x32xf32>
    %249 = arith.addf %248, %247 : vector<2x32xf32>
    %250 = arith.divf %248, %249 : vector<2x32xf32>
    %251 = vector.extract_strided_slice %238 {offsets = [0, 64], sizes = [2, 32], strides = [1, 1]} : vector<2x128xf32> to vector<2x32xf32>
    %252 = math.tanh %251 : vector<2x32xf32>
    %253 = vector.extract_strided_slice %238 {offsets = [0, 96], sizes = [2, 32], strides = [1, 1]} : vector<2x128xf32> to vector<2x32xf32>
    %254 = arith.negf %253 : vector<2x32xf32>
    %255 = math.exp %254 : vector<2x32xf32>
    %cst_162 = arith.constant 1.000000e+00 : f32
    %256 = vector.broadcast %cst_162 : f32 to vector<2x32xf32>
    %257 = arith.addf %256, %255 : vector<2x32xf32>
    %258 = arith.divf %256, %257 : vector<2x32xf32>
    %259 = arith.mulf %250, %227 : vector<2x32xf32>
    %260 = arith.mulf %244, %252 : vector<2x32xf32>
    %261 = arith.addf %259, %260 : vector<2x32xf32>
    %262 = math.tanh %261 : vector<2x32xf32>
    %263 = arith.mulf %258, %262 : vector<2x32xf32>
    %c0_163 = arith.constant 0 : index
    %c0_164 = arith.constant 0 : index
    %264 = vector.load %arg14[%c0_163, %c0_164] : memref<2x32xf32, #tpu.memory_space<vmem>>, vector<2x32xf32>
    tpu.vector_store %arg14[%c0_163, %c0_164], %263 {strides = array<i32>} : memref<2x32xf32, #tpu.memory_space<vmem>>, vector<2x32xf32>,
    %c0_165 = arith.constant 0 : index
    %c0_166 = arith.constant 0 : index
    %265 = vector.load %arg15[%c0_165, %c0_166] : memref<2x32xf32, #tpu.memory_space<vmem>>, vector<2x32xf32>
    tpu.vector_store %arg15[%c0_165, %c0_166], %261 {strides = array<i32>} : memref<2x32xf32, #tpu.memory_space<vmem>>, vector<2x32xf32>,
    %c0_167 = arith.constant 0 : index
    %c0_168 = arith.constant 0 : index
    %266 = vector.load %arg8[%c0_167, %c0_168] : memref<32x32xf32, #tpu.memory_space<vmem>>, vector<32x32xf32>
    %cst_169 = arith.constant dense<0.000000e+00> : vector<2x32xf32>
    %267 = tpu.matmul %263, %266, %cst_169 {dimension_numbers = #tpu.dot_dimension_numbers<[1], [0], [0], [1], [0, 0, 1, 1], [], []>} : vector<2x32xf32>, vector<32x32xf32>, vector<2x32xf32> -> vector<2x32xf32>
    %c0_170 = arith.constant 0 : index
    %c0_171 = arith.constant 0 : index
    %c0_172 = arith.constant 0 : index
    %268 = vector.load %arg1[%c0_170, %c0_171, %c0_172] : memref<2x8x32xf32, #tpu.memory_space<vmem>>, vector<2x8x32xf32>
    %269 = vector.shape_cast %267 : vector<2x32xf32> to vector<2x1x32xf32>
    %270 = vector.broadcast %269 : vector<2x1x32xf32> to vector<2x8x32xf32>
    %271 = arith.mulf %268, %270 : vector<2x8x32xf32>
    %cst_173 = arith.constant dense<0.000000e+00> : vector<2x8xf32>
    %272 = vector.multi_reduction <add>, %271, %cst_173 [2] : vector<2x8x32xf32> to vector<2x8xf32>
    %cst_174 = arith.constant dense<0xFF800000> : vector<2xf32>
    %273 = vector.multi_reduction <maximumf>, %272, %cst_174 [1] : vector<2x8xf32> to vector<2xf32>
    %274 = vector.shape_cast %273 : vector<2xf32> to vector<2x1xf32>
    %275 = vector.broadcast %274 : vector<2x1xf32> to vector<2x8xf32>
    %276 = arith.subf %272, %275 : vector<2x8xf32>
    %277 = math.exp %276 : vector<2x8xf32>
    %cst_175 = arith.constant dense<0.000000e+00> : vector<2xf32>
    %278 = vector.multi_reduction <add>, %277, %cst_175 [1] : vector<2x8xf32> to vector<2xf32>
    %279 = vector.shape_cast %278 : vector<2xf32> to vector<2x1xf32>
    %280 = tpu.reciprocal %279 {approx = true} : vector<2x1xf32> -> vector<2x1xf32>
    %281 = vector.broadcast %280 : vector<2x1xf32> to vector<2x8xf32>
    %282 = arith.mulf %277, %281 : vector<2x8xf32>
    %283 = vector.shape_cast %282 : vector<2x8xf32> to vector<2x8x1xf32>
    %284 = vector.broadcast %283 : vector<2x8x1xf32> to vector<2x8x32xf32>
    %285 = arith.mulf %284, %268 : vector<2x8x32xf32>
    %cst_176 = arith.constant dense<0.000000e+00> : vector<2x32xf32>
    %286 = vector.multi_reduction <add>, %285, %cst_176 [1] : vector<2x8x32xf32> to vector<2x32xf32>
    %c0_177 = arith.constant 0 : index
    %c0_178 = arith.constant 0 : index
    %287 = vector.load %arg9[%c0_177, %c0_178] : memref<32x32xf32, #tpu.memory_space<vmem>>, vector<32x32xf32>
    %cst_179 = arith.constant dense<0.000000e+00> : vector<2x32xf32>
    %288 = tpu.matmul %263, %287, %cst_179 {dimension_numbers = #tpu.dot_dimension_numbers<[1], [0], [0], [1], [0, 0, 1, 1], [], []>} : vector<2x32xf32>, vector<32x32xf32>, vector<2x32xf32> -> vector<2x32xf32>
    %c0_180 = arith.constant 0 : index
    %c0_181 = arith.constant 0 : index
    %c0_182 = arith.constant 0 : index
    %289 = vector.load %arg2[%c0_180, %c0_181, %c0_182] : memref<2x4x32xf32, #tpu.memory_space<vmem>>, vector<2x4x32xf32>
    %290 = vector.shape_cast %288 : vector<2x32xf32> to vector<2x1x32xf32>
    %291 = vector.broadcast %290 : vector<2x1x32xf32> to vector<2x4x32xf32>
    %292 = arith.mulf %289, %291 : vector<2x4x32xf32>
    %cst_183 = arith.constant dense<0.000000e+00> : vector<2x4xf32>
    %293 = vector.multi_reduction <add>, %292, %cst_183 [2] : vector<2x4x32xf32> to vector<2x4xf32>
    %cst_184 = arith.constant dense<0xFF800000> : vector<2xf32>
    %294 = vector.multi_reduction <maximumf>, %293, %cst_184 [1] : vector<2x4xf32> to vector<2xf32>
    %295 = vector.shape_cast %294 : vector<2xf32> to vector<2x1xf32>
    %296 = vector.broadcast %295 : vector<2x1xf32> to vector<2x4xf32>
    %297 = arith.subf %293, %296 : vector<2x4xf32>
    %298 = math.exp %297 : vector<2x4xf32>
    %cst_185 = arith.constant dense<0.000000e+00> : vector<2xf32>
    %299 = vector.multi_reduction <add>, %298, %cst_185 [1] : vector<2x4xf32> to vector<2xf32>
    %300 = vector.shape_cast %299 : vector<2xf32> to vector<2x1xf32>
    %301 = tpu.reciprocal %300 {approx = true} : vector<2x1xf32> -> vector<2x1xf32>
    %302 = vector.broadcast %301 : vector<2x1xf32> to vector<2x4xf32>
    %303 = arith.mulf %298, %302 : vector<2x4xf32>
    %304 = vector.shape_cast %303 : vector<2x4xf32> to vector<2x4x1xf32>
    %305 = vector.broadcast %304 : vector<2x4x1xf32> to vector<2x4x32xf32>
    %306 = arith.mulf %305, %289 : vector<2x4x32xf32>
    %cst_186 = arith.constant dense<0.000000e+00> : vector<2x32xf32>
    %307 = vector.multi_reduction <add>, %306, %cst_186 [1] : vector<2x4x32xf32> to vector<2x32xf32>
    %c0_187 = arith.constant 0 : index
    %c0_188 = arith.constant 0 : index
    %308 = vector.load %arg10[%c0_187, %c0_188] : memref<96x32xf32, #tpu.memory_space<vmem>>, vector<32x32xf32>
    %cst_189 = arith.constant dense<0.000000e+00> : vector<2x32xf32>
    %309 = tpu.matmul %286, %308, %cst_189 {dimension_numbers = #tpu.dot_dimension_numbers<[1], [0], [0], [1], [0, 0, 1, 1], [], []>} : vector<2x32xf32>, vector<32x32xf32>, vector<2x32xf32> -> vector<2x32xf32>
    %c32_190 = arith.constant 32 : index
    %c0_191 = arith.constant 0 : index
    %310 = vector.load %arg10[%c32_190, %c0_191] : memref<96x32xf32, #tpu.memory_space<vmem>>, vector<32x32xf32>
    %cst_192 = arith.constant dense<0.000000e+00> : vector<2x32xf32>
    %311 = tpu.matmul %263, %310, %cst_192 {dimension_numbers = #tpu.dot_dimension_numbers<[1], [0], [0], [1], [0, 0, 1, 1], [], []>} : vector<2x32xf32>, vector<32x32xf32>, vector<2x32xf32> -> vector<2x32xf32>
    %312 = arith.addf %309, %311 : vector<2x32xf32>
    %c64_193 = arith.constant 64 : index
    %c0_194 = arith.constant 0 : index
    %313 = vector.load %arg10[%c64_193, %c0_194] : memref<96x32xf32, #tpu.memory_space<vmem>>, vector<32x32xf32>
    %cst_195 = arith.constant dense<0.000000e+00> : vector<2x32xf32>
    %314 = tpu.matmul %307, %313, %cst_195 {dimension_numbers = #tpu.dot_dimension_numbers<[1], [0], [0], [1], [0, 0, 1, 1], [], []>} : vector<2x32xf32>, vector<32x32xf32>, vector<2x32xf32> -> vector<2x32xf32>
    %315 = arith.addf %312, %314 : vector<2x32xf32>
    %316 = math.tanh %315 : vector<2x32xf32>
    %c0_196 = arith.constant 0 : index
    %c0_197 = arith.constant 0 : index
    %317 = vector.load %arg16[%c0_196, %c0_197] : memref<2x32xf32, #tpu.memory_space<vmem>>, vector<2x32xf32>
    tpu.vector_store %arg16[%c0_196, %c0_197], %316 {strides = array<i32>} : memref<2x32xf32, #tpu.memory_space<vmem>>, vector<2x32xf32>,
    %c0_198 = arith.constant 0 : index
    %c0_199 = arith.constant 0 : index
    %318 = vector.load %arg11[%c0_198, %c0_199] : memref<32x16xf32, #tpu.memory_space<vmem>>, vector<32x16xf32>
    %cst_200 = arith.constant dense<0.000000e+00> : vector<2x16xf32>
    %319 = tpu.matmul %316, %318, %cst_200 {dimension_numbers = #tpu.dot_dimension_numbers<[1], [0], [0], [1], [0, 0, 1, 1], [], []>} : vector<2x32xf32>, vector<32x16xf32>, vector<2x16xf32> -> vector<2x16xf32>
    %c0_201 = arith.constant 0 : index
    %c0_202 = arith.constant 0 : index
    %320 = vector.load %arg12[%c0_201, %c0_202] : memref<1x16xf32, #tpu.memory_space<vmem>>, vector<1x16xf32>
    %321 = vector.broadcast %320 : vector<1x16xf32> to vector<2x16xf32>
    %322 = arith.addf %319, %321 : vector<2x16xf32>
    %323 = arith.index_cast %221 : i32 to index
    %c0_203 = arith.constant 0 : index
    %c0_204 = arith.constant 0 : index
    %324 = vector.load %arg13[%323, %c0_203, %c0_204] : memref<5x2x16xf32, #tpu.memory_space<vmem>>, vector<1x2x16xf32>
    %325 = vector.shape_cast %324 : vector<1x2x16xf32> to vector<2x16xf32>
    %326 = vector.shape_cast %322 : vector<2x16xf32> to vector<1x2x16xf32>
    tpu.vector_store %arg13[%323, %c0_203, %c0_204], %326 {strides = array<i32>} : memref<5x2x16xf32, #tpu.memory_space<vmem>>, vector<1x2x16xf32>,
    %c3_i32 = arith.constant 3 : i32
    %c1_i32_205 = arith.constant 1 : i32
    %327 = arith.muli %c3_i32, %c1_i32_205 : i32
    %c0_i32_206 = arith.constant 0 : i32
    %328 = arith.addi %c0_i32_206, %327 : i32
    %329 = arith.index_cast %328 : i32 to index
    %c0_207 = arith.constant 0 : index
    %c0_208 = arith.constant 0 : index
    %330 = vector.load %arg0[%329, %c0_207, %c0_208] : memref<5x2x32xf32, #tpu.memory_space<vmem>>, vector<1x2x32xf32>
    %331 = vector.shape_cast %330 : vector<1x2x32xf32> to vector<2x32xf32>
    %c0_209 = arith.constant 0 : index
    %c0_210 = arith.constant 0 : index
    %332 = vector.load %arg16[%c0_209, %c0_210] : memref<2x32xf32, #tpu.memory_space<vmem>>, vector<2x32xf32>
    %c0_211 = arith.constant 0 : index
    %c0_212 = arith.constant 0 : index
    %333 = vector.load %arg14[%c0_211, %c0_212] : memref<2x32xf32, #tpu.memory_space<vmem>>, vector<2x32xf32>
    %c0_213 = arith.constant 0 : index
    %c0_214 = arith.constant 0 : index
    %334 = vector.load %arg15[%c0_213, %c0_214] : memref<2x32xf32, #tpu.memory_space<vmem>>, vector<2x32xf32>
    %c0_215 = arith.constant 0 : index
    %c0_216 = arith.constant 0 : index
    %335 = vector.load %arg5[%c0_215, %c0_216] : memref<64x128xf32, #tpu.memory_space<vmem>>, vector<32x128xf32>
    %cst_217 = arith.constant dense<0.000000e+00> : vector<2x128xf32>
    %336 = tpu.matmul %331, %335, %cst_217 {dimension_numbers = #tpu.dot_dimension_numbers<[1], [0], [0], [1], [0, 0, 1, 1], [], []>} : vector<2x32xf32>, vector<32x128xf32>, vector<2x128xf32> -> vector<2x128xf32>
    %c32_218 = arith.constant 32 : index
    %c0_219 = arith.constant 0 : index
    %337 = vector.load %arg5[%c32_218, %c0_219] : memref<64x128xf32, #tpu.memory_space<vmem>>, vector<32x128xf32>
    %cst_220 = arith.constant dense<0.000000e+00> : vector<2x128xf32>
    %338 = tpu.matmul %332, %337, %cst_220 {dimension_numbers = #tpu.dot_dimension_numbers<[1], [0], [0], [1], [0, 0, 1, 1], [], []>} : vector<2x32xf32>, vector<32x128xf32>, vector<2x128xf32> -> vector<2x128xf32>
    %339 = arith.addf %336, %338 : vector<2x128xf32>
    %c0_221 = arith.constant 0 : index
    %c0_222 = arith.constant 0 : index
    %340 = vector.load %arg6[%c0_221, %c0_222] : memref<32x128xf32, #tpu.memory_space<vmem>>, vector<32x128xf32>
    %cst_223 = arith.constant dense<0.000000e+00> : vector<2x128xf32>
    %341 = tpu.matmul %333, %340, %cst_223 {dimension_numbers = #tpu.dot_dimension_numbers<[1], [0], [0], [1], [0, 0, 1, 1], [], []>} : vector<2x32xf32>, vector<32x128xf32>, vector<2x128xf32> -> vector<2x128xf32>
    %342 = arith.addf %339, %341 : vector<2x128xf32>
    %c0_224 = arith.constant 0 : index
    %c0_225 = arith.constant 0 : index
    %343 = vector.load %arg7[%c0_224, %c0_225] : memref<1x128xf32, #tpu.memory_space<vmem>>, vector<1x128xf32>
    %344 = vector.broadcast %343 : vector<1x128xf32> to vector<2x128xf32>
    %345 = arith.addf %342, %344 : vector<2x128xf32>
    %346 = vector.extract_strided_slice %345 {offsets = [0, 0], sizes = [2, 32], strides = [1, 1]} : vector<2x128xf32> to vector<2x32xf32>
    %347 = arith.negf %346 : vector<2x32xf32>
    %348 = math.exp %347 : vector<2x32xf32>
    %cst_226 = arith.constant 1.000000e+00 : f32
    %349 = vector.broadcast %cst_226 : f32 to vector<2x32xf32>
    %350 = arith.addf %349, %348 : vector<2x32xf32>
    %351 = arith.divf %349, %350 : vector<2x32xf32>
    %352 = vector.extract_strided_slice %345 {offsets = [0, 32], sizes = [2, 32], strides = [1, 1]} : vector<2x128xf32> to vector<2x32xf32>
    %353 = arith.negf %352 : vector<2x32xf32>
    %354 = math.exp %353 : vector<2x32xf32>
    %cst_227 = arith.constant 1.000000e+00 : f32
    %355 = vector.broadcast %cst_227 : f32 to vector<2x32xf32>
    %356 = arith.addf %355, %354 : vector<2x32xf32>
    %357 = arith.divf %355, %356 : vector<2x32xf32>
    %358 = vector.extract_strided_slice %345 {offsets = [0, 64], sizes = [2, 32], strides = [1, 1]} : vector<2x128xf32> to vector<2x32xf32>
    %359 = math.tanh %358 : vector<2x32xf32>
    %360 = vector.extract_strided_slice %345 {offsets = [0, 96], sizes = [2, 32], strides = [1, 1]} : vector<2x128xf32> to vector<2x32xf32>
    %361 = arith.negf %360 : vector<2x32xf32>
    %362 = math.exp %361 : vector<2x32xf32>
    %cst_228 = arith.constant 1.000000e+00 : f32
    %363 = vector.broadcast %cst_228 : f32 to vector<2x32xf32>
    %364 = arith.addf %363, %362 : vector<2x32xf32>
    %365 = arith.divf %363, %364 : vector<2x32xf32>
    %366 = arith.mulf %357, %334 : vector<2x32xf32>
    %367 = arith.mulf %351, %359 : vector<2x32xf32>
    %368 = arith.addf %366, %367 : vector<2x32xf32>
    %369 = math.tanh %368 : vector<2x32xf32>
    %370 = arith.mulf %365, %369 : vector<2x32xf32>
    %c0_229 = arith.constant 0 : index
    %c0_230 = arith.constant 0 : index
    %371 = vector.load %arg14[%c0_229, %c0_230] : memref<2x32xf32, #tpu.memory_space<vmem>>, vector<2x32xf32>
    tpu.vector_store %arg14[%c0_229, %c0_230], %370 {strides = array<i32>} : memref<2x32xf32, #tpu.memory_space<vmem>>, vector<2x32xf32>,
    %c0_231 = arith.constant 0 : index
    %c0_232 = arith.constant 0 : index
    %372 = vector.load %arg15[%c0_231, %c0_232] : memref<2x32xf32, #tpu.memory_space<vmem>>, vector<2x32xf32>
    tpu.vector_store %arg15[%c0_231, %c0_232], %368 {strides = array<i32>} : memref<2x32xf32, #tpu.memory_space<vmem>>, vector<2x32xf32>,
    %c0_233 = arith.constant 0 : index
    %c0_234 = arith.constant 0 : index
    %373 = vector.load %arg8[%c0_233, %c0_234] : memref<32x32xf32, #tpu.memory_space<vmem>>, vector<32x32xf32>
    %cst_235 = arith.constant dense<0.000000e+00> : vector<2x32xf32>
    %374 = tpu.matmul %370, %373, %cst_235 {dimension_numbers = #tpu.dot_dimension_numbers<[1], [0], [0], [1], [0, 0, 1, 1], [], []>} : vector<2x32xf32>, vector<32x32xf32>, vector<2x32xf32> -> vector<2x32xf32>
    %c0_236 = arith.constant 0 : index
    %c0_237 = arith.constant 0 : index
    %c0_238 = arith.constant 0 : index
    %375 = vector.load %arg1[%c0_236, %c0_237, %c0_238] : memref<2x8x32xf32, #tpu.memory_space<vmem>>, vector<2x8x32xf32>
    %376 = vector.shape_cast %374 : vector<2x32xf32> to vector<2x1x32xf32>
    %377 = vector.broadcast %376 : vector<2x1x32xf32> to vector<2x8x32xf32>
    %378 = arith.mulf %375, %377 : vector<2x8x32xf32>
    %cst_239 = arith.constant dense<0.000000e+00> : vector<2x8xf32>
    %379 = vector.multi_reduction <add>, %378, %cst_239 [2] : vector<2x8x32xf32> to vector<2x8xf32>
    %cst_240 = arith.constant dense<0xFF800000> : vector<2xf32>
    %380 = vector.multi_reduction <maximumf>, %379, %cst_240 [1] : vector<2x8xf32> to vector<2xf32>
    %381 = vector.shape_cast %380 : vector<2xf32> to vector<2x1xf32>
    %382 = vector.broadcast %381 : vector<2x1xf32> to vector<2x8xf32>
    %383 = arith.subf %379, %382 : vector<2x8xf32>
    %384 = math.exp %383 : vector<2x8xf32>
    %cst_241 = arith.constant dense<0.000000e+00> : vector<2xf32>
    %385 = vector.multi_reduction <add>, %384, %cst_241 [1] : vector<2x8xf32> to vector<2xf32>
    %386 = vector.shape_cast %385 : vector<2xf32> to vector<2x1xf32>
    %387 = tpu.reciprocal %386 {approx = true} : vector<2x1xf32> -> vector<2x1xf32>
    %388 = vector.broadcast %387 : vector<2x1xf32> to vector<2x8xf32>
    %389 = arith.mulf %384, %388 : vector<2x8xf32>
    %390 = vector.shape_cast %389 : vector<2x8xf32> to vector<2x8x1xf32>
    %391 = vector.broadcast %390 : vector<2x8x1xf32> to vector<2x8x32xf32>
    %392 = arith.mulf %391, %375 : vector<2x8x32xf32>
    %cst_242 = arith.constant dense<0.000000e+00> : vector<2x32xf32>
    %393 = vector.multi_reduction <add>, %392, %cst_242 [1] : vector<2x8x32xf32> to vector<2x32xf32>
    %c0_243 = arith.constant 0 : index
    %c0_244 = arith.constant 0 : index
    %394 = vector.load %arg9[%c0_243, %c0_244] : memref<32x32xf32, #tpu.memory_space<vmem>>, vector<32x32xf32>
    %cst_245 = arith.constant dense<0.000000e+00> : vector<2x32xf32>
    %395 = tpu.matmul %370, %394, %cst_245 {dimension_numbers = #tpu.dot_dimension_numbers<[1], [0], [0], [1], [0, 0, 1, 1], [], []>} : vector<2x32xf32>, vector<32x32xf32>, vector<2x32xf32> -> vector<2x32xf32>
    %c0_246 = arith.constant 0 : index
    %c0_247 = arith.constant 0 : index
    %c0_248 = arith.constant 0 : index
    %396 = vector.load %arg2[%c0_246, %c0_247, %c0_248] : memref<2x4x32xf32, #tpu.memory_space<vmem>>, vector<2x4x32xf32>
    %397 = vector.shape_cast %395 : vector<2x32xf32> to vector<2x1x32xf32>
    %398 = vector.broadcast %397 : vector<2x1x32xf32> to vector<2x4x32xf32>
    %399 = arith.mulf %396, %398 : vector<2x4x32xf32>
    %cst_249 = arith.constant dense<0.000000e+00> : vector<2x4xf32>
    %400 = vector.multi_reduction <add>, %399, %cst_249 [2] : vector<2x4x32xf32> to vector<2x4xf32>
    %cst_250 = arith.constant dense<0xFF800000> : vector<2xf32>
    %401 = vector.multi_reduction <maximumf>, %400, %cst_250 [1] : vector<2x4xf32> to vector<2xf32>
    %402 = vector.shape_cast %401 : vector<2xf32> to vector<2x1xf32>
    %403 = vector.broadcast %402 : vector<2x1xf32> to vector<2x4xf32>
    %404 = arith.subf %400, %403 : vector<2x4xf32>
    %405 = math.exp %404 : vector<2x4xf32>
    %cst_251 = arith.constant dense<0.000000e+00> : vector<2xf32>
    %406 = vector.multi_reduction <add>, %405, %cst_251 [1] : vector<2x4xf32> to vector<2xf32>
    %407 = vector.shape_cast %406 : vector<2xf32> to vector<2x1xf32>
    %408 = tpu.reciprocal %407 {approx = true} : vector<2x1xf32> -> vector<2x1xf32>
    %409 = vector.broadcast %408 : vector<2x1xf32> to vector<2x4xf32>
    %410 = arith.mulf %405, %409 : vector<2x4xf32>
    %411 = vector.shape_cast %410 : vector<2x4xf32> to vector<2x4x1xf32>
    %412 = vector.broadcast %411 : vector<2x4x1xf32> to vector<2x4x32xf32>
    %413 = arith.mulf %412, %396 : vector<2x4x32xf32>
    %cst_252 = arith.constant dense<0.000000e+00> : vector<2x32xf32>
    %414 = vector.multi_reduction <add>, %413, %cst_252 [1] : vector<2x4x32xf32> to vector<2x32xf32>
    %c0_253 = arith.constant 0 : index
    %c0_254 = arith.constant 0 : index
    %415 = vector.load %arg10[%c0_253, %c0_254] : memref<96x32xf32, #tpu.memory_space<vmem>>, vector<32x32xf32>
    %cst_255 = arith.constant dense<0.000000e+00> : vector<2x32xf32>
    %416 = tpu.matmul %393, %415, %cst_255 {dimension_numbers = #tpu.dot_dimension_numbers<[1], [0], [0], [1], [0, 0, 1, 1], [], []>} : vector<2x32xf32>, vector<32x32xf32>, vector<2x32xf32> -> vector<2x32xf32>
    %c32_256 = arith.constant 32 : index
    %c0_257 = arith.constant 0 : index
    %417 = vector.load %arg10[%c32_256, %c0_257] : memref<96x32xf32, #tpu.memory_space<vmem>>, vector<32x32xf32>
    %cst_258 = arith.constant dense<0.000000e+00> : vector<2x32xf32>
    %418 = tpu.matmul %370, %417, %cst_258 {dimension_numbers = #tpu.dot_dimension_numbers<[1], [0], [0], [1], [0, 0, 1, 1], [], []>} : vector<2x32xf32>, vector<32x32xf32>, vector<2x32xf32> -> vector<2x32xf32>
    %419 = arith.addf %416, %418 : vector<2x32xf32>
    %c64_259 = arith.constant 64 : index
    %c0_260 = arith.constant 0 : index
    %420 = vector.load %arg10[%c64_259, %c0_260] : memref<96x32xf32, #tpu.memory_space<vmem>>, vector<32x32xf32>
    %cst_261 = arith.constant dense<0.000000e+00> : vector<2x32xf32>
    %421 = tpu.matmul %414, %420, %cst_261 {dimension_numbers = #tpu.dot_dimension_numbers<[1], [0], [0], [1], [0, 0, 1, 1], [], []>} : vector<2x32xf32>, vector<32x32xf32>, vector<2x32xf32> -> vector<2x32xf32>
    %422 = arith.addf %419, %421 : vector<2x32xf32>
    %423 = math.tanh %422 : vector<2x32xf32>
    %c0_262 = arith.constant 0 : index
    %c0_263 = arith.constant 0 : index
    %424 = vector.load %arg16[%c0_262, %c0_263] : memref<2x32xf32, #tpu.memory_space<vmem>>, vector<2x32xf32>
    tpu.vector_store %arg16[%c0_262, %c0_263], %423 {strides = array<i32>} : memref<2x32xf32, #tpu.memory_space<vmem>>, vector<2x32xf32>,
    %c0_264 = arith.constant 0 : index
    %c0_265 = arith.constant 0 : index
    %425 = vector.load %arg11[%c0_264, %c0_265] : memref<32x16xf32, #tpu.memory_space<vmem>>, vector<32x16xf32>
    %cst_266 = arith.constant dense<0.000000e+00> : vector<2x16xf32>
    %426 = tpu.matmul %423, %425, %cst_266 {dimension_numbers = #tpu.dot_dimension_numbers<[1], [0], [0], [1], [0, 0, 1, 1], [], []>} : vector<2x32xf32>, vector<32x16xf32>, vector<2x16xf32> -> vector<2x16xf32>
    %c0_267 = arith.constant 0 : index
    %c0_268 = arith.constant 0 : index
    %427 = vector.load %arg12[%c0_267, %c0_268] : memref<1x16xf32, #tpu.memory_space<vmem>>, vector<1x16xf32>
    %428 = vector.broadcast %427 : vector<1x16xf32> to vector<2x16xf32>
    %429 = arith.addf %426, %428 : vector<2x16xf32>
    %430 = arith.index_cast %328 : i32 to index
    %c0_269 = arith.constant 0 : index
    %c0_270 = arith.constant 0 : index
    %431 = vector.load %arg13[%430, %c0_269, %c0_270] : memref<5x2x16xf32, #tpu.memory_space<vmem>>, vector<1x2x16xf32>
    %432 = vector.shape_cast %431 : vector<1x2x16xf32> to vector<2x16xf32>
    %433 = vector.shape_cast %429 : vector<2x16xf32> to vector<1x2x16xf32>
    tpu.vector_store %arg13[%430, %c0_269, %c0_270], %433 {strides = array<i32>} : memref<5x2x16xf32, #tpu.memory_space<vmem>>, vector<1x2x16xf32>,
    %c4_i32 = arith.constant 4 : i32
    %c1_i32_271 = arith.constant 1 : i32
    %434 = arith.muli %c4_i32, %c1_i32_271 : i32
    %c0_i32_272 = arith.constant 0 : i32
    %435 = arith.addi %c0_i32_272, %434 : i32
    %436 = arith.index_cast %435 : i32 to index
    %c0_273 = arith.constant 0 : index
    %c0_274 = arith.constant 0 : index
    %437 = vector.load %arg0[%436, %c0_273, %c0_274] : memref<5x2x32xf32, #tpu.memory_space<vmem>>, vector<1x2x32xf32>
    %438 = vector.shape_cast %437 : vector<1x2x32xf32> to vector<2x32xf32>
    %c0_275 = arith.constant 0 : index
    %c0_276 = arith.constant 0 : index
    %439 = vector.load %arg16[%c0_275, %c0_276] : memref<2x32xf32, #tpu.memory_space<vmem>>, vector<2x32xf32>
    %c0_277 = arith.constant 0 : index
    %c0_278 = arith.constant 0 : index
    %440 = vector.load %arg14[%c0_277, %c0_278] : memref<2x32xf32, #tpu.memory_space<vmem>>, vector<2x32xf32>
    %c0_279 = arith.constant 0 : index
    %c0_280 = arith.constant 0 : index
    %441 = vector.load %arg15[%c0_279, %c0_280] : memref<2x32xf32, #tpu.memory_space<vmem>>, vector<2x32xf32>
    %c0_281 = arith.constant 0 : index
    %c0_282 = arith.constant 0 : index
    %442 = vector.load %arg5[%c0_281, %c0_282] : memref<64x128xf32, #tpu.memory_space<vmem>>, vector<32x128xf32>
    %cst_283 = arith.constant dense<0.000000e+00> : vector<2x128xf32>
    %443 = tpu.matmul %438, %442, %cst_283 {dimension_numbers = #tpu.dot_dimension_numbers<[1], [0], [0], [1], [0, 0, 1, 1], [], []>} : vector<2x32xf32>, vector<32x128xf32>, vector<2x128xf32> -> vector<2x128xf32>
    %c32_284 = arith.constant 32 : index
    %c0_285 = arith.constant 0 : index
    %444 = vector.load %arg5[%c32_284, %c0_285] : memref<64x128xf32, #tpu.memory_space<vmem>>, vector<32x128xf32>
    %cst_286 = arith.constant dense<0.000000e+00> : vector<2x128xf32>
    %445 = tpu.matmul %439, %444, %cst_286 {dimension_numbers = #tpu.dot_dimension_numbers<[1], [0], [0], [1], [0, 0, 1, 1], [], []>} : vector<2x32xf32>, vector<32x128xf32>, vector<2x128xf32> -> vector<2x128xf32>
    %446 = arith.addf %443, %445 : vector<2x128xf32>
    %c0_287 = arith.constant 0 : index
    %c0_288 = arith.constant 0 : index
    %447 = vector.load %arg6[%c0_287, %c0_288] : memref<32x128xf32, #tpu.memory_space<vmem>>, vector<32x128xf32>
    %cst_289 = arith.constant dense<0.000000e+00> : vector<2x128xf32>
    %448 = tpu.matmul %440, %447, %cst_289 {dimension_numbers = #tpu.dot_dimension_numbers<[1], [0], [0], [1], [0, 0, 1, 1], [], []>} : vector<2x32xf32>, vector<32x128xf32>, vector<2x128xf32> -> vector<2x128xf32>
    %449 = arith.addf %446, %448 : vector<2x128xf32>
    %c0_290 = arith.constant 0 : index
    %c0_291 = arith.constant 0 : index
    %450 = vector.load %arg7[%c0_290, %c0_291] : memref<1x128xf32, #tpu.memory_space<vmem>>, vector<1x128xf32>
    %451 = vector.broadcast %450 : vector<1x128xf32> to vector<2x128xf32>
    %452 = arith.addf %449, %451 : vector<2x128xf32>
    %453 = vector.extract_strided_slice %452 {offsets = [0, 0], sizes = [2, 32], strides = [1, 1]} : vector<2x128xf32> to vector<2x32xf32>
    %454 = arith.negf %453 : vector<2x32xf32>
    %455 = math.exp %454 : vector<2x32xf32>
    %cst_292 = arith.constant 1.000000e+00 : f32
    %456 = vector.broadcast %cst_292 : f32 to vector<2x32xf32>
    %457 = arith.addf %456, %455 : vector<2x32xf32>
    %458 = arith.divf %456, %457 : vector<2x32xf32>
    %459 = vector.extract_strided_slice %452 {offsets = [0, 32], sizes = [2, 32], strides = [1, 1]} : vector<2x128xf32> to vector<2x32xf32>
    %460 = arith.negf %459 : vector<2x32xf32>
    %461 = math.exp %460 : vector<2x32xf32>
    %cst_293 = arith.constant 1.000000e+00 : f32
    %462 = vector.broadcast %cst_293 : f32 to vector<2x32xf32>
    %463 = arith.addf %462, %461 : vector<2x32xf32>
    %464 = arith.divf %462, %463 : vector<2x32xf32>
    %465 = vector.extract_strided_slice %452 {offsets = [0, 64], sizes = [2, 32], strides = [1, 1]} : vector<2x128xf32> to vector<2x32xf32>
    %466 = math.tanh %465 : vector<2x32xf32>
    %467 = vector.extract_strided_slice %452 {offsets = [0, 96], sizes = [2, 32], strides = [1, 1]} : vector<2x128xf32> to vector<2x32xf32>
    %468 = arith.negf %467 : vector<2x32xf32>
    %469 = math.exp %468 : vector<2x32xf32>
    %cst_294 = arith.constant 1.000000e+00 : f32
    %470 = vector.broadcast %cst_294 : f32 to vector<2x32xf32>
    %471 = arith.addf %470, %469 : vector<2x32xf32>
    %472 = arith.divf %470, %471 : vector<2x32xf32>
    %473 = arith.mulf %464, %441 : vector<2x32xf32>
    %474 = arith.mulf %458, %466 : vector<2x32xf32>
    %475 = arith.addf %473, %474 : vector<2x32xf32>
    %476 = math.tanh %475 : vector<2x32xf32>
    %477 = arith.mulf %472, %476 : vector<2x32xf32>
    %c0_295 = arith.constant 0 : index
    %c0_296 = arith.constant 0 : index
    %478 = vector.load %arg14[%c0_295, %c0_296] : memref<2x32xf32, #tpu.memory_space<vmem>>, vector<2x32xf32>
    tpu.vector_store %arg14[%c0_295, %c0_296], %477 {strides = array<i32>} : memref<2x32xf32, #tpu.memory_space<vmem>>, vector<2x32xf32>,
    %c0_297 = arith.constant 0 : index
    %c0_298 = arith.constant 0 : index
    %479 = vector.load %arg15[%c0_297, %c0_298] : memref<2x32xf32, #tpu.memory_space<vmem>>, vector<2x32xf32>
    tpu.vector_store %arg15[%c0_297, %c0_298], %475 {strides = array<i32>} : memref<2x32xf32, #tpu.memory_space<vmem>>, vector<2x32xf32>,
    %c0_299 = arith.constant 0 : index
    %c0_300 = arith.constant 0 : index
    %480 = vector.load %arg8[%c0_299, %c0_300] : memref<32x32xf32, #tpu.memory_space<vmem>>, vector<32x32xf32>
    %cst_301 = arith.constant dense<0.000000e+00> : vector<2x32xf32>
    %481 = tpu.matmul %477, %480, %cst_301 {dimension_numbers = #tpu.dot_dimension_numbers<[1], [0], [0], [1], [0, 0, 1, 1], [], []>} : vector<2x32xf32>, vector<32x32xf32>, vector<2x32xf32> -> vector<2x32xf32>
    %c0_302 = arith.constant 0 : index
    %c0_303 = arith.constant 0 : index
    %c0_304 = arith.constant 0 : index
    %482 = vector.load %arg1[%c0_302, %c0_303, %c0_304] : memref<2x8x32xf32, #tpu.memory_space<vmem>>, vector<2x8x32xf32>
    %483 = vector.shape_cast %481 : vector<2x32xf32> to vector<2x1x32xf32>
    %484 = vector.broadcast %483 : vector<2x1x32xf32> to vector<2x8x32xf32>
    %485 = arith.mulf %482, %484 : vector<2x8x32xf32>
    %cst_305 = arith.constant dense<0.000000e+00> : vector<2x8xf32>
    %486 = vector.multi_reduction <add>, %485, %cst_305 [2] : vector<2x8x32xf32> to vector<2x8xf32>
    %cst_306 = arith.constant dense<0xFF800000> : vector<2xf32>
    %487 = vector.multi_reduction <maximumf>, %486, %cst_306 [1] : vector<2x8xf32> to vector<2xf32>
    %488 = vector.shape_cast %487 : vector<2xf32> to vector<2x1xf32>
    %489 = vector.broadcast %488 : vector<2x1xf32> to vector<2x8xf32>
    %490 = arith.subf %486, %489 : vector<2x8xf32>
    %491 = math.exp %490 : vector<2x8xf32>
    %cst_307 = arith.constant dense<0.000000e+00> : vector<2xf32>
    %492 = vector.multi_reduction <add>, %491, %cst_307 [1] : vector<2x8xf32> to vector<2xf32>
    %493 = vector.shape_cast %492 : vector<2xf32> to vector<2x1xf32>
    %494 = tpu.reciprocal %493 {approx = true} : vector<2x1xf32> -> vector<2x1xf32>
    %495 = vector.broadcast %494 : vector<2x1xf32> to vector<2x8xf32>
    %496 = arith.mulf %491, %495 : vector<2x8xf32>
    %497 = vector.shape_cast %496 : vector<2x8xf32> to vector<2x8x1xf32>
    %498 = vector.broadcast %497 : vector<2x8x1xf32> to vector<2x8x32xf32>
    %499 = arith.mulf %498, %482 : vector<2x8x32xf32>
    %cst_308 = arith.constant dense<0.000000e+00> : vector<2x32xf32>
    %500 = vector.multi_reduction <add>, %499, %cst_308 [1] : vector<2x8x32xf32> to vector<2x32xf32>
    %c0_309 = arith.constant 0 : index
    %c0_310 = arith.constant 0 : index
    %501 = vector.load %arg9[%c0_309, %c0_310] : memref<32x32xf32, #tpu.memory_space<vmem>>, vector<32x32xf32>
    %cst_311 = arith.constant dense<0.000000e+00> : vector<2x32xf32>
    %502 = tpu.matmul %477, %501, %cst_311 {dimension_numbers = #tpu.dot_dimension_numbers<[1], [0], [0], [1], [0, 0, 1, 1], [], []>} : vector<2x32xf32>, vector<32x32xf32>, vector<2x32xf32> -> vector<2x32xf32>
    %c0_312 = arith.constant 0 : index
    %c0_313 = arith.constant 0 : index
    %c0_314 = arith.constant 0 : index
    %503 = vector.load %arg2[%c0_312, %c0_313, %c0_314] : memref<2x4x32xf32, #tpu.memory_space<vmem>>, vector<2x4x32xf32>
    %504 = vector.shape_cast %502 : vector<2x32xf32> to vector<2x1x32xf32>
    %505 = vector.broadcast %504 : vector<2x1x32xf32> to vector<2x4x32xf32>
    %506 = arith.mulf %503, %505 : vector<2x4x32xf32>
    %cst_315 = arith.constant dense<0.000000e+00> : vector<2x4xf32>
    %507 = vector.multi_reduction <add>, %506, %cst_315 [2] : vector<2x4x32xf32> to vector<2x4xf32>
    %cst_316 = arith.constant dense<0xFF800000> : vector<2xf32>
    %508 = vector.multi_reduction <maximumf>, %507, %cst_316 [1] : vector<2x4xf32> to vector<2xf32>
    %509 = vector.shape_cast %508 : vector<2xf32> to vector<2x1xf32>
    %510 = vector.broadcast %509 : vector<2x1xf32> to vector<2x4xf32>
    %511 = arith.subf %507, %510 : vector<2x4xf32>
    %512 = math.exp %511 : vector<2x4xf32>
    %cst_317 = arith.constant dense<0.000000e+00> : vector<2xf32>
    %513 = vector.multi_reduction <add>, %512, %cst_317 [1] : vector<2x4xf32> to vector<2xf32>
    %514 = vector.shape_cast %513 : vector<2xf32> to vector<2x1xf32>
    %515 = tpu.reciprocal %514 {approx = true} : vector<2x1xf32> -> vector<2x1xf32>
    %516 = vector.broadcast %515 : vector<2x1xf32> to vector<2x4xf32>
    %517 = arith.mulf %512, %516 : vector<2x4xf32>
    %518 = vector.shape_cast %517 : vector<2x4xf32> to vector<2x4x1xf32>
    %519 = vector.broadcast %518 : vector<2x4x1xf32> to vector<2x4x32xf32>
    %520 = arith.mulf %519, %503 : vector<2x4x32xf32>
    %cst_318 = arith.constant dense<0.000000e+00> : vector<2x32xf32>
    %521 = vector.multi_reduction <add>, %520, %cst_318 [1] : vector<2x4x32xf32> to vector<2x32xf32>
    %c0_319 = arith.constant 0 : index
    %c0_320 = arith.constant 0 : index
    %522 = vector.load %arg10[%c0_319, %c0_320] : memref<96x32xf32, #tpu.memory_space<vmem>>, vector<32x32xf32>
    %cst_321 = arith.constant dense<0.000000e+00> : vector<2x32xf32>
    %523 = tpu.matmul %500, %522, %cst_321 {dimension_numbers = #tpu.dot_dimension_numbers<[1], [0], [0], [1], [0, 0, 1, 1], [], []>} : vector<2x32xf32>, vector<32x32xf32>, vector<2x32xf32> -> vector<2x32xf32>
    %c32_322 = arith.constant 32 : index
    %c0_323 = arith.constant 0 : index
    %524 = vector.load %arg10[%c32_322, %c0_323] : memref<96x32xf32, #tpu.memory_space<vmem>>, vector<32x32xf32>
    %cst_324 = arith.constant dense<0.000000e+00> : vector<2x32xf32>
    %525 = tpu.matmul %477, %524, %cst_324 {dimension_numbers = #tpu.dot_dimension_numbers<[1], [0], [0], [1], [0, 0, 1, 1], [], []>} : vector<2x32xf32>, vector<32x32xf32>, vector<2x32xf32> -> vector<2x32xf32>
    %526 = arith.addf %523, %525 : vector<2x32xf32>
    %c64_325 = arith.constant 64 : index
    %c0_326 = arith.constant 0 : index
    %527 = vector.load %arg10[%c64_325, %c0_326] : memref<96x32xf32, #tpu.memory_space<vmem>>, vector<32x32xf32>
    %cst_327 = arith.constant dense<0.000000e+00> : vector<2x32xf32>
    %528 = tpu.matmul %521, %527, %cst_327 {dimension_numbers = #tpu.dot_dimension_numbers<[1], [0], [0], [1], [0, 0, 1, 1], [], []>} : vector<2x32xf32>, vector<32x32xf32>, vector<2x32xf32> -> vector<2x32xf32>
    %529 = arith.addf %526, %528 : vector<2x32xf32>
    %530 = math.tanh %529 : vector<2x32xf32>
    %c0_328 = arith.constant 0 : index
    %c0_329 = arith.constant 0 : index
    %531 = vector.load %arg16[%c0_328, %c0_329] : memref<2x32xf32, #tpu.memory_space<vmem>>, vector<2x32xf32>
    tpu.vector_store %arg16[%c0_328, %c0_329], %530 {strides = array<i32>} : memref<2x32xf32, #tpu.memory_space<vmem>>, vector<2x32xf32>,
    %c0_330 = arith.constant 0 : index
    %c0_331 = arith.constant 0 : index
    %532 = vector.load %arg11[%c0_330, %c0_331] : memref<32x16xf32, #tpu.memory_space<vmem>>, vector<32x16xf32>
    %cst_332 = arith.constant dense<0.000000e+00> : vector<2x16xf32>
    %533 = tpu.matmul %530, %532, %cst_332 {dimension_numbers = #tpu.dot_dimension_numbers<[1], [0], [0], [1], [0, 0, 1, 1], [], []>} : vector<2x32xf32>, vector<32x16xf32>, vector<2x16xf32> -> vector<2x16xf32>
    %c0_333 = arith.constant 0 : index
    %c0_334 = arith.constant 0 : index
    %534 = vector.load %arg12[%c0_333, %c0_334] : memref<1x16xf32, #tpu.memory_space<vmem>>, vector<1x16xf32>
    %535 = vector.broadcast %534 : vector<1x16xf32> to vector<2x16xf32>
    %536 = arith.addf %533, %535 : vector<2x16xf32>
    %537 = arith.index_cast %435 : i32 to index
    %c0_335 = arith.constant 0 : index
    %c0_336 = arith.constant 0 : index
    %538 = vector.load %arg13[%537, %c0_335, %c0_336] : memref<5x2x16xf32, #tpu.memory_space<vmem>>, vector<1x2x16xf32>
    %539 = vector.shape_cast %538 : vector<1x2x16xf32> to vector<2x16xf32>
    %540 = vector.shape_cast %536 : vector<2x16xf32> to vector<1x2x16xf32>
    tpu.vector_store %arg13[%537, %c0_335, %c0_336], %540 {strides = array<i32>} : memref<5x2x16xf32, #tpu.memory_space<vmem>>, vector<1x2x16xf32>,
    %c5_i32 = arith.constant 5 : i32
    return
  }
}

</mosaic_0001>

<bundles_post_ra>
// kernel: forward.4
= control target key start
LH: loop header
LB: loop body
LE: loop exit
PB: predicated region body
PF: predicated region fallthrough
CT: control target
= control target key end

     0   :  { %vm43_vm0 = vcmask 254976   ;;  %v3766_v0 = vmov 0.0|0.0   ;;  %v3767_v4 = vmov 0.0   ;;  %vm3768_vm1 = vmmov 0   ;;  %s3770_s20 = smov 32   ;;  %s3773_s28 = smov 96   ;;  %s4533_s4 = inlined_call_operand.vmem [shape: f32[64,128], index: 4, kind: input, shape index: {}]   ;;  %s4534_s5 = inlined_call_operand.vmem [shape: f32[32,128], index: 5, kind: input, shape index: {}]   ;;  %s4535_s2 = inlined_call_operand.vmem [shape: f32[2,32], index: 2, kind: input, shape index: {}]   ;;  %s4536_s13 = inlined_call_operand.vmem [shape: f32[2,32], index: 13, kind: output, shape index: {2}]   ;;  %s4537_s0 = inlined_call_operand.vmem [shape: f32[4,2,32], index: 0, kind: input, shape index: {}]   ;;  %s4538_s3 = inlined_call_operand.vmem [shape: f32[2,32], index: 3, kind: input, shape index: {}]   ;;  %s4539_s14 = inlined_call_operand.vmem [shape: f32[2,32], index: 14, kind: output, shape index: {3}]   ;;  %s4540_s6 = inlined_call_operand.vmem [shape: f32[1,128], index: 6, kind: input, shape index: {}]   ;;  %s4541_s7 = inlined_call_operand.vmem [shape: f32[32,32], index: 7, kind: input, shape index: {}]   ;;  %s4542_s8 = inlined_call_operand.vmem [shape: f32[64,32], index: 8, kind: input, shape index: {}]   ;;  %s4543_s12 = inlined_call_operand.vmem [shape: f32[4,2,32], index: 12, kind: output, shape index: {1}]   ;;  %s4544_s1 = inlined_call_operand.vmem [shape: f32[2,8,32], index: 1, kind: input, shape index: {}]   ;;  %s4545_s9 = inlined_call_operand.vmem [shape: f32[32,16], index: 9, kind: input, shape index: {}]   ;;  %s4546_s10 = inlined_call_operand.vmem [shape: f32[1,16], index: 10, kind: input, shape index: {}]   ;;  %s4547_s11 = inlined_call_operand.vmem [shape: f32[4,2,16], index: 11, kind: output, shape index: {0}]  }
   0x1   :  { %3516 = vmatprep.subr.bf16.mxu0 %v3766_v0  ;;  %v56_v1 = vld [vmem:[%s4533_s4 + $0x20] sm:$0xff]  ;;  %v57_v2 = vld [vmem:[%s4533_s4 + $0x28] sm:$0xff]  ;;  %3522 = vmatprep.subr.bf16.mxu1 %v3766_v0  ;;  %47 = vst.msk [vmem:[#allocation2] sm:$0x3] %vm43_vm0, %v3767_v4  ;;  %v58_v7 = vld [vmem:[%s4533_s4 + $0x30] sm:$0xff]  ;;  %vm60_vm2 = vcmask 261120  }
   0x2   :  { %v52_v3 = vld [vmem:[%s4533_s4] sm:$0xff]  ;;  %v3862_v5 = vpack.c.bf16 %v57_v2, %v56_v1  ;;  %v53_v6 = vld [vmem:[%s4533_s4 + $0x8] sm:$0xff]  ;;  %v59_v8 = vld [vmem:[%s4533_s4 + $0x38] sm:$0xff]  ;;  %3216 = vmatprep.mubr.msk.f32.mxu0 %vm3768_vm1, %v3767_v4  ;;  %3227 = vmatprep.mubr.msk.f32.mxu1 %vm3768_vm1, %v3767_v4  ;;  %v3771_v63 = vmov 1966171168   ;;  %v414_v2 = vlaneseq  ;;  %vm463_vm3 = vcmask 1041409  }
   0x3   :  { %v3877_v9 = vpack.c.bf16 %v53_v6, %v52_v3  ;;  %v54_v10 = vld [vmem:[%s4533_s4 + $0x10] sm:$0xff]  ;;  %v55_v11 = vld [vmem:[%s4533_s4 + $0x18] sm:$0xff]  ;;  %v3886_v12 = vpack.c.bf16 %v59_v8, %v58_v7  ;;  %v207_v14 = vld [vmem:[%s4534_s5] sm:$0xff]  ;;  %v412_v1 = vunpack.c.l.s4 %v3771_v63  ;;  %vm466_vm4 = vcmask 58368  }
   0x4   :  { %3518 = vmatpush3.bf16.msra.mxu0 %v3862_v5  ;;  %v3890_v13 = vpack.c.bf16 %v55_v11, %v54_v10  ;;  %v208_v15 = vld [vmem:[%s4534_s5 + $0x8] sm:$0xff]  ;;  %v42_v16 = vld [vmem:[%s4535_s2] sm:$0x3]  ;;  %v209_v20 = vld [vmem:[%s4534_s5 + $0x10] sm:$0xff]  ;;  %v415_v6 = vshrl.u32 %v414_v2, 7  ;;  %vm787_vm5 = vcmask 123904  }
   0x5   :  { %3524 = vmatpush3.bf16.msra.mxu1 %v3877_v9  ;;  %3519 = vmatprep.subr.bf16.mxu0 %v3766_v0  ;;  %44 = vst.msk [vmem:[%s4536_s13] sm:$0x3] %vm43_vm0, %v42_v16  ;;  %v3907_v18 = vpack.c.bf16 %v208_v15, %v207_v14  ;;  %v48_v19 = vld [vmem:[%s4537_s0] sm:$0x3]  ;;  %v210_v21 = vld [vmem:[%s4534_s5 + $0x18] sm:$0xff]  ;;  %v333_v48 = vld [vmem:[%s4541_s7 + $0x8] sm:$0xff]  ;;  %v413_v3 = vunpack.c.0.s8 %v412_v1 }
   0x6   :  { %3525 = vmatprep.subr.bf16.mxu1 %v3766_v0  ;;  %v3924_v22 = vpack.c.bf16 %v210_v21, %v209_v20  ;;  %v45_v24 = vld [vmem:[%s4538_s3] sm:$0x3]  ;;  %s3769_s3 = smov 64   ;;  %v553_v51 = vld [vmem:[%s4542_s8 + $0x28] sm:$0xff]  ;;  %v334_v52 = vld [vmem:[%s4541_s7 + $0x10] sm:$0xff]  ;;  %v4020_v11 = vsub.s32 0, %v415_v6 }
   0x7   :  { %46 = vst.msk [vmem:[%s4539_s14] sm:$0x3] %vm43_vm0, %v45_v24  ;;  %v3949_v31 = vld [vmem:[%s4540_s6] ss:$0 sm:$0xff]  ;;  %v335_v53 = vld [vmem:[%s4541_s7 + $0x18] sm:$0xff]  ;;  %v554_v55 = vld [vmem:[%s4542_s8 + $0x30] sm:$0xff]  ;;  %v4017_v7 = vsub.s32 %v413_v3, %v415_v6 }
   0x8   :  { %3521 = vmatpush3.bf16.msra.mxu0 %v3886_v12  ;;  %v49_v17 = vld [vmem:[#allocation2] sm:$0x3]  ;;  %v555_v56 = vld [vmem:[%s4542_s8 + $0x38] sm:$0xff]  ;;  %v3990_v57 = vpack.c.bf16 %v335_v53, %v334_v52  ;;  %v4033_v21 = vld [vmem:[%s4544_s1 + $0x8] sm:$0xff] }
   0x9   :  { %3527 = vmatpush3.bf16.msra.mxu1 %v3890_v13  ;;  %3528 = vmatprep.subr.bf16.mxu0 %v3766_v0  ;;  %v332_v47 = vld [vmem:[%s4541_s7] sm:$0xff]  ;;  %v3994_v58 = vpack.c.bf16 %v555_v56, %v554_v55  ;;  %v549_v3 = vld [vmem:[%s4542_s8 + $0x8] sm:$0xff] }
   0xa   :  { %3534 = vmatprep.subr.bf16.mxu1 %v3766_v0  ;;  %v552_v49 = vld [vmem:[%s4542_s8 + $0x20] sm:$0xff]  ;;  %v3970_v50 = vpack.c.bf16 %v333_v48, %v332_v47 }
   0xb   :  { %3217 = vmatmul.mubr.msk.f32.vlgmr.msra.gmra.mrb[0].mxu0 %vm60_vm2, %v49_v17  ;;  %v3981_v54 = vpack.c.bf16 %v553_v51, %v552_v49  ;;  %v4026_v17 = vld [vmem:[%s4544_s1] sm:$0xff] }
   0xc   :  { %3228 = vmatmul.mubr.msk.f32.vlgmr.msra.gmra.mrb[0].mxu1 %vm60_vm2, %v48_v19  ;;  %3530 = vmatpush3.bf16.msra.mxu0 %v3907_v18  ;;  %v50_v23 = vld [vmem:[%s4536_s13] sm:$0x3] }
   0xd   :  { %3531 = vmatprep.subr.bf16.mxu0 %v3766_v0  ;;  %3238 = vmatprep.mubr.msk.f32.mxu0 %vm3768_vm1, %v3767_v4 }
   0xe   :  { %3249 = vmatprep.mubr.msk.f32.mxu1 %vm3768_vm1, %v3767_v4  ;;  %v51_v36 = vld [vmem:[%s4539_s14] sm:$0x3]  ;;  %3536 = vmatpush3.bf16.msra.mxu1 %v3970_v50 }
   0xf   :  { %3537 = vmatprep.subr.bf16.mxu1 %v3766_v0 }
  0x10   :  { %3533 = vmatpush3.bf16.msra.mxu0 %v3924_v22 }
  0x11   :  { %3540 = vmatprep.subr.bf16.mxu0 %v3766_v0 }
  0x12   :  { %3539 = vmatpush3.bf16.msra.mxu1 %v3990_v57 }
  0x13   :  { %3239 = vmatmul.mubr.msk.f32.vlgmr.msra.gmra.mrb[2].mxu0 %vm60_vm2, %v50_v23  ;;  %3552 = vmatprep.subr.bf16.mxu1 %v3766_v0 }
  0x14   :  { %3260 = vmatprep.mubr.msk.f32.mxu0 %vm3768_vm1, %v3767_v4  ;;  %3542 = vmatpush3.bf16.msra.mxu0 %v3981_v54 }
  0x15   :  { %3543 = vmatprep.subr.bf16.mxu0 %v3766_v0 }
  0x18   :  { %3545 = vmatpush3.bf16.msra.mxu0 %v3994_v58 }
  0x19   :  { %3546 = vmatprep.subr.bf16.mxu0 %v3766_v0 }
  0xde   :  { %v130_v25 = vpop.f32.mrb[0].mxu0 }
  0xdf   :  { %v3218_v26 = vpop.f32.mrb[1].mxu0  ;;  %v203_v27 = vpop.f32.mrb[0].mxu1 }
  0xe0   :  { %v204_v28 = vadd.f32 %v203_v27, %v130_v25  ;;  %v3229_v29 = vpop.f32.mrb[1].mxu1 }
  0xe6   :  { %v280_v30 = vpop.f32.mrb[2].mxu0 }
  0xe7   :  { %v284_v32 = vadd.f32 %v280_v30, %v204_v28  ;;  %v3240_v33 = vpop.f32.mrb[3].mxu0  ;;  %v454_v28 = vand.u32 127, %v414_v2 }
  0xe9   :  { %v292_v34 = vadd.f32 %v3949_v31, %v284_v32  ;;  %v4040_v29 = vsub.s32 %v454_v28, %v415_v6 }
  0xeb   :  { %3702 = vtanh.f32 %v292_v34  ;;  %v3023_v37 = vmul.f32 -1.442695, %v292_v34 }
  0xed   :  { %3704 = vpow2.f32 %v3023_v37  ;;  %v3772_v37 = vmov 0  }
  0xee   :  { %3701 = vset.pattern.permute.xlu0 %v3772_v37  ;;  %3700 = vset.pattern.permute.xlu1 %v3772_v37 }
  0xf5   :  { %v3703_v35 = vpop.eup %3702 }
  0xf6   :  { %306 = vrot.lane.b32.xlu0 %v3703_v35, %s3769_s3 }
  0xf7   :  { %v3705_v38 = vpop.eup %3704 }
  0xf8   :  { %v296_v39 = vadd.f32 1.0, %v3705_v38  ;;  %v4046_v38 = vsub.s32 1, %v415_v6 }
  0xfa   :  { %301 = vrot.lane.b32.xlu0 %v51_v36, %s3770_s20  ;;  %3706 = vrcp.f32 %v296_v39 }
 0x104   :  { %v3707_v40 = vpop.eup %3706 }
 0x168   :  { %v307_v41 = vpop.permute.xlu0 %306 }
 0x169   :  { %v309_v42 = vmul.f32 %v3707_v40, %v307_v41 }
 0x16b   :  { %311 = vrot.lane.b32.xlu1 %v309_v42, %s3770_s20 }
 0x16c   :  { %v302_v43 = vpop.permute.xlu0 %301 }
 0x16d   :  { %v304_v44 = vmul.f32 %v3707_v40, %v302_v43 }
 0x1dd   :  { %v312_v45 = vpop.permute.xlu1 %311 }
 0x1de   :  { %v3958_v46 = vadd.f32 %v312_v45, %v304_v44 }
 0x1e0   :  { %3708 = vtanh.f32 %v3958_v46 }
 0x1ea   :  { %v3709_v59 = vpop.eup %3708 }
 0x1eb   :  { %317 = vrot.lane.b32.xlu1 %v3709_v59, %s3769_s3 }
 0x25d   :  { %v318_v60 = vpop.permute.xlu1 %317 }
 0x25e   :  { %v320_v61 = vmul.f32 %v3707_v40, %v318_v60 }
 0x260   :  { %322 = vrot.lane.b32.xlu0 %v320_v61, %s3770_s20 }
 0x2d2   :  { %v323_v62 = vpop.permute.xlu0 %322 }
 0x2d3   :  { %325 = vst.msk [vmem:[%s4536_s13] sm:$0x3] %vm43_vm0, %v323_v62  ;;  %331 = vst.msk [vmem:[%s4543_s12] sm:$0x3] %vm43_vm0, %v323_v62  ;;  %3250 = vmatmul.mubr.msk.f32.vlgmr.msra.gmra.mrb[2].mxu1 %vm60_vm2, %v323_v62  ;;  %3261 = vmatmul.mubr.msk.f32.vlgmr.msra.gmra.mrb[4].mxu0 %vm60_vm2, %v323_v62 }
 0x2d4   :  { %3271 = vmatprep.mubr.msk.f32.mxu0 %vm3768_vm1, %v3767_v4  ;;  %3282 = vmatprep.mubr.msk.f32.mxu1 %vm3768_vm1, %v3767_v4 }
 0x3a6   :  { %v404_v8 = vpop.f32.mrb[2].mxu1 }
 0x3a7   :  { %v417_v10 = vrot.slane %v404_v8, %v4017_v7  ;;  %v3251_v14 = vpop.f32.mrb[3].mxu1  ;;  %v550_v8 = vld [vmem:[%s4542_s8 + $0x10] sm:$0xff] }
 0x3a9   :  { %v418_v15 = vcombine.high %v417_v10, %v417_v10  ;;  %v425_v16 = vrot.slane %v417_v10, %v4017_v7  ;;  %v551_v10 = vld [vmem:[%s4542_s8 + $0x18] sm:$0xff] }
 0x3aa   :  { %v4078_v14 = vpack.c.bf16 %v551_v10, %v550_v8 }
 0x3ab   :  { %v432_v19 = vrot.slane %v418_v15, %v4017_v7  ;;  %v436_v20 = vrot.slane %v425_v16, %v4020_v11 }
 0x3ad   :  { %v443_v23 = vmul.f32 %v436_v20, %v4026_v17  ;;  %v440_v24 = vrot.slane %v432_v19, %v4020_v11 }
 0x3af   :  { %v445_v25 = vsel %vm60_vm2, %v443_v23, 0.0  ;;  %v444_v26 = vmul.f32 %v440_v24, %v4033_v21 }
 0x3b0   :  { %446 = vadd.xlane.f32.xlu1 %v445_v25 }
 0x3b1   :  { %v448_v27 = vsel %vm60_vm2, %v444_v26, 0.0 }
 0x3b2   :  { %449 = vadd.xlane.f32.xlu0 %v448_v27 }
 0x43d   :  { %v447_v30 = vpop.xlane.xlu1 %446 }
 0x43e   :  { %v458_v33 = vrot.slane %v447_v30, %v4040_v29 }
 0x43f   :  { %v450_v32 = vpop.xlane.xlu0 %449 }
 0x440   :  { %v462_v34 = vrot.slane %v450_v32, %v4040_v29 }
 0x442   :  { %v464_v35 = vsel %vm463_vm3, %v462_v34, %v458_v33 }
 0x443   :  { %v467_v36 = vsel %vm466_vm4, %v464_v35, -inf }
 0x444   :  { %468 = vmax.xlane.f32.xlu0 %v467_v36 }
 0x4d1   :  { %v469_v39 = vpop.xlane.xlu0 %468 }
 0x4d2   :  { %v474_v40 = vrot.slane %v469_v39, %v4020_v11  ;;  %v478_v41 = vrot.slane %v469_v39, %v4046_v38 }
 0x4d4   :  { %v481_v42 = vsub.f32 %v447_v30, %v474_v40  ;;  %v482_v43 = vsub.f32 %v450_v32, %v478_v41  ;;  %v703_v41 = vld [vmem:[%s4545_s9] sm:$0xff] }
 0x4d6   :  { %v483_v44 = vmul.f32 1.442695, %v481_v42  ;;  %v485_v45 = vmul.f32 1.442695, %v482_v43  ;;  %v704_v42 = vld [vmem:[%s4545_s9 + $0x8] sm:$0xff] }
 0x4d7   :  { %v4100_v43 = vpack.c.bf16 %v704_v42, %v703_v41 }
 0x4d8   :  { %3710 = vpow2.f32 %v483_v44  ;;  %v705_v44 = vld [vmem:[%s4545_s9 + $0x10] sm:$0xff] }
 0x4d9   :  { %3712 = vpow2.f32 %v485_v45  ;;  %3554 = vmatpush3.bf16.msra.mxu1 %v4100_v43  ;;  %v706_v45 = vld [vmem:[%s4545_s9 + $0x18] sm:$0xff] }
 0x4da   :  { %3555 = vmatprep.subr.bf16.mxu1 %v3766_v0 }
 0x4e2   :  { %v3711_v47 = vpop.eup %3710 }
 0x4e3   :  { %v3713_v48 = vpop.eup %3712  ;;  %490 = vperm.xlu1 %3700, %v3711_v47  }
 0x4e4   :  { %493 = vperm.xlu0 %3701, %v3713_v48  }
 0x562   :  { %v491_v49 = vpop.permute.xlu1 %490 }
 0x563   :  { %v494_v51 = vpop.permute.xlu0 %493  ;;  %v498_v52 = vrot.slane %v491_v49, %v4040_v29 }
 0x564   :  { %v502_v53 = vrot.slane %v494_v51, %v4040_v29 }
 0x566   :  { %v503_v55 = vsel %vm463_vm3, %v502_v53, %v498_v52 }
 0x567   :  { %v505_v56 = vsel %vm466_vm4, %v503_v55, 0.0  ;;  %v792_v55 = vld [vmem:[%s4536_s13] sm:$0x3] }
 0x568   :  { %506 = vadd.xlane.f32.xlu1 %v505_v56 }
 0x579   :  { %327 = vrot.lane.b32.xlu1 %v3958_v46, %s3773_s28  ;;  %v548_v46 = vld [vmem:[%s4542_s8] sm:$0xff] }
 0x57a   :  { %v4068_v6 = vpack.c.bf16 %v549_v3, %v548_v46 }
 0x57c   :  { %3548 = vmatpush3.bf16.msra.mxu0 %v4068_v6 }
 0x57d   :  { %3549 = vmatprep.subr.bf16.mxu0 %v3766_v0 }
 0x580   :  { %3551 = vmatpush3.bf16.msra.mxu0 %v4078_v14 }
 0x581   :  { %3564 = vmatprep.subr.bf16.mxu0 %v3766_v0 }
 0x5f5   :  { %v507_v59 = vpop.xlane.xlu1 %506 }
 0x5f6   :  { %3714 = vrcp.f32 %v507_v59 }
 0x5f9   :  { %v328_v60 = vpop.permute.xlu1 %327 }
 0x5fa   :  { %330 = vst.msk [vmem:[%s4539_s14] sm:$0x3] %vm43_vm0, %v328_v60  ;;  %v4152_v60 = vld [vmem:[%s4546_s10] ss:$0 sm:$0xff] }
 0x600   :  { %v3715_v61 = vpop.eup %3714 }
 0x601   :  { %v513_v62 = vrot.slane %v3715_v61, %v4020_v11  ;;  %v517_v1 = vrot.slane %v3715_v61, %v4046_v38 }
 0x603   :  { %v520_v63 = vmul.f32 %v3711_v47, %v513_v62  ;;  %v521_v2 = vmul.f32 %v3713_v48, %v517_v1  ;;  %v4110_v47 = vpack.c.bf16 %v706_v45, %v705_v44  ;;  %v3029_v48 = vld [vmem:[%s4537_s0 + $0x2] sm:$0x3] }
 0x605   :  { %524 = vperm.xlu0 %3701, %v520_v63   ;;  %3557 = vmatpush3.bf16.msra.mxu1 %v4110_v47 }
 0x606   :  { %3558 = vmatprep.subr.bf16.mxu1 %v3766_v0 }
 0x609   :  { %529 = vperm.xlu0 %3701, %v521_v2  }
 0x684   :  { %v525_v15 = vpop.permute.xlu0 %524 }
 0x685   :  { %v532_v16 = vmul.f32 %v525_v15, %v4026_v17 }
 0x687   :  { %v534_v19 = vsel %vm60_vm2, %v532_v16, 0.0 }
 0x688   :  { %v535_v20 = vrot.slane %v534_v19, 4  ;;  %v530_v23 = vpop.permute.xlu0 %529 }
 0x689   :  { %v533_v24 = vmul.f32 %v530_v23, %v4033_v21 }
 0x68a   :  { %v536_v25 = vadd.f32 %v535_v20, %v534_v19  ;;  %v793_v19 = vld [vmem:[%s4539_s14] sm:$0x3] }
 0x68b   :  { %v541_v26 = vsel %vm60_vm2, %v533_v24, 0.0 }
 0x68c   :  { %v537_v27 = vrot.slane %v536_v25, 2  ;;  %v542_v28 = vrot.slane %v541_v26, 4 }
 0x68e   :  { %v538_v30 = vadd.f32 %v537_v27, %v536_v25  ;;  %v543_v32 = vadd.f32 %v542_v28, %v541_v26 }
 0x690   :  { %v544_v33 = vrot.slane %v543_v32, 2  ;;  %v539_v34 = vrot.slane %v538_v30, 1 }
 0x692   :  { %v545_v35 = vadd.f32 %v544_v33, %v543_v32  ;;  %v540_v37 = vadd.f32 %v539_v34, %v538_v30 }
 0x694   :  { %v546_v36 = vrot.slane %v545_v35, 1 }
 0x696   :  { %v547_v39 = vadd.f32 %v546_v36, %v545_v35 }
 0x698   :  { %v628_v40 = vsel %vm463_vm3, %v547_v39, %v540_v37 }
 0x699   :  { %3272 = vmatmul.mubr.msk.f32.vlgmr.msra.gmra.mrb[4].mxu0 %vm60_vm2, %v628_v40 }
 0x69a   :  { %3566 = vmatpush3.bf16.msra.mxu0 %v3877_v9  ;;  %3304 = vmatprep.mubr.msk.f32.mxu0 %vm3768_vm1, %v3767_v4 }
 0x69b   :  { %3567 = vmatprep.subr.bf16.mxu0 %v3766_v0 }
 0x69e   :  { %3569 = vmatpush3.bf16.msra.mxu0 %v3890_v13 }
 0x69f   :  { %3576 = vmatprep.subr.bf16.mxu0 %v3766_v0 }
 0x6a1   :  { %3305 = vmatmul.mubr.msk.f32.vlgmr.msra.gmra.mrb[6].mxu0 %vm60_vm2, %v3029_v48 }
 0x6a2   :  { %3578 = vmatpush3.bf16.msra.mxu0 %v3970_v50  ;;  %3326 = vmatprep.mubr.msk.f32.mxu0 %vm3768_vm1, %v3767_v4 }
 0x6a3   :  { %3579 = vmatprep.subr.bf16.mxu0 %v3766_v0 }
 0x6a6   :  { %3581 = vmatpush3.bf16.msra.mxu0 %v3990_v57 }
 0x6a7   :  { %3594 = vmatprep.subr.bf16.mxu0 %v3766_v0 }
 0x76c   :  { %v697_v49 = vpop.f32.mrb[4].mxu0 }
 0x76d   :  { %3716 = vtanh.f32 %v697_v49  ;;  %v3273_v51 = vpop.f32.mrb[5].mxu0 }
 0x774   :  { %v944_v56 = vpop.f32.mrb[6].mxu0 }
 0x775   :  { %v3306_v59 = vpop.f32.mrb[7].mxu0 }
 0x777   :  { %v3717_v52 = vpop.eup %3716 }
 0x778   :  { %702 = vst.msk [vmem:[#allocation2] sm:$0x3] %vm43_vm0, %v3717_v52  ;;  %3283 = vmatmul.mubr.msk.f32.vlgmr.msra.gmra.mrb[4].mxu1 %vm60_vm2, %v3717_v52 }
 0x779   :  { %3560 = vmatpush3.bf16.msra.mxu1 %v3862_v5  ;;  %3293 = vmatprep.mubr.msk.f32.mxu1 %vm3768_vm1, %v3767_v4 }
 0x77a   :  { %3561 = vmatprep.subr.bf16.mxu1 %v3766_v0 }
 0x77d   :  { %3563 = vmatpush3.bf16.msra.mxu1 %v3886_v12 }
 0x77e   :  { %3570 = vmatprep.subr.bf16.mxu1 %v3766_v0 }
 0x77f   :  { %v791_v53 = vld [vmem:[#allocation2] sm:$0x3] }
 0x780   :  { %3294 = vmatmul.mubr.msk.f32.vlgmr.msra.gmra.mrb[6].mxu1 %vm60_vm2, %v791_v53 }
 0x781   :  { %3572 = vmatpush3.bf16.msra.mxu1 %v3907_v18  ;;  %3315 = vmatprep.mubr.msk.f32.mxu1 %vm3768_vm1, %v3767_v4 }
 0x782   :  { %3573 = vmatprep.subr.bf16.mxu1 %v3766_v0 }
 0x785   :  { %3575 = vmatpush3.bf16.msra.mxu1 %v3924_v22 }
 0x786   :  { %3582 = vmatprep.subr.bf16.mxu1 %v3766_v0 }
 0x788   :  { %3316 = vmatmul.mubr.msk.f32.vlgmr.msra.gmra.mrb[8].mxu1 %vm60_vm2, %v792_v55 }
 0x789   :  { %3584 = vmatpush3.bf16.msra.mxu1 %v3981_v54  ;;  %3337 = vmatprep.mubr.msk.f32.mxu1 %vm3768_vm1, %v3767_v4 }
 0x78a   :  { %3585 = vmatprep.subr.bf16.mxu1 %v3766_v0 }
 0x78d   :  { %3587 = vmatpush3.bf16.msra.mxu1 %v3994_v58 }
 0x78e   :  { %3588 = vmatprep.subr.bf16.mxu1 %v3766_v0 }
 0x84b   :  { %v783_v61 = vpop.f32.mrb[4].mxu1 }
 0x84c   :  { %v784_v62 = vadd.f32 %v4152_v60, %v783_v61  ;;  %v3284_v63 = vpop.f32.mrb[5].mxu1 }
 0x84e   :  { %788 = vst.msk [vmem:[%s4547_s11] sm:$0x3] %vm787_vm5, %v784_v62 }
 0x853   :  { %v871_v1 = vpop.f32.mrb[6].mxu1 }
 0x854   :  { %v945_v2 = vadd.f32 %v944_v56, %v871_v1  ;;  %v3295_v46 = vpop.f32.mrb[7].mxu1 }
 0x85b   :  { %v1021_v3 = vpop.f32.mrb[8].mxu1 }
 0x85c   :  { %v1025_v8 = vadd.f32 %v1021_v3, %v945_v2  ;;  %v3317_v10 = vpop.f32.mrb[9].mxu1 }
 0x85e   :  { %v1033_v15 = vadd.f32 %v3949_v31, %v1025_v8 }
 0x860   :  { %3718 = vtanh.f32 %v1033_v15  ;;  %v3034_v20 = vmul.f32 -1.442695, %v1033_v15 }
 0x862   :  { %3720 = vpow2.f32 %v3034_v20 }
 0x86a   :  { %v3719_v16 = vpop.eup %3718 }
 0x86b   :  { %1047 = vrot.lane.b32.xlu0 %v3719_v16, %s3769_s3 }
 0x86c   :  { %v3721_v23 = vpop.eup %3720 }
 0x86d   :  { %v1037_v24 = vadd.f32 1.0, %v3721_v23 }
 0x86f   :  { %1042 = vrot.lane.b32.xlu0 %v793_v19, %s3770_s20  ;;  %3722 = vrcp.f32 %v1037_v24 }
 0x879   :  { %v3723_v25 = vpop.eup %3722 }
 0x8dd   :  { %v1048_v26 = vpop.permute.xlu0 %1047 }
 0x8de   :  { %v1050_v27 = vmul.f32 %v3723_v25, %v1048_v26 }
 0x8e0   :  { %1052 = vrot.lane.b32.xlu0 %v1050_v27, %s3770_s20 }
 0x8e1   :  { %v1043_v28 = vpop.permute.xlu0 %1042 }
 0x8e2   :  { %v1045_v30 = vmul.f32 %v3723_v25, %v1043_v28 }
 0x952   :  { %v1053_v32 = vpop.permute.xlu0 %1052 }
 0x953   :  { %v4166_v33 = vadd.f32 %v1053_v32, %v1045_v30 }
 0x955   :  { %3724 = vtanh.f32 %v4166_v33 }
 0x95f   :  { %v3725_v34 = vpop.eup %3724 }
 0x960   :  { %1058 = vrot.lane.b32.xlu0 %v3725_v34, %s3769_s3 }
 0x9d2   :  { %v1059_v35 = vpop.permute.xlu0 %1058 }
 0x9d3   :  { %v1061_v36 = vmul.f32 %v3723_v25, %v1059_v35 }
 0x9d5   :  { %1063 = vrot.lane.b32.xlu1 %v1061_v36, %s3770_s20 }
 0xa47   :  { %v1064_v37 = vpop.permute.xlu1 %1063 }
 0xa48   :  { %1066 = vst.msk [vmem:[%s4536_s13] sm:$0x3] %vm43_vm0, %v1064_v37  ;;  %3035 = vst.msk [vmem:[%s4543_s12 + $0x2] sm:$0x3] %vm43_vm0, %v1064_v37  ;;  %3327 = vmatmul.mubr.msk.f32.vlgmr.msra.gmra.mrb[8].mxu0 %vm60_vm2, %v1064_v37  ;;  %3338 = vmatmul.mubr.msk.f32.vlgmr.msra.gmra.mrb[10].mxu1 %vm60_vm2, %v1064_v37 }
 0xa49   :  { %3590 = vmatpush3.bf16.msra.mxu1 %v4068_v6  ;;  %3348 = vmatprep.mubr.msk.f32.mxu1 %vm3768_vm1, %v3767_v4 }
 0xa4a   :  { %3591 = vmatprep.subr.bf16.mxu1 %v3766_v0  ;;  %3596 = vmatpush3.bf16.msra.mxu0 %v4100_v43 }
 0xa4b   :  { %3597 = vmatprep.subr.bf16.mxu0 %v3766_v0  ;;  %3359 = vmatprep.mubr.msk.f32.mxu0 %vm3768_vm1, %v3767_v4 }
 0xa4d   :  { %3593 = vmatpush3.bf16.msra.mxu1 %v4078_v14 }
 0xa4e   :  { %3599 = vmatpush3.bf16.msra.mxu0 %v4110_v47  ;;  %3606 = vmatprep.subr.bf16.mxu1 %v3766_v0 }
 0xa4f   :  { %3600 = vmatprep.subr.bf16.mxu0 %v3766_v0 }
 0xb1b   :  { %v1146_v39 = vpop.f32.mrb[8].mxu0 }
 0xb1c   :  { %v1159_v40 = vrot.slane %v1146_v39, %v4017_v7  ;;  %v3328_v41 = vpop.f32.mrb[9].mxu0 }
 0xb1e   :  { %v1160_v42 = vcombine.high %v1159_v40, %v1159_v40  ;;  %v1167_v44 = vrot.slane %v1159_v40, %v4017_v7 }
 0xb20   :  { %v1174_v45 = vrot.slane %v1160_v42, %v4017_v7  ;;  %v1178_v48 = vrot.slane %v1167_v44, %v4020_v11 }
 0xb22   :  { %v1185_v49 = vmul.f32 %v1178_v48, %v4026_v17  ;;  %v1182_v51 = vrot.slane %v1174_v45, %v4020_v11 }
 0xb24   :  { %v1187_v52 = vsel %vm60_vm2, %v1185_v49, 0.0  ;;  %v1186_v53 = vmul.f32 %v1182_v51, %v4033_v21 }
 0xb25   :  { %1188 = vadd.xlane.f32.xlu0 %v1187_v52 }
 0xb26   :  { %v1190_v55 = vsel %vm60_vm2, %v1186_v53, 0.0 }
 0xb27   :  { %1191 = vadd.xlane.f32.xlu1 %v1190_v55 }
 0xbb2   :  { %v1189_v56 = vpop.xlane.xlu0 %1188 }
 0xbb3   :  { %v1198_v61 = vrot.slane %v1189_v56, %v4040_v29 }
 0xbb4   :  { %v1192_v59 = vpop.xlane.xlu1 %1191 }
 0xbb5   :  { %v1202_v62 = vrot.slane %v1192_v59, %v4040_v29 }
 0xbb7   :  { %v1203_v63 = vsel %vm463_vm3, %v1202_v62, %v1198_v61 }
 0xbb8   :  { %v1205_v1 = vsel %vm466_vm4, %v1203_v63, -inf }
 0xbb9   :  { %1206 = vmax.xlane.f32.xlu0 %v1205_v1 }
 0xc46   :  { %v1207_v2 = vpop.xlane.xlu0 %1206 }
 0xc47   :  { %v1212_v46 = vrot.slane %v1207_v2, %v4020_v11  ;;  %v1216_v3 = vrot.slane %v1207_v2, %v4046_v38 }
 0xc49   :  { %v1219_v8 = vsub.f32 %v1189_v56, %v1212_v46  ;;  %v1220_v10 = vsub.f32 %v1192_v59, %v1216_v3  ;;  %v3042_v46 = vld [vmem:[%s4537_s0 + $0x4] sm:$0x3] }
 0xc4b   :  { %v1221_v15 = vmul.f32 1.442695, %v1219_v8  ;;  %v1223_v16 = vmul.f32 1.442695, %v1220_v10 }
 0xc4d   :  { %3726 = vpow2.f32 %v1221_v15 }
 0xc4e   :  { %3728 = vpow2.f32 %v1223_v16 }
 0xc57   :  { %v3727_v19 = vpop.eup %3726 }
 0xc58   :  { %v3729_v20 = vpop.eup %3728  ;;  %1228 = vperm.xlu0 %3701, %v3727_v19  }
 0xc59   :  { %1231 = vperm.xlu1 %3700, %v3729_v20  }
 0xcd7   :  { %v1229_v23 = vpop.permute.xlu0 %1228 }
 0xcd8   :  { %v1232_v24 = vpop.permute.xlu1 %1231  ;;  %v1236_v25 = vrot.slane %v1229_v23, %v4040_v29 }
 0xcd9   :  { %v1240_v26 = vrot.slane %v1232_v24, %v4040_v29 }
 0xcdb   :  { %v1241_v27 = vsel %vm463_vm3, %v1240_v26, %v1236_v25 }
 0xcdc   :  { %v1243_v28 = vsel %vm466_vm4, %v1241_v27, 0.0 }
 0xcdd   :  { %1244 = vadd.xlane.f32.xlu1 %v1243_v28 }
 0xd6a   :  { %v1245_v30 = vpop.xlane.xlu1 %1244 }
 0xd6b   :  { %3730 = vrcp.f32 %v1245_v30 }
 0xd75   :  { %v3731_v32 = vpop.eup %3730 }
 0xd76   :  { %v1251_v34 = vrot.slane %v3731_v32, %v4020_v11  ;;  %v1255_v36 = vrot.slane %v3731_v32, %v4046_v38 }
 0xd78   :  { %v1258_v35 = vmul.f32 %v3727_v19, %v1251_v34  ;;  %v1259_v37 = vmul.f32 %v3729_v20, %v1255_v36 }
 0xd7a   :  { %1262 = vperm.xlu0 %3701, %v1258_v35  }
 0xd7e   :  { %1267 = vperm.xlu0 %3701, %v1259_v37  }
 0xd82   :  { %1068 = vrot.lane.b32.xlu0 %v4166_v33, %s3773_s28 }
 0xdf9   :  { %v1263_v39 = vpop.permute.xlu0 %1262 }
 0xdfa   :  { %v1270_v40 = vmul.f32 %v1263_v39, %v4026_v17 }
 0xdfc   :  { %v1272_v41 = vsel %vm60_vm2, %v1270_v40, 0.0 }
 0xdfd   :  { %v1273_v42 = vrot.slane %v1272_v41, 4  ;;  %v1268_v44 = vpop.permute.xlu0 %1267 }
 0xdfe   :  { %v1271_v45 = vmul.f32 %v1268_v44, %v4033_v21 }
 0xdff   :  { %v1274_v48 = vadd.f32 %v1273_v42, %v1272_v41 }
 0xe00   :  { %v1279_v49 = vsel %vm60_vm2, %v1271_v45, 0.0 }
 0xe01   :  { %v1275_v51 = vrot.slane %v1274_v48, 2  ;;  %v1280_v52 = vrot.slane %v1279_v49, 4  ;;  %v1069_v53 = vpop.permute.xlu0 %1068 }
 0xe02   :  { %1071 = vst.msk [vmem:[%s4539_s14] sm:$0x3] %vm43_vm0, %v1069_v53 }
 0xe03   :  { %v1276_v33 = vadd.f32 %v1275_v51, %v1274_v48  ;;  %v1281_v55 = vadd.f32 %v1280_v52, %v1279_v49 }
 0xe05   :  { %v1282_v56 = vrot.slane %v1281_v55, 2  ;;  %v1277_v59 = vrot.slane %v1276_v33, 1 }
 0xe07   :  { %v1283_v61 = vadd.f32 %v1282_v56, %v1281_v55  ;;  %v1278_v63 = vadd.f32 %v1277_v59, %v1276_v33 }
 0xe09   :  { %v1284_v62 = vrot.slane %v1283_v61, 1  ;;  %v1531_v24 = vld [vmem:[%s4539_s14] sm:$0x3] }
 0xe0b   :  { %v1285_v1 = vadd.f32 %v1284_v62, %v1283_v61 }
 0xe0d   :  { %v1366_v2 = vsel %vm463_vm3, %v1285_v1, %v1278_v63 }
 0xe0e   :  { %3349 = vmatmul.mubr.msk.f32.vlgmr.msra.gmra.mrb[10].mxu1 %vm60_vm2, %v1366_v2 }
 0xe0f   :  { %3608 = vmatpush3.bf16.msra.mxu1 %v3877_v9  ;;  %3381 = vmatprep.mubr.msk.f32.mxu1 %vm3768_vm1, %v3767_v4 }
 0xe10   :  { %3609 = vmatprep.subr.bf16.mxu1 %v3766_v0 }
 0xe13   :  { %3611 = vmatpush3.bf16.msra.mxu1 %v3890_v13 }
 0xe14   :  { %3618 = vmatprep.subr.bf16.mxu1 %v3766_v0 }
 0xe16   :  { %3382 = vmatmul.mubr.msk.f32.vlgmr.msra.gmra.mrb[12].mxu1 %vm60_vm2, %v3042_v46 }
 0xe17   :  { %3620 = vmatpush3.bf16.msra.mxu1 %v3970_v50  ;;  %3403 = vmatprep.mubr.msk.f32.mxu1 %vm3768_vm1, %v3767_v4 }
 0xe18   :  { %3621 = vmatprep.subr.bf16.mxu1 %v3766_v0 }
 0xe1b   :  { %3623 = vmatpush3.bf16.msra.mxu1 %v3990_v57 }
 0xe1c   :  { %3636 = vmatprep.subr.bf16.mxu1 %v3766_v0 }
 0xee1   :  { %v1435_v9 = vpop.f32.mrb[10].mxu1 }
 0xee2   :  { %3732 = vtanh.f32 %v1435_v9  ;;  %v3350_v13 = vpop.f32.mrb[11].mxu1 }
 0xeec   :  { %v3733_v3 = vpop.eup %3732 }
 0xeed   :  { %1440 = vst.msk [vmem:[#allocation2] sm:$0x3] %vm43_vm0, %v3733_v3  ;;  %3360 = vmatmul.mubr.msk.f32.vlgmr.msra.gmra.mrb[10].mxu0 %vm60_vm2, %v3733_v3 }
 0xeee   :  { %3602 = vmatpush3.bf16.msra.mxu0 %v3862_v5  ;;  %3370 = vmatprep.mubr.msk.f32.mxu0 %vm3768_vm1, %v3767_v4  ;;  %v1530_v5 = vld [vmem:[%s4536_s13] sm:$0x3] }
 0xeef   :  { %3603 = vmatprep.subr.bf16.mxu0 %v3766_v0 }
 0xef2   :  { %3605 = vmatpush3.bf16.msra.mxu0 %v3886_v12  ;;  %v1682_v12 = vpop.f32.mrb[12].mxu1 }
 0xef3   :  { %3612 = vmatprep.subr.bf16.mxu0 %v3766_v0 }
 0xef4   :  { %v1529_v50 = vld [vmem:[#allocation2] sm:$0x3] }
 0xef5   :  { %3371 = vmatmul.mubr.msk.f32.vlgmr.msra.gmra.mrb[12].mxu0 %vm60_vm2, %v1529_v50 }
 0xef6   :  { %3614 = vmatpush3.bf16.msra.mxu0 %v3907_v18  ;;  %3392 = vmatprep.mubr.msk.f32.mxu0 %vm3768_vm1, %v3767_v4  ;;  %v3383_v18 = vpop.f32.mrb[13].mxu1 }
 0xef7   :  { %3615 = vmatprep.subr.bf16.mxu0 %v3766_v0 }
 0xefa   :  { %3617 = vmatpush3.bf16.msra.mxu0 %v3924_v22 }
 0xefb   :  { %3624 = vmatprep.subr.bf16.mxu0 %v3766_v0 }
 0xefd   :  { %3393 = vmatmul.mubr.msk.f32.vlgmr.msra.gmra.mrb[14].mxu0 %vm60_vm2, %v1530_v5 }
 0xefe   :  { %3626 = vmatpush3.bf16.msra.mxu0 %v3981_v54  ;;  %3414 = vmatprep.mubr.msk.f32.mxu0 %vm3768_vm1, %v3767_v4 }
 0xeff   :  { %3627 = vmatprep.subr.bf16.mxu0 %v3766_v0 }
 0xf02   :  { %3629 = vmatpush3.bf16.msra.mxu0 %v3994_v58 }
 0xf03   :  { %3630 = vmatprep.subr.bf16.mxu0 %v3766_v0 }
 0xfc0   :  { %v1521_v22 = vpop.f32.mrb[10].mxu0 }
 0xfc1   :  { %v1522_v57 = vadd.f32 %v4152_v60, %v1521_v22  ;;  %v3361_v8 = vpop.f32.mrb[11].mxu0 }
 0xfc3   :  { %3041 = vst.msk [vmem:[%s4547_s11 + $0x2] sm:$0x3] %vm787_vm5, %v1522_v57 }
 0xfc8   :  { %v1609_v54 = vpop.f32.mrb[12].mxu0 }
 0xfc9   :  { %v1683_v10 = vadd.f32 %v1682_v12, %v1609_v54  ;;  %v3372_v15 = vpop.f32.mrb[13].mxu0 }
 0xfd0   :  { %v1759_v16 = vpop.f32.mrb[14].mxu0 }
 0xfd1   :  { %v1763_v19 = vadd.f32 %v1759_v16, %v1683_v10  ;;  %v3394_v20 = vpop.f32.mrb[15].mxu0 }
 0xfd3   :  { %v1771_v58 = vadd.f32 %v3949_v31, %v1763_v19 }
 0xfd5   :  { %3734 = vtanh.f32 %v1771_v58  ;;  %v3047_v25 = vmul.f32 -1.442695, %v1771_v58 }
 0xfd7   :  { %3736 = vpow2.f32 %v3047_v25 }
 0xfdf   :  { %v3735_v23 = vpop.eup %3734 }
 0xfe0   :  { %1785 = vrot.lane.b32.xlu0 %v3735_v23, %s3769_s3 }
 0xfe1   :  { %v3737_v26 = vpop.eup %3736 }
 0xfe2   :  { %v1775_v27 = vadd.f32 1.0, %v3737_v26 }
 0xfe4   :  { %1780 = vrot.lane.b32.xlu0 %v1531_v24, %s3770_s20  ;;  %3738 = vrcp.f32 %v1775_v27 }
 0xfee   :  { %v3739_v28 = vpop.eup %3738 }
0x1052   :  { %v1786_v30 = vpop.permute.xlu0 %1785 }
0x1053   :  { %v1788_v32 = vmul.f32 %v3739_v28, %v1786_v30 }
0x1055   :  { %1790 = vrot.lane.b32.xlu0 %v1788_v32, %s3770_s20 }
0x1056   :  { %v1781_v31 = vpop.permute.xlu0 %1780 }
0x1057   :  { %v1783_v34 = vmul.f32 %v3739_v28, %v1781_v31 }
0x10c7   :  { %v1791_v35 = vpop.permute.xlu0 %1790 }
0x10c8   :  { %v4279_v36 = vadd.f32 %v1791_v35, %v1783_v34 }
0x10ca   :  { %3740 = vtanh.f32 %v4279_v36 }
0x10d4   :  { %v3741_v37 = vpop.eup %3740 }
0x10d5   :  { %1796 = vrot.lane.b32.xlu0 %v3741_v37, %s3769_s3 }
0x1147   :  { %v1797_v39 = vpop.permute.xlu0 %1796 }
0x1148   :  { %v1799_v40 = vmul.f32 %v3739_v28, %v1797_v39 }
0x114a   :  { %1801 = vrot.lane.b32.xlu0 %v1799_v40, %s3770_s20 }
0x11bc   :  { %v1802_v41 = vpop.permute.xlu0 %1801 }
0x11bd   :  { %1804 = vst.msk [vmem:[%s4536_s13] sm:$0x3] %vm43_vm0, %v1802_v41  ;;  %3048 = vst.msk [vmem:[%s4543_s12 + $0x4] sm:$0x3] %vm43_vm0, %v1802_v41  ;;  %3404 = vmatmul.mubr.msk.f32.vlgmr.msra.gmra.mrb[14].mxu1 %vm60_vm2, %v1802_v41  ;;  %3415 = vmatmul.mubr.msk.f32.vlgmr.msra.gmra.mrb[16].mxu0 %vm60_vm2, %v1802_v41 }
0x11be   :  { %3632 = vmatpush3.bf16.msra.mxu0 %v4068_v6  ;;  %3425 = vmatprep.mubr.msk.f32.mxu0 %vm3768_vm1, %v3767_v4 }
0x11bf   :  { %3633 = vmatprep.subr.bf16.mxu0 %v3766_v0  ;;  %3638 = vmatpush3.bf16.msra.mxu1 %v4100_v43 }
0x11c0   :  { %3639 = vmatprep.subr.bf16.mxu1 %v3766_v0  ;;  %3436 = vmatprep.mubr.msk.f32.mxu1 %vm3768_vm1, %v3767_v4 }
0x11c2   :  { %3635 = vmatpush3.bf16.msra.mxu0 %v4078_v14 }
0x11c3   :  { %3641 = vmatpush3.bf16.msra.mxu1 %v4110_v47  ;;  %3648 = vmatprep.subr.bf16.mxu0 %v3766_v0 }
0x11c4   :  { %3642 = vmatprep.subr.bf16.mxu1 %v3766_v0 }
0x1290   :  { %v1884_v6 = vpop.f32.mrb[14].mxu1 }
0x1291   :  { %v1897_v42 = vrot.slane %v1884_v6, %v4017_v7  ;;  %v3405_v44 = vpop.f32.mrb[15].mxu1 }
0x1292   :  { %v2270_v44 = vld [vmem:[%s4533_s4] sm:$0xff] }
0x1293   :  { %v1898_v45 = vcombine.high %v1897_v42, %v1897_v42  ;;  %v1905_v43 = vrot.slane %v1897_v42, %v4017_v7 }
0x1295   :  { %v1912_v48 = vrot.slane %v1898_v45, %v4017_v7  ;;  %v1916_v49 = vrot.slane %v1905_v43, %v4020_v11  ;;  %v2271_v45 = vld [vmem:[%s4533_s4 + $0x8] sm:$0xff] }
0x1296   :  { %v3649_v43 = vpack.c.bf16 %v2271_v45, %v2270_v44  ;;  %v2769_v44 = vld [vmem:[%s4542_s8 + $0x38] sm:$0xff] }
0x1297   :  { %v1923_v51 = vmul.f32 %v1916_v49, %v4026_v17  ;;  %v1920_v14 = vrot.slane %v1912_v48, %v4020_v11  ;;  %v2272_v48 = vld [vmem:[%s4533_s4 + $0x10] sm:$0xff]  ;;  %v2273_v49 = vld [vmem:[%s4533_s4 + $0x18] sm:$0xff] }
0x1299   :  { %v1925_v47 = vsel %vm60_vm2, %v1923_v51, 0.0  ;;  %v1924_v52 = vmul.f32 %v1920_v14, %v4033_v21  ;;  %v3652_v51 = vpack.c.bf16 %v2273_v49, %v2272_v48  ;;  %v3055_v14 = vld [vmem:[%s4537_s0 + $0x6] sm:$0x3] }
0x129a   :  { %1926 = vadd.xlane.f32.xlu0 %v1925_v47 }
0x129b   :  { %v1928_v53 = vsel %vm60_vm2, %v1924_v52, 0.0 }
0x129c   :  { %1929 = vadd.xlane.f32.xlu1 %v1928_v53  ;;  %v2274_v53 = vld [vmem:[%s4533_s4 + $0x20] sm:$0xff] }
0x1327   :  { %v1927_v33 = vpop.xlane.xlu0 %1926 }
0x1328   :  { %v1936_v56 = vrot.slane %v1927_v33, %v4040_v29 }
0x1329   :  { %v1930_v55 = vpop.xlane.xlu1 %1929 }
0x132a   :  { %v1940_v59 = vrot.slane %v1930_v55, %v4040_v29 }
0x132c   :  { %v1941_v61 = vsel %vm463_vm3, %v1940_v59, %v1936_v56  ;;  %v2276_v56 = vld [vmem:[%s4533_s4 + $0x30] sm:$0xff]  ;;  %v2277_v59 = vld [vmem:[%s4533_s4 + $0x38] sm:$0xff] }
0x132d   :  { %v1943_v62 = vsel %vm466_vm4, %v1941_v61, -inf }
0x132e   :  { %1944 = vmax.xlane.f32.xlu1 %v1943_v62  ;;  %v3646_v62 = vpack.c.bf16 %v2277_v59, %v2276_v56  ;;  %v2626_v56 = vld [vmem:[%s4544_s1] sm:$0xff] }
0x13bb   :  { %v1945_v63 = vpop.xlane.xlu1 %1944 }
0x13bc   :  { %v1950_v1 = vrot.slane %v1945_v63, %v4020_v11  ;;  %v1954_v2 = vrot.slane %v1945_v63, %v4046_v38  ;;  %v2424_v63 = vld [vmem:[%s4534_s5] sm:$0xff] }
0x13be   :  { %v1957_v46 = vsub.f32 %v1927_v33, %v1950_v1  ;;  %v1958_v9 = vsub.f32 %v1930_v55, %v1954_v2  ;;  %v2275_v33 = vld [vmem:[%s4533_s4 + $0x28] sm:$0xff] }
0x13bf   :  { %v3643_v55 = vpack.c.bf16 %v2275_v33, %v2274_v53  ;;  %v2425_v1 = vld [vmem:[%s4534_s5 + $0x8] sm:$0xff] }
0x13c0   :  { %v1959_v13 = vmul.f32 1.442695, %v1957_v46  ;;  %v1961_v3 = vmul.f32 1.442695, %v1958_v9  ;;  %v3655_v2 = vpack.c.bf16 %v2425_v1, %v2424_v63  ;;  %v2426_v46 = vld [vmem:[%s4534_s5 + $0x10] sm:$0xff]  ;;  %v2427_v9 = vld [vmem:[%s4534_s5 + $0x18] sm:$0xff] }
0x13c2   :  { %3742 = vpow2.f32 %v1959_v13 }
0x13c3   :  { %3744 = vpow2.f32 %v1961_v3  ;;  %v3658_v3 = vpack.c.bf16 %v2427_v9, %v2426_v46 }
0x13cc   :  { %v3743_v50 = vpop.eup %3742 }
0x13cd   :  { %1966 = vperm.xlu1 %3700, %v3743_v50   ;;  %v3745_v5 = vpop.eup %3744 }
0x13d1   :  { %1969 = vperm.xlu1 %3700, %v3745_v5  }
0x144c   :  { %v1967_v12 = vpop.permute.xlu1 %1966 }
0x144d   :  { %v1974_v22 = vrot.slane %v1967_v12, %v4040_v29 }
0x1450   :  { %v1970_v18 = vpop.permute.xlu1 %1969 }
0x1451   :  { %v1978_v57 = vrot.slane %v1970_v18, %v4040_v29 }
0x1453   :  { %v1979_v8 = vsel %vm463_vm3, %v1978_v57, %v1974_v22 }
0x1454   :  { %v1981_v54 = vsel %vm466_vm4, %v1979_v8, 0.0 }
0x1455   :  { %1982 = vadd.xlane.f32.xlu0 %v1981_v54 }
0x14e2   :  { %v1983_v10 = vpop.xlane.xlu0 %1982 }
0x14e3   :  { %3746 = vrcp.f32 %v1983_v10 }
0x14ed   :  { %v3747_v15 = vpop.eup %3746 }
0x14ee   :  { %v1993_v16 = vrot.slane %v3747_v15, %v4046_v38  ;;  %v1989_v19 = vrot.slane %v3747_v15, %v4020_v11 }
0x14f0   :  { %v1997_v20 = vmul.f32 %v3745_v5, %v1993_v16  ;;  %v1996_v58 = vmul.f32 %v3743_v50, %v1989_v19  ;;  %v2268_v50 = vld [vmem:[%s4536_s13] sm:$0x3] }
0x14f1   :  { %v3059_v16 = vld [vmem:[%s4540_s6] ss:$0 sm:$0xff] }
0x14f2   :  { %2005 = vperm.xlu0 %3701, %v1997_v20   ;;  %2000 = vperm.xlu1 %3700, %v1996_v58  }
0x14f6   :  { %1806 = vrot.lane.b32.xlu1 %v4279_v36, %s3773_s28 }
0x1571   :  { %v2006_v23 = vpop.permute.xlu0 %2005  ;;  %v2001_v24 = vpop.permute.xlu1 %2000 }
0x1572   :  { %v2009_v25 = vmul.f32 %v2006_v23, %v4033_v21  ;;  %v2008_v26 = vmul.f32 %v2001_v24, %v4026_v17 }
0x1574   :  { %v2017_v27 = vsel %vm60_vm2, %v2009_v25, 0.0  ;;  %v2010_v28 = vsel %vm60_vm2, %v2008_v26, 0.0 }
0x1575   :  { %v2018_v30 = vrot.slane %v2017_v27, 4  ;;  %v2011_v32 = vrot.slane %v2010_v28, 4  ;;  %v1807_v31 = vpop.permute.xlu1 %1806 }
0x1576   :  { %1809 = vst.msk [vmem:[%s4539_s14] sm:$0x3] %vm43_vm0, %v1807_v31 }
0x1577   :  { %v2019_v34 = vadd.f32 %v2018_v30, %v2017_v27  ;;  %v2012_v35 = vadd.f32 %v2011_v32, %v2010_v28 }
0x1579   :  { %v2020_v36 = vrot.slane %v2019_v34, 2  ;;  %v2013_v37 = vrot.slane %v2012_v35, 2 }
0x157b   :  { %v2021_v39 = vadd.f32 %v2020_v36, %v2019_v34  ;;  %v2014_v21 = vadd.f32 %v2013_v37, %v2012_v35  ;;  %v2550_v36 = vld [vmem:[%s4541_s7] sm:$0xff]  ;;  %v2551_v37 = vld [vmem:[%s4541_s7 + $0x8] sm:$0xff] }
0x157d   :  { %v2022_v40 = vrot.slane %v2021_v39, 1  ;;  %v2015_v17 = vrot.slane %v2014_v21, 1 }
0x157f   :  { %v2023_v41 = vadd.f32 %v2022_v40, %v2021_v39  ;;  %v2016_v6 = vadd.f32 %v2015_v17, %v2014_v21  ;;  %v2766_v39 = vld [vmem:[%s4542_s8 + $0x20] sm:$0xff]  ;;  %v3661_v21 = vpack.c.bf16 %v2551_v37, %v2550_v36  ;;  %v2767_v40 = vld [vmem:[%s4542_s8 + $0x28] sm:$0xff]  ;;  %v2552_v17 = vld [vmem:[%s4541_s7 + $0x10] sm:$0xff] }
0x1581   :  { %v2104_v42 = vsel %vm463_vm3, %v2023_v41, %v2016_v6  ;;  %v2553_v41 = vld [vmem:[%s4541_s7 + $0x18] sm:$0xff]  ;;  %v3667_v6 = vpack.c.bf16 %v2767_v40, %v2766_v39 }
0x1582   :  { %3426 = vmatmul.mubr.msk.f32.vlgmr.msra.gmra.mrb[16].mxu0 %vm60_vm2, %v2104_v42  ;;  %v2768_v42 = vld [vmem:[%s4542_s8 + $0x30] sm:$0xff]  ;;  %v3664_v45 = vpack.c.bf16 %v2553_v41, %v2552_v17 }
0x1583   :  { %3458 = vmatprep.mubr.msk.f32.mxu0 %vm3768_vm1, %v3767_v4  ;;  %3650 = vmatpush3.bf16.msra.mxu0 %v3649_v43  ;;  %v3670_v43 = vpack.c.bf16 %v2769_v44, %v2768_v42 }
0x1584   :  { %3651 = vmatprep.subr.bf16.mxu0 %v3766_v0 }
0x1587   :  { %3653 = vmatpush3.bf16.msra.mxu0 %v3652_v51 }
0x1588   :  { %3660 = vmatprep.subr.bf16.mxu0 %v3766_v0 }
0x158a   :  { %3459 = vmatmul.mubr.msk.f32.vlgmr.msra.gmra.mrb[18].mxu0 %vm60_vm2, %v3055_v14 }
0x158b   :  { %3480 = vmatprep.mubr.msk.f32.mxu0 %vm3768_vm1, %v3767_v4  ;;  %3662 = vmatpush3.bf16.msra.mxu0 %v3661_v21 }
0x158c   :  { %3663 = vmatprep.subr.bf16.mxu0 %v3766_v0 }
0x158f   :  { %3665 = vmatpush3.bf16.msra.mxu0 %v3664_v45 }
0x1590   :  { %3678 = vmatprep.subr.bf16.mxu0 %v3766_v0 }
0x1655   :  { %v2173_v47 = vpop.f32.mrb[16].mxu0 }
0x1656   :  { %3748 = vtanh.f32 %v2173_v47  ;;  %v3427_v52 = vpop.f32.mrb[17].mxu0 }
0x165d   :  { %v2420_v5 = vpop.f32.mrb[18].mxu0 }
0x165e   :  { %v3460_v12 = vpop.f32.mrb[19].mxu0 }
0x1660   :  { %v3749_v61 = vpop.eup %3748 }
0x1661   :  { %2178 = vst.msk [vmem:[#allocation2] sm:$0x3] %vm43_vm0, %v3749_v61  ;;  %3437 = vmatmul.mubr.msk.f32.vlgmr.msra.gmra.mrb[16].mxu1 %vm60_vm2, %v3749_v61 }
0x1662   :  { %3644 = vmatpush3.bf16.msra.mxu1 %v3643_v55  ;;  %3447 = vmatprep.mubr.msk.f32.mxu1 %vm3768_vm1, %v3767_v4 }
0x1663   :  { %3645 = vmatprep.subr.bf16.mxu1 %v3766_v0 }
0x1666   :  { %3647 = vmatpush3.bf16.msra.mxu1 %v3646_v62  ;;  %v2627_v62 = vld [vmem:[%s4544_s1 + $0x8] sm:$0xff] }
0x1667   :  { %3654 = vmatprep.subr.bf16.mxu1 %v3766_v0 }
0x1668   :  { %v2267_v13 = vld [vmem:[#allocation2] sm:$0x3] }
0x1669   :  { %3448 = vmatmul.mubr.msk.f32.vlgmr.msra.gmra.mrb[18].mxu1 %vm60_vm2, %v2267_v13 }
0x166a   :  { %3656 = vmatpush3.bf16.msra.mxu1 %v3655_v2  ;;  %3469 = vmatprep.mubr.msk.f32.mxu1 %vm3768_vm1, %v3767_v4 }
0x166b   :  { %3657 = vmatprep.subr.bf16.mxu1 %v3766_v0 }
0x166e   :  { %3659 = vmatpush3.bf16.msra.mxu1 %v3658_v3 }
0x166f   :  { %3666 = vmatprep.subr.bf16.mxu1 %v3766_v0 }
0x1671   :  { %3470 = vmatmul.mubr.msk.f32.vlgmr.msra.gmra.mrb[20].mxu1 %vm60_vm2, %v2268_v50 }
0x1672   :  { %3491 = vmatprep.mubr.msk.f32.mxu1 %vm3768_vm1, %v3767_v4  ;;  %3668 = vmatpush3.bf16.msra.mxu1 %v3667_v6 }
0x1673   :  { %3669 = vmatprep.subr.bf16.mxu1 %v3766_v0 }
0x1676   :  { %3671 = vmatpush3.bf16.msra.mxu1 %v3670_v43 }
0x1677   :  { %3672 = vmatprep.subr.bf16.mxu1 %v3766_v0 }
0x1734   :  { %v2259_v18 = vpop.f32.mrb[16].mxu1 }
0x1735   :  { %v2260_v22 = vadd.f32 %v4152_v60, %v2259_v18  ;;  %v3438_v57 = vpop.f32.mrb[17].mxu1  ;;  %v2269_v60 = vld [vmem:[%s4539_s14] sm:$0x3] }
0x1737   :  { %3054 = vst.msk [vmem:[%s4547_s11 + $0x4] sm:$0x3] %vm787_vm5, %v2260_v22 }
0x173c   :  { %v2347_v8 = vpop.f32.mrb[18].mxu1 }
0x173d   :  { %v2421_v54 = vadd.f32 %v2420_v5, %v2347_v8  ;;  %v3449_v10 = vpop.f32.mrb[19].mxu1 }
0x1744   :  { %v2497_v15 = vpop.f32.mrb[20].mxu1 }
0x1745   :  { %v2501_v19 = vadd.f32 %v2497_v15, %v2421_v54  ;;  %v3471_v20 = vpop.f32.mrb[21].mxu1 }
0x1747   :  { %v2509_v58 = vadd.f32 %v3059_v16, %v2501_v19 }
0x1749   :  { %3750 = vtanh.f32 %v2509_v58  ;;  %v3060_v24 = vmul.f32 -1.442695, %v2509_v58 }
0x174b   :  { %3752 = vpow2.f32 %v3060_v24 }
0x1753   :  { %v3751_v23 = vpop.eup %3750 }
0x1754   :  { %2523 = vrot.lane.b32.xlu1 %v3751_v23, %s3769_s3 }
0x1755   :  { %v3753_v25 = vpop.eup %3752 }
0x1756   :  { %v2513_v26 = vadd.f32 1.0, %v3753_v25 }
0x1758   :  { %2518 = vrot.lane.b32.xlu1 %v2269_v60, %s3770_s20  ;;  %3754 = vrcp.f32 %v2513_v26 }
0x1762   :  { %v3755_v27 = vpop.eup %3754 }
0x17c6   :  { %v2524_v28 = vpop.permute.xlu1 %2523 }
0x17c7   :  { %v2526_v30 = vmul.f32 %v3755_v27, %v2524_v28 }
0x17c9   :  { %2528 = vrot.lane.b32.xlu1 %v2526_v30, %s3770_s20 }
0x17ca   :  { %v2519_v32 = vpop.permute.xlu1 %2518 }
0x17cb   :  { %v2521_v31 = vmul.f32 %v3755_v27, %v2519_v32 }
0x183b   :  { %v2529_v34 = vpop.permute.xlu1 %2528 }
0x183c   :  { %v4416_v35 = vadd.f32 %v2529_v34, %v2521_v31  ;;  %v2763_v31 = vld [vmem:[%s4542_s8 + $0x8] sm:$0xff] }
0x183e   :  { %3756 = vtanh.f32 %v4416_v35 }
0x1848   :  { %v3757_v48 = vpop.eup %3756 }
0x1849   :  { %2534 = vrot.lane.b32.xlu1 %v3757_v48, %s3769_s3 }
0x18bb   :  { %v2535_v49 = vpop.permute.xlu1 %2534 }
0x18bc   :  { %v2537_v51 = vmul.f32 %v3755_v27, %v2535_v49 }
0x18be   :  { %2539 = vrot.lane.b32.xlu1 %v2537_v51, %s3770_s20 }
0x1930   :  { %v2540_v14 = vpop.permute.xlu1 %2539 }
0x1931   :  { %2542 = vst.msk [vmem:[%s4536_s13] sm:$0x3] %vm43_vm0, %v2540_v14  ;;  %3061 = vst.msk [vmem:[%s4543_s12 + $0x6] sm:$0x3] %vm43_vm0, %v2540_v14  ;;  %3481 = vmatmul.mubr.msk.f32.vlgmr.msra.gmra.mrb[20].mxu0 %vm60_vm2, %v2540_v14  ;;  %3492 = vmatmul.mubr.msk.f32.vlgmr.msra.gmra.mrb[22].mxu1 %vm60_vm2, %v2540_v14 }
0x1932   :  { %3502 = vmatprep.mubr.msk.f32.mxu1 %vm3768_vm1, %v3767_v4  ;;  %3513 = vmatprep.mubr.msk.f32.mxu0 %vm3768_vm1, %v3767_v4 }
0x1a04   :  { %v2622_v47 = vpop.f32.mrb[20].mxu0 }
0x1a05   :  { %v2635_v52 = vrot.slane %v2622_v47, %v4017_v7  ;;  %v3482_v53 = vpop.f32.mrb[21].mxu0 }
0x1a07   :  { %v2636_v33 = vcombine.high %v2635_v52, %v2635_v52  ;;  %v2643_v55 = vrot.slane %v2635_v52, %v4017_v7 }
0x1a09   :  { %v2650_v59 = vrot.slane %v2636_v33, %v4017_v7  ;;  %v2654_v61 = vrot.slane %v2643_v55, %v4020_v11  ;;  %v2917_v55 = vld [vmem:[%s4545_s9] sm:$0xff] }
0x1a0b   :  { %v2661_v4 = vmul.f32 %v2654_v61, %v2626_v56  ;;  %v2658_v63 = vrot.slane %v2650_v59, %v4020_v11  ;;  %v2919_v61 = vld [vmem:[%s4545_s9 + $0x10] sm:$0xff] }
0x1a0d   :  { %v2663_v1 = vsel %vm60_vm2, %v2661_v4, 0.0  ;;  %v2662_v2 = vmul.f32 %v2658_v63, %v2627_v62 }
0x1a0e   :  { %2664 = vadd.xlane.f32.xlu0 %v2663_v1 }
0x1a0f   :  { %v2666_v46 = vsel %vm60_vm2, %v2662_v2, 0.0 }
0x1a10   :  { %2667 = vadd.xlane.f32.xlu1 %v2666_v46 }
0x1a9b   :  { %v2665_v9 = vpop.xlane.xlu0 %2664 }
0x1a9c   :  { %v2674_v7 = vrot.slane %v2665_v9, %v4040_v29 }
0x1a9d   :  { %v2668_v13 = vpop.xlane.xlu1 %2667 }
0x1a9e   :  { %v2678_v3 = vrot.slane %v2668_v13, %v4040_v29 }
0x1aa0   :  { %v2679_v50 = vsel %vm463_vm3, %v2678_v3, %v2674_v7 }
0x1aa1   :  { %v2681_v5 = vsel %vm466_vm4, %v2679_v50, -inf }
0x1aa2   :  { %2682 = vmax.xlane.f32.xlu0 %v2681_v5 }
0x1b2f   :  { %v2683_v12 = vpop.xlane.xlu0 %2682 }
0x1b30   :  { %v2688_v18 = vrot.slane %v2683_v12, %v4020_v11  ;;  %v2692_v22 = vrot.slane %v2683_v12, %v4046_v38 }
0x1b32   :  { %v2695_v57 = vsub.f32 %v2665_v9, %v2688_v18  ;;  %v2696_v8 = vsub.f32 %v2668_v13, %v2692_v22 }
0x1b34   :  { %v2697_v54 = vmul.f32 1.442695, %v2695_v57  ;;  %v2699_v10 = vmul.f32 1.442695, %v2696_v8 }
0x1b36   :  { %3758 = vpow2.f32 %v2697_v54 }
0x1b37   :  { %3760 = vpow2.f32 %v2699_v10 }
0x1b40   :  { %v3759_v15 = vpop.eup %3758 }
0x1b41   :  { %v3761_v16 = vpop.eup %3760  ;;  %2704 = vperm.xlu0 %3701, %v3759_v15  }
0x1b42   :  { %2707 = vperm.xlu1 %3700, %v3761_v16  }
0x1bc0   :  { %v2705_v19 = vpop.permute.xlu0 %2704 }
0x1bc1   :  { %v2708_v20 = vpop.permute.xlu1 %2707  ;;  %v2712_v58 = vrot.slane %v2705_v19, %v4040_v29 }
0x1bc2   :  { %v2716_v23 = vrot.slane %v2708_v20, %v4040_v29  ;;  %v2762_v29 = vld [vmem:[%s4542_s8] sm:$0xff] }
0x1bc3   :  { %v3673_v34 = vpack.c.bf16 %v2763_v31, %v2762_v29 }
0x1bc4   :  { %v2717_v60 = vsel %vm463_vm3, %v2716_v23, %v2712_v58 }
0x1bc5   :  { %v2719_v24 = vsel %vm466_vm4, %v2717_v60, 0.0  ;;  %3674 = vmatpush3.bf16.msra.mxu1 %v3673_v34 }
0x1bc6   :  { %2720 = vadd.xlane.f32.xlu1 %v2719_v24  ;;  %3675 = vmatprep.subr.bf16.mxu1 %v3766_v0 }
0x1c53   :  { %v2721_v25 = vpop.xlane.xlu1 %2720 }
0x1c54   :  { %3762 = vrcp.f32 %v2721_v25 }
0x1c5e   :  { %v3763_v26 = vpop.eup %3762 }
0x1c5f   :  { %v2727_v27 = vrot.slane %v3763_v26, %v4020_v11  ;;  %v2731_v30 = vrot.slane %v3763_v26, %v4046_v38  ;;  %v2764_v11 = vld [vmem:[%s4542_s8 + $0x10] sm:$0xff]  ;;  %v2765_v38 = vld [vmem:[%s4542_s8 + $0x18] sm:$0xff] }
0x1c61   :  { %v2734_v28 = vmul.f32 %v3759_v15, %v2727_v27  ;;  %v2735_v32 = vmul.f32 %v3761_v16, %v2731_v30 }
0x1c63   :  { %2738 = vperm.xlu0 %3701, %v2734_v28  }
0x1c67   :  { %2743 = vperm.xlu0 %3701, %v2735_v32  }
0x1c6b   :  { %2544 = vrot.lane.b32.xlu0 %v4416_v35, %s3773_s28  ;;  %v3676_v35 = vpack.c.bf16 %v2765_v38, %v2764_v11 }
0x1c6d   :  { %3677 = vmatpush3.bf16.msra.mxu1 %v3676_v35 }
0x1ce2   :  { %v2739_v36 = vpop.permute.xlu0 %2738 }
0x1ce3   :  { %v2746_v37 = vmul.f32 %v2739_v36, %v2626_v56  ;;  %v2918_v56 = vld [vmem:[%s4545_s9 + $0x8] sm:$0xff] }
0x1ce4   :  { %v3679_v59 = vpack.c.bf16 %v2918_v56, %v2917_v55 }
0x1ce5   :  { %v2748_v39 = vsel %vm60_vm2, %v2746_v37, 0.0 }
0x1ce6   :  { %v2749_v21 = vrot.slane %v2748_v39, 4  ;;  %v2744_v40 = vpop.permute.xlu0 %2743  ;;  %3680 = vmatpush3.bf16.msra.mxu0 %v3679_v59 }
0x1ce7   :  { %v2747_v17 = vmul.f32 %v2744_v40, %v2627_v62  ;;  %3681 = vmatprep.subr.bf16.mxu0 %v3766_v0  ;;  %v2920_v62 = vld [vmem:[%s4545_s9 + $0x18] sm:$0xff]  ;;  %v3065_v0 = vld [vmem:[%s4546_s10] ss:$0 sm:$0xff] }
0x1ce8   :  { %v2750_v41 = vadd.f32 %v2749_v21, %v2748_v39  ;;  %v3682_v4 = vpack.c.bf16 %v2920_v62, %v2919_v61 }
0x1ce9   :  { %v2755_v6 = vsel %vm60_vm2, %v2747_v17, 0.0 }
0x1cea   :  { %v2751_v42 = vrot.slane %v2750_v41, 2  ;;  %v2756_v44 = vrot.slane %v2755_v6, 4  ;;  %v2545_v45 = vpop.permute.xlu0 %2544  ;;  %3683 = vmatpush3.bf16.msra.mxu0 %v3682_v4 }
0x1ceb   :  { %2547 = vst.msk [vmem:[%s4539_s14] sm:$0x3] %vm43_vm0, %v2545_v45 }
0x1cec   :  { %v2752_v43 = vadd.f32 %v2751_v42, %v2750_v41  ;;  %v2757_v48 = vadd.f32 %v2756_v44, %v2755_v6 }
0x1cee   :  { %v2758_v49 = vrot.slane %v2757_v48, 2  ;;  %v2753_v51 = vrot.slane %v2752_v43, 1 }
0x1cf0   :  { %v2759_v14 = vadd.f32 %v2758_v49, %v2757_v48  ;;  %v2754_v52 = vadd.f32 %v2753_v51, %v2752_v43 }
0x1cf2   :  { %v2760_v47 = vrot.slane %v2759_v14, 1 }
0x1cf4   :  { %v2761_v53 = vadd.f32 %v2760_v47, %v2759_v14 }
0x1cf6   :  { %v2842_v33 = vsel %vm463_vm3, %v2761_v53, %v2754_v52 }
0x1cf7   :  { %3503 = vmatmul.mubr.msk.f32.vlgmr.msra.gmra.mrb[22].mxu1 %vm60_vm2, %v2842_v33 }
0x1dca   :  { %v2911_v63 = vpop.f32.mrb[22].mxu1 }
0x1dcb   :  { %3764 = vtanh.f32 %v2911_v63  ;;  %v3504_v1 = vpop.f32.mrb[23].mxu1 }
0x1dd5   :  { %v3765_v2 = vpop.eup %3764 }
0x1dd6   :  { %2916 = vst.msk [vmem:[#allocation2] sm:$0x3] %vm43_vm0, %v3765_v2  ;;  %3514 = vmatmul.mubr.msk.f32.vlgmr.msra.gmra.mrb[22].mxu0 %vm60_vm2, %v3765_v2 }
0x1ea9   :  { %v2997_v46 = vpop.f32.mrb[22].mxu0 }
0x1eaa   :  { %v2998_v9 = vadd.f32 %v3065_v0, %v2997_v46  ;;  %v3515_v13 = vpop.f32.mrb[23].mxu0 }
0x1eac   :  { %3067 = vst.msk [vmem:[%s4547_s11 + $0x6] sm:$0x3] %vm787_vm5, %v2998_v9 }

// kernel: forward.3
= control target key start
LH: loop header
LB: loop body
LE: loop exit
PB: predicated region body
PF: predicated region fallthrough
CT: control target
= control target key end

     0   :  { %vm32_vm0 = vcmask 123904   ;;  %v4105_v0 = vmov 0.0|0.0   ;;  %vm4106_vm1 = vmmov 0   ;;  %v4107_v3 = vmov 0.0   ;;  %s4108_s23 = smov 96   ;;  %s4109_s26 = smov 16   ;;  %s4905_s2 = inlined_call_operand.vmem [shape: f32[16,64], index: 2, kind: input, shape index: {}]   ;;  %s4906_s9 = inlined_call_operand.vmem [shape: f32[2,16], index: 9, kind: output, shape index: {2}]   ;;  %s4907_s1 = inlined_call_operand.vmem [shape: f32[32,64], index: 1, kind: input, shape index: {}]   ;;  %s4908_s0 = inlined_call_operand.vmem [shape: f32[8,2,32], index: 0, kind: input, shape index: {}]   ;;  %s4909_s10 = inlined_call_operand.vmem [shape: f32[2,16], index: 10, kind: output, shape index: {3}]   ;;  %s4910_s3 = inlined_call_operand.vmem [shape: f32[1,64], index: 3, kind: input, shape index: {}]   ;;  %s4911_s7 = inlined_call_operand.vmem [shape: f32[8,2,16], index: 7, kind: output, shape index: {0}]   ;;  %s4912_s11 = inlined_call_operand.vmem [shape: f32[2,16], index: 11, kind: output, shape index: {4}]   ;;  %s4913_s5 = inlined_call_operand.vmem [shape: f32[16,64], index: 5, kind: input, shape index: {}]   ;;  %s4914_s4 = inlined_call_operand.vmem [shape: f32[32,64], index: 4, kind: input, shape index: {}]   ;;  %s4915_s12 = inlined_call_operand.vmem [shape: f32[2,16], index: 12, kind: output, shape index: {5}]   ;;  %s4916_s6 = inlined_call_operand.vmem [shape: f32[1,64], index: 6, kind: input, shape index: {}]   ;;  %s4917_s8 = inlined_call_operand.vmem [shape: f32[8,2,16], index: 8, kind: output, shape index: {1}]  }
   0x1   :  { %3824 = vmatprep.subr.bf16.mxu1 %v4105_v0  ;;  %v44_v1 = vld [vmem:[%s4905_s2] sm:$0xff]  ;;  %v45_v2 = vld [vmem:[%s4905_s2 + $0x8] sm:$0xff]  ;;  %3540 = vmatprep.mubr.msk.f32.mxu1 %vm4106_vm1, %v4107_v3  ;;  %33 = vst.msk [vmem:[%s4906_s9] sm:$0x3] %vm32_vm0, %v4107_v3  ;;  %vm46_vm2 = vcmask 130048   ;;  %v42_v8 = vld [vmem:[%s4907_s1 + $0x10] sm:$0xff] }
   0x2   :  { %v4192_v4 = vpack.c.bf16 %v45_v2, %v44_v1  ;;  %3833 = vmatprep.subr.bf16.mxu0 %v4105_v0  ;;  %3558 = vmatprep.mubr.msk.f32.mxu0 %vm4106_vm1, %v4107_v3  ;;  %v40_v5 = vld [vmem:[%s4907_s1] sm:$0xff]  ;;  %v41_v6 = vld [vmem:[%s4907_s1 + $0x8] sm:$0xff]  ;;  %v43_v9 = vld [vmem:[%s4907_s1 + $0x18] sm:$0xff]  ;;  %vm120_vm3 = vcmask 261120   ;;  %34 = vst.msk [vmem:[%s4909_s10] sm:$0x3] %vm32_vm0, %v4107_v3 }
   0x3   :  { %v4207_v7 = vpack.c.bf16 %v41_v6, %v40_v5  ;;  %v4220_v11 = vpack.c.bf16 %v43_v9, %v42_v8  ;;  %v37_v12 = vld [vmem:[%s4908_s0] sm:$0x3]  ;;  %s4110_s27 = smov 32   ;;  %s4111_s2 = smov 112   ;;  %v3320_v39 = vld [vmem:[%s4908_s0 + $0x2] sm:$0x3] }
   0x4   :  { %3826 = vmatpush3.bf16.msra.mxu1 %v4192_v4  ;;  %3835 = vmatpush3.bf16.msra.mxu0 %v4192_v4  ;;  %v4243_v16 = vld [vmem:[%s4910_s3] ss:$0 sm:$0xff]  ;;  %s4112_s28 = smov 80   ;;  %v3326_v1 = vld [vmem:[%s4908_s0 + $0x4] sm:$0x3] }
   0x5   :  { %3827 = vmatprep.subr.bf16.mxu1 %v4105_v0  ;;  %3836 = vmatprep.subr.bf16.mxu0 %v4105_v0  ;;  %35 = vst.msk [vmem:[%s4912_s11] sm:$0x3] %vm32_vm0, %v4107_v3  ;;  %36 = vst.msk [vmem:[%s4915_s12] sm:$0x3] %vm32_vm0, %v4107_v3 }
   0x8   :  { %v38_v10 = vld [vmem:[%s4906_s9] sm:$0x3] }
   0x9   :  { %3541 = vmatmul.mubr.msk.f32.vlgmr.msra.gmra.mrb[0].mxu1 %vm46_vm2, %v38_v10  ;;  %v39_v21 = vld [vmem:[%s4909_s10] sm:$0x3] }
   0xa   :  { %3829 = vmatpush3.bf16.msra.mxu1 %v4207_v7  ;;  %3551 = vmatprep.mubr.msk.f32.mxu1 %vm4106_vm1, %v4107_v3 }
   0xb   :  { %3830 = vmatprep.subr.bf16.mxu1 %v4105_v0 }
   0xe   :  { %3832 = vmatpush3.bf16.msra.mxu1 %v4220_v11 }
   0xf   :  { %3842 = vmatprep.subr.bf16.mxu1 %v4105_v0 }
  0x11   :  { %3552 = vmatmul.mubr.msk.f32.vlgmr.msra.gmra.mrb[2].mxu1 %vm120_vm3, %v37_v12 }
  0x12   :  { %3844 = vmatpush3.bf16.msra.mxu1 %v4192_v4  ;;  %3576 = vmatprep.mubr.msk.f32.mxu1 %vm4106_vm1, %v4107_v3 }
  0x13   :  { %3845 = vmatprep.subr.bf16.mxu1 %v4105_v0 }
  0xdc   :  { %v116_v13 = vpop.f32.mrb[0].mxu1 }
  0xdd   :  { %v3542_v14 = vpop.f32.mrb[1].mxu1 }
  0xe4   :  { %v190_v15 = vpop.f32.mrb[2].mxu1 }
  0xe5   :  { %v191_v17 = vadd.f32 %v190_v15, %v116_v13  ;;  %v3553_v18 = vpop.f32.mrb[3].mxu1 }
  0xe7   :  { %v201_v19 = vadd.f32 %v4243_v16, %v191_v17 }
  0xe9   :  { %3976 = vtanh.f32 %v201_v19  ;;  %v3319_v22 = vmul.f32 -1.442695, %v201_v19 }
  0xeb   :  { %3978 = vpow2.f32 %v3319_v22 }
  0xf3   :  { %v3977_v20 = vpop.eup %3976 }
  0xf4   :  { %215 = vrot.lane.b32.xlu0 %v3977_v20, %s4108_s23 }
  0xf5   :  { %v3979_v23 = vpop.eup %3978 }
  0xf6   :  { %v205_v24 = vadd.f32 1.0, %v3979_v23 }
  0xf8   :  { %210 = vrot.lane.b32.xlu0 %v39_v21, %s4109_s26  ;;  %3980 = vrcp.f32 %v205_v24 }
 0x102   :  { %v3981_v25 = vpop.eup %3980 }
 0x166   :  { %v216_v26 = vpop.permute.xlu0 %215 }
 0x167   :  { %v218_v27 = vmul.f32 %v3981_v25, %v216_v26 }
 0x169   :  { %220 = vrot.lane.b32.xlu1 %v218_v27, %s4109_s26 }
 0x16a   :  { %v211_v28 = vpop.permute.xlu0 %210 }
 0x16b   :  { %v213_v29 = vmul.f32 %v3981_v25, %v211_v28 }
 0x1db   :  { %v221_v30 = vpop.permute.xlu1 %220 }
 0x1dc   :  { %v223_v31 = vadd.f32 %v221_v30, %v213_v29 }
 0x1de   :  { %3982 = vtanh.f32 %v223_v31 }
 0x1e8   :  { %v3983_v32 = vpop.eup %3982 }
 0x1e9   :  { %226 = vrot.lane.b32.xlu1 %v3983_v32, %s4110_s27 }
 0x1ed   :  { %236 = vrot.lane.b32.xlu1 %v223_v31, %s4111_s2  ;;  %v3332_v31 = vld [vmem:[%s4908_s0 + $0x6] sm:$0x3] }
 0x25b   :  { %v227_v33 = vpop.permute.xlu1 %226 }
 0x25c   :  { %v229_v34 = vmul.f32 %v3981_v25, %v227_v33 }
 0x25e   :  { %231 = vrot.lane.b32.xlu0 %v229_v34, %s4112_s28 }
 0x25f   :  { %v237_v35 = vpop.permute.xlu1 %236 }
 0x260   :  { %239 = vst.msk [vmem:[%s4909_s10] sm:$0x3] %vm32_vm0, %v237_v35 }
 0x267   :  { %v244_v36 = vld [vmem:[%s4909_s10] sm:$0x3] }
 0x268   :  { %413 = vrot.lane.b32.xlu1 %v244_v36, %s4109_s26 }
 0x2d0   :  { %v232_v37 = vpop.permute.xlu0 %231 }
 0x2d1   :  { %234 = vst.msk [vmem:[%s4906_s9] sm:$0x3] %vm32_vm0, %v232_v37  ;;  %240 = vst.msk [vmem:[%s4911_s7] sm:$0x3] %vm32_vm0, %v232_v37 }
 0x2d8   :  { %v243_v38 = vld [vmem:[%s4906_s9] sm:$0x3] }
 0x2d9   :  { %3559 = vmatmul.mubr.msk.f32.vlgmr.msra.gmra.mrb[0].mxu0 %vm46_vm2, %v243_v38 }
 0x2da   :  { %3838 = vmatpush3.bf16.msra.mxu0 %v4207_v7  ;;  %3569 = vmatprep.mubr.msk.f32.mxu0 %vm4106_vm1, %v4107_v3  ;;  %v414_v53 = vpop.permute.xlu1 %413 }
 0x2db   :  { %3839 = vmatprep.subr.bf16.mxu0 %v4105_v0 }
 0x2de   :  { %3841 = vmatpush3.bf16.msra.mxu0 %v4220_v11 }
 0x2df   :  { %3851 = vmatprep.subr.bf16.mxu0 %v4105_v0 }
 0x2e1   :  { %3570 = vmatmul.mubr.msk.f32.vlgmr.msra.gmra.mrb[2].mxu0 %vm120_vm3, %v3320_v39 }
 0x2e2   :  { %3853 = vmatpush3.bf16.msra.mxu0 %v4192_v4  ;;  %3594 = vmatprep.mubr.msk.f32.mxu0 %vm4106_vm1, %v4107_v3 }
 0x2e3   :  { %3854 = vmatprep.subr.bf16.mxu0 %v4105_v0 }
 0x3ac   :  { %v320_v40 = vpop.f32.mrb[0].mxu0 }
 0x3ad   :  { %v3560_v41 = vpop.f32.mrb[1].mxu0 }
 0x3b4   :  { %v393_v42 = vpop.f32.mrb[2].mxu0 }
 0x3b5   :  { %v394_v43 = vadd.f32 %v393_v42, %v320_v40  ;;  %v3571_v44 = vpop.f32.mrb[3].mxu0 }
 0x3b7   :  { %v404_v45 = vadd.f32 %v4243_v16, %v394_v43 }
 0x3b9   :  { %3984 = vtanh.f32 %v404_v45  ;;  %v3324_v47 = vmul.f32 -1.442695, %v404_v45 }
 0x3bb   :  { %3986 = vpow2.f32 %v3324_v47 }
 0x3c3   :  { %v3985_v46 = vpop.eup %3984 }
 0x3c4   :  { %418 = vrot.lane.b32.xlu0 %v3985_v46, %s4108_s23 }
 0x3c5   :  { %v3987_v48 = vpop.eup %3986 }
 0x3c6   :  { %v408_v49 = vadd.f32 1.0, %v3987_v48 }
 0x3c8   :  { %3988 = vrcp.f32 %v408_v49 }
 0x3d2   :  { %v3989_v50 = vpop.eup %3988 }
 0x3d3   :  { %v416_v54 = vmul.f32 %v3989_v50, %v414_v53 }
 0x436   :  { %v419_v51 = vpop.permute.xlu0 %418 }
 0x437   :  { %v421_v52 = vmul.f32 %v3989_v50, %v419_v51 }
 0x439   :  { %423 = vrot.lane.b32.xlu0 %v421_v52, %s4109_s26 }
 0x4ab   :  { %v424_v55 = vpop.permute.xlu0 %423 }
 0x4ac   :  { %v426_v56 = vadd.f32 %v424_v55, %v416_v54 }
 0x4ae   :  { %3990 = vtanh.f32 %v426_v56 }
 0x4b8   :  { %v3991_v57 = vpop.eup %3990 }
 0x4b9   :  { %429 = vrot.lane.b32.xlu1 %v3991_v57, %s4110_s27 }
 0x4bd   :  { %439 = vrot.lane.b32.xlu1 %v426_v56, %s4111_s2  ;;  %v3338_v56 = vld [vmem:[%s4908_s0 + $0x8] sm:$0x3] }
 0x52b   :  { %v430_v58 = vpop.permute.xlu1 %429 }
 0x52c   :  { %v432_v59 = vmul.f32 %v3989_v50, %v430_v58 }
 0x52e   :  { %434 = vrot.lane.b32.xlu0 %v432_v59, %s4112_s28 }
 0x52f   :  { %v440_v60 = vpop.permute.xlu1 %439 }
 0x530   :  { %442 = vst.msk [vmem:[%s4909_s10] sm:$0x3] %vm32_vm0, %v440_v60 }
 0x537   :  { %v448_v61 = vld [vmem:[%s4909_s10] sm:$0x3] }
 0x538   :  { %617 = vrot.lane.b32.xlu1 %v448_v61, %s4109_s26 }
 0x5a0   :  { %v435_v62 = vpop.permute.xlu0 %434 }
 0x5a1   :  { %437 = vst.msk [vmem:[%s4906_s9] sm:$0x3] %vm32_vm0, %v435_v62  ;;  %3325 = vst.msk [vmem:[%s4911_s7 + $0x2] sm:$0x3] %vm32_vm0, %v435_v62 }
 0x5a8   :  { %v447_v63 = vld [vmem:[%s4906_s9] sm:$0x3] }
 0x5a9   :  { %3577 = vmatmul.mubr.msk.f32.vlgmr.msra.gmra.mrb[4].mxu1 %vm46_vm2, %v447_v63 }
 0x5aa   :  { %3847 = vmatpush3.bf16.msra.mxu1 %v4207_v7  ;;  %3587 = vmatprep.mubr.msk.f32.mxu1 %vm4106_vm1, %v4107_v3  ;;  %v618_v20 = vpop.permute.xlu1 %617 }
 0x5ab   :  { %3848 = vmatprep.subr.bf16.mxu1 %v4105_v0 }
 0x5ae   :  { %3850 = vmatpush3.bf16.msra.mxu1 %v4220_v11 }
 0x5af   :  { %3860 = vmatprep.subr.bf16.mxu1 %v4105_v0 }
 0x5b1   :  { %3588 = vmatmul.mubr.msk.f32.vlgmr.msra.gmra.mrb[6].mxu1 %vm120_vm3, %v3326_v1 }
 0x5b2   :  { %3862 = vmatpush3.bf16.msra.mxu1 %v4192_v4  ;;  %3612 = vmatprep.mubr.msk.f32.mxu1 %vm4106_vm1, %v4107_v3 }
 0x5b3   :  { %3863 = vmatprep.subr.bf16.mxu1 %v4105_v0 }
 0x67c   :  { %v524_v2 = vpop.f32.mrb[4].mxu1 }
 0x67d   :  { %v3578_v5 = vpop.f32.mrb[5].mxu1 }
 0x684   :  { %v597_v6 = vpop.f32.mrb[6].mxu1 }
 0x685   :  { %v598_v8 = vadd.f32 %v597_v6, %v524_v2  ;;  %v3589_v9 = vpop.f32.mrb[7].mxu1 }
 0x687   :  { %v608_v10 = vadd.f32 %v4243_v16, %v598_v8 }
 0x689   :  { %3992 = vtanh.f32 %v608_v10  ;;  %v3330_v13 = vmul.f32 -1.442695, %v608_v10 }
 0x68b   :  { %3994 = vpow2.f32 %v3330_v13 }
 0x693   :  { %v3993_v12 = vpop.eup %3992 }
 0x694   :  { %622 = vrot.lane.b32.xlu0 %v3993_v12, %s4108_s23 }
 0x695   :  { %v3995_v14 = vpop.eup %3994 }
 0x696   :  { %v612_v15 = vadd.f32 1.0, %v3995_v14 }
 0x698   :  { %3996 = vrcp.f32 %v612_v15 }
 0x6a2   :  { %v3997_v17 = vpop.eup %3996 }
 0x6a3   :  { %v620_v21 = vmul.f32 %v3997_v17, %v618_v20 }
 0x706   :  { %v623_v18 = vpop.permute.xlu0 %622 }
 0x707   :  { %v625_v19 = vmul.f32 %v3997_v17, %v623_v18 }
 0x709   :  { %627 = vrot.lane.b32.xlu0 %v625_v19, %s4109_s26 }
 0x77b   :  { %v628_v22 = vpop.permute.xlu0 %627 }
 0x77c   :  { %v630_v23 = vadd.f32 %v628_v22, %v620_v21 }
 0x77e   :  { %3998 = vtanh.f32 %v630_v23 }
 0x788   :  { %v3999_v24 = vpop.eup %3998 }
 0x789   :  { %633 = vrot.lane.b32.xlu1 %v3999_v24, %s4110_s27 }
 0x78d   :  { %643 = vrot.lane.b32.xlu1 %v630_v23, %s4111_s2  ;;  %v3344_v23 = vld [vmem:[%s4908_s0 + $0xa] sm:$0x3] }
 0x7fb   :  { %v634_v25 = vpop.permute.xlu1 %633 }
 0x7fc   :  { %v636_v26 = vmul.f32 %v3997_v17, %v634_v25 }
 0x7fe   :  { %638 = vrot.lane.b32.xlu0 %v636_v26, %s4112_s28 }
 0x7ff   :  { %v644_v27 = vpop.permute.xlu1 %643 }
 0x800   :  { %646 = vst.msk [vmem:[%s4909_s10] sm:$0x3] %vm32_vm0, %v644_v27 }
 0x807   :  { %v652_v28 = vld [vmem:[%s4909_s10] sm:$0x3] }
 0x808   :  { %821 = vrot.lane.b32.xlu1 %v652_v28, %s4109_s26 }
 0x870   :  { %v639_v29 = vpop.permute.xlu0 %638 }
 0x871   :  { %641 = vst.msk [vmem:[%s4906_s9] sm:$0x3] %vm32_vm0, %v639_v29  ;;  %3331 = vst.msk [vmem:[%s4911_s7 + $0x4] sm:$0x3] %vm32_vm0, %v639_v29 }
 0x878   :  { %v651_v30 = vld [vmem:[%s4906_s9] sm:$0x3] }
 0x879   :  { %3595 = vmatmul.mubr.msk.f32.vlgmr.msra.gmra.mrb[4].mxu0 %vm46_vm2, %v651_v30 }
 0x87a   :  { %3856 = vmatpush3.bf16.msra.mxu0 %v4207_v7  ;;  %3605 = vmatprep.mubr.msk.f32.mxu0 %vm4106_vm1, %v4107_v3  ;;  %v822_v45 = vpop.permute.xlu1 %821 }
 0x87b   :  { %3857 = vmatprep.subr.bf16.mxu0 %v4105_v0 }
 0x87e   :  { %3859 = vmatpush3.bf16.msra.mxu0 %v4220_v11 }
 0x87f   :  { %3869 = vmatprep.subr.bf16.mxu0 %v4105_v0 }
 0x881   :  { %3606 = vmatmul.mubr.msk.f32.vlgmr.msra.gmra.mrb[6].mxu0 %vm120_vm3, %v3332_v31 }
 0x882   :  { %3871 = vmatpush3.bf16.msra.mxu0 %v4192_v4  ;;  %3630 = vmatprep.mubr.msk.f32.mxu0 %vm4106_vm1, %v4107_v3 }
 0x883   :  { %3872 = vmatprep.subr.bf16.mxu0 %v4105_v0 }
 0x94c   :  { %v728_v32 = vpop.f32.mrb[4].mxu0 }
 0x94d   :  { %v3596_v33 = vpop.f32.mrb[5].mxu0 }
 0x954   :  { %v801_v34 = vpop.f32.mrb[6].mxu0 }
 0x955   :  { %v802_v35 = vadd.f32 %v801_v34, %v728_v32  ;;  %v3607_v36 = vpop.f32.mrb[7].mxu0 }
 0x957   :  { %v812_v37 = vadd.f32 %v4243_v16, %v802_v35 }
 0x959   :  { %4000 = vtanh.f32 %v812_v37  ;;  %v3336_v39 = vmul.f32 -1.442695, %v812_v37 }
 0x95b   :  { %4002 = vpow2.f32 %v3336_v39 }
 0x963   :  { %v4001_v38 = vpop.eup %4000 }
 0x964   :  { %826 = vrot.lane.b32.xlu0 %v4001_v38, %s4108_s23 }
 0x965   :  { %v4003_v40 = vpop.eup %4002 }
 0x966   :  { %v816_v41 = vadd.f32 1.0, %v4003_v40 }
 0x968   :  { %4004 = vrcp.f32 %v816_v41 }
 0x972   :  { %v4005_v42 = vpop.eup %4004 }
 0x973   :  { %v824_v46 = vmul.f32 %v4005_v42, %v822_v45 }
 0x9d6   :  { %v827_v43 = vpop.permute.xlu0 %826 }
 0x9d7   :  { %v829_v44 = vmul.f32 %v4005_v42, %v827_v43 }
 0x9d9   :  { %831 = vrot.lane.b32.xlu0 %v829_v44, %s4109_s26 }
 0xa4b   :  { %v832_v47 = vpop.permute.xlu0 %831 }
 0xa4c   :  { %v834_v48 = vadd.f32 %v832_v47, %v824_v46  ;;  %v1676_v46 = vld [vmem:[%s4913_s5] sm:$0xff]  ;;  %v1677_v47 = vld [vmem:[%s4913_s5 + $0x8] sm:$0xff] }
 0xa4e   :  { %4006 = vtanh.f32 %v834_v48 }
 0xa58   :  { %v4007_v49 = vpop.eup %4006 }
 0xa59   :  { %837 = vrot.lane.b32.xlu1 %v4007_v49, %s4110_s27  ;;  %v4490_v49 = vpack.c.bf16 %v1677_v47, %v1676_v46 }
 0xa5d   :  { %847 = vrot.lane.b32.xlu1 %v834_v48, %s4111_s2  ;;  %v3350_v48 = vld [vmem:[%s4908_s0 + $0xc] sm:$0x3] }
 0xacb   :  { %v838_v50 = vpop.permute.xlu1 %837 }
 0xacc   :  { %v840_v51 = vmul.f32 %v4005_v42, %v838_v50  ;;  %v1672_v50 = vld [vmem:[%s4914_s4] sm:$0xff] }
 0xace   :  { %842 = vrot.lane.b32.xlu0 %v840_v51, %s4112_s28  ;;  %v1673_v51 = vld [vmem:[%s4914_s4 + $0x8] sm:$0xff] }
 0xacf   :  { %v848_v52 = vpop.permute.xlu1 %847 }
 0xad0   :  { %850 = vst.msk [vmem:[%s4909_s10] sm:$0x3] %vm32_vm0, %v848_v52  ;;  %v1670_v52 = vld [vmem:[%s4912_s11] sm:$0x3] }
 0xad7   :  { %v856_v53 = vld [vmem:[%s4909_s10] sm:$0x3] }
 0xad8   :  { %1025 = vrot.lane.b32.xlu1 %v856_v53, %s4109_s26  ;;  %v4506_v53 = vpack.c.bf16 %v1673_v51, %v1672_v50 }
 0xb40   :  { %v843_v54 = vpop.permute.xlu0 %842 }
 0xb41   :  { %845 = vst.msk [vmem:[%s4906_s9] sm:$0x3] %vm32_vm0, %v843_v54  ;;  %3337 = vst.msk [vmem:[%s4911_s7 + $0x6] sm:$0x3] %vm32_vm0, %v843_v54  ;;  %v1674_v54 = vld [vmem:[%s4914_s4 + $0x10] sm:$0xff] }
 0xb48   :  { %v855_v55 = vld [vmem:[%s4906_s9] sm:$0x3] }
 0xb49   :  { %3613 = vmatmul.mubr.msk.f32.vlgmr.msra.gmra.mrb[8].mxu1 %vm46_vm2, %v855_v55  ;;  %v1675_v55 = vld [vmem:[%s4914_s4 + $0x18] sm:$0xff] }
 0xb4a   :  { %3865 = vmatpush3.bf16.msra.mxu1 %v4207_v7  ;;  %3623 = vmatprep.mubr.msk.f32.mxu1 %vm4106_vm1, %v4107_v3  ;;  %v1026_v10 = vpop.permute.xlu1 %1025 }
 0xb4b   :  { %3866 = vmatprep.subr.bf16.mxu1 %v4105_v0 }
 0xb4e   :  { %3868 = vmatpush3.bf16.msra.mxu1 %v4220_v11 }
 0xb4f   :  { %3878 = vmatprep.subr.bf16.mxu1 %v4105_v0 }
 0xb51   :  { %3624 = vmatmul.mubr.msk.f32.vlgmr.msra.gmra.mrb[10].mxu1 %vm120_vm3, %v3338_v56  ;;  %v4517_v56 = vpack.c.bf16 %v1675_v55, %v1674_v54 }
 0xb52   :  { %3880 = vmatpush3.bf16.msra.mxu1 %v4192_v4  ;;  %3648 = vmatprep.mubr.msk.f32.mxu1 %vm4106_vm1, %v4107_v3 }
 0xb53   :  { %3881 = vmatprep.subr.bf16.mxu1 %v4105_v0 }
 0xc1c   :  { %v932_v57 = vpop.f32.mrb[8].mxu1 }
 0xc1d   :  { %v3614_v58 = vpop.f32.mrb[9].mxu1 }
 0xc24   :  { %v1005_v59 = vpop.f32.mrb[10].mxu1 }
 0xc25   :  { %v1006_v60 = vadd.f32 %v1005_v59, %v932_v57  ;;  %v3625_v61 = vpop.f32.mrb[11].mxu1  ;;  %v3362_v57 = vld [vmem:[%s4908_s0 + $0xe] sm:$0x3] }
 0xc27   :  { %v1016_v62 = vadd.f32 %v4243_v16, %v1006_v60 }
 0xc29   :  { %4008 = vtanh.f32 %v1016_v62  ;;  %v3342_v1 = vmul.f32 -1.442695, %v1016_v62 }
 0xc2b   :  { %4010 = vpow2.f32 %v3342_v1 }
 0xc33   :  { %v4009_v63 = vpop.eup %4008 }
 0xc34   :  { %1030 = vrot.lane.b32.xlu0 %v4009_v63, %s4108_s23 }
 0xc35   :  { %v4011_v2 = vpop.eup %4010 }
 0xc36   :  { %v1020_v5 = vadd.f32 1.0, %v4011_v2 }
 0xc38   :  { %4012 = vrcp.f32 %v1020_v5 }
 0xc42   :  { %v4013_v6 = vpop.eup %4012 }
 0xc43   :  { %v1028_v12 = vmul.f32 %v4013_v6, %v1026_v10 }
 0xca6   :  { %v1031_v8 = vpop.permute.xlu0 %1030 }
 0xca7   :  { %v1033_v9 = vmul.f32 %v4013_v6, %v1031_v8 }
 0xca9   :  { %1035 = vrot.lane.b32.xlu0 %v1033_v9, %s4109_s26 }
 0xd1b   :  { %v1036_v13 = vpop.permute.xlu0 %1035 }
 0xd1c   :  { %v1038_v14 = vadd.f32 %v1036_v13, %v1028_v12  ;;  %v1671_v13 = vld [vmem:[%s4915_s12] sm:$0x3] }
 0xd1e   :  { %4014 = vtanh.f32 %v1038_v14 }
 0xd28   :  { %v4015_v15 = vpop.eup %4014 }
 0xd29   :  { %1041 = vrot.lane.b32.xlu1 %v4015_v15, %s4110_s27 }
 0xd2d   :  { %1051 = vrot.lane.b32.xlu1 %v1038_v14, %s4111_s2 }
 0xd9b   :  { %v1042_v17 = vpop.permute.xlu1 %1041 }
 0xd9c   :  { %v1044_v18 = vmul.f32 %v4013_v6, %v1042_v17  ;;  %v4541_v6 = vld [vmem:[%s4916_s6] ss:$0 sm:$0xff] }
 0xd9e   :  { %1046 = vrot.lane.b32.xlu0 %v1044_v18, %s4112_s28 }
 0xd9f   :  { %v1052_v19 = vpop.permute.xlu1 %1051 }
 0xda0   :  { %1054 = vst.msk [vmem:[%s4909_s10] sm:$0x3] %vm32_vm0, %v1052_v19 }
 0xda7   :  { %v1060_v20 = vld [vmem:[%s4909_s10] sm:$0x3] }
 0xda8   :  { %1229 = vrot.lane.b32.xlu1 %v1060_v20, %s4109_s26 }
 0xe10   :  { %v1047_v21 = vpop.permute.xlu0 %1046 }
 0xe11   :  { %1049 = vst.msk [vmem:[%s4906_s9] sm:$0x3] %vm32_vm0, %v1047_v21  ;;  %3343 = vst.msk [vmem:[%s4911_s7 + $0x8] sm:$0x3] %vm32_vm0, %v1047_v21 }
 0xe18   :  { %v1059_v22 = vld [vmem:[%s4906_s9] sm:$0x3] }
 0xe19   :  { %3631 = vmatmul.mubr.msk.f32.vlgmr.msra.gmra.mrb[8].mxu0 %vm46_vm2, %v1059_v22 }
 0xe1a   :  { %3874 = vmatpush3.bf16.msra.mxu0 %v4207_v7  ;;  %3641 = vmatprep.mubr.msk.f32.mxu0 %vm4106_vm1, %v4107_v3  ;;  %v1230_v36 = vpop.permute.xlu1 %1229 }
 0xe1b   :  { %3875 = vmatprep.subr.bf16.mxu0 %v4105_v0 }
 0xe1e   :  { %3877 = vmatpush3.bf16.msra.mxu0 %v4220_v11 }
 0xe1f   :  { %3887 = vmatprep.subr.bf16.mxu0 %v4105_v0 }
 0xe21   :  { %3642 = vmatmul.mubr.msk.f32.vlgmr.msra.gmra.mrb[10].mxu0 %vm120_vm3, %v3344_v23 }
 0xe22   :  { %3889 = vmatpush3.bf16.msra.mxu0 %v4192_v4  ;;  %3666 = vmatprep.mubr.msk.f32.mxu0 %vm4106_vm1, %v4107_v3 }
 0xe23   :  { %3890 = vmatprep.subr.bf16.mxu0 %v4105_v0 }
 0xeec   :  { %v1136_v24 = vpop.f32.mrb[8].mxu0 }
 0xeed   :  { %v3632_v25 = vpop.f32.mrb[9].mxu0 }
 0xef4   :  { %v1209_v26 = vpop.f32.mrb[10].mxu0 }
 0xef5   :  { %v1210_v27 = vadd.f32 %v1209_v26, %v1136_v24  ;;  %v3643_v28 = vpop.f32.mrb[11].mxu0 }
 0xef7   :  { %v1220_v29 = vadd.f32 %v4243_v16, %v1210_v27 }
 0xef9   :  { %4016 = vtanh.f32 %v1220_v29  ;;  %v3348_v31 = vmul.f32 -1.442695, %v1220_v29 }
 0xefb   :  { %4018 = vpow2.f32 %v3348_v31 }
 0xf03   :  { %v4017_v30 = vpop.eup %4016 }
 0xf04   :  { %1234 = vrot.lane.b32.xlu0 %v4017_v30, %s4108_s23 }
 0xf05   :  { %v4019_v32 = vpop.eup %4018 }
 0xf06   :  { %v1224_v4 = vadd.f32 1.0, %v4019_v32 }
 0xf08   :  { %4020 = vrcp.f32 %v1224_v4 }
 0xf12   :  { %v4021_v33 = vpop.eup %4020 }
 0xf13   :  { %v1232_v37 = vmul.f32 %v4021_v33, %v1230_v36 }
 0xf76   :  { %v1235_v34 = vpop.permute.xlu0 %1234 }
 0xf77   :  { %v1237_v35 = vmul.f32 %v4021_v33, %v1235_v34 }
 0xf79   :  { %1239 = vrot.lane.b32.xlu0 %v1237_v35, %s4109_s26 }
 0xfeb   :  { %v1240_v38 = vpop.permute.xlu0 %1239 }
 0xfec   :  { %v1242_v39 = vadd.f32 %v1240_v38, %v1232_v37 }
 0xfee   :  { %4022 = vtanh.f32 %v1242_v39 }
 0xff8   :  { %v4023_v40 = vpop.eup %4022 }
 0xff9   :  { %1245 = vrot.lane.b32.xlu1 %v4023_v40, %s4110_s27 }
 0xffd   :  { %1255 = vrot.lane.b32.xlu1 %v1242_v39, %s4111_s2 }
0x106b   :  { %v1246_v41 = vpop.permute.xlu1 %1245 }
0x106c   :  { %v1248_v42 = vmul.f32 %v4021_v33, %v1246_v41 }
0x106e   :  { %1250 = vrot.lane.b32.xlu0 %v1248_v42, %s4112_s28 }
0x106f   :  { %v1256_v43 = vpop.permute.xlu1 %1255 }
0x1070   :  { %1258 = vst.msk [vmem:[%s4909_s10] sm:$0x3] %vm32_vm0, %v1256_v43 }
0x10e0   :  { %v1251_v44 = vpop.permute.xlu0 %1250 }
0x10e1   :  { %1253 = vst.msk [vmem:[%s4906_s9] sm:$0x3] %vm32_vm0, %v1251_v44  ;;  %3349 = vst.msk [vmem:[%s4911_s7 + $0xa] sm:$0x3] %vm32_vm0, %v1251_v44 }
0x10e8   :  { %v1263_v45 = vld [vmem:[%s4906_s9] sm:$0x3] }
0x10e9   :  { %3649 = vmatmul.mubr.msk.f32.vlgmr.msra.gmra.mrb[12].mxu1 %vm46_vm2, %v1263_v45 }
0x10ea   :  { %3883 = vmatpush3.bf16.msra.mxu1 %v4207_v7  ;;  %3659 = vmatprep.mubr.msk.f32.mxu1 %vm4106_vm1, %v4107_v3 }
0x10eb   :  { %3884 = vmatprep.subr.bf16.mxu1 %v4105_v0 }
0x10ee   :  { %3886 = vmatpush3.bf16.msra.mxu1 %v4220_v11 }
0x10ef   :  { %3896 = vmatprep.subr.bf16.mxu1 %v4105_v0 }
0x10f1   :  { %3660 = vmatmul.mubr.msk.f32.vlgmr.msra.gmra.mrb[14].mxu1 %vm120_vm3, %v3350_v48 }
0x10f2   :  { %3898 = vmatpush3.bf16.msra.mxu1 %v4490_v49  ;;  %3684 = vmatprep.mubr.msk.f32.mxu1 %vm4106_vm1, %v4107_v3 }
0x10f3   :  { %3899 = vmatprep.subr.bf16.mxu1 %v4105_v0 }
0x10f5   :  { %3685 = vmatmul.mubr.msk.f32.vlgmr.msra.gmra.mrb[16].mxu1 %vm46_vm2, %v1670_v52 }
0x10f6   :  { %3901 = vmatpush3.bf16.msra.mxu1 %v4506_v53  ;;  %3695 = vmatprep.mubr.msk.f32.mxu1 %vm4106_vm1, %v4107_v3 }
0x10f7   :  { %3902 = vmatprep.subr.bf16.mxu1 %v4105_v0 }
0x10fa   :  { %3904 = vmatpush3.bf16.msra.mxu1 %v4517_v56 }
0x10fb   :  { %3914 = vmatprep.subr.bf16.mxu1 %v4105_v0 }
0x10fd   :  { %3696 = vmatmul.mubr.msk.f32.vlgmr.msra.gmra.mrb[18].mxu1 %vm120_vm3, %v3362_v57 }
0x10fe   :  { %3916 = vmatpush3.bf16.msra.mxu1 %v4490_v49  ;;  %3720 = vmatprep.mubr.msk.f32.mxu1 %vm4106_vm1, %v4107_v3 }
0x10ff   :  { %3917 = vmatprep.subr.bf16.mxu1 %v4105_v0 }
0x11bc   :  { %v1340_v58 = vpop.f32.mrb[12].mxu1 }
0x11bd   :  { %v3650_v59 = vpop.f32.mrb[13].mxu1 }
0x11c4   :  { %v1413_v60 = vpop.f32.mrb[14].mxu1 }
0x11c5   :  { %v1414_v61 = vadd.f32 %v1413_v60, %v1340_v58  ;;  %v3661_v62 = vpop.f32.mrb[15].mxu1 }
0x11c7   :  { %v1424_v63 = vadd.f32 %v4243_v16, %v1414_v61  ;;  %v1264_v16 = vld [vmem:[%s4909_s10] sm:$0x3] }
0x11c8   :  { %v1747_v1 = vpop.f32.mrb[16].mxu1 }
0x11c9   :  { %4024 = vtanh.f32 %v1424_v63  ;;  %v3686_v2 = vpop.f32.mrb[17].mxu1  ;;  %v3354_v15 = vmul.f32 -1.442695, %v1424_v63 }
0x11d0   :  { %v1820_v5 = vpop.f32.mrb[18].mxu1 }
0x11d1   :  { %v1821_v8 = vadd.f32 %v1820_v5, %v1747_v1  ;;  %v3697_v9 = vpop.f32.mrb[19].mxu1 }
0x11d3   :  { %v4025_v10 = vpop.eup %4024  ;;  %v1831_v12 = vadd.f32 %v4541_v6, %v1821_v8 }
0x11d4   :  { %1438 = vrot.lane.b32.xlu0 %v4025_v10, %s4108_s23 }
0x11d5   :  { %4026 = vtanh.f32 %v1831_v12  ;;  %v3366_v17 = vmul.f32 -1.442695, %v1831_v12 }
0x11d6   :  { %4028 = vpow2.f32 %v3354_v15 }
0x11d7   :  { %4030 = vpow2.f32 %v3366_v17 }
0x11d8   :  { %1433 = vrot.lane.b32.xlu0 %v1264_v16, %s4109_s26 }
0x11dc   :  { %1840 = vrot.lane.b32.xlu0 %v1671_v13, %s4109_s26 }
0x11df   :  { %v4027_v14 = vpop.eup %4026 }
0x11e0   :  { %1845 = vrot.lane.b32.xlu1 %v4027_v14, %s4108_s23  ;;  %v4029_v18 = vpop.eup %4028 }
0x11e1   :  { %v1428_v19 = vadd.f32 1.0, %v4029_v18  ;;  %v4031_v20 = vpop.eup %4030 }
0x11e2   :  { %v1835_v21 = vadd.f32 1.0, %v4031_v20 }
0x11e3   :  { %4032 = vrcp.f32 %v1428_v19 }
0x11e4   :  { %4034 = vrcp.f32 %v1835_v21  ;;  %v3374_v21 = vld [vmem:[%s4908_s0 + $0xa] sm:$0x3] }
0x11ed   :  { %v4033_v22 = vpop.eup %4032 }
0x11ee   :  { %v4035_v25 = vpop.eup %4034 }
0x1246   :  { %v1439_v23 = vpop.permute.xlu0 %1438 }
0x1247   :  { %v1441_v24 = vmul.f32 %v4033_v22, %v1439_v23 }
0x1249   :  { %1443 = vrot.lane.b32.xlu1 %v1441_v24, %s4109_s26 }
0x124a   :  { %v1434_v28 = vpop.permute.xlu0 %1433 }
0x124b   :  { %v1436_v29 = vmul.f32 %v4033_v22, %v1434_v28 }
0x124e   :  { %v1841_v32 = vpop.permute.xlu0 %1840 }
0x124f   :  { %v1843_v4 = vmul.f32 %v4035_v25, %v1841_v32 }
0x1252   :  { %v1846_v26 = vpop.permute.xlu1 %1845 }
0x1253   :  { %v1848_v27 = vmul.f32 %v4035_v25, %v1846_v26 }
0x1255   :  { %1850 = vrot.lane.b32.xlu1 %v1848_v27, %s4109_s26 }
0x12bb   :  { %v1444_v30 = vpop.permute.xlu1 %1443 }
0x12bc   :  { %v4556_v31 = vadd.f32 %v1444_v30, %v1436_v29 }
0x12be   :  { %4036 = vtanh.f32 %v4556_v31 }
0x12c7   :  { %v1851_v33 = vpop.permute.xlu1 %1850 }
0x12c8   :  { %v4037_v34 = vpop.eup %4036  ;;  %v1853_v35 = vadd.f32 %v1851_v33, %v1843_v4 }
0x12c9   :  { %1449 = vrot.lane.b32.xlu0 %v4037_v34, %s4110_s27 }
0x12ca   :  { %4038 = vtanh.f32 %v1853_v35 }
0x12d4   :  { %v4039_v36 = vpop.eup %4038 }
0x12d5   :  { %1856 = vrot.lane.b32.xlu1 %v4039_v36, %s4110_s27 }
0x133b   :  { %v1450_v37 = vpop.permute.xlu0 %1449 }
0x133c   :  { %v1452_v38 = vmul.f32 %v4033_v22, %v1450_v37 }
0x133e   :  { %1454 = vrot.lane.b32.xlu0 %v1452_v38, %s4112_s28 }
0x1342   :  { %1866 = vrot.lane.b32.xlu0 %v1853_v35, %s4111_s2 }
0x1347   :  { %v1857_v39 = vpop.permute.xlu1 %1856 }
0x1348   :  { %v1859_v40 = vmul.f32 %v4035_v25, %v1857_v39 }
0x134a   :  { %1861 = vrot.lane.b32.xlu1 %v1859_v40, %s4112_s28 }
0x13b0   :  { %v1455_v41 = vpop.permute.xlu0 %1454 }
0x13b1   :  { %1457 = vst.msk [vmem:[%s4906_s9] sm:$0x3] %vm32_vm0, %v1455_v41  ;;  %3355 = vst.msk [vmem:[%s4911_s7 + $0xc] sm:$0x3] %vm32_vm0, %v1455_v41 }
0x13b4   :  { %v1867_v42 = vpop.permute.xlu0 %1866 }
0x13b5   :  { %1869 = vst.msk [vmem:[%s4915_s12] sm:$0x3] %vm32_vm0, %v1867_v42 }
0x13b8   :  { %v1467_v43 = vld [vmem:[%s4906_s9] sm:$0x3] }
0x13b9   :  { %3667 = vmatmul.mubr.msk.f32.vlgmr.msra.gmra.mrb[12].mxu0 %vm46_vm2, %v1467_v43 }
0x13ba   :  { %3892 = vmatpush3.bf16.msra.mxu0 %v4207_v7  ;;  %3677 = vmatprep.mubr.msk.f32.mxu0 %vm4106_vm1, %v4107_v3  ;;  %v3356_v7 = vld [vmem:[%s4908_s0 + $0xe] sm:$0x3] }
0x13bb   :  { %3893 = vmatprep.subr.bf16.mxu0 %v4105_v0 }
0x13bc   :  { %v1862_v44 = vpop.permute.xlu1 %1861  ;;  %v1874_v45 = vld [vmem:[%s4915_s12] sm:$0x3] }
0x13bd   :  { %1864 = vst.msk [vmem:[%s4912_s11] sm:$0x3] %vm32_vm0, %v1862_v44  ;;  %3367 = vst.msk [vmem:[%s4917_s8 + $0xe] sm:$0x3] %vm32_vm0, %v1862_v44  ;;  %2043 = vrot.lane.b32.xlu0 %v1874_v45, %s4109_s26 }
0x13be   :  { %3895 = vmatpush3.bf16.msra.mxu0 %v4220_v11  ;;  %v3368_v11 = vld [vmem:[%s4908_s0 + $0xc] sm:$0x3] }
0x13bf   :  { %3905 = vmatprep.subr.bf16.mxu0 %v4105_v0 }
0x13c1   :  { %3678 = vmatmul.mubr.msk.f32.vlgmr.msra.gmra.mrb[14].mxu0 %vm120_vm3, %v3356_v7  ;;  %v3380_v7 = vld [vmem:[%s4908_s0 + $0x8] sm:$0x3] }
0x13c2   :  { %3907 = vmatpush3.bf16.msra.mxu0 %v4490_v49  ;;  %3702 = vmatprep.mubr.msk.f32.mxu0 %vm4106_vm1, %v4107_v3 }
0x13c3   :  { %3908 = vmatprep.subr.bf16.mxu0 %v4105_v0 }
0x13c4   :  { %v1873_v46 = vld [vmem:[%s4912_s11] sm:$0x3] }
0x13c5   :  { %3703 = vmatmul.mubr.msk.f32.vlgmr.msra.gmra.mrb[16].mxu0 %vm46_vm2, %v1873_v46 }
0x13c6   :  { %3910 = vmatpush3.bf16.msra.mxu0 %v4506_v53  ;;  %3713 = vmatprep.mubr.msk.f32.mxu0 %vm4106_vm1, %v4107_v3 }
0x13c7   :  { %3911 = vmatprep.subr.bf16.mxu0 %v4105_v0 }
0x13ca   :  { %3913 = vmatpush3.bf16.msra.mxu0 %v4517_v56 }
0x13cb   :  { %3923 = vmatprep.subr.bf16.mxu0 %v4105_v0 }
0x13cd   :  { %3714 = vmatmul.mubr.msk.f32.vlgmr.msra.gmra.mrb[18].mxu0 %vm120_vm3, %v3368_v11 }
0x13ce   :  { %3925 = vmatpush3.bf16.msra.mxu0 %v4490_v49  ;;  %3738 = vmatprep.mubr.msk.f32.mxu0 %vm4106_vm1, %v4107_v3 }
0x13cf   :  { %3926 = vmatprep.subr.bf16.mxu0 %v4105_v0 }
0x142f   :  { %v2044_v9 = vpop.permute.xlu0 %2043 }
0x148c   :  { %v1544_v47 = vpop.f32.mrb[12].mxu0 }
0x148d   :  { %v3668_v48 = vpop.f32.mrb[13].mxu0 }
0x1494   :  { %v1617_v50 = vpop.f32.mrb[14].mxu0 }
0x1495   :  { %v4624_v51 = vadd.f32 %v1617_v50, %v1544_v47  ;;  %v3679_v52 = vpop.f32.mrb[15].mxu0 }
0x1498   :  { %v1950_v54 = vpop.f32.mrb[16].mxu0 }
0x1499   :  { %v3704_v55 = vpop.f32.mrb[17].mxu0 }
0x14a0   :  { %v2023_v57 = vpop.f32.mrb[18].mxu0 }
0x14a1   :  { %v2024_v58 = vadd.f32 %v2023_v57, %v1950_v54  ;;  %v3715_v59 = vpop.f32.mrb[19].mxu0 }
0x14a3   :  { %v2034_v60 = vadd.f32 %v4541_v6, %v2024_v58 }
0x14a5   :  { %4040 = vtanh.f32 %v2034_v60  ;;  %v3372_v62 = vmul.f32 -1.442695, %v2034_v60 }
0x14a7   :  { %4042 = vpow2.f32 %v3372_v62 }
0x14af   :  { %v4041_v61 = vpop.eup %4040 }
0x14b0   :  { %2048 = vrot.lane.b32.xlu1 %v4041_v61, %s4108_s23 }
0x14b1   :  { %v4043_v63 = vpop.eup %4042 }
0x14b2   :  { %v2038_v1 = vadd.f32 1.0, %v4043_v63 }
0x14b4   :  { %4044 = vrcp.f32 %v2038_v1 }
0x14be   :  { %v4045_v2 = vpop.eup %4044 }
0x14bf   :  { %v2046_v10 = vmul.f32 %v4045_v2, %v2044_v9 }
0x1522   :  { %v2049_v5 = vpop.permute.xlu1 %2048 }
0x1523   :  { %v2051_v8 = vmul.f32 %v4045_v2, %v2049_v5 }
0x1525   :  { %2053 = vrot.lane.b32.xlu1 %v2051_v8, %s4109_s26 }
0x1597   :  { %v2054_v12 = vpop.permute.xlu1 %2053 }
0x1598   :  { %v2056_v16 = vadd.f32 %v2054_v12, %v2046_v10 }
0x159a   :  { %4046 = vtanh.f32 %v2056_v16 }
0x15a4   :  { %v4047_v13 = vpop.eup %4046 }
0x15a5   :  { %2059 = vrot.lane.b32.xlu0 %v4047_v13, %s4110_s27 }
0x15a9   :  { %2069 = vrot.lane.b32.xlu0 %v2056_v16, %s4111_s2 }
0x1617   :  { %v2060_v14 = vpop.permute.xlu0 %2059 }
0x1618   :  { %v2062_v15 = vmul.f32 %v4045_v2, %v2060_v14  ;;  %v3386_v14 = vld [vmem:[%s4908_s0 + $0x6] sm:$0x3] }
0x161a   :  { %2064 = vrot.lane.b32.xlu1 %v2062_v15, %s4112_s28 }
0x161b   :  { %v2070_v17 = vpop.permute.xlu0 %2069 }
0x161c   :  { %2072 = vst.msk [vmem:[%s4915_s12] sm:$0x3] %vm32_vm0, %v2070_v17 }
0x1623   :  { %v2077_v18 = vld [vmem:[%s4915_s12] sm:$0x3] }
0x1624   :  { %2246 = vrot.lane.b32.xlu0 %v2077_v18, %s4109_s26 }
0x168c   :  { %v2065_v19 = vpop.permute.xlu1 %2064 }
0x168d   :  { %2067 = vst.msk [vmem:[%s4912_s11] sm:$0x3] %vm32_vm0, %v2065_v19  ;;  %3373 = vst.msk [vmem:[%s4917_s8 + $0xc] sm:$0x3] %vm32_vm0, %v2065_v19 }
0x1694   :  { %v2076_v20 = vld [vmem:[%s4912_s11] sm:$0x3] }
0x1695   :  { %3721 = vmatmul.mubr.msk.f32.vlgmr.msra.gmra.mrb[20].mxu1 %vm46_vm2, %v2076_v20 }
0x1696   :  { %3919 = vmatpush3.bf16.msra.mxu1 %v4506_v53  ;;  %3731 = vmatprep.mubr.msk.f32.mxu1 %vm4106_vm1, %v4107_v3  ;;  %v2247_v35 = vpop.permute.xlu0 %2246 }
0x1697   :  { %3920 = vmatprep.subr.bf16.mxu1 %v4105_v0 }
0x169a   :  { %3922 = vmatpush3.bf16.msra.mxu1 %v4517_v56 }
0x169b   :  { %3932 = vmatprep.subr.bf16.mxu1 %v4105_v0 }
0x169d   :  { %3732 = vmatmul.mubr.msk.f32.vlgmr.msra.gmra.mrb[22].mxu1 %vm120_vm3, %v3374_v21 }
0x169e   :  { %3934 = vmatpush3.bf16.msra.mxu1 %v4490_v49  ;;  %3756 = vmatprep.mubr.msk.f32.mxu1 %vm4106_vm1, %v4107_v3 }
0x169f   :  { %3935 = vmatprep.subr.bf16.mxu1 %v4105_v0 }
0x1768   :  { %v2153_v22 = vpop.f32.mrb[20].mxu1 }
0x1769   :  { %v3722_v23 = vpop.f32.mrb[21].mxu1 }
0x1770   :  { %v2226_v24 = vpop.f32.mrb[22].mxu1 }
0x1771   :  { %v2227_v25 = vadd.f32 %v2226_v24, %v2153_v22  ;;  %v3733_v26 = vpop.f32.mrb[23].mxu1 }
0x1773   :  { %v2237_v27 = vadd.f32 %v4541_v6, %v2227_v25 }
0x1775   :  { %4048 = vtanh.f32 %v2237_v27  ;;  %v3378_v29 = vmul.f32 -1.442695, %v2237_v27 }
0x1777   :  { %4050 = vpow2.f32 %v3378_v29 }
0x177f   :  { %v4049_v28 = vpop.eup %4048 }
0x1780   :  { %2251 = vrot.lane.b32.xlu1 %v4049_v28, %s4108_s23 }
0x1781   :  { %v4051_v30 = vpop.eup %4050 }
0x1782   :  { %v2241_v32 = vadd.f32 1.0, %v4051_v30 }
0x1784   :  { %4052 = vrcp.f32 %v2241_v32 }
0x178e   :  { %v4053_v4 = vpop.eup %4052 }
0x178f   :  { %v2249_v36 = vmul.f32 %v4053_v4, %v2247_v35 }
0x17f2   :  { %v2252_v33 = vpop.permute.xlu1 %2251 }
0x17f3   :  { %v2254_v34 = vmul.f32 %v4053_v4, %v2252_v33 }
0x17f5   :  { %2256 = vrot.lane.b32.xlu1 %v2254_v34, %s4109_s26 }
0x1867   :  { %v2257_v37 = vpop.permute.xlu1 %2256 }
0x1868   :  { %v2259_v38 = vadd.f32 %v2257_v37, %v2249_v36 }
0x186a   :  { %4054 = vtanh.f32 %v2259_v38 }
0x1874   :  { %v4055_v39 = vpop.eup %4054 }
0x1875   :  { %2262 = vrot.lane.b32.xlu0 %v4055_v39, %s4110_s27 }
0x1879   :  { %2272 = vrot.lane.b32.xlu0 %v2259_v38, %s4111_s2 }
0x18e7   :  { %v2263_v40 = vpop.permute.xlu0 %2262 }
0x18e8   :  { %v2265_v41 = vmul.f32 %v4053_v4, %v2263_v40  ;;  %v3392_v40 = vld [vmem:[%s4908_s0 + $0x4] sm:$0x3] }
0x18ea   :  { %2267 = vrot.lane.b32.xlu1 %v2265_v41, %s4112_s28 }
0x18eb   :  { %v2273_v42 = vpop.permute.xlu0 %2272 }
0x18ec   :  { %2275 = vst.msk [vmem:[%s4915_s12] sm:$0x3] %vm32_vm0, %v2273_v42 }
0x18f3   :  { %v2280_v43 = vld [vmem:[%s4915_s12] sm:$0x3] }
0x18f4   :  { %2449 = vrot.lane.b32.xlu0 %v2280_v43, %s4109_s26 }
0x195c   :  { %v2268_v44 = vpop.permute.xlu1 %2267 }
0x195d   :  { %2270 = vst.msk [vmem:[%s4912_s11] sm:$0x3] %vm32_vm0, %v2268_v44  ;;  %3379 = vst.msk [vmem:[%s4917_s8 + $0xa] sm:$0x3] %vm32_vm0, %v2268_v44 }
0x1964   :  { %v2279_v45 = vld [vmem:[%s4912_s11] sm:$0x3] }
0x1965   :  { %3739 = vmatmul.mubr.msk.f32.vlgmr.msra.gmra.mrb[20].mxu0 %vm46_vm2, %v2279_v45 }
0x1966   :  { %3928 = vmatpush3.bf16.msra.mxu0 %v4506_v53  ;;  %3749 = vmatprep.mubr.msk.f32.mxu0 %vm4106_vm1, %v4107_v3  ;;  %v2450_v62 = vpop.permute.xlu0 %2449 }
0x1967   :  { %3929 = vmatprep.subr.bf16.mxu0 %v4105_v0 }
0x196a   :  { %3931 = vmatpush3.bf16.msra.mxu0 %v4517_v56 }
0x196b   :  { %3941 = vmatprep.subr.bf16.mxu0 %v4105_v0 }
0x196d   :  { %3750 = vmatmul.mubr.msk.f32.vlgmr.msra.gmra.mrb[22].mxu0 %vm120_vm3, %v3380_v7 }
0x196e   :  { %3943 = vmatpush3.bf16.msra.mxu0 %v4490_v49  ;;  %3774 = vmatprep.mubr.msk.f32.mxu0 %vm4106_vm1, %v4107_v3 }
0x196f   :  { %3944 = vmatprep.subr.bf16.mxu0 %v4105_v0 }
0x1a38   :  { %v2356_v46 = vpop.f32.mrb[20].mxu0 }
0x1a39   :  { %v3740_v11 = vpop.f32.mrb[21].mxu0 }
0x1a40   :  { %v2429_v47 = vpop.f32.mrb[22].mxu0 }
0x1a41   :  { %v2430_v48 = vadd.f32 %v2429_v47, %v2356_v46  ;;  %v3751_v50 = vpop.f32.mrb[23].mxu0 }
0x1a43   :  { %v2440_v52 = vadd.f32 %v4541_v6, %v2430_v48 }
0x1a45   :  { %4056 = vtanh.f32 %v2440_v52  ;;  %v3384_v55 = vmul.f32 -1.442695, %v2440_v52 }
0x1a47   :  { %4058 = vpow2.f32 %v3384_v55 }
0x1a4f   :  { %v4057_v54 = vpop.eup %4056 }
0x1a50   :  { %2454 = vrot.lane.b32.xlu1 %v4057_v54, %s4108_s23 }
0x1a51   :  { %v4059_v57 = vpop.eup %4058 }
0x1a52   :  { %v2444_v58 = vadd.f32 1.0, %v4059_v57 }
0x1a54   :  { %4060 = vrcp.f32 %v2444_v58 }
0x1a5e   :  { %v4061_v59 = vpop.eup %4060 }
0x1a5f   :  { %v2452_v63 = vmul.f32 %v4061_v59, %v2450_v62 }
0x1ac2   :  { %v2455_v60 = vpop.permute.xlu1 %2454 }
0x1ac3   :  { %v2457_v61 = vmul.f32 %v4061_v59, %v2455_v60 }
0x1ac5   :  { %2459 = vrot.lane.b32.xlu1 %v2457_v61, %s4109_s26 }
0x1b37   :  { %v2460_v1 = vpop.permute.xlu1 %2459 }
0x1b38   :  { %v2462_v2 = vadd.f32 %v2460_v1, %v2452_v63 }
0x1b3a   :  { %4062 = vtanh.f32 %v2462_v2 }
0x1b44   :  { %v4063_v5 = vpop.eup %4062 }
0x1b45   :  { %2465 = vrot.lane.b32.xlu0 %v4063_v5, %s4110_s27  ;;  %v3398_v5 = vld [vmem:[%s4908_s0 + $0x2] sm:$0x3] }
0x1b49   :  { %2475 = vrot.lane.b32.xlu0 %v2462_v2, %s4111_s2 }
0x1bb7   :  { %v2466_v8 = vpop.permute.xlu0 %2465 }
0x1bb8   :  { %v2468_v9 = vmul.f32 %v4061_v59, %v2466_v8 }
0x1bba   :  { %2470 = vrot.lane.b32.xlu1 %v2468_v9, %s4112_s28 }
0x1bbb   :  { %v2476_v10 = vpop.permute.xlu0 %2475 }
0x1bbc   :  { %2478 = vst.msk [vmem:[%s4915_s12] sm:$0x3] %vm32_vm0, %v2476_v10 }
0x1bc3   :  { %v2483_v12 = vld [vmem:[%s4915_s12] sm:$0x3] }
0x1bc4   :  { %2652 = vrot.lane.b32.xlu0 %v2483_v12, %s4109_s26 }
0x1c2c   :  { %v2471_v16 = vpop.permute.xlu1 %2470 }
0x1c2d   :  { %2473 = vst.msk [vmem:[%s4912_s11] sm:$0x3] %vm32_vm0, %v2471_v16  ;;  %3385 = vst.msk [vmem:[%s4917_s8 + $0x8] sm:$0x3] %vm32_vm0, %v2471_v16 }
0x1c34   :  { %v2482_v13 = vld [vmem:[%s4912_s11] sm:$0x3] }
0x1c35   :  { %3757 = vmatmul.mubr.msk.f32.vlgmr.msra.gmra.mrb[24].mxu1 %vm46_vm2, %v2482_v13 }
0x1c36   :  { %3937 = vmatpush3.bf16.msra.mxu1 %v4506_v53  ;;  %3767 = vmatprep.mubr.msk.f32.mxu1 %vm4106_vm1, %v4107_v3  ;;  %v2653_v29 = vpop.permute.xlu0 %2652 }
0x1c37   :  { %3938 = vmatprep.subr.bf16.mxu1 %v4105_v0 }
0x1c3a   :  { %3940 = vmatpush3.bf16.msra.mxu1 %v4517_v56 }
0x1c3b   :  { %3950 = vmatprep.subr.bf16.mxu1 %v4105_v0 }
0x1c3d   :  { %3768 = vmatmul.mubr.msk.f32.vlgmr.msra.gmra.mrb[26].mxu1 %vm120_vm3, %v3386_v14 }
0x1c3e   :  { %3952 = vmatpush3.bf16.msra.mxu1 %v4490_v49  ;;  %3792 = vmatprep.mubr.msk.f32.mxu1 %vm4106_vm1, %v4107_v3 }
0x1c3f   :  { %3953 = vmatprep.subr.bf16.mxu1 %v4105_v0 }
0x1d08   :  { %v2559_v15 = vpop.f32.mrb[24].mxu1 }
0x1d09   :  { %v3758_v17 = vpop.f32.mrb[25].mxu1 }
0x1d10   :  { %v2632_v18 = vpop.f32.mrb[26].mxu1 }
0x1d11   :  { %v2633_v19 = vadd.f32 %v2632_v18, %v2559_v15  ;;  %v3769_v20 = vpop.f32.mrb[27].mxu1 }
0x1d13   :  { %v2643_v21 = vadd.f32 %v4541_v6, %v2633_v19 }
0x1d15   :  { %4064 = vtanh.f32 %v2643_v21  ;;  %v3390_v23 = vmul.f32 -1.442695, %v2643_v21 }
0x1d17   :  { %4066 = vpow2.f32 %v3390_v23 }
0x1d1f   :  { %v4065_v22 = vpop.eup %4064 }
0x1d20   :  { %2657 = vrot.lane.b32.xlu1 %v4065_v22, %s4108_s23 }
0x1d21   :  { %v4067_v24 = vpop.eup %4066 }
0x1d22   :  { %v2647_v25 = vadd.f32 1.0, %v4067_v24 }
0x1d24   :  { %4068 = vrcp.f32 %v2647_v25 }
0x1d2e   :  { %v4069_v26 = vpop.eup %4068 }
0x1d2f   :  { %v2655_v30 = vmul.f32 %v4069_v26, %v2653_v29 }
0x1d92   :  { %v2658_v27 = vpop.permute.xlu1 %2657 }
0x1d93   :  { %v2660_v28 = vmul.f32 %v4069_v26, %v2658_v27 }
0x1d95   :  { %2662 = vrot.lane.b32.xlu1 %v2660_v28, %s4109_s26 }
0x1e07   :  { %v2663_v32 = vpop.permute.xlu1 %2662 }
0x1e08   :  { %v2665_v4 = vadd.f32 %v2663_v32, %v2655_v30 }
0x1e0a   :  { %4070 = vtanh.f32 %v2665_v4 }
0x1e14   :  { %v4071_v33 = vpop.eup %4070 }
0x1e15   :  { %2668 = vrot.lane.b32.xlu0 %v4071_v33, %s4110_s27 }
0x1e19   :  { %2678 = vrot.lane.b32.xlu0 %v2665_v4, %s4111_s2 }
0x1e87   :  { %v2669_v34 = vpop.permute.xlu0 %2668 }
0x1e88   :  { %v2671_v35 = vmul.f32 %v4069_v26, %v2669_v34  ;;  %v4104_v26 = vld [vmem:[%s4910_s3] ss:$0 sm:$0xff] }
0x1e89   :  { %v1628_v27 = vadd.f32 %v4104_v26, %v4624_v51 }
0x1e8a   :  { %2673 = vrot.lane.b32.xlu1 %v2671_v35, %s4112_s28 }
0x1e8b   :  { %v2679_v36 = vpop.permute.xlu0 %2678  ;;  %v3360_v30 = vmul.f32 -1.442695, %v1628_v27 }
0x1e8c   :  { %2681 = vst.msk [vmem:[%s4915_s12] sm:$0x3] %vm32_vm0, %v2679_v36 }
0x1e93   :  { %v2686_v37 = vld [vmem:[%s4915_s12] sm:$0x3] }
0x1e94   :  { %2855 = vrot.lane.b32.xlu0 %v2686_v37, %s4109_s26 }
0x1efc   :  { %v2674_v38 = vpop.permute.xlu1 %2673 }
0x1efd   :  { %2676 = vst.msk [vmem:[%s4912_s11] sm:$0x3] %vm32_vm0, %v2674_v38  ;;  %3391 = vst.msk [vmem:[%s4917_s8 + $0x6] sm:$0x3] %vm32_vm0, %v2674_v38 }
0x1f04   :  { %v2685_v39 = vld [vmem:[%s4912_s11] sm:$0x3] }
0x1f05   :  { %3775 = vmatmul.mubr.msk.f32.vlgmr.msra.gmra.mrb[24].mxu0 %vm46_vm2, %v2685_v39 }
0x1f06   :  { %3946 = vmatpush3.bf16.msra.mxu0 %v4506_v53  ;;  %3785 = vmatprep.mubr.msk.f32.mxu0 %vm4106_vm1, %v4107_v3  ;;  %v2856_v54 = vpop.permute.xlu0 %2855 }
0x1f07   :  { %3947 = vmatprep.subr.bf16.mxu0 %v4105_v0 }
0x1f0a   :  { %3949 = vmatpush3.bf16.msra.mxu0 %v4517_v56 }
0x1f0b   :  { %3959 = vmatprep.subr.bf16.mxu0 %v4105_v0 }
0x1f0d   :  { %3786 = vmatmul.mubr.msk.f32.vlgmr.msra.gmra.mrb[26].mxu0 %vm120_vm3, %v3392_v40 }
0x1f0e   :  { %3961 = vmatpush3.bf16.msra.mxu0 %v4490_v49  ;;  %3810 = vmatprep.mubr.msk.f32.mxu0 %vm4106_vm1, %v4107_v3 }
0x1f0f   :  { %3962 = vmatprep.subr.bf16.mxu0 %v4105_v0 }
0x1fd8   :  { %v2762_v41 = vpop.f32.mrb[24].mxu0 }
0x1fd9   :  { %v3776_v42 = vpop.f32.mrb[25].mxu0 }
0x1fe0   :  { %v2835_v43 = vpop.f32.mrb[26].mxu0 }
0x1fe1   :  { %v2836_v44 = vadd.f32 %v2835_v43, %v2762_v41  ;;  %v3787_v45 = vpop.f32.mrb[27].mxu0 }
0x1fe3   :  { %v2846_v7 = vadd.f32 %v4541_v6, %v2836_v44  ;;  %v3090_v44 = vld [vmem:[%s4908_s0] sm:$0x3] }
0x1fe5   :  { %4072 = vtanh.f32 %v2846_v7  ;;  %v3396_v11 = vmul.f32 -1.442695, %v2846_v7 }
0x1fe7   :  { %4074 = vpow2.f32 %v3396_v11 }
0x1fef   :  { %v4073_v46 = vpop.eup %4072 }
0x1ff0   :  { %2860 = vrot.lane.b32.xlu1 %v4073_v46, %s4108_s23 }
0x1ff1   :  { %v4075_v47 = vpop.eup %4074 }
0x1ff2   :  { %v2850_v49 = vadd.f32 1.0, %v4075_v47 }
0x1ff4   :  { %4076 = vrcp.f32 %v2850_v49 }
0x1ffe   :  { %v4077_v48 = vpop.eup %4076 }
0x1fff   :  { %v2858_v55 = vmul.f32 %v4077_v48, %v2856_v54 }
0x2062   :  { %v2861_v50 = vpop.permute.xlu1 %2860 }
0x2063   :  { %v2863_v52 = vmul.f32 %v4077_v48, %v2861_v50 }
0x2065   :  { %2865 = vrot.lane.b32.xlu1 %v2863_v52, %s4109_s26 }
0x20d7   :  { %v2866_v57 = vpop.permute.xlu1 %2865 }
0x20d8   :  { %v2868_v58 = vadd.f32 %v2866_v57, %v2858_v55 }
0x20da   :  { %4078 = vtanh.f32 %v2868_v58 }
0x20e4   :  { %v4079_v59 = vpop.eup %4078 }
0x20e5   :  { %2871 = vrot.lane.b32.xlu0 %v4079_v59, %s4110_s27 }
0x20e9   :  { %2881 = vrot.lane.b32.xlu0 %v2868_v58, %s4111_s2 }
0x2157   :  { %v2872_v60 = vpop.permute.xlu0 %2871 }
0x2158   :  { %v2874_v61 = vmul.f32 %v4077_v48, %v2872_v60 }
0x215a   :  { %2876 = vrot.lane.b32.xlu1 %v2874_v61, %s4112_s28 }
0x215b   :  { %v2882_v62 = vpop.permute.xlu0 %2881 }
0x215c   :  { %2884 = vst.msk [vmem:[%s4915_s12] sm:$0x3] %vm32_vm0, %v2882_v62 }
0x2163   :  { %v2889_v63 = vld [vmem:[%s4915_s12] sm:$0x3] }
0x2164   :  { %3058 = vrot.lane.b32.xlu0 %v2889_v63, %s4109_s26 }
0x21cc   :  { %v2877_v1 = vpop.permute.xlu1 %2876 }
0x21cd   :  { %2879 = vst.msk [vmem:[%s4912_s11] sm:$0x3] %vm32_vm0, %v2877_v1  ;;  %3397 = vst.msk [vmem:[%s4917_s8 + $0x4] sm:$0x3] %vm32_vm0, %v2877_v1 }
0x21d4   :  { %v2888_v2 = vld [vmem:[%s4912_s11] sm:$0x3] }
0x21d5   :  { %3793 = vmatmul.mubr.msk.f32.vlgmr.msra.gmra.mrb[28].mxu1 %vm46_vm2, %v2888_v2 }
0x21d6   :  { %3955 = vmatpush3.bf16.msra.mxu1 %v4506_v53  ;;  %3803 = vmatprep.mubr.msk.f32.mxu1 %vm4106_vm1, %v4107_v3  ;;  %v3059_v22 = vpop.permute.xlu0 %3058 }
0x21d7   :  { %3956 = vmatprep.subr.bf16.mxu1 %v4105_v0 }
0x21da   :  { %3958 = vmatpush3.bf16.msra.mxu1 %v4517_v56 }
0x21dd   :  { %3804 = vmatmul.mubr.msk.f32.vlgmr.msra.gmra.mrb[30].mxu1 %vm120_vm3, %v3398_v5 }
0x22a8   :  { %v2965_v8 = vpop.f32.mrb[28].mxu1 }
0x22a9   :  { %v3794_v9 = vpop.f32.mrb[29].mxu1 }
0x22b0   :  { %v3038_v10 = vpop.f32.mrb[30].mxu1 }
0x22b1   :  { %v3039_v12 = vadd.f32 %v3038_v10, %v2965_v8  ;;  %v3805_v16 = vpop.f32.mrb[31].mxu1 }
0x22b3   :  { %v3049_v13 = vadd.f32 %v4541_v6, %v3039_v12 }
0x22b5   :  { %4080 = vtanh.f32 %v3049_v13  ;;  %v3402_v15 = vmul.f32 -1.442695, %v3049_v13 }
0x22b7   :  { %4082 = vpow2.f32 %v3402_v15 }
0x22bf   :  { %v4081_v14 = vpop.eup %4080 }
0x22c0   :  { %3063 = vrot.lane.b32.xlu1 %v4081_v14, %s4108_s23 }
0x22c1   :  { %v4083_v17 = vpop.eup %4082 }
0x22c2   :  { %v3053_v18 = vadd.f32 1.0, %v4083_v17 }
0x22c4   :  { %4084 = vrcp.f32 %v3053_v18 }
0x22ce   :  { %v4085_v19 = vpop.eup %4084 }
0x22cf   :  { %v3061_v23 = vmul.f32 %v4085_v19, %v3059_v22 }
0x2332   :  { %v3064_v20 = vpop.permute.xlu1 %3063 }
0x2333   :  { %v3066_v21 = vmul.f32 %v4085_v19, %v3064_v20 }
0x2335   :  { %3068 = vrot.lane.b32.xlu1 %v3066_v21, %s4109_s26 }
0x23a7   :  { %v3069_v24 = vpop.permute.xlu1 %3068 }
0x23a8   :  { %v3071_v25 = vadd.f32 %v3069_v24, %v3061_v23 }
0x23aa   :  { %4086 = vtanh.f32 %v3071_v25 }
0x23ab   :  { %4088 = vtanh.f32 %v1628_v27 }
0x23ac   :  { %4090 = vpow2.f32 %v3360_v30 }
0x23b4   :  { %v4087_v28 = vpop.eup %4086 }
0x23b5   :  { %3074 = vrot.lane.b32.xlu0 %v4087_v28, %s4110_s27  ;;  %v4089_v29 = vpop.eup %4088 }
0x23b6   :  { %v4091_v32 = vpop.eup %4090 }
0x23b7   :  { %v1632_v4 = vadd.f32 1.0, %v4091_v32 }
0x23b9   :  { %1459 = vrot.lane.b32.xlu0 %v4556_v31, %s4111_s2  ;;  %4092 = vrcp.f32 %v1632_v4 }
0x23bd   :  { %1642 = vrot.lane.b32.xlu0 %v4089_v29, %s4108_s23 }
0x23c3   :  { %v4093_v36 = vpop.eup %4092 }
0x2427   :  { %v3075_v33 = vpop.permute.xlu0 %3074 }
0x2428   :  { %v3077_v34 = vmul.f32 %v4085_v19, %v3075_v33 }
0x242a   :  { %3079 = vrot.lane.b32.xlu1 %v3077_v34, %s4112_s28 }
0x242b   :  { %v1460_v51 = vpop.permute.xlu0 %1459 }
0x242c   :  { %1462 = vst.msk [vmem:[%s4909_s10] sm:$0x3] %vm32_vm0, %v1460_v51 }
0x242e   :  { %3084 = vrot.lane.b32.xlu1 %v3071_v25, %s4111_s2 }
0x242f   :  { %v1643_v31 = vpop.permute.xlu0 %1642 }
0x2430   :  { %v1645_v37 = vmul.f32 %v4093_v36, %v1643_v31 }
0x2433   :  { %v1468_v35 = vld [vmem:[%s4909_s10] sm:$0x3] }
0x2434   :  { %1637 = vrot.lane.b32.xlu0 %v1468_v35, %s4109_s26 }
0x2438   :  { %1647 = vrot.lane.b32.xlu0 %v1645_v37, %s4109_s26 }
0x249c   :  { %v3080_v38 = vpop.permute.xlu1 %3079 }
0x249d   :  { %3082 = vst.msk [vmem:[%s4912_s11] sm:$0x3] %vm32_vm0, %v3080_v38  ;;  %3403 = vst.msk [vmem:[%s4917_s8 + $0x2] sm:$0x3] %vm32_vm0, %v3080_v38 }
0x24a0   :  { %v3085_v39 = vpop.permute.xlu1 %3084 }
0x24a1   :  { %3087 = vst.msk [vmem:[%s4915_s12] sm:$0x3] %vm32_vm0, %v3085_v39 }
0x24a4   :  { %v3091_v40 = vld [vmem:[%s4912_s11] sm:$0x3] }
0x24a5   :  { %3811 = vmatmul.mubr.msk.f32.vlgmr.msra.gmra.mrb[28].mxu0 %vm46_vm2, %v3091_v40 }
0x24a6   :  { %3964 = vmatpush3.bf16.msra.mxu0 %v4506_v53  ;;  %v1638_v41 = vpop.permute.xlu0 %1637  ;;  %3821 = vmatprep.mubr.msk.f32.mxu0 %vm4106_vm1, %v4107_v3 }
0x24a7   :  { %3965 = vmatprep.subr.bf16.mxu0 %v4105_v0  ;;  %v1640_v42 = vmul.f32 %v4093_v36, %v1638_v41 }
0x24a8   :  { %v3092_v50 = vld [vmem:[%s4915_s12] sm:$0x3] }
0x24aa   :  { %3967 = vmatpush3.bf16.msra.mxu0 %v4517_v56  ;;  %v1648_v43 = vpop.permute.xlu0 %1647 }
0x24ab   :  { %v1650_v45 = vadd.f32 %v1648_v43, %v1640_v42 }
0x24ad   :  { %4094 = vtanh.f32 %v1650_v45  ;;  %3822 = vmatmul.mubr.msk.f32.vlgmr.msra.gmra.mrb[30].mxu0 %vm120_vm3, %v3090_v44 }
0x24b7   :  { %v4095_v7 = vpop.eup %4094 }
0x24b8   :  { %1653 = vrot.lane.b32.xlu0 %v4095_v7, %s4110_s27 }
0x252a   :  { %v1654_v53 = vpop.permute.xlu0 %1653 }
0x252b   :  { %v1656_v46 = vmul.f32 %v4093_v36, %v1654_v53 }
0x252d   :  { %1658 = vrot.lane.b32.xlu0 %v1656_v46, %s4112_s28 }
0x2578   :  { %v3168_v0 = vpop.f32.mrb[28].mxu0 }
0x2579   :  { %v3812_v3 = vpop.f32.mrb[29].mxu0 }
0x2580   :  { %v3241_v11 = vpop.f32.mrb[30].mxu0 }
0x2581   :  { %v3242_v56 = vadd.f32 %v3241_v11, %v3168_v0  ;;  %v3823_v47 = vpop.f32.mrb[31].mxu0 }
0x2583   :  { %v3252_v49 = vadd.f32 %v4541_v6, %v3242_v56 }
0x2585   :  { %4096 = vtanh.f32 %v3252_v49  ;;  %v3407_v6 = vmul.f32 -1.442695, %v3252_v49 }
0x2587   :  { %4098 = vpow2.f32 %v3407_v6 }
0x258f   :  { %v4097_v48 = vpop.eup %4096 }
0x2590   :  { %3266 = vrot.lane.b32.xlu1 %v4097_v48, %s4108_s23 }
0x2591   :  { %v4099_v54 = vpop.eup %4098 }
0x2592   :  { %v3256_v55 = vadd.f32 1.0, %v4099_v54 }
0x2594   :  { %3261 = vrot.lane.b32.xlu1 %v3092_v50, %s4109_s26  ;;  %4100 = vrcp.f32 %v3256_v55 }
0x259e   :  { %v4101_v57 = vpop.eup %4100 }
0x259f   :  { %v1659_v52 = vpop.permute.xlu0 %1658 }
0x25a0   :  { %1661 = vst.msk [vmem:[%s4906_s9] sm:$0x3] %vm32_vm0, %v1659_v52  ;;  %3361 = vst.msk [vmem:[%s4911_s7 + $0xe] sm:$0x3] %vm32_vm0, %v1659_v52 }
0x2602   :  { %v3267_v58 = vpop.permute.xlu1 %3266 }
0x2603   :  { %v3269_v59 = vmul.f32 %v4101_v57, %v3267_v58 }
0x2605   :  { %3271 = vrot.lane.b32.xlu1 %v3269_v59, %s4109_s26 }
0x2606   :  { %v3262_v60 = vpop.permute.xlu1 %3261 }
0x2607   :  { %v3264_v61 = vmul.f32 %v4101_v57, %v3262_v60 }
0x2677   :  { %v3272_v62 = vpop.permute.xlu1 %3271 }
0x2678   :  { %v3274_v63 = vadd.f32 %v3272_v62, %v3264_v61 }
0x267a   :  { %4102 = vtanh.f32 %v3274_v63 }
0x2684   :  { %v4103_v1 = vpop.eup %4102 }
0x2685   :  { %3277 = vrot.lane.b32.xlu1 %v4103_v1, %s4110_s27 }
0x2689   :  { %1663 = vrot.lane.b32.xlu1 %v1650_v45, %s4111_s2 }
0x268d   :  { %3287 = vrot.lane.b32.xlu1 %v3274_v63, %s4111_s2 }
0x26f7   :  { %v3278_v2 = vpop.permute.xlu1 %3277 }
0x26f8   :  { %v3280_v5 = vmul.f32 %v4101_v57, %v3278_v2 }
0x26fa   :  { %3282 = vrot.lane.b32.xlu0 %v3280_v5, %s4112_s28 }
0x26fb   :  { %v1664_v8 = vpop.permute.xlu1 %1663 }
0x26fc   :  { %1666 = vst.msk [vmem:[%s4909_s10] sm:$0x3] %vm32_vm0, %v1664_v8 }
0x26ff   :  { %v3288_v9 = vpop.permute.xlu1 %3287 }
0x2700   :  { %3290 = vst.msk [vmem:[%s4915_s12] sm:$0x3] %vm32_vm0, %v3288_v9 }
0x276c   :  { %v3283_v10 = vpop.permute.xlu0 %3282 }
0x276d   :  { %3285 = vst.msk [vmem:[%s4912_s11] sm:$0x3] %vm32_vm0, %v3283_v10  ;;  %3291 = vst.msk [vmem:[%s4917_s8] sm:$0x3] %vm32_vm0, %v3283_v10 }

// kernel: forward.5
= control target key start
LH: loop header
LB: loop body
LE: loop exit
PB: predicated region body
PF: predicated region fallthrough
CT: control target
= control target key end

     0   :  { %v6423_v3 = vmov 0.0|0.0   ;;  %vm46_vm0 = vcmask 254976   ;;  %vm6424_vm1 = vmmov 0   ;;  %v6425_v11 = vmov 0.0   ;;  %s7687_s0 = inlined_call_operand.vmem [shape: f32[5,2,32], index: 0, kind: input, shape index: {}]   ;;  %s7688_s1 = inlined_call_operand.vmem [shape: f32[2,8,32], index: 1, kind: input, shape index: {}]   ;;  %s7689_s2 = inlined_call_operand.vmem [shape: f32[2,4,32], index: 2, kind: input, shape index: {}]   ;;  %s7690_s3 = inlined_call_operand.vmem [shape: f32[2,32], index: 3, kind: input, shape index: {}]   ;;  %s7691_s4 = inlined_call_operand.vmem [shape: f32[2,32], index: 4, kind: input, shape index: {}]   ;;  %s7692_s5 = inlined_call_operand.vmem [shape: f32[64,128], index: 5, kind: input, shape index: {}]   ;;  %s7693_s6 = inlined_call_operand.vmem [shape: f32[32,128], index: 6, kind: input, shape index: {}]   ;;  %s7694_s7 = inlined_call_operand.vmem [shape: f32[1,128], index: 7, kind: input, shape index: {}]   ;;  %s7695_s8 = inlined_call_operand.vmem [shape: f32[32,32], index: 8, kind: input, shape index: {}]   ;;  %s7696_s9 = inlined_call_operand.vmem [shape: f32[32,32], index: 9, kind: input, shape index: {}]   ;;  %s7697_s10 = inlined_call_operand.vmem [shape: f32[96,32], index: 10, kind: input, shape index: {}]   ;;  %s7698_s11 = inlined_call_operand.vmem [shape: f32[32,16], index: 11, kind: input, shape index: {}]   ;;  %s7699_s12 = inlined_call_operand.vmem [shape: f32[1,16], index: 12, kind: input, shape index: {}]   ;;  %s7700_s13 = inlined_call_operand.hbm [shape: f32[5,2,16], index: 13, kind: output, shape index: {}]  }
   0x1   :  { %v59_v0 = vld [vmem:[%s7692_s5 + $0x20] sm:$0xff]  ;;  %v60_v1 = vld [vmem:[%s7692_s5 + $0x28] sm:$0xff]  ;;  %5987 = vmatprep.subr.bf16.mxu0 %v6423_v3  ;;  %5993 = vmatprep.subr.bf16.mxu1 %v6423_v3  ;;  %v61_v6 = vld [vmem:[%s7692_s5 + $0x30] sm:$0xff]  ;;  %50 = vst.msk [vmem:[#allocation4] sm:$0x3] %vm46_vm0, %v6425_v11 }
   0x2   :  { %v55_v2 = vld [vmem:[%s7692_s5] sm:$0xff]  ;;  %v6513_v4 = vpack.c.bf16 %v60_v1, %v59_v0  ;;  %v56_v5 = vld [vmem:[%s7692_s5 + $0x8] sm:$0xff]  ;;  %v62_v7 = vld [vmem:[%s7692_s5 + $0x38] sm:$0xff]  ;;  %5500 = vmatprep.mubr.msk.f32.mxu0 %vm6424_vm1, %v6425_v11  ;;  %5511 = vmatprep.mubr.msk.f32.mxu1 %vm6424_vm1, %v6425_v11 }
   0x3   :  { %v6525_v8 = vpack.c.bf16 %v56_v5, %v55_v2  ;;  %v57_v9 = vld [vmem:[%s7692_s5 + $0x10] sm:$0xff]  ;;  %v58_v10 = vld [vmem:[%s7692_s5 + $0x18] sm:$0xff]  ;;  %v6540_v12 = vpack.c.bf16 %v62_v7, %v61_v6  ;;  %v210_v13 = vld [vmem:[%s7693_s6] sm:$0xff] }
   0x4   :  { %5989 = vmatpush3.bf16.msra.mxu0 %v6513_v4  ;;  %v6547_v14 = vpack.c.bf16 %v58_v10, %v57_v9  ;;  %v211_v15 = vld [vmem:[%s7693_s6 + $0x8] sm:$0xff]  ;;  %v45_v16 = vld [vmem:[%s7690_s3] sm:$0x3] }
   0x5   :  { %5995 = vmatpush3.bf16.msra.mxu1 %v6525_v8  ;;  %5990 = vmatprep.subr.bf16.mxu0 %v6423_v3 }
   0x6   :  { %18 = vsyncpa [#allocation6], 0  ;;  %5996 = vmatprep.subr.bf16.mxu1 %v6423_v3  ;;  %47 = vst.msk [vmem:[#allocation2] sm:$0x3] %vm46_vm0, %v45_v16  ;;  %vm63_vm2 = vcmask 261120   ;;  %v6558_v17 = vpack.c.bf16 %v211_v15, %v210_v13  ;;  %v212_v19 = vld [vmem:[%s7693_s6 + $0x10] sm:$0xff]  ;;  %v416_v10 = vlaneseq }
   0x7   :  { %v51_v18 = vld [vmem:[%s7687_s0] sm:$0x3]  ;;  %v213_v20 = vld [vmem:[%s7693_s6 + $0x18] sm:$0xff]  ;;  %s6427_s22 = smov 32   ;;  %v335_v48 = vld [vmem:[%s7695_s8 + $0x8] sm:$0xff]  ;;  %vm661_vm3 = vcmask 257024  }
   0x8   :  { %5992 = vmatpush3.bf16.msra.mxu0 %v6540_v12  ;;  %v52_v21 = vld [vmem:[#allocation4] sm:$0x3]  ;;  %v6575_v22 = vpack.c.bf16 %v213_v20, %v212_v19  ;;  %v48_v24 = vld [vmem:[%s7691_s4] sm:$0x3]  ;;  %s6426_s4 = smov 64   ;;  %v551_v51 = vld [vmem:[%s7696_s9 + $0x8] sm:$0xff] }
   0x9   :  { %5998 = vmatpush3.bf16.msra.mxu1 %v6547_v14  ;;  %5999 = vmatprep.subr.bf16.mxu0 %v6423_v3  ;;  %49 = vst.msk [vmem:[#allocation3] sm:$0x3] %vm46_vm0, %v48_v24  ;;  %v6594_v31 = vld [vmem:[%s7694_s7] ss:$0 sm:$0xff]  ;;  %v336_v52 = vld [vmem:[%s7695_s8 + $0x10] sm:$0xff]  ;;  %v337_v53 = vld [vmem:[%s7695_s8 + $0x18] sm:$0xff] }
   0xa   :  { %6005 = vmatprep.subr.bf16.mxu1 %v6423_v3  ;;  %v334_v47 = vld [vmem:[%s7695_s8] sm:$0xff]  ;;  %v552_v55 = vld [vmem:[%s7696_s9 + $0x10] sm:$0xff]  ;;  %v553_v56 = vld [vmem:[%s7696_s9 + $0x18] sm:$0xff]  ;;  %v6632_v57 = vpack.c.bf16 %v337_v53, %v336_v52  ;;  %v6428_v7 = vmov 1966171168   ;;  %v417_v15 = vshrl.u32 %v416_v10, 7 }
   0xb   :  { %5501 = vmatmul.mubr.msk.f32.vlgmr.msra.gmra.mrb[0].mxu0 %vm63_vm2, %v52_v21  ;;  %v550_v49 = vld [vmem:[%s7696_s9] sm:$0xff]  ;;  %v6612_v50 = vpack.c.bf16 %v335_v48, %v334_v47  ;;  %v6636_v58 = vpack.c.bf16 %v553_v56, %v552_v55  ;;  %v767_v63 = vld [vmem:[%s7697_s10 + $0x28] sm:$0xff]  ;;  %v768_v1 = vld [vmem:[%s7697_s10 + $0x30] sm:$0xff]  ;;  %v414_v9 = vunpack.c.l.s4 %v6428_v7  ;;  %vm465_vm4 = vcmask 1041409   ;;  %s6430_s29 = smov 96   ;;  %s6431_s3 = smov [#allocation5]  }
   0xc   :  { %5512 = vmatmul.mubr.msk.f32.vlgmr.msra.gmra.mrb[0].mxu1 %vm63_vm2, %v51_v18  ;;  %6001 = vmatpush3.bf16.msra.mxu0 %v6558_v17  ;;  %v6623_v54 = vpack.c.bf16 %v551_v51, %v550_v49  ;;  %v766_v62 = vld [vmem:[%s7697_s10 + $0x20] sm:$0xff]  ;;  %v769_v2 = vld [vmem:[%s7697_s10 + $0x38] sm:$0xff]  ;;  %v456_v51 = vand.u32 127, %v416_v10  ;;  %vm468_vm5 = vcmask 58368   ;;  %vm680_vm6 = vcmask 25600  }
   0xd   :  { %6002 = vmatprep.subr.bf16.mxu0 %v6423_v3  ;;  %5522 = vmatprep.mubr.msk.f32.mxu0 %vm6424_vm1, %v6425_v11  ;;  %v53_v23 = vld [vmem:[#allocation2] sm:$0x3]  ;;  %v6651_v0 = vpack.c.bf16 %v767_v63, %v766_v62  ;;  %v6663_v6 = vpack.c.bf16 %v769_v2, %v768_v1  ;;  %v415_v13 = vunpack.c.0.s8 %v414_v9  ;;  %v6429_v9 = vmov 0  }
   0xe   :  { %5533 = vmatprep.mubr.msk.f32.mxu1 %vm6424_vm1, %v6425_v11  ;;  %6007 = vmatpush3.bf16.msra.mxu1 %v6612_v50  ;;  %v6717_v52 = vsub.s32 %v456_v51, %v417_v15  ;;  %v6727_v10 = vsub.s32 1, %v417_v15  ;;  %vm1081_vm7 = vcmask 123904  }
   0xf   :  { %6008 = vmatprep.subr.bf16.mxu1 %v6423_v3  ;;  %v6675_v16 = vsub.s32 %v415_v13, %v417_v15  ;;  %6288 = vset.pattern.permute.xlu1 %v6429_v9 }
  0x10   :  { %6004 = vmatpush3.bf16.msra.mxu0 %v6575_v22  ;;  %v54_v36 = vld [vmem:[#allocation3] sm:$0x3]  ;;  %6287 = vset.pattern.permute.xlu0 %v6429_v9 }
  0x11   :  { %6011 = vmatprep.subr.bf16.mxu0 %v6423_v3 }
  0x12   :  { %6010 = vmatpush3.bf16.msra.mxu1 %v6632_v57 }
  0x13   :  { %5523 = vmatmul.mubr.msk.f32.vlgmr.msra.gmra.mrb[2].mxu0 %vm63_vm2, %v53_v23  ;;  %6017 = vmatprep.subr.bf16.mxu1 %v6423_v3 }
  0x14   :  { %5544 = vmatprep.mubr.msk.f32.mxu0 %vm6424_vm1, %v6425_v11  ;;  %6013 = vmatpush3.bf16.msra.mxu0 %v6623_v54 }
  0x15   :  { %6014 = vmatprep.subr.bf16.mxu0 %v6423_v3 }
  0x18   :  { %6016 = vmatpush3.bf16.msra.mxu0 %v6636_v58 }
  0x19   :  { %6035 = vmatprep.subr.bf16.mxu0 %v6423_v3 }
  0xde   :  { %v133_v25 = vpop.f32.mrb[0].mxu0 }
  0xdf   :  { %v5502_v26 = vpop.f32.mrb[1].mxu0  ;;  %v206_v27 = vpop.f32.mrb[0].mxu1 }
  0xe0   :  { %v207_v28 = vadd.f32 %v206_v27, %v133_v25  ;;  %v5513_v29 = vpop.f32.mrb[1].mxu1  ;;  %v6679_v25 = vsub.s32 0, %v417_v15 }
  0xe6   :  { %v283_v30 = vpop.f32.mrb[2].mxu0 }
  0xe7   :  { %v287_v32 = vadd.f32 %v283_v30, %v207_v28  ;;  %v5524_v33 = vpop.f32.mrb[3].mxu0  ;;  %v6686_v30 = vld [vmem:[%s7688_s1] sm:$0xff] }
  0xe9   :  { %v295_v34 = vadd.f32 %v6594_v31, %v287_v32 }
  0xeb   :  { %6289 = vtanh.f32 %v295_v34  ;;  %v5207_v37 = vmul.f32 -1.442695, %v295_v34 }
  0xed   :  { %6291 = vpow2.f32 %v5207_v37 }
  0xf5   :  { %v6290_v35 = vpop.eup %6289 }
  0xf6   :  { %309 = vrot.lane.b32.xlu0 %v6290_v35, %s6426_s4  ;;  %v6694_v35 = vld [vmem:[%s7688_s1 + $0x8] sm:$0xff] }
  0xf7   :  { %v6292_v38 = vpop.eup %6291 }
  0xf8   :  { %v299_v39 = vadd.f32 1.0, %v6292_v38 }
  0xfa   :  { %304 = vrot.lane.b32.xlu0 %v54_v36, %s6427_s22  ;;  %6293 = vrcp.f32 %v299_v39  ;;  %v6699_v36 = vld [vmem:[%s7689_s2 + $0x4] sm:$0xf] }
 0x104   :  { %v6294_v40 = vpop.eup %6293 }
 0x168   :  { %v310_v41 = vpop.permute.xlu0 %309 }
 0x169   :  { %v312_v42 = vmul.f32 %v6294_v40, %v310_v41  ;;  %v6708_v41 = vld [vmem:[%s7689_s2] sm:$0xf] }
 0x16b   :  { %314 = vrot.lane.b32.xlu1 %v312_v42, %s6427_s22 }
 0x16c   :  { %v305_v43 = vpop.permute.xlu0 %304 }
 0x16d   :  { %v307_v44 = vmul.f32 %v6294_v40, %v305_v43 }
 0x1dd   :  { %v315_v45 = vpop.permute.xlu1 %314 }
 0x1de   :  { %v6600_v46 = vadd.f32 %v315_v45, %v307_v44 }
 0x1e0   :  { %6295 = vtanh.f32 %v6600_v46 }
 0x1ea   :  { %v6296_v59 = vpop.eup %6295 }
 0x1eb   :  { %320 = vrot.lane.b32.xlu1 %v6296_v59, %s6426_s4 }
 0x25d   :  { %v321_v60 = vpop.permute.xlu1 %320 }
 0x25e   :  { %v323_v61 = vmul.f32 %v6294_v40, %v321_v60 }
 0x260   :  { %325 = vrot.lane.b32.xlu0 %v323_v61, %s6427_s22 }
 0x2d2   :  { %v326_v5 = vpop.permute.xlu0 %325 }
 0x2d3   :  { %328 = vst.msk [vmem:[#allocation2] sm:$0x3] %vm46_vm0, %v326_v5  ;;  %5534 = vmatmul.mubr.msk.f32.vlgmr.msra.gmra.mrb[2].mxu1 %vm63_vm2, %v326_v5  ;;  %5545 = vmatmul.mubr.msk.f32.vlgmr.msra.gmra.mrb[4].mxu0 %vm63_vm2, %v326_v5 }
 0x2d4   :  { %6019 = vmatpush3.bf16.msra.mxu1 %v6651_v0  ;;  %5555 = vmatprep.mubr.msk.f32.mxu1 %vm6424_vm1, %v6425_v11 }
 0x2d5   :  { %6020 = vmatprep.subr.bf16.mxu1 %v6423_v3  ;;  %5588 = vmatprep.mubr.msk.f32.mxu0 %vm6424_vm1, %v6425_v11 }
 0x2d8   :  { %6022 = vmatpush3.bf16.msra.mxu1 %v6663_v6 }
 0x2d9   :  { %6023 = vmatprep.subr.bf16.mxu1 %v6423_v3 }
 0x2db   :  { %5556 = vmatmul.mubr.msk.f32.vlgmr.msra.gmra.mrb[4].mxu1 %vm63_vm2, %v326_v5 }
 0x2dc   :  { %5566 = vmatprep.mubr.msk.f32.mxu1 %vm6424_vm1, %v6425_v11 }
 0x3a6   :  { %v406_v18 = vpop.f32.mrb[2].mxu1  ;;  %v620_v19 = vpop.f32.mrb[4].mxu0 }
 0x3a7   :  { %v419_v20 = vrot.slane %v406_v18, %v6675_v16  ;;  %v633_v21 = vrot.slane %v620_v19, %v6675_v16  ;;  %v5535_v23 = vpop.f32.mrb[3].mxu1  ;;  %v5546_v24 = vpop.f32.mrb[5].mxu0 }
 0x3a9   :  { %v420_v26 = vcombine.high %v419_v20, %v419_v20  ;;  %v427_v27 = vrot.slane %v419_v20, %v6675_v16  ;;  %v634_v28 = vcombine.high %v633_v21, %v633_v21  ;;  %v641_v29 = vrot.slane %v633_v21, %v6675_v16 }
 0x3ab   :  { %v434_v32 = vrot.slane %v420_v26, %v6675_v16  ;;  %v648_v33 = vrot.slane %v634_v28, %v6675_v16  ;;  %v438_v34 = vrot.slane %v427_v27, %v6679_v25  ;;  %v652_v40 = vrot.slane %v641_v29, %v6679_v25 }
 0x3ad   :  { %v445_v37 = vmul.f32 %v438_v34, %v6686_v30  ;;  %v442_v38 = vrot.slane %v434_v32, %v6679_v25  ;;  %v656_v39 = vrot.slane %v648_v33, %v6679_v25  ;;  %v659_v47 = vmul.f32 %v652_v40, %v6708_v41 }
 0x3af   :  { %v447_v42 = vsel %vm63_vm2, %v445_v37, 0.0  ;;  %v446_v43 = vmul.f32 %v442_v38, %v6694_v35  ;;  %v660_v44 = vmul.f32 %v656_v39, %v6699_v36  ;;  %v662_v49 = vsel %vm661_vm3, %v659_v47, 0.0 }
 0x3b0   :  { %448 = vadd.xlane.f32.xlu1 %v447_v42 }
 0x3b1   :  { %v450_v45 = vsel %vm63_vm2, %v446_v43, 0.0  ;;  %v665_v48 = vsel %vm661_vm3, %v660_v44, 0.0 }
 0x3b2   :  { %451 = vadd.xlane.f32.xlu0 %v450_v45 }
 0x3b4   :  { %666 = vadd.xlane.f32.xlu1 %v665_v48 }
 0x3b6   :  { %663 = vadd.xlane.f32.xlu0 %v662_v49 }
 0x43d   :  { %v449_v53 = vpop.xlane.xlu1 %448 }
 0x43e   :  { %v460_v56 = vrot.slane %v449_v53, %v6717_v52 }
 0x43f   :  { %v452_v55 = vpop.xlane.xlu0 %451 }
 0x440   :  { %v464_v59 = vrot.slane %v452_v55, %v6717_v52 }
 0x441   :  { %v667_v60 = vpop.xlane.xlu1 %666 }
 0x442   :  { %v466_v61 = vsel %vm465_vm4, %v464_v59, %v460_v56  ;;  %v677_v1 = vrot.slane %v667_v60, %v6717_v52 }
 0x443   :  { %v664_v62 = vpop.xlane.xlu0 %663  ;;  %v469_v63 = vsel %vm468_vm5, %v466_v61, -inf }
 0x444   :  { %v673_v2 = vrot.slane %v664_v62, %v6717_v52  ;;  %470 = vmax.xlane.f32.xlu0 %v469_v63 }
 0x446   :  { %v678_v5 = vsel %vm465_vm4, %v677_v1, %v673_v2 }
 0x447   :  { %v681_v7 = vsel %vm680_vm6, %v678_v5, -inf }
 0x448   :  { %682 = vmax.xlane.f32.xlu1 %v681_v7 }
 0x4d1   :  { %v471_v13 = vpop.xlane.xlu0 %470 }
 0x4d2   :  { %v476_v18 = vrot.slane %v471_v13, %v6679_v25  ;;  %v480_v19 = vrot.slane %v471_v13, %v6727_v10 }
 0x4d4   :  { %v483_v20 = vsub.f32 %v449_v53, %v476_v18  ;;  %v484_v21 = vsub.f32 %v452_v55, %v480_v19  ;;  %v762_v18 = vld [vmem:[%s7697_s10] sm:$0xff]  ;;  %v763_v19 = vld [vmem:[%s7697_s10 + $0x8] sm:$0xff] }
 0x4d5   :  { %v683_v23 = vpop.xlane.xlu1 %682 }
 0x4d6   :  { %v485_v24 = vmul.f32 1.442695, %v483_v20  ;;  %v487_v26 = vmul.f32 1.442695, %v484_v21  ;;  %v688_v27 = vrot.slane %v683_v23, %v6679_v25  ;;  %v692_v28 = vrot.slane %v683_v23, %v6727_v10  ;;  %v764_v23 = vld [vmem:[%s7697_s10 + $0x10] sm:$0xff] }
 0x4d7   :  { %v6751_v20 = vpack.c.bf16 %v763_v19, %v762_v18 }
 0x4d8   :  { %6297 = vpow2.f32 %v485_v24  ;;  %v695_v29 = vsub.f32 %v664_v62, %v688_v27  ;;  %v696_v32 = vsub.f32 %v667_v60, %v692_v28  ;;  %v765_v24 = vld [vmem:[%s7697_s10 + $0x18] sm:$0xff] }
 0x4d9   :  { %6299 = vpow2.f32 %v487_v26  ;;  %6025 = vmatpush3.bf16.msra.mxu1 %v6751_v20  ;;  %v6761_v26 = vpack.c.bf16 %v765_v24, %v764_v23 }
 0x4da   :  { %v697_v15 = vmul.f32 1.442695, %v695_v29  ;;  %v699_v33 = vmul.f32 1.442695, %v696_v32  ;;  %6026 = vmatprep.subr.bf16.mxu1 %v6423_v3 }
 0x4dc   :  { %6301 = vpow2.f32 %v697_v15 }
 0x4dd   :  { %6303 = vpow2.f32 %v699_v33  ;;  %6028 = vmatpush3.bf16.msra.mxu1 %v6761_v26 }
 0x4de   :  { %6029 = vmatprep.subr.bf16.mxu1 %v6423_v3 }
 0x4e2   :  { %v6298_v34 = vpop.eup %6297 }
 0x4e3   :  { %v6300_v37 = vpop.eup %6299  ;;  %492 = vperm.xlu0 %6287, %v6298_v34  }
 0x4e4   :  { %495 = vperm.xlu1 %6288, %v6300_v37  }
 0x4e6   :  { %v6302_v38 = vpop.eup %6301 }
 0x4e7   :  { %v6304_v39 = vpop.eup %6303 }
 0x4e8   :  { %704 = vperm.xlu1 %6288, %v6302_v38  }
 0x4ec   :  { %707 = vperm.xlu1 %6288, %v6304_v39  }
 0x562   :  { %v493_v40 = vpop.permute.xlu0 %492 }
 0x563   :  { %v500_v42 = vrot.slane %v493_v40, %v6717_v52  ;;  %v496_v43 = vpop.permute.xlu1 %495 }
 0x564   :  { %v504_v44 = vrot.slane %v496_v43, %v6717_v52 }
 0x566   :  { %v505_v45 = vsel %vm465_vm4, %v504_v44, %v500_v42 }
 0x567   :  { %v705_v47 = vpop.permute.xlu1 %704  ;;  %v507_v48 = vsel %vm468_vm5, %v505_v45, 0.0 }
 0x568   :  { %508 = vadd.xlane.f32.xlu1 %v507_v48  ;;  %v712_v51 = vrot.slane %v705_v47, %v6717_v52  ;;  %v915_v48 = vld [vmem:[%s7697_s10 + $0x40] sm:$0xff] }
 0x56b   :  { %v708_v49 = vpop.permute.xlu1 %707 }
 0x56c   :  { %v716_v53 = vrot.slane %v708_v49, %v6717_v52  ;;  %v916_v49 = vld [vmem:[%s7697_s10 + $0x48] sm:$0xff] }
 0x56e   :  { %v717_v55 = vsel %vm465_vm4, %v716_v53, %v712_v51 }
 0x56f   :  { %v719_v56 = vsel %vm680_vm6, %v717_v55, 0.0 }
 0x570   :  { %720 = vadd.xlane.f32.xlu0 %v719_v56 }
 0x5f5   :  { %v509_v59 = vpop.xlane.xlu1 %508 }
 0x5f6   :  { %6305 = vrcp.f32 %v509_v59 }
 0x5fd   :  { %v721_v60 = vpop.xlane.xlu0 %720 }
 0x5fe   :  { %6307 = vrcp.f32 %v721_v60 }
 0x600   :  { %v6306_v61 = vpop.eup %6305 }
 0x601   :  { %v519_v62 = vrot.slane %v6306_v61, %v6727_v10  ;;  %v515_v63 = vrot.slane %v6306_v61, %v6679_v25 }
 0x603   :  { %v523_v1 = vmul.f32 %v6300_v37, %v519_v62  ;;  %v522_v2 = vmul.f32 %v6298_v34, %v515_v63  ;;  %v6780_v62 = vpack.c.bf16 %v916_v49, %v915_v48 }
 0x605   :  { %531 = vperm.xlu0 %6287, %v523_v1   ;;  %526 = vperm.xlu1 %6288, %v522_v2   ;;  %v917_v1 = vld [vmem:[%s7697_s10 + $0x50] sm:$0xff]  ;;  %v918_v2 = vld [vmem:[%s7697_s10 + $0x58] sm:$0xff] }
 0x606   :  { %v6793_v19 = vpack.c.bf16 %v918_v2, %v917_v1 }
 0x608   :  { %v6308_v5 = vpop.eup %6307 }
 0x609   :  { %v727_v7 = vrot.slane %v6308_v5, %v6679_v25  ;;  %v731_v13 = vrot.slane %v6308_v5, %v6727_v10 }
 0x60b   :  { %v734_v9 = vmul.f32 %v6302_v38, %v727_v7  ;;  %v735_v21 = vmul.f32 %v6304_v39, %v731_v13 }
 0x60d   :  { %738 = vperm.xlu1 %6288, %v734_v9  }
 0x611   :  { %743 = vperm.xlu1 %6288, %v735_v21  }
 0x615   :  { %330 = vrot.lane.b32.xlu1 %v6600_v46, %s6430_s29 }
 0x684   :  { %v532_v27 = vpop.permute.xlu0 %531  ;;  %v527_v28 = vpop.permute.xlu1 %526 }
 0x685   :  { %v535_v29 = vmul.f32 %v532_v27, %v6694_v35  ;;  %v534_v32 = vmul.f32 %v527_v28, %v6686_v30 }
 0x687   :  { %v543_v15 = vsel %vm63_vm2, %v535_v29, 0.0  ;;  %v536_v33 = vsel %vm63_vm2, %v534_v32, 0.0 }
 0x688   :  { %v544_v34 = vrot.slane %v543_v15, 4  ;;  %v537_v37 = vrot.slane %v536_v33, 4 }
 0x68a   :  { %v545_v38 = vadd.f32 %v544_v34, %v543_v15  ;;  %v538_v39 = vadd.f32 %v537_v37, %v536_v33  ;;  %v1086_v15 = vld [vmem:[#allocation2] sm:$0x3] }
 0x68c   :  { %v546_v40 = vrot.slane %v545_v38, 2  ;;  %v539_v42 = vrot.slane %v538_v39, 2  ;;  %v739_v43 = vpop.permute.xlu1 %738 }
 0x68d   :  { %v746_v44 = vmul.f32 %v739_v43, %v6708_v41 }
 0x68e   :  { %v547_v46 = vadd.f32 %v546_v40, %v545_v38  ;;  %v540_v45 = vadd.f32 %v539_v42, %v538_v39 }
 0x68f   :  { %v748_v47 = vsel %vm661_vm3, %v746_v44, 0.0 }
 0x690   :  { %v548_v51 = vrot.slane %v547_v46, 1  ;;  %v541_v53 = vrot.slane %v540_v45, 1  ;;  %v749_v55 = vrot.slane %v748_v47, 4  ;;  %v744_v56 = vpop.permute.xlu1 %743 }
 0x691   :  { %v747_v59 = vmul.f32 %v744_v56, %v6699_v36 }
 0x692   :  { %v549_v60 = vadd.f32 %v548_v51, %v547_v46  ;;  %v542_v41 = vadd.f32 %v541_v53, %v540_v45  ;;  %v750_v61 = vadd.f32 %v749_v55, %v748_v47 }
 0x693   :  { %v755_v63 = vsel %vm661_vm3, %v747_v59, 0.0 }
 0x694   :  { %v751_v5 = vrot.slane %v750_v61, 2  ;;  %v756_v7 = vrot.slane %v755_v63, 4  ;;  %v331_v9 = vpop.permute.xlu1 %330  ;;  %v842_v36 = vsel %vm465_vm4, %v549_v60, %v542_v41 }
 0x695   :  { %333 = vst.msk [vmem:[#allocation3] sm:$0x3] %vm46_vm0, %v331_v9  ;;  %5567 = vmatmul.mubr.msk.f32.vlgmr.msra.gmra.mrb[4].mxu1 %vm63_vm2, %v842_v36 }
 0x696   :  { %v752_v13 = vadd.f32 %v751_v5, %v750_v61  ;;  %v757_v18 = vadd.f32 %v756_v7, %v755_v63  ;;  %6031 = vmatpush3.bf16.msra.mxu1 %v6780_v62  ;;  %5577 = vmatprep.mubr.msk.f32.mxu1 %vm6424_vm1, %v6425_v11 }
 0x697   :  { %6032 = vmatprep.subr.bf16.mxu1 %v6423_v3 }
 0x698   :  { %v758_v21 = vrot.slane %v757_v18, 2  ;;  %v753_v23 = vrot.slane %v752_v13, 1 }
 0x69a   :  { %v759_v24 = vadd.f32 %v758_v21, %v757_v18  ;;  %6034 = vmatpush3.bf16.msra.mxu1 %v6793_v19  ;;  %v754_v28 = vadd.f32 %v753_v23, %v752_v13 }
 0x69b   :  { %6053 = vmatprep.subr.bf16.mxu1 %v6423_v3 }
 0x69c   :  { %v760_v27 = vrot.slane %v759_v24, 1  ;;  %v1087_v53 = vld [vmem:[#allocation3] sm:$0x3] }
 0x69e   :  { %v761_v29 = vadd.f32 %v760_v27, %v759_v24 }
 0x6a0   :  { %v921_v32 = vsel %vm465_vm4, %v761_v29, %v754_v28 }
 0x6a1   :  { %5578 = vmatmul.mubr.msk.f32.vlgmr.msra.gmra.mrb[4].mxu1 %vm63_vm2, %v921_v32 }
 0x6a2   :  { %6055 = vmatpush3.bf16.msra.mxu1 %v6558_v17  ;;  %5621 = vmatprep.mubr.msk.f32.mxu1 %vm6424_vm1, %v6425_v11  ;;  %v997_v17 = vld [vmem:[%s7698_s11] sm:$0xff] }
 0x6a3   :  { %6056 = vmatprep.subr.bf16.mxu1 %v6423_v3 }
 0x6a6   :  { %6058 = vmatpush3.bf16.msra.mxu1 %v6575_v22  ;;  %v998_v22 = vld [vmem:[%s7698_s11 + $0x8] sm:$0xff] }
 0x6a7   :  { %6065 = vmatprep.subr.bf16.mxu1 %v6423_v3  ;;  %v6821_v33 = vpack.c.bf16 %v998_v22, %v997_v17 }
 0x6a9   :  { %5622 = vmatmul.mubr.msk.f32.vlgmr.msra.gmra.mrb[6].mxu1 %vm63_vm2, %v1086_v15  ;;  %6037 = vmatpush3.bf16.msra.mxu0 %v6821_v33  ;;  %v6908_v15 = vld [vmem:[%s7689_s2 + $0x4] sm:$0xf] }
 0x6aa   :  { %6067 = vmatpush3.bf16.msra.mxu1 %v6623_v54  ;;  %5643 = vmatprep.mubr.msk.f32.mxu1 %vm6424_vm1, %v6425_v11  ;;  %v999_v54 = vld [vmem:[%s7698_s11 + $0x10] sm:$0xff] }
 0x6ab   :  { %6068 = vmatprep.subr.bf16.mxu1 %v6423_v3  ;;  %6038 = vmatprep.subr.bf16.mxu0 %v6423_v3 }
 0x6ae   :  { %6070 = vmatpush3.bf16.msra.mxu1 %v6636_v58  ;;  %v1000_v58 = vld [vmem:[%s7698_s11 + $0x18] sm:$0xff] }
 0x6af   :  { %6089 = vmatprep.subr.bf16.mxu1 %v6423_v3  ;;  %v6831_v34 = vpack.c.bf16 %v1000_v58, %v999_v54  ;;  %v6917_v58 = vld [vmem:[%s7689_s2] sm:$0xf] }
 0x6b1   :  { %6040 = vmatpush3.bf16.msra.mxu0 %v6831_v34 }
 0x6b2   :  { %6041 = vmatprep.subr.bf16.mxu0 %v6423_v3 }
 0x774   :  { %v990_v37 = vpop.f32.mrb[4].mxu1 }
 0x775   :  { %6309 = vtanh.f32 %v990_v37  ;;  %v5579_v38 = vpop.f32.mrb[5].mxu1 }
 0x77c   :  { %v1315_v39 = vpop.f32.mrb[6].mxu1 }
 0x77d   :  { %v5623_v40 = vpop.f32.mrb[7].mxu1 }
 0x77f   :  { %v6310_v42 = vpop.eup %6309 }
 0x780   :  { %996 = vst.msk [vmem:[#allocation4] sm:$0x3] %vm46_vm0, %v6310_v42  ;;  %5589 = vmatmul.mubr.msk.f32.vlgmr.msra.gmra.mrb[6].mxu0 %vm63_vm2, %v6310_v42 }
 0x781   :  { %6043 = vmatpush3.bf16.msra.mxu0 %v6513_v4  ;;  %5599 = vmatprep.mubr.msk.f32.mxu0 %vm6424_vm1, %v6425_v11  ;;  %v5215_v4 = vld [vmem:[%s7687_s0 + $0x2] sm:$0x3] }
 0x782   :  { %6044 = vmatprep.subr.bf16.mxu0 %v6423_v3 }
 0x785   :  { %6046 = vmatpush3.bf16.msra.mxu0 %v6540_v12 }
 0x786   :  { %6047 = vmatprep.subr.bf16.mxu0 %v6423_v3 }
 0x787   :  { %v1085_v43 = vld [vmem:[#allocation4] sm:$0x3] }
 0x788   :  { %5600 = vmatmul.mubr.msk.f32.vlgmr.msra.gmra.mrb[8].mxu0 %vm63_vm2, %v1085_v43 }
 0x789   :  { %6049 = vmatpush3.bf16.msra.mxu0 %v6525_v8  ;;  %5610 = vmatprep.mubr.msk.f32.mxu0 %vm6424_vm1, %v6425_v11  ;;  %v6863_v8 = vld [vmem:[%s7699_s12] ss:$0 sm:$0xff] }
 0x78a   :  { %6050 = vmatprep.subr.bf16.mxu0 %v6423_v3 }
 0x78d   :  { %6052 = vmatpush3.bf16.msra.mxu0 %v6547_v14 }
 0x78e   :  { %6059 = vmatprep.subr.bf16.mxu0 %v6423_v3 }
 0x790   :  { %5611 = vmatmul.mubr.msk.f32.vlgmr.msra.gmra.mrb[10].mxu0 %vm63_vm2, %v5215_v4 }
 0x791   :  { %6061 = vmatpush3.bf16.msra.mxu0 %v6612_v50  ;;  %5632 = vmatprep.mubr.msk.f32.mxu0 %vm6424_vm1, %v6425_v11 }
 0x792   :  { %6062 = vmatprep.subr.bf16.mxu0 %v6423_v3 }
 0x795   :  { %6064 = vmatpush3.bf16.msra.mxu0 %v6632_v57 }
 0x796   :  { %6071 = vmatprep.subr.bf16.mxu0 %v6423_v3 }
 0x853   :  { %v1077_v12 = vpop.f32.mrb[6].mxu0 }
 0x854   :  { %v1078_v14 = vadd.f32 %v6863_v8, %v1077_v12  ;;  %v5590_v44 = vpop.f32.mrb[7].mxu0 }
 0x856   :  { %1082 = vst.msk [vmem:[#allocation5] sm:$0x3] %vm1081_vm7, %v1078_v14 }
 0x85b   :  { %v1165_v50 = vpop.f32.mrb[8].mxu0 }
 0x85c   :  { %v5601_v46 = vpop.f32.mrb[9].mxu0 }
 0x863   :  { %v1238_v45 = vpop.f32.mrb[10].mxu0 }
 0x864   :  { %v1239_v47 = vadd.f32 %v1238_v45, %v1165_v50  ;;  %v5612_v48 = vpop.f32.mrb[11].mxu0 }
 0x866   :  { %v1319_v57 = vadd.f32 %v1315_v39, %v1239_v47 }
 0x868   :  { %v1327_v49 = vadd.f32 %v6594_v31, %v1319_v57 }
 0x86a   :  { %6311 = vtanh.f32 %v1327_v49  ;;  %v5220_v55 = vmul.f32 -1.442695, %v1327_v49 }
 0x86c   :  { %6313 = vpow2.f32 %v5220_v55 }
 0x874   :  { %v6312_v51 = vpop.eup %6311 }
 0x875   :  { %1341 = vrot.lane.b32.xlu1 %v6312_v51, %s6426_s4 }
 0x876   :  { %v6314_v56 = vpop.eup %6313 }
 0x877   :  { %v1331_v59 = vadd.f32 1.0, %v6314_v56 }
 0x879   :  { %1336 = vrot.lane.b32.xlu1 %v1087_v53, %s6427_s22  ;;  %6315 = vrcp.f32 %v1331_v59 }
 0x883   :  { %v6316_v60 = vpop.eup %6315 }
 0x8e7   :  { %v1342_v41 = vpop.permute.xlu1 %1341 }
 0x8e8   :  { %v1344_v61 = vmul.f32 %v6316_v60, %v1342_v41 }
 0x8ea   :  { %1346 = vrot.lane.b32.xlu0 %v1344_v61, %s6427_s22 }
 0x8eb   :  { %v1337_v63 = vpop.permute.xlu1 %1336 }
 0x8ec   :  { %v1339_v1 = vmul.f32 %v6316_v60, %v1337_v63 }
 0x95c   :  { %v1347_v31 = vpop.permute.xlu0 %1346 }
 0x95d   :  { %v6871_v2 = vadd.f32 %v1347_v31, %v1339_v1 }
 0x95f   :  { %6317 = vtanh.f32 %v6871_v2 }
 0x969   :  { %v6318_v5 = vpop.eup %6317 }
 0x96a   :  { %1352 = vrot.lane.b32.xlu1 %v6318_v5, %s6426_s4 }
 0x9dc   :  { %v1353_v7 = vpop.permute.xlu1 %1352 }
 0x9dd   :  { %v1355_v9 = vmul.f32 %v6316_v60, %v1353_v7 }
 0x9df   :  { %1357 = vrot.lane.b32.xlu0 %v1355_v9, %s6427_s22 }
 0xa51   :  { %v1358_v36 = vpop.permute.xlu0 %1357 }
 0xa52   :  { %1360 = vst.msk [vmem:[#allocation2] sm:$0x3] %vm46_vm0, %v1358_v36  ;;  %5633 = vmatmul.mubr.msk.f32.vlgmr.msra.gmra.mrb[12].mxu0 %vm63_vm2, %v1358_v36  ;;  %5644 = vmatmul.mubr.msk.f32.vlgmr.msra.gmra.mrb[8].mxu1 %vm63_vm2, %v1358_v36 }
 0xa53   :  { %6073 = vmatpush3.bf16.msra.mxu0 %v6651_v0  ;;  %5654 = vmatprep.mubr.msk.f32.mxu0 %vm6424_vm1, %v6425_v11 }
 0xa54   :  { %6074 = vmatprep.subr.bf16.mxu0 %v6423_v3  ;;  %6091 = vmatpush3.bf16.msra.mxu1 %v6821_v33 }
 0xa55   :  { %6092 = vmatprep.subr.bf16.mxu1 %v6423_v3  ;;  %5687 = vmatprep.mubr.msk.f32.mxu1 %vm6424_vm1, %v6425_v11 }
 0xa57   :  { %6076 = vmatpush3.bf16.msra.mxu0 %v6663_v6 }
 0xa58   :  { %6077 = vmatprep.subr.bf16.mxu0 %v6423_v3  ;;  %6094 = vmatpush3.bf16.msra.mxu1 %v6831_v34 }
 0xa59   :  { %6095 = vmatprep.subr.bf16.mxu1 %v6423_v3 }
 0xa5a   :  { %5655 = vmatmul.mubr.msk.f32.vlgmr.msra.gmra.mrb[14].mxu0 %vm63_vm2, %v1358_v36 }
 0xa5b   :  { %6079 = vmatpush3.bf16.msra.mxu0 %v6751_v20  ;;  %5665 = vmatprep.mubr.msk.f32.mxu0 %vm6424_vm1, %v6425_v11 }
 0xa5c   :  { %6080 = vmatprep.subr.bf16.mxu0 %v6423_v3 }
 0xa5f   :  { %6082 = vmatpush3.bf16.msra.mxu0 %v6761_v26 }
 0xa60   :  { %6083 = vmatprep.subr.bf16.mxu0 %v6423_v3 }
 0xb25   :  { %v1438_v0 = vpop.f32.mrb[12].mxu0  ;;  %v1648_v6 = vpop.f32.mrb[8].mxu1 }
 0xb26   :  { %v1451_v13 = vrot.slane %v1438_v0, %v6675_v16  ;;  %v1661_v18 = vrot.slane %v1648_v6, %v6675_v16  ;;  %v5634_v21 = vpop.f32.mrb[13].mxu0  ;;  %v5645_v23 = vpop.f32.mrb[9].mxu1 }
 0xb28   :  { %v1452_v24 = vcombine.high %v1451_v13, %v1451_v13  ;;  %v1459_v20 = vrot.slane %v1451_v13, %v6675_v16  ;;  %v1662_v27 = vcombine.high %v1661_v18, %v1661_v18  ;;  %v1669_v28 = vrot.slane %v1661_v18, %v6675_v16 }
 0xb2a   :  { %v1466_v29 = vrot.slane %v1452_v24, %v6675_v16  ;;  %v1676_v26 = vrot.slane %v1662_v27, %v6675_v16  ;;  %v1470_v32 = vrot.slane %v1459_v20, %v6679_v25  ;;  %v1680_v54 = vrot.slane %v1669_v28, %v6679_v25 }
 0xb2c   :  { %v1477_v17 = vmul.f32 %v1470_v32, %v6686_v30  ;;  %v1474_v22 = vrot.slane %v1466_v29, %v6679_v25  ;;  %v1684_v33 = vrot.slane %v1676_v26, %v6679_v25  ;;  %v1687_v40 = vmul.f32 %v1680_v54, %v6917_v58 }
 0xb2e   :  { %v1479_v34 = vsel %vm63_vm2, %v1477_v17, 0.0  ;;  %v1478_v37 = vmul.f32 %v1474_v22, %v6694_v35  ;;  %v1688_v38 = vmul.f32 %v1684_v33, %v6908_v15  ;;  %v1689_v43 = vsel %vm661_vm3, %v1687_v40, 0.0 }
 0xb2f   :  { %1480 = vadd.xlane.f32.xlu1 %v1479_v34 }
 0xb30   :  { %v1482_v39 = vsel %vm63_vm2, %v1478_v37, 0.0  ;;  %v1692_v42 = vsel %vm661_vm3, %v1688_v38, 0.0 }
 0xb31   :  { %1483 = vadd.xlane.f32.xlu0 %v1482_v39 }
 0xb33   :  { %1693 = vadd.xlane.f32.xlu1 %v1692_v42 }
 0xb35   :  { %1690 = vadd.xlane.f32.xlu0 %v1689_v43 }
 0xbbc   :  { %v1481_v4 = vpop.xlane.xlu1 %1480 }
 0xbbd   :  { %v1490_v14 = vrot.slane %v1481_v4, %v6717_v52 }
 0xbbe   :  { %v1484_v12 = vpop.xlane.xlu0 %1483 }
 0xbbf   :  { %v1494_v44 = vrot.slane %v1484_v12, %v6717_v52 }
 0xbc0   :  { %v1694_v50 = vpop.xlane.xlu1 %1693 }
 0xbc1   :  { %v1495_v46 = vsel %vm465_vm4, %v1494_v44, %v1490_v14  ;;  %v1704_v48 = vrot.slane %v1694_v50, %v6717_v52 }
 0xbc2   :  { %v1691_v45 = vpop.xlane.xlu0 %1690  ;;  %v1497_v47 = vsel %vm468_vm5, %v1495_v46, -inf }
 0xbc3   :  { %v1700_v57 = vrot.slane %v1691_v45, %v6717_v52  ;;  %1498 = vmax.xlane.f32.xlu0 %v1497_v47 }
 0xbc5   :  { %v1705_v49 = vsel %vm465_vm4, %v1704_v48, %v1700_v57 }
 0xbc6   :  { %v1707_v51 = vsel %vm680_vm6, %v1705_v49, -inf }
 0xbc7   :  { %1708 = vmax.xlane.f32.xlu1 %v1707_v51 }
 0xc50   :  { %v1499_v53 = vpop.xlane.xlu0 %1498 }
 0xc51   :  { %v1504_v55 = vrot.slane %v1499_v53, %v6679_v25  ;;  %v1508_v56 = vrot.slane %v1499_v53, %v6727_v10 }
 0xc53   :  { %v1511_v59 = vsub.f32 %v1481_v4, %v1504_v55  ;;  %v1512_v60 = vsub.f32 %v1484_v12, %v1508_v56 }
 0xc54   :  { %v1709_v41 = vpop.xlane.xlu1 %1708 }
 0xc55   :  { %v1513_v61 = vmul.f32 1.442695, %v1511_v59  ;;  %v1515_v63 = vmul.f32 1.442695, %v1512_v60  ;;  %v1714_v1 = vrot.slane %v1709_v41, %v6679_v25  ;;  %v1718_v31 = vrot.slane %v1709_v41, %v6727_v10 }
 0xc57   :  { %6319 = vpow2.f32 %v1513_v61  ;;  %v1721_v5 = vsub.f32 %v1691_v45, %v1714_v1  ;;  %v1722_v7 = vsub.f32 %v1694_v50, %v1718_v31 }
 0xc58   :  { %6321 = vpow2.f32 %v1515_v63 }
 0xc59   :  { %v1723_v9 = vmul.f32 1.442695, %v1721_v5  ;;  %v1725_v36 = vmul.f32 1.442695, %v1722_v7 }
 0xc5b   :  { %6323 = vpow2.f32 %v1723_v9 }
 0xc5c   :  { %6325 = vpow2.f32 %v1725_v36 }
 0xc61   :  { %v6320_v0 = vpop.eup %6319 }
 0xc62   :  { %v6322_v6 = vpop.eup %6321  ;;  %1520 = vperm.xlu0 %6287, %v6320_v0  }
 0xc63   :  { %1523 = vperm.xlu1 %6288, %v6322_v6  }
 0xc65   :  { %v6324_v13 = vpop.eup %6323 }
 0xc66   :  { %v6326_v18 = vpop.eup %6325 }
 0xc67   :  { %1730 = vperm.xlu1 %6288, %v6324_v13   ;;  %1733 = vperm.xlu0 %6287, %v6326_v18  }
 0xce1   :  { %v1521_v21 = vpop.permute.xlu0 %1520 }
 0xce2   :  { %v1524_v23 = vpop.permute.xlu1 %1523  ;;  %v1528_v24 = vrot.slane %v1521_v21, %v6717_v52 }
 0xce3   :  { %v1532_v20 = vrot.slane %v1524_v23, %v6717_v52 }
 0xce5   :  { %v1533_v27 = vsel %vm465_vm4, %v1532_v20, %v1528_v24 }
 0xce6   :  { %v1731_v28 = vpop.permute.xlu1 %1730  ;;  %v1734_v29 = vpop.permute.xlu0 %1733  ;;  %v1535_v26 = vsel %vm468_vm5, %v1533_v27, 0.0 }
 0xce7   :  { %v1738_v32 = vrot.slane %v1731_v28, %v6717_v52  ;;  %v1742_v17 = vrot.slane %v1734_v29, %v6717_v52  ;;  %1536 = vadd.xlane.f32.xlu1 %v1535_v26  ;;  %v2268_v29 = vld [vmem:[%s7693_s6] sm:$0xff]  ;;  %v2269_v26 = vld [vmem:[%s7693_s6 + $0x8] sm:$0xff] }
 0xce9   :  { %v1743_v22 = vsel %vm465_vm4, %v1742_v17, %v1738_v32 }
 0xcea   :  { %v1745_v33 = vsel %vm680_vm6, %v1743_v22, 0.0  ;;  %v6975_v22 = vpack.c.bf16 %v2269_v26, %v2268_v29  ;;  %v2606_v26 = vld [vmem:[%s7696_s9 + $0x10] sm:$0xff] }
 0xceb   :  { %1746 = vadd.xlane.f32.xlu0 %v1745_v33  ;;  %v2271_v33 = vld [vmem:[%s7693_s6 + $0x18] sm:$0xff] }
 0xd74   :  { %v1537_v54 = vpop.xlane.xlu1 %1536 }
 0xd75   :  { %6327 = vrcp.f32 %v1537_v54 }
 0xd78   :  { %v1747_v34 = vpop.xlane.xlu0 %1746 }
 0xd79   :  { %6329 = vrcp.f32 %v1747_v34 }
 0xd7f   :  { %v6328_v37 = vpop.eup %6327 }
 0xd80   :  { %v1547_v38 = vrot.slane %v6328_v37, %v6727_v10  ;;  %v1543_v39 = vrot.slane %v6328_v37, %v6679_v25 }
 0xd82   :  { %v1551_v40 = vmul.f32 %v6322_v6, %v1547_v38  ;;  %v1550_v42 = vmul.f32 %v6320_v0, %v1543_v39  ;;  %v2118_v39 = vld [vmem:[%s7692_s5 + $0x20] sm:$0xff] }
 0xd83   :  { %v6330_v43 = vpop.eup %6329 }
 0xd84   :  { %1559 = vperm.xlu1 %6288, %v1551_v40   ;;  %1554 = vperm.xlu0 %6287, %v1550_v42   ;;  %v1757_v4 = vrot.slane %v6330_v43, %v6727_v10  ;;  %v1753_v12 = vrot.slane %v6330_v43, %v6679_v25  ;;  %v2119_v40 = vld [vmem:[%s7692_s5 + $0x28] sm:$0xff] }
 0xd86   :  { %v1761_v14 = vmul.f32 %v6326_v18, %v1757_v4  ;;  %v1760_v44 = vmul.f32 %v6324_v13, %v1753_v12  ;;  %v7003_v4 = vpack.c.bf16 %v2119_v40, %v2118_v39  ;;  %v2120_v12 = vld [vmem:[%s7692_s5 + $0x30] sm:$0xff] }
 0xd87   :  { %v2820_v40 = vld [vmem:[%s7697_s10 + $0x30] sm:$0xff] }
 0xd88   :  { %1769 = vperm.xlu0 %6287, %v1761_v14   ;;  %1764 = vperm.xlu1 %6288, %v1760_v44   ;;  %v2121_v14 = vld [vmem:[%s7692_s5 + $0x38] sm:$0xff] }
 0xd8c   :  { %1362 = vrot.lane.b32.xlu1 %v6871_v2, %s6430_s29 }
 0xe03   :  { %v1560_v50 = vpop.permute.xlu1 %1559  ;;  %v1555_v46 = vpop.permute.xlu0 %1554 }
 0xe04   :  { %v1563_v45 = vmul.f32 %v1560_v50, %v6694_v35  ;;  %v1562_v47 = vmul.f32 %v1555_v46, %v6686_v30  ;;  %v7014_v50 = vpack.c.bf16 %v2121_v14, %v2120_v12  ;;  %v2114_v46 = vld [vmem:[%s7692_s5] sm:$0xff] }
 0xe06   :  { %v1571_v48 = vsel %vm63_vm2, %v1563_v45, 0.0  ;;  %v1564_v57 = vsel %vm63_vm2, %v1562_v47, 0.0  ;;  %v2115_v45 = vld [vmem:[%s7692_s5 + $0x8] sm:$0xff] }
 0xe07   :  { %v1572_v49 = vrot.slane %v1571_v48, 4  ;;  %v1565_v51 = vrot.slane %v1564_v57, 4  ;;  %v1765_v53 = vpop.permute.xlu1 %1764  ;;  %v1770_v55 = vpop.permute.xlu0 %1769  ;;  %v7026_v47 = vpack.c.bf16 %v2115_v45, %v2114_v46 }
 0xe08   :  { %v1772_v56 = vmul.f32 %v1765_v53, %v6917_v58  ;;  %v1773_v59 = vmul.f32 %v1770_v55, %v6908_v15  ;;  %v5228_v53 = vld [vmem:[%s7687_s0 + $0x4] sm:$0x3] }
 0xe09   :  { %v1573_v60 = vadd.f32 %v1572_v49, %v1571_v48  ;;  %v1566_v2 = vadd.f32 %v1565_v51, %v1564_v57  ;;  %v2116_v48 = vld [vmem:[%s7692_s5 + $0x10] sm:$0xff]  ;;  %v2117_v57 = vld [vmem:[%s7692_s5 + $0x18] sm:$0xff] }
 0xe0a   :  { %v1774_v41 = vsel %vm661_vm3, %v1772_v56, 0.0  ;;  %v1781_v35 = vsel %vm661_vm3, %v1773_v59, 0.0  ;;  %v7037_v51 = vpack.c.bf16 %v2117_v57, %v2116_v48 }
 0xe0b   :  { %v1574_v61 = vrot.slane %v1573_v60, 2  ;;  %v1567_v30 = vrot.slane %v1566_v2, 2  ;;  %v1775_v63 = vrot.slane %v1774_v41, 4  ;;  %v1782_v1 = vrot.slane %v1781_v35, 4  ;;  %v1363_v31 = vpop.permute.xlu1 %1362 }
 0xe0c   :  { %1365 = vst.msk [vmem:[#allocation3] sm:$0x3] %vm46_vm0, %v1363_v31 }
 0xe0d   :  { %v1575_v5 = vadd.f32 %v1574_v61, %v1573_v60  ;;  %v1568_v7 = vadd.f32 %v1567_v30, %v1566_v2  ;;  %v1776_v9 = vadd.f32 %v1775_v63, %v1774_v41  ;;  %v1783_v36 = vadd.f32 %v1782_v1, %v1781_v35  ;;  %v7055_v30 = vld [vmem:[%s7694_s7] ss:$0 sm:$0xff] }
 0xe0f   :  { %v1576_v58 = vrot.slane %v1575_v5, 1  ;;  %v1569_v0 = vrot.slane %v1568_v7, 1  ;;  %v1777_v15 = vrot.slane %v1776_v9, 2  ;;  %v1784_v6 = vrot.slane %v1783_v36, 2 }
 0xe11   :  { %v1577_v13 = vadd.f32 %v1576_v58, %v1575_v5  ;;  %v1570_v18 = vadd.f32 %v1569_v0, %v1568_v7  ;;  %v1778_v21 = vadd.f32 %v1777_v15, %v1776_v9  ;;  %v1785_v23 = vadd.f32 %v1784_v6, %v1783_v36 }
 0xe13   :  { %v1779_v24 = vrot.slane %v1778_v21, 1  ;;  %v1786_v20 = vrot.slane %v1785_v23, 1  ;;  %v2113_v27 = vld [vmem:[#allocation3] sm:$0x3]  ;;  %v1868_v28 = vsel %vm465_vm4, %v1577_v13, %v1570_v18 }
 0xe14   :  { %2362 = vrot.lane.b32.xlu1 %v2113_v27, %s6427_s22  ;;  %5666 = vmatmul.mubr.msk.f32.vlgmr.msra.gmra.mrb[14].mxu0 %vm63_vm2, %v1868_v28  ;;  %v2392_v18 = vld [vmem:[%s7695_s8] sm:$0xff]  ;;  %v2394_v27 = vld [vmem:[%s7695_s8 + $0x10] sm:$0xff]  ;;  %v2395_v28 = vld [vmem:[%s7695_s8 + $0x18] sm:$0xff] }
 0xe15   :  { %6085 = vmatpush3.bf16.msra.mxu0 %v6780_v62  ;;  %5676 = vmatprep.mubr.msk.f32.mxu0 %vm6424_vm1, %v6425_v11  ;;  %v1780_v32 = vadd.f32 %v1779_v24, %v1778_v21  ;;  %v1787_v17 = vadd.f32 %v1786_v20, %v1785_v23  ;;  %v2270_v62 = vld [vmem:[%s7693_s6 + $0x10] sm:$0xff]  ;;  %v2393_v21 = vld [vmem:[%s7695_s8 + $0x8] sm:$0xff]  ;;  %v2604_v23 = vld [vmem:[%s7696_s9] sm:$0xff] }
 0xe16   :  { %6086 = vmatprep.subr.bf16.mxu0 %v6423_v3  ;;  %v6987_v34 = vpack.c.bf16 %v2271_v33, %v2270_v62  ;;  %v7072_v24 = vpack.c.bf16 %v2393_v21, %v2392_v18  ;;  %v2605_v20 = vld [vmem:[%s7696_s9 + $0x8] sm:$0xff] }
 0xe17   :  { %v1947_v54 = vsel %vm465_vm4, %v1787_v17, %v1780_v32  ;;  %v7083_v29 = vpack.c.bf16 %v2605_v20, %v2604_v23  ;;  %v2607_v32 = vld [vmem:[%s7696_s9 + $0x18] sm:$0xff]  ;;  %v7092_v17 = vpack.c.bf16 %v2395_v28, %v2394_v27 }
 0xe18   :  { %v7096_v62 = vpack.c.bf16 %v2607_v32, %v2606_v26 }
 0xe19   :  { %6088 = vmatpush3.bf16.msra.mxu0 %v6793_v19  ;;  %v2112_v19 = vld [vmem:[#allocation2] sm:$0x3] }
 0xe1a   :  { %6107 = vmatprep.subr.bf16.mxu0 %v6423_v3 }
 0xe1c   :  { %5677 = vmatmul.mubr.msk.f32.vlgmr.msra.gmra.mrb[14].mxu0 %vm63_vm2, %v1947_v54 }
 0xe1d   :  { %6109 = vmatpush3.bf16.msra.mxu0 %v6975_v22  ;;  %5720 = vmatprep.mubr.msk.f32.mxu0 %vm6424_vm1, %v6425_v11 }
 0xe1e   :  { %6110 = vmatprep.subr.bf16.mxu0 %v6423_v3 }
 0xe21   :  { %6112 = vmatpush3.bf16.msra.mxu0 %v6987_v34 }
 0xe22   :  { %6119 = vmatprep.subr.bf16.mxu0 %v6423_v3 }
 0xe24   :  { %5721 = vmatmul.mubr.msk.f32.vlgmr.msra.gmra.mrb[16].mxu0 %vm63_vm2, %v2112_v19 }
 0xe25   :  { %5742 = vmatprep.mubr.msk.f32.mxu0 %vm6424_vm1, %v6425_v11  ;;  %6121 = vmatpush3.bf16.msra.mxu0 %v7083_v29 }
 0xe26   :  { %6122 = vmatprep.subr.bf16.mxu0 %v6423_v3 }
 0xe29   :  { %6124 = vmatpush3.bf16.msra.mxu0 %v7096_v62 }
 0xe2a   :  { %6143 = vmatprep.subr.bf16.mxu0 %v6423_v3 }
 0xe86   :  { %v2363_v0 = vpop.permute.xlu1 %2362 }
 0xeef   :  { %v2016_v37 = vpop.f32.mrb[14].mxu0 }
 0xef0   :  { %6331 = vtanh.f32 %v2016_v37  ;;  %v5678_v38 = vpop.f32.mrb[15].mxu0  ;;  %v2818_v37 = vld [vmem:[%s7697_s10 + $0x20] sm:$0xff] }
 0xef1   :  { %v2819_v38 = vld [vmem:[%s7697_s10 + $0x28] sm:$0xff] }
 0xef2   :  { %v7111_v39 = vpack.c.bf16 %v2819_v38, %v2818_v37 }
 0xef7   :  { %v2341_v42 = vpop.f32.mrb[16].mxu0 }
 0xef8   :  { %v5722_v43 = vpop.f32.mrb[17].mxu0 }
 0xefa   :  { %v6332_v44 = vpop.eup %6331 }
 0xefb   :  { %2022 = vst.msk [vmem:[#allocation4] sm:$0x3] %vm46_vm0, %v6332_v44  ;;  %5688 = vmatmul.mubr.msk.f32.vlgmr.msra.gmra.mrb[10].mxu1 %vm63_vm2, %v6332_v44 }
 0xefc   :  { %6097 = vmatpush3.bf16.msra.mxu1 %v7003_v4  ;;  %5698 = vmatprep.mubr.msk.f32.mxu1 %vm6424_vm1, %v6425_v11 }
 0xefd   :  { %6098 = vmatprep.subr.bf16.mxu1 %v6423_v3 }
 0xf00   :  { %6100 = vmatpush3.bf16.msra.mxu1 %v7014_v50 }
 0xf01   :  { %6101 = vmatprep.subr.bf16.mxu1 %v6423_v3 }
 0xf02   :  { %v2111_v49 = vld [vmem:[#allocation4] sm:$0x3] }
 0xf03   :  { %5699 = vmatmul.mubr.msk.f32.vlgmr.msra.gmra.mrb[12].mxu1 %vm63_vm2, %v2111_v49 }
 0xf04   :  { %6103 = vmatpush3.bf16.msra.mxu1 %v7026_v47  ;;  %5709 = vmatprep.mubr.msk.f32.mxu1 %vm6424_vm1, %v6425_v11 }
 0xf05   :  { %6104 = vmatprep.subr.bf16.mxu1 %v6423_v3 }
 0xf08   :  { %6106 = vmatpush3.bf16.msra.mxu1 %v7037_v51 }
 0xf09   :  { %6113 = vmatprep.subr.bf16.mxu1 %v6423_v3 }
 0xf0b   :  { %5710 = vmatmul.mubr.msk.f32.vlgmr.msra.gmra.mrb[14].mxu1 %vm63_vm2, %v5228_v53 }
 0xf0c   :  { %5731 = vmatprep.mubr.msk.f32.mxu1 %vm6424_vm1, %v6425_v11  ;;  %6115 = vmatpush3.bf16.msra.mxu1 %v7072_v24 }
 0xf0d   :  { %6116 = vmatprep.subr.bf16.mxu1 %v6423_v3 }
 0xf10   :  { %6118 = vmatpush3.bf16.msra.mxu1 %v7092_v17 }
 0xf11   :  { %6125 = vmatprep.subr.bf16.mxu1 %v6423_v3 }
 0xfce   :  { %v2103_v55 = vpop.f32.mrb[10].mxu1 }
 0xfcf   :  { %v2104_v56 = vadd.f32 %v6863_v8, %v2103_v55  ;;  %v5689_v59 = vpop.f32.mrb[11].mxu1 }
 0xfd0   :  { %v7142_v59 = vld [vmem:[%s7688_s1] sm:$0xff] }
 0xfd1   :  { %2108 = vst.msk [vmem:[#allocation5 + $0x2] sm:$0x3] %vm1081_vm7, %v2104_v56 }
 0xfd6   :  { %v2191_v60 = vpop.f32.mrb[12].mxu1 }
 0xfd7   :  { %v5700_v2 = vpop.f32.mrb[13].mxu1 }
 0xfde   :  { %v2264_v41 = vpop.f32.mrb[14].mxu1 }
 0xfdf   :  { %v2265_v35 = vadd.f32 %v2264_v41, %v2191_v60  ;;  %v5711_v61 = vpop.f32.mrb[15].mxu1 }
 0xfe0   :  { %v7155_v61 = vld [vmem:[%s7689_s2 + $0x4] sm:$0xf] }
 0xfe1   :  { %v2345_v63 = vadd.f32 %v2341_v42, %v2265_v35  ;;  %v2821_v42 = vld [vmem:[%s7697_s10 + $0x38] sm:$0xff]  ;;  %v7150_v35 = vld [vmem:[%s7688_s1 + $0x8] sm:$0xff] }
 0xfe2   :  { %v7123_v12 = vpack.c.bf16 %v2821_v42, %v2820_v40 }
 0xfe3   :  { %v2353_v1 = vadd.f32 %v7055_v30, %v2345_v63 }
 0xfe5   :  { %6333 = vtanh.f32 %v2353_v1  ;;  %v5233_v8 = vmul.f32 -1.442695, %v2353_v1 }
 0xfe7   :  { %6335 = vpow2.f32 %v5233_v8 }
 0xfef   :  { %v6334_v31 = vpop.eup %6333 }
 0xff0   :  { %2367 = vrot.lane.b32.xlu0 %v6334_v31, %s6426_s4 }
 0xff1   :  { %v6336_v5 = vpop.eup %6335 }
 0xff2   :  { %v2357_v7 = vadd.f32 1.0, %v6336_v5  ;;  %v7164_v5 = vld [vmem:[%s7689_s2] sm:$0xf] }
 0xff4   :  { %6337 = vrcp.f32 %v2357_v7 }
 0xffe   :  { %v6338_v9 = vpop.eup %6337 }
 0xfff   :  { %v2365_v15 = vmul.f32 %v6338_v9, %v2363_v0 }
0x1062   :  { %v2368_v36 = vpop.permute.xlu0 %2367 }
0x1063   :  { %v2370_v58 = vmul.f32 %v6338_v9, %v2368_v36 }
0x1065   :  { %2372 = vrot.lane.b32.xlu0 %v2370_v58, %s6427_s22 }
0x10d7   :  { %v2373_v6 = vpop.permute.xlu0 %2372 }
0x10d8   :  { %v7060_v13 = vadd.f32 %v2373_v6, %v2365_v15 }
0x10da   :  { %6339 = vtanh.f32 %v7060_v13 }
0x10e4   :  { %v6340_v33 = vpop.eup %6339 }
0x10e5   :  { %2378 = vrot.lane.b32.xlu1 %v6340_v33, %s6426_s4 }
0x1157   :  { %v2379_v54 = vpop.permute.xlu1 %2378 }
0x1158   :  { %v2381_v19 = vmul.f32 %v6338_v9, %v2379_v54 }
0x115a   :  { %2383 = vrot.lane.b32.xlu0 %v2381_v19, %s6427_s22 }
0x11cc   :  { %v2384_v43 = vpop.permute.xlu0 %2383 }
0x11cd   :  { %2386 = vst.msk [vmem:[#allocation2] sm:$0x3] %vm46_vm0, %v2384_v43  ;;  %5732 = vmatmul.mubr.msk.f32.vlgmr.msra.gmra.mrb[16].mxu1 %vm63_vm2, %v2384_v43  ;;  %5743 = vmatmul.mubr.msk.f32.vlgmr.msra.gmra.mrb[18].mxu0 %vm63_vm2, %v2384_v43 }
0x11ce   :  { %6127 = vmatpush3.bf16.msra.mxu1 %v7111_v39  ;;  %5753 = vmatprep.mubr.msk.f32.mxu1 %vm6424_vm1, %v6425_v11 }
0x11cf   :  { %6128 = vmatprep.subr.bf16.mxu1 %v6423_v3  ;;  %5786 = vmatprep.mubr.msk.f32.mxu0 %vm6424_vm1, %v6425_v11 }
0x11d2   :  { %6130 = vmatpush3.bf16.msra.mxu1 %v7123_v12 }
0x11d3   :  { %6131 = vmatprep.subr.bf16.mxu1 %v6423_v3 }
0x11d5   :  { %5754 = vmatmul.mubr.msk.f32.vlgmr.msra.gmra.mrb[18].mxu1 %vm63_vm2, %v2384_v43 }
0x11d6   :  { %5764 = vmatprep.mubr.msk.f32.mxu1 %vm6424_vm1, %v6425_v11 }
0x12a0   :  { %v2464_v14 = vpop.f32.mrb[16].mxu1  ;;  %v2674_v44 = vpop.f32.mrb[18].mxu0 }
0x12a1   :  { %v2477_v46 = vrot.slane %v2464_v14, %v6675_v16  ;;  %v2687_v45 = vrot.slane %v2674_v44, %v6675_v16  ;;  %v5733_v48 = vpop.f32.mrb[17].mxu1  ;;  %v5744_v57 = vpop.f32.mrb[19].mxu0 }
0x12a3   :  { %v2478_v49 = vcombine.high %v2477_v46, %v2477_v46  ;;  %v2485_v53 = vrot.slane %v2477_v46, %v6675_v16  ;;  %v2688_v55 = vcombine.high %v2687_v45, %v2687_v45  ;;  %v2695_v56 = vrot.slane %v2687_v45, %v6675_v16 }
0x12a5   :  { %v2492_v60 = vrot.slane %v2478_v49, %v6675_v16  ;;  %v2702_v2 = vrot.slane %v2688_v55, %v6675_v16  ;;  %v2496_v41 = vrot.slane %v2485_v53, %v6679_v25  ;;  %v2706_v8 = vrot.slane %v2695_v56, %v6679_v25 }
0x12a7   :  { %v2503_v63 = vmul.f32 %v2496_v41, %v7142_v59  ;;  %v2500_v1 = vrot.slane %v2492_v60, %v6679_v25  ;;  %v2710_v31 = vrot.slane %v2702_v2, %v6679_v25  ;;  %v2713_v0 = vmul.f32 %v2706_v8, %v7164_v5 }
0x12a9   :  { %v2505_v7 = vsel %vm63_vm2, %v2503_v63, 0.0  ;;  %v2504_v9 = vmul.f32 %v2500_v1, %v7150_v35  ;;  %v2714_v36 = vmul.f32 %v2710_v31, %v7155_v61  ;;  %v2715_v6 = vsel %vm661_vm3, %v2713_v0, 0.0 }
0x12aa   :  { %2506 = vadd.xlane.f32.xlu1 %v2505_v7 }
0x12ab   :  { %v2508_v58 = vsel %vm63_vm2, %v2504_v9, 0.0  ;;  %v2718_v15 = vsel %vm661_vm3, %v2714_v36, 0.0 }
0x12ac   :  { %2509 = vadd.xlane.f32.xlu0 %v2508_v58 }
0x12ae   :  { %2719 = vadd.xlane.f32.xlu1 %v2718_v15 }
0x12b0   :  { %2716 = vadd.xlane.f32.xlu0 %v2715_v6 }
0x1337   :  { %v2507_v18 = vpop.xlane.xlu1 %2506 }
0x1338   :  { %v2516_v23 = vrot.slane %v2507_v18, %v6717_v52 }
0x1339   :  { %v2510_v21 = vpop.xlane.xlu0 %2509 }
0x133a   :  { %v2520_v20 = vrot.slane %v2510_v21, %v6717_v52 }
0x133b   :  { %v2720_v27 = vpop.xlane.xlu1 %2719 }
0x133c   :  { %v2521_v28 = vsel %vm465_vm4, %v2520_v20, %v2516_v23  ;;  %v2730_v33 = vrot.slane %v2720_v27, %v6717_v52 }
0x133d   :  { %v2717_v26 = vpop.xlane.xlu0 %2716  ;;  %v2523_v32 = vsel %vm468_vm5, %v2521_v28, -inf }
0x133e   :  { %v2726_v54 = vrot.slane %v2717_v26, %v6717_v52  ;;  %2524 = vmax.xlane.f32.xlu0 %v2523_v32 }
0x1340   :  { %v2731_v19 = vsel %vm465_vm4, %v2730_v33, %v2726_v54 }
0x1341   :  { %v2733_v37 = vsel %vm680_vm6, %v2731_v19, -inf }
0x1342   :  { %2734 = vmax.xlane.f32.xlu1 %v2733_v37 }
0x13cb   :  { %v2525_v38 = vpop.xlane.xlu0 %2524 }
0x13cc   :  { %v2530_v40 = vrot.slane %v2525_v38, %v6679_v25  ;;  %v2534_v42 = vrot.slane %v2525_v38, %v6727_v10 }
0x13ce   :  { %v2537_v43 = vsub.f32 %v2507_v18, %v2530_v40  ;;  %v2538_v14 = vsub.f32 %v2510_v21, %v2534_v42  ;;  %v2814_v42 = vld [vmem:[%s7697_s10] sm:$0xff] }
0x13cf   :  { %v2735_v44 = vpop.xlane.xlu1 %2734 }
0x13d0   :  { %v2539_v46 = vmul.f32 1.442695, %v2537_v43  ;;  %v2541_v45 = vmul.f32 1.442695, %v2538_v14  ;;  %v2740_v48 = vrot.slane %v2735_v44, %v6679_v25  ;;  %v2744_v57 = vrot.slane %v2735_v44, %v6727_v10  ;;  %v2815_v43 = vld [vmem:[%s7697_s10 + $0x8] sm:$0xff]  ;;  %v2816_v44 = vld [vmem:[%s7697_s10 + $0x10] sm:$0xff] }
0x13d1   :  { %v7203_v14 = vpack.c.bf16 %v2815_v43, %v2814_v42  ;;  %v2970_v42 = vld [vmem:[%s7697_s10 + $0x58] sm:$0xff] }
0x13d2   :  { %6341 = vpow2.f32 %v2539_v46  ;;  %v2747_v49 = vsub.f32 %v2717_v26, %v2740_v48  ;;  %v2748_v53 = vsub.f32 %v2720_v27, %v2744_v57  ;;  %v2817_v46 = vld [vmem:[%s7697_s10 + $0x18] sm:$0xff] }
0x13d3   :  { %6343 = vpow2.f32 %v2541_v45  ;;  %6133 = vmatpush3.bf16.msra.mxu1 %v7203_v14  ;;  %v7215_v45 = vpack.c.bf16 %v2817_v46, %v2816_v44 }
0x13d4   :  { %v2749_v55 = vmul.f32 1.442695, %v2747_v49  ;;  %v2751_v56 = vmul.f32 1.442695, %v2748_v53  ;;  %6134 = vmatprep.subr.bf16.mxu1 %v6423_v3 }
0x13d6   :  { %6345 = vpow2.f32 %v2749_v55 }
0x13d7   :  { %6347 = vpow2.f32 %v2751_v56  ;;  %6136 = vmatpush3.bf16.msra.mxu1 %v7215_v45 }
0x13d8   :  { %6137 = vmatprep.subr.bf16.mxu1 %v6423_v3 }
0x13dc   :  { %v6342_v60 = vpop.eup %6341 }
0x13dd   :  { %v6344_v2 = vpop.eup %6343  ;;  %2546 = vperm.xlu0 %6287, %v6342_v60  }
0x13de   :  { %2549 = vperm.xlu1 %6288, %v6344_v2  }
0x13e0   :  { %v6346_v41 = vpop.eup %6345 }
0x13e1   :  { %v6348_v63 = vpop.eup %6347 }
0x13e2   :  { %2759 = vperm.xlu0 %6287, %v6348_v63   ;;  %2756 = vperm.xlu1 %6288, %v6346_v41  }
0x145c   :  { %v2547_v1 = vpop.permute.xlu0 %2546 }
0x145d   :  { %v2554_v31 = vrot.slane %v2547_v1, %v6717_v52  ;;  %v2550_v8 = vpop.permute.xlu1 %2549 }
0x145e   :  { %v2558_v7 = vrot.slane %v2550_v8, %v6717_v52 }
0x1460   :  { %v2559_v9 = vsel %vm465_vm4, %v2558_v7, %v2554_v31 }
0x1461   :  { %v2760_v36 = vpop.permute.xlu0 %2759  ;;  %v2757_v58 = vpop.permute.xlu1 %2756  ;;  %v2561_v0 = vsel %vm468_vm5, %v2559_v9, 0.0 }
0x1462   :  { %v2768_v15 = vrot.slane %v2760_v36, %v6717_v52  ;;  %v2764_v6 = vrot.slane %v2757_v58, %v6717_v52  ;;  %2562 = vadd.xlane.f32.xlu1 %v2561_v0 }
0x1464   :  { %v2769_v18 = vsel %vm465_vm4, %v2768_v15, %v2764_v6 }
0x1465   :  { %v2771_v21 = vsel %vm680_vm6, %v2769_v18, 0.0 }
0x1466   :  { %2772 = vadd.xlane.f32.xlu0 %v2771_v21 }
0x14ef   :  { %v2563_v23 = vpop.xlane.xlu1 %2562 }
0x14f0   :  { %6349 = vrcp.f32 %v2563_v23 }
0x14f3   :  { %v2773_v20 = vpop.xlane.xlu0 %2772 }
0x14f4   :  { %6351 = vrcp.f32 %v2773_v20 }
0x14fa   :  { %v6350_v27 = vpop.eup %6349 }
0x14fb   :  { %v2573_v28 = vrot.slane %v6350_v27, %v6727_v10  ;;  %v2569_v26 = vrot.slane %v6350_v27, %v6679_v25 }
0x14fd   :  { %v2577_v32 = vmul.f32 %v6344_v2, %v2573_v28  ;;  %v2576_v33 = vmul.f32 %v6342_v60, %v2569_v26 }
0x14fe   :  { %v6352_v54 = vpop.eup %6351 }
0x14ff   :  { %2585 = vperm.xlu1 %6288, %v2577_v32   ;;  %2580 = vperm.xlu0 %6287, %v2576_v33   ;;  %v2779_v19 = vrot.slane %v6352_v54, %v6679_v25  ;;  %v2783_v37 = vrot.slane %v6352_v54, %v6727_v10 }
0x1501   :  { %v2786_v38 = vmul.f32 %v6346_v41, %v2779_v19  ;;  %v2787_v40 = vmul.f32 %v6348_v63, %v2783_v37 }
0x1503   :  { %2790 = vperm.xlu1 %6288, %v2786_v38   ;;  %2795 = vperm.xlu0 %6287, %v2787_v40   ;;  %v2969_v40 = vld [vmem:[%s7697_s10 + $0x50] sm:$0xff] }
0x1507   :  { %2388 = vrot.lane.b32.xlu1 %v7060_v13, %s6430_s29 }
0x157e   :  { %v2586_v48 = vpop.permute.xlu1 %2585  ;;  %v2581_v13 = vpop.permute.xlu0 %2580 }
0x157f   :  { %v2589_v57 = vmul.f32 %v2586_v48, %v7150_v35  ;;  %v2588_v49 = vmul.f32 %v2581_v13, %v7142_v59  ;;  %v7246_v13 = vpack.c.bf16 %v2970_v42, %v2969_v40 }
0x1581   :  { %v2597_v53 = vsel %vm63_vm2, %v2589_v57, 0.0  ;;  %v2590_v55 = vsel %vm63_vm2, %v2588_v49, 0.0 }
0x1582   :  { %v2598_v56 = vrot.slane %v2597_v53, 4  ;;  %v2591_v60 = vrot.slane %v2590_v55, 4  ;;  %v2791_v2 = vpop.permute.xlu1 %2790  ;;  %v2796_v41 = vpop.permute.xlu0 %2795 }
0x1583   :  { %v2798_v63 = vmul.f32 %v2791_v2, %v7164_v5  ;;  %v2799_v1 = vmul.f32 %v2796_v41, %v7155_v61  ;;  %v2967_v61 = vld [vmem:[%s7697_s10 + $0x40] sm:$0xff]  ;;  %v2968_v5 = vld [vmem:[%s7697_s10 + $0x48] sm:$0xff] }
0x1584   :  { %v2599_v31 = vadd.f32 %v2598_v56, %v2597_v53  ;;  %v2592_v8 = vadd.f32 %v2591_v60, %v2590_v55  ;;  %v7234_v33 = vpack.c.bf16 %v2968_v5, %v2967_v61  ;;  %v3138_v55 = vld [vmem:[#allocation2] sm:$0x3] }
0x1585   :  { %v2800_v7 = vsel %vm661_vm3, %v2798_v63, 0.0  ;;  %v2807_v9 = vsel %vm661_vm3, %v2799_v1, 0.0 }
0x1586   :  { %v2600_v36 = vrot.slane %v2599_v31, 2  ;;  %v2593_v58 = vrot.slane %v2592_v8, 2  ;;  %v2801_v0 = vrot.slane %v2800_v7, 4  ;;  %v2808_v15 = vrot.slane %v2807_v9, 4  ;;  %v2389_v6 = vpop.permute.xlu1 %2388 }
0x1587   :  { %2391 = vst.msk [vmem:[#allocation3] sm:$0x3] %vm46_vm0, %v2389_v6 }
0x1588   :  { %v2601_v18 = vadd.f32 %v2600_v36, %v2599_v31  ;;  %v2594_v21 = vadd.f32 %v2593_v58, %v2592_v8  ;;  %v2802_v23 = vadd.f32 %v2801_v0, %v2800_v7  ;;  %v2809_v20 = vadd.f32 %v2808_v15, %v2807_v9 }
0x158a   :  { %v2602_v27 = vrot.slane %v2601_v18, 1  ;;  %v2595_v28 = vrot.slane %v2594_v21, 1  ;;  %v2803_v26 = vrot.slane %v2802_v23, 2  ;;  %v2810_v32 = vrot.slane %v2809_v20, 2 }
0x158c   :  { %v2603_v54 = vadd.f32 %v2602_v27, %v2601_v18  ;;  %v2596_v19 = vadd.f32 %v2595_v28, %v2594_v21  ;;  %v2804_v37 = vadd.f32 %v2803_v26, %v2802_v23  ;;  %v2811_v38 = vadd.f32 %v2810_v32, %v2809_v20 }
0x158e   :  { %v2805_v43 = vrot.slane %v2804_v37, 1  ;;  %v2812_v44 = vrot.slane %v2811_v38, 1  ;;  %v3139_v46 = vld [vmem:[#allocation3] sm:$0x3]  ;;  %v2894_v48 = vsel %vm465_vm4, %v2603_v54, %v2596_v19 }
0x158f   :  { %3388 = vrot.lane.b32.xlu1 %v3139_v46, %s6427_s22  ;;  %5765 = vmatmul.mubr.msk.f32.vlgmr.msra.gmra.mrb[18].mxu1 %vm63_vm2, %v2894_v48 }
0x1590   :  { %6139 = vmatpush3.bf16.msra.mxu1 %v7234_v33  ;;  %5775 = vmatprep.mubr.msk.f32.mxu1 %vm6424_vm1, %v6425_v11  ;;  %v2806_v57 = vadd.f32 %v2805_v43, %v2804_v37  ;;  %v2813_v49 = vadd.f32 %v2812_v44, %v2811_v38 }
0x1591   :  { %6140 = vmatprep.subr.bf16.mxu1 %v6423_v3 }
0x1592   :  { %v2973_v53 = vsel %vm465_vm4, %v2813_v49, %v2806_v57 }
0x1594   :  { %6142 = vmatpush3.bf16.msra.mxu1 %v7246_v13 }
0x1595   :  { %6161 = vmatprep.subr.bf16.mxu1 %v6423_v3 }
0x1597   :  { %5776 = vmatmul.mubr.msk.f32.vlgmr.msra.gmra.mrb[18].mxu1 %vm63_vm2, %v2973_v53  ;;  %v7360_v53 = vld [vmem:[%s7689_s2 + $0x4] sm:$0xf] }
0x1598   :  { %6163 = vmatpush3.bf16.msra.mxu1 %v6975_v22  ;;  %5819 = vmatprep.mubr.msk.f32.mxu1 %vm6424_vm1, %v6425_v11  ;;  %v3049_v22 = vld [vmem:[%s7698_s11] sm:$0xff] }
0x1599   :  { %6164 = vmatprep.subr.bf16.mxu1 %v6423_v3 }
0x159c   :  { %6166 = vmatpush3.bf16.msra.mxu1 %v6987_v34  ;;  %v3050_v34 = vld [vmem:[%s7698_s11 + $0x8] sm:$0xff] }
0x159d   :  { %6173 = vmatprep.subr.bf16.mxu1 %v6423_v3  ;;  %v7274_v56 = vpack.c.bf16 %v3050_v34, %v3049_v22 }
0x159f   :  { %5820 = vmatmul.mubr.msk.f32.vlgmr.msra.gmra.mrb[20].mxu1 %vm63_vm2, %v3138_v55  ;;  %6145 = vmatpush3.bf16.msra.mxu0 %v7274_v56 }
0x15a0   :  { %6175 = vmatpush3.bf16.msra.mxu1 %v7083_v29  ;;  %5841 = vmatprep.mubr.msk.f32.mxu1 %vm6424_vm1, %v6425_v11  ;;  %v3051_v29 = vld [vmem:[%s7698_s11 + $0x10] sm:$0xff] }
0x15a1   :  { %6176 = vmatprep.subr.bf16.mxu1 %v6423_v3  ;;  %6146 = vmatprep.subr.bf16.mxu0 %v6423_v3 }
0x15a4   :  { %6178 = vmatpush3.bf16.msra.mxu1 %v7096_v62  ;;  %v3052_v62 = vld [vmem:[%s7698_s11 + $0x18] sm:$0xff] }
0x15a5   :  { %6197 = vmatprep.subr.bf16.mxu1 %v6423_v3  ;;  %v7284_v60 = vpack.c.bf16 %v3052_v62, %v3051_v29  ;;  %v7369_v29 = vld [vmem:[%s7689_s2] sm:$0xf] }
0x15a7   :  { %6148 = vmatpush3.bf16.msra.mxu0 %v7284_v60 }
0x15a8   :  { %6149 = vmatprep.subr.bf16.mxu0 %v6423_v3 }
0x1601   :  { %v3389_v27 = vpop.permute.xlu1 %3388 }
0x166a   :  { %v3042_v2 = vpop.f32.mrb[18].mxu1 }
0x166b   :  { %6353 = vtanh.f32 %v3042_v2  ;;  %v5777_v41 = vpop.f32.mrb[19].mxu1 }
0x1672   :  { %v3367_v63 = vpop.f32.mrb[20].mxu1 }
0x1673   :  { %v5821_v1 = vpop.f32.mrb[21].mxu1 }
0x1675   :  { %v6354_v31 = vpop.eup %6353 }
0x1676   :  { %3048 = vst.msk [vmem:[#allocation4] sm:$0x3] %vm46_vm0, %v6354_v31  ;;  %5787 = vmatmul.mubr.msk.f32.vlgmr.msra.gmra.mrb[20].mxu0 %vm63_vm2, %v6354_v31 }
0x1677   :  { %6151 = vmatpush3.bf16.msra.mxu0 %v7003_v4  ;;  %5797 = vmatprep.mubr.msk.f32.mxu0 %vm6424_vm1, %v6425_v11  ;;  %v5241_v4 = vld [vmem:[%s7687_s0 + $0x6] sm:$0x3] }
0x1678   :  { %6152 = vmatprep.subr.bf16.mxu0 %v6423_v3 }
0x167b   :  { %6154 = vmatpush3.bf16.msra.mxu0 %v7014_v50  ;;  %v7316_v50 = vld [vmem:[%s7699_s12] ss:$0 sm:$0xff] }
0x167c   :  { %6155 = vmatprep.subr.bf16.mxu0 %v6423_v3 }
0x167d   :  { %v3137_v8 = vld [vmem:[#allocation4] sm:$0x3] }
0x167e   :  { %5798 = vmatmul.mubr.msk.f32.vlgmr.msra.gmra.mrb[22].mxu0 %vm63_vm2, %v3137_v8 }
0x167f   :  { %6157 = vmatpush3.bf16.msra.mxu0 %v7026_v47  ;;  %5808 = vmatprep.mubr.msk.f32.mxu0 %vm6424_vm1, %v6425_v11 }
0x1680   :  { %6158 = vmatprep.subr.bf16.mxu0 %v6423_v3 }
0x1683   :  { %6160 = vmatpush3.bf16.msra.mxu0 %v7037_v51 }
0x1684   :  { %6167 = vmatprep.subr.bf16.mxu0 %v6423_v3 }
0x1686   :  { %5809 = vmatmul.mubr.msk.f32.vlgmr.msra.gmra.mrb[24].mxu0 %vm63_vm2, %v5241_v4 }
0x1687   :  { %6169 = vmatpush3.bf16.msra.mxu0 %v7072_v24  ;;  %5830 = vmatprep.mubr.msk.f32.mxu0 %vm6424_vm1, %v6425_v11 }
0x1688   :  { %6170 = vmatprep.subr.bf16.mxu0 %v6423_v3 }
0x168b   :  { %6172 = vmatpush3.bf16.msra.mxu0 %v7092_v17 }
0x168c   :  { %6179 = vmatprep.subr.bf16.mxu0 %v6423_v3 }
0x1749   :  { %v3129_v47 = vpop.f32.mrb[20].mxu0 }
0x174a   :  { %v3130_v51 = vadd.f32 %v7316_v50, %v3129_v47  ;;  %v5788_v7 = vpop.f32.mrb[21].mxu0 }
0x174c   :  { %3134 = vst.msk [vmem:[#allocation5 + $0x4] sm:$0x3] %vm1081_vm7, %v3130_v51 }
0x1751   :  { %v3217_v24 = vpop.f32.mrb[22].mxu0 }
0x1752   :  { %v5799_v9 = vpop.f32.mrb[23].mxu0 }
0x1759   :  { %v3290_v36 = vpop.f32.mrb[24].mxu0 }
0x175a   :  { %v3291_v58 = vadd.f32 %v3290_v36, %v3217_v24  ;;  %v5810_v0 = vpop.f32.mrb[25].mxu0 }
0x175c   :  { %v3371_v15 = vadd.f32 %v3367_v63, %v3291_v58 }
0x175e   :  { %v3379_v17 = vadd.f32 %v7055_v30, %v3371_v15 }
0x1760   :  { %6355 = vtanh.f32 %v3379_v17  ;;  %v5246_v18 = vmul.f32 -1.442695, %v3379_v17 }
0x1762   :  { %6357 = vpow2.f32 %v5246_v18 }
0x176a   :  { %v6356_v6 = vpop.eup %6355 }
0x176b   :  { %3393 = vrot.lane.b32.xlu0 %v6356_v6, %s6426_s4 }
0x176c   :  { %v6358_v21 = vpop.eup %6357 }
0x176d   :  { %v3383_v23 = vadd.f32 1.0, %v6358_v21 }
0x176f   :  { %6359 = vrcp.f32 %v3383_v23 }
0x1779   :  { %v6360_v20 = vpop.eup %6359 }
0x177a   :  { %v3391_v28 = vmul.f32 %v6360_v20, %v3389_v27 }
0x17dd   :  { %v3394_v61 = vpop.permute.xlu0 %3393 }
0x17de   :  { %v3396_v5 = vmul.f32 %v6360_v20, %v3394_v61 }
0x17e0   :  { %3398 = vrot.lane.b32.xlu0 %v3396_v5, %s6427_s22 }
0x1852   :  { %v3399_v26 = vpop.permute.xlu0 %3398 }
0x1853   :  { %v7323_v32 = vadd.f32 %v3399_v26, %v3391_v28 }
0x1855   :  { %6361 = vtanh.f32 %v7323_v32 }
0x185f   :  { %v6362_v30 = vpop.eup %6361 }
0x1860   :  { %3404 = vrot.lane.b32.xlu1 %v6362_v30, %s6426_s4 }
0x18d2   :  { %v3405_v54 = vpop.permute.xlu1 %3404 }
0x18d3   :  { %v3407_v19 = vmul.f32 %v6360_v20, %v3405_v54 }
0x18d5   :  { %3409 = vrot.lane.b32.xlu0 %v3407_v19, %s6427_s22 }
0x1947   :  { %v3410_v37 = vpop.permute.xlu0 %3409 }
0x1948   :  { %3412 = vst.msk [vmem:[#allocation2] sm:$0x3] %vm46_vm0, %v3410_v37  ;;  %5831 = vmatmul.mubr.msk.f32.vlgmr.msra.gmra.mrb[26].mxu0 %vm63_vm2, %v3410_v37  ;;  %5842 = vmatmul.mubr.msk.f32.vlgmr.msra.gmra.mrb[22].mxu1 %vm63_vm2, %v3410_v37 }
0x1949   :  { %6181 = vmatpush3.bf16.msra.mxu0 %v7111_v39  ;;  %5852 = vmatprep.mubr.msk.f32.mxu0 %vm6424_vm1, %v6425_v11 }
0x194a   :  { %6182 = vmatprep.subr.bf16.mxu0 %v6423_v3  ;;  %6199 = vmatpush3.bf16.msra.mxu1 %v7274_v56 }
0x194b   :  { %6200 = vmatprep.subr.bf16.mxu1 %v6423_v3  ;;  %5885 = vmatprep.mubr.msk.f32.mxu1 %vm6424_vm1, %v6425_v11 }
0x194d   :  { %6184 = vmatpush3.bf16.msra.mxu0 %v7123_v12 }
0x194e   :  { %6185 = vmatprep.subr.bf16.mxu0 %v6423_v3  ;;  %6202 = vmatpush3.bf16.msra.mxu1 %v7284_v60 }
0x194f   :  { %6203 = vmatprep.subr.bf16.mxu1 %v6423_v3 }
0x1950   :  { %5853 = vmatmul.mubr.msk.f32.vlgmr.msra.gmra.mrb[28].mxu0 %vm63_vm2, %v3410_v37 }
0x1951   :  { %6187 = vmatpush3.bf16.msra.mxu0 %v7203_v14  ;;  %5863 = vmatprep.mubr.msk.f32.mxu0 %vm6424_vm1, %v6425_v11 }
0x1952   :  { %6188 = vmatprep.subr.bf16.mxu0 %v6423_v3 }
0x1955   :  { %6190 = vmatpush3.bf16.msra.mxu0 %v7215_v45 }
0x1956   :  { %6191 = vmatprep.subr.bf16.mxu0 %v6423_v3 }
0x1a1b   :  { %v3490_v39 = vpop.f32.mrb[26].mxu0  ;;  %v3700_v12 = vpop.f32.mrb[22].mxu1 }
0x1a1c   :  { %v3503_v38 = vrot.slane %v3490_v39, %v6675_v16  ;;  %v3713_v40 = vrot.slane %v3700_v12, %v6675_v16  ;;  %v5832_v42 = vpop.f32.mrb[27].mxu0  ;;  %v5843_v43 = vpop.f32.mrb[23].mxu1 }
0x1a1e   :  { %v3504_v44 = vcombine.high %v3503_v38, %v3503_v38  ;;  %v3511_v14 = vrot.slane %v3503_v38, %v6675_v16  ;;  %v3714_v46 = vcombine.high %v3713_v40, %v3713_v40  ;;  %v3721_v48 = vrot.slane %v3713_v40, %v6675_v16 }
0x1a20   :  { %v3518_v57 = vrot.slane %v3504_v44, %v6675_v16  ;;  %v3728_v45 = vrot.slane %v3714_v46, %v6675_v16  ;;  %v3522_v49 = vrot.slane %v3511_v14, %v6679_v25  ;;  %v3732_v56 = vrot.slane %v3721_v48, %v6679_v25 }
0x1a22   :  { %v3529_v55 = vmul.f32 %v3522_v49, %v7142_v59  ;;  %v3526_v22 = vrot.slane %v3518_v57, %v6679_v25  ;;  %v3736_v34 = vrot.slane %v3728_v45, %v6679_v25  ;;  %v3739_v63 = vmul.f32 %v3732_v56, %v7369_v29 }
0x1a24   :  { %v3531_v62 = vsel %vm63_vm2, %v3529_v55, 0.0  ;;  %v3530_v60 = vmul.f32 %v3526_v22, %v7150_v35  ;;  %v3740_v2 = vmul.f32 %v3736_v34, %v7360_v53  ;;  %v3741_v31 = vsel %vm661_vm3, %v3739_v63, 0.0 }
0x1a25   :  { %3532 = vadd.xlane.f32.xlu1 %v3531_v62 }
0x1a26   :  { %v3534_v41 = vsel %vm63_vm2, %v3530_v60, 0.0  ;;  %v3744_v1 = vsel %vm661_vm3, %v3740_v2, 0.0 }
0x1a27   :  { %3535 = vadd.xlane.f32.xlu0 %v3534_v41 }
0x1a29   :  { %3745 = vadd.xlane.f32.xlu1 %v3744_v1 }
0x1a2b   :  { %3742 = vadd.xlane.f32.xlu0 %v3741_v31 }
0x1ab2   :  { %v3533_v8 = vpop.xlane.xlu1 %3532 }
0x1ab3   :  { %v3542_v47 = vrot.slane %v3533_v8, %v6717_v52 }
0x1ab4   :  { %v3536_v4 = vpop.xlane.xlu0 %3535 }
0x1ab5   :  { %v3546_v51 = vrot.slane %v3536_v4, %v6717_v52 }
0x1ab6   :  { %v3746_v7 = vpop.xlane.xlu1 %3745 }
0x1ab7   :  { %v3547_v24 = vsel %vm465_vm4, %v3546_v51, %v3542_v47  ;;  %v3756_v58 = vrot.slane %v3746_v7, %v6717_v52 }
0x1ab8   :  { %v3743_v9 = vpop.xlane.xlu0 %3742  ;;  %v3549_v36 = vsel %vm468_vm5, %v3547_v24, -inf }
0x1ab9   :  { %v3752_v0 = vrot.slane %v3743_v9, %v6717_v52  ;;  %3550 = vmax.xlane.f32.xlu0 %v3549_v36 }
0x1abb   :  { %v3757_v15 = vsel %vm465_vm4, %v3756_v58, %v3752_v0 }
0x1abc   :  { %v3759_v17 = vsel %vm680_vm6, %v3757_v15, -inf }
0x1abd   :  { %3760 = vmax.xlane.f32.xlu1 %v3759_v17 }
0x1b46   :  { %v3551_v6 = vpop.xlane.xlu0 %3550 }
0x1b47   :  { %v3556_v18 = vrot.slane %v3551_v6, %v6679_v25  ;;  %v3560_v21 = vrot.slane %v3551_v6, %v6727_v10 }
0x1b49   :  { %v3563_v23 = vsub.f32 %v3533_v8, %v3556_v18  ;;  %v3564_v20 = vsub.f32 %v3536_v4, %v3560_v21 }
0x1b4a   :  { %v3761_v61 = vpop.xlane.xlu1 %3760 }
0x1b4b   :  { %v3565_v5 = vmul.f32 1.442695, %v3563_v23  ;;  %v3567_v27 = vmul.f32 1.442695, %v3564_v20  ;;  %v3766_v28 = vrot.slane %v3761_v61, %v6679_v25  ;;  %v3770_v26 = vrot.slane %v3761_v61, %v6727_v10 }
0x1b4d   :  { %6363 = vpow2.f32 %v3565_v5  ;;  %v3773_v30 = vsub.f32 %v3743_v9, %v3766_v28  ;;  %v3774_v54 = vsub.f32 %v3746_v7, %v3770_v26 }
0x1b4e   :  { %6365 = vpow2.f32 %v3567_v27 }
0x1b4f   :  { %v3775_v19 = vmul.f32 1.442695, %v3773_v30  ;;  %v3777_v37 = vmul.f32 1.442695, %v3774_v54 }
0x1b51   :  { %6367 = vpow2.f32 %v3775_v19 }
0x1b52   :  { %6369 = vpow2.f32 %v3777_v37 }
0x1b57   :  { %v6364_v39 = vpop.eup %6363 }
0x1b58   :  { %v6366_v12 = vpop.eup %6365  ;;  %3572 = vperm.xlu0 %6287, %v6364_v39  }
0x1b59   :  { %3575 = vperm.xlu1 %6288, %v6366_v12  }
0x1b5b   :  { %v6368_v38 = vpop.eup %6367 }
0x1b5c   :  { %v6370_v40 = vpop.eup %6369 }
0x1b5d   :  { %3782 = vperm.xlu1 %6288, %v6368_v38   ;;  %3785 = vperm.xlu0 %6287, %v6370_v40  }
0x1bd7   :  { %v3573_v42 = vpop.permute.xlu0 %3572 }
0x1bd8   :  { %v3576_v43 = vpop.permute.xlu1 %3575  ;;  %v3580_v44 = vrot.slane %v3573_v42, %v6717_v52 }
0x1bd9   :  { %v3584_v14 = vrot.slane %v3576_v43, %v6717_v52 }
0x1bdb   :  { %v3585_v46 = vsel %vm465_vm4, %v3584_v14, %v3580_v44 }
0x1bdc   :  { %v3783_v48 = vpop.permute.xlu1 %3782  ;;  %v3786_v57 = vpop.permute.xlu0 %3785  ;;  %v3587_v45 = vsel %vm468_vm5, %v3585_v46, 0.0 }
0x1bdd   :  { %v3790_v49 = vrot.slane %v3783_v48, %v6717_v52  ;;  %v3794_v55 = vrot.slane %v3786_v57, %v6717_v52  ;;  %3588 = vadd.xlane.f32.xlu1 %v3587_v45  ;;  %v4320_v57 = vld [vmem:[%s7693_s6] sm:$0xff]  ;;  %v4321_v45 = vld [vmem:[%s7693_s6 + $0x8] sm:$0xff] }
0x1bdf   :  { %v3795_v22 = vsel %vm465_vm4, %v3794_v55, %v3790_v49 }
0x1be0   :  { %v3797_v34 = vsel %vm680_vm6, %v3795_v22, 0.0  ;;  %v6216_v22 = vpack.c.bf16 %v4321_v45, %v4320_v57  ;;  %v4658_v45 = vld [vmem:[%s7696_s9 + $0x10] sm:$0xff] }
0x1be1   :  { %3798 = vadd.xlane.f32.xlu0 %v3797_v34  ;;  %v4323_v34 = vld [vmem:[%s7693_s6 + $0x18] sm:$0xff] }
0x1c6a   :  { %v3589_v56 = vpop.xlane.xlu1 %3588 }
0x1c6b   :  { %6371 = vrcp.f32 %v3589_v56 }
0x1c6e   :  { %v3799_v62 = vpop.xlane.xlu0 %3798 }
0x1c6f   :  { %6373 = vrcp.f32 %v3799_v62 }
0x1c75   :  { %v6372_v60 = vpop.eup %6371 }
0x1c76   :  { %v3599_v2 = vrot.slane %v6372_v60, %v6727_v10  ;;  %v3595_v41 = vrot.slane %v6372_v60, %v6679_v25 }
0x1c78   :  { %v3603_v63 = vmul.f32 %v6366_v12, %v3599_v2  ;;  %v3602_v1 = vmul.f32 %v6364_v39, %v3595_v41  ;;  %v4170_v41 = vld [vmem:[%s7692_s5 + $0x20] sm:$0xff] }
0x1c79   :  { %v6374_v31 = vpop.eup %6373 }
0x1c7a   :  { %3611 = vperm.xlu1 %6288, %v3603_v63   ;;  %3606 = vperm.xlu0 %6287, %v3602_v1   ;;  %v3809_v8 = vrot.slane %v6374_v31, %v6727_v10  ;;  %v3805_v4 = vrot.slane %v6374_v31, %v6679_v25  ;;  %v4171_v63 = vld [vmem:[%s7692_s5 + $0x28] sm:$0xff] }
0x1c7c   :  { %v3813_v47 = vmul.f32 %v6370_v40, %v3809_v8  ;;  %v3812_v51 = vmul.f32 %v6368_v38, %v3805_v4  ;;  %v6204_v8 = vpack.c.bf16 %v4171_v63, %v4170_v41  ;;  %v4172_v4 = vld [vmem:[%s7692_s5 + $0x30] sm:$0xff]  ;;  %v4873_v41 = vld [vmem:[%s7697_s10 + $0x38] sm:$0xff] }
0x1c7e   :  { %3821 = vperm.xlu0 %6287, %v3813_v47   ;;  %3816 = vperm.xlu1 %6288, %v3812_v51   ;;  %v4173_v47 = vld [vmem:[%s7692_s5 + $0x38] sm:$0xff] }
0x1c82   :  { %3414 = vrot.lane.b32.xlu1 %v7323_v32, %s6430_s29 }
0x1cf9   :  { %v3612_v7 = vpop.permute.xlu1 %3611  ;;  %v3607_v24 = vpop.permute.xlu0 %3606 }
0x1cfa   :  { %v3615_v9 = vmul.f32 %v3612_v7, %v7150_v35  ;;  %v3614_v36 = vmul.f32 %v3607_v24, %v7142_v59  ;;  %v6207_v7 = vpack.c.bf16 %v4173_v47, %v4172_v4  ;;  %v4166_v24 = vld [vmem:[%s7692_s5] sm:$0xff] }
0x1cfc   :  { %v3623_v58 = vsel %vm63_vm2, %v3615_v9, 0.0  ;;  %v3616_v0 = vsel %vm63_vm2, %v3614_v36, 0.0  ;;  %v4167_v9 = vld [vmem:[%s7692_s5 + $0x8] sm:$0xff] }
0x1cfd   :  { %v3624_v15 = vrot.slane %v3623_v58, 4  ;;  %v3617_v17 = vrot.slane %v3616_v0, 4  ;;  %v3817_v6 = vpop.permute.xlu1 %3816  ;;  %v3822_v18 = vpop.permute.xlu0 %3821  ;;  %v6210_v36 = vpack.c.bf16 %v4167_v9, %v4166_v24 }
0x1cfe   :  { %v3824_v21 = vmul.f32 %v3817_v6, %v7369_v29  ;;  %v3825_v23 = vmul.f32 %v3822_v18, %v7360_v53  ;;  %v5254_v6 = vld [vmem:[%s7687_s0 + $0x8] sm:$0x3] }
0x1cff   :  { %v3625_v20 = vadd.f32 %v3624_v15, %v3623_v58  ;;  %v3618_v32 = vadd.f32 %v3617_v17, %v3616_v0  ;;  %v4168_v58 = vld [vmem:[%s7692_s5 + $0x10] sm:$0xff]  ;;  %v4169_v0 = vld [vmem:[%s7692_s5 + $0x18] sm:$0xff] }
0x1d00   :  { %v3826_v61 = vsel %vm661_vm3, %v3824_v21, 0.0  ;;  %v3833_v35 = vsel %vm661_vm3, %v3825_v23, 0.0  ;;  %v6213_v17 = vpack.c.bf16 %v4169_v0, %v4168_v58  ;;  %v7555_v0 = vld [vmem:[%s7688_s1] sm:$0xff] }
0x1d01   :  { %v3626_v5 = vrot.slane %v3625_v20, 2  ;;  %v3619_v59 = vrot.slane %v3618_v32, 2  ;;  %v3827_v27 = vrot.slane %v3826_v61, 4  ;;  %v3834_v28 = vrot.slane %v3833_v35, 4  ;;  %v3415_v26 = vpop.permute.xlu1 %3414 }
0x1d02   :  { %3417 = vst.msk [vmem:[#allocation3] sm:$0x3] %vm46_vm0, %v3415_v26 }
0x1d03   :  { %v3627_v30 = vadd.f32 %v3626_v5, %v3625_v20  ;;  %v3620_v54 = vadd.f32 %v3619_v59, %v3618_v32  ;;  %v3828_v19 = vadd.f32 %v3827_v27, %v3826_v61  ;;  %v3835_v37 = vadd.f32 %v3834_v28, %v3833_v35  ;;  %v5258_v59 = vld [vmem:[%s7694_s7] ss:$0 sm:$0xff] }
0x1d05   :  { %v3628_v29 = vrot.slane %v3627_v30, 1  ;;  %v3621_v39 = vrot.slane %v3620_v54, 1  ;;  %v3829_v53 = vrot.slane %v3828_v19, 2  ;;  %v3836_v12 = vrot.slane %v3835_v37, 2 }
0x1d07   :  { %v3629_v38 = vadd.f32 %v3628_v29, %v3627_v30  ;;  %v3622_v40 = vadd.f32 %v3621_v39, %v3620_v54  ;;  %v3830_v42 = vadd.f32 %v3829_v53, %v3828_v19  ;;  %v3837_v43 = vadd.f32 %v3836_v12, %v3835_v37 }
0x1d09   :  { %v3831_v44 = vrot.slane %v3830_v42, 1  ;;  %v3838_v14 = vrot.slane %v3837_v43, 1  ;;  %v4165_v46 = vld [vmem:[#allocation3] sm:$0x3]  ;;  %v3920_v48 = vsel %vm465_vm4, %v3629_v38, %v3622_v40 }
0x1d0a   :  { %4414 = vrot.lane.b32.xlu1 %v4165_v46, %s6427_s22  ;;  %5864 = vmatmul.mubr.msk.f32.vlgmr.msra.gmra.mrb[28].mxu0 %vm63_vm2, %v3920_v48  ;;  %v4444_v40 = vld [vmem:[%s7695_s8] sm:$0xff]  ;;  %v4446_v46 = vld [vmem:[%s7695_s8 + $0x10] sm:$0xff]  ;;  %v4447_v48 = vld [vmem:[%s7695_s8 + $0x18] sm:$0xff] }
0x1d0b   :  { %6193 = vmatpush3.bf16.msra.mxu0 %v7234_v33  ;;  %5874 = vmatprep.mubr.msk.f32.mxu0 %vm6424_vm1, %v6425_v11  ;;  %v3832_v49 = vadd.f32 %v3831_v44, %v3830_v42  ;;  %v3839_v55 = vadd.f32 %v3838_v14, %v3837_v43  ;;  %v4322_v33 = vld [vmem:[%s7693_s6 + $0x10] sm:$0xff]  ;;  %v4445_v42 = vld [vmem:[%s7695_s8 + $0x8] sm:$0xff]  ;;  %v4656_v43 = vld [vmem:[%s7696_s9] sm:$0xff] }
0x1d0c   :  { %6194 = vmatprep.subr.bf16.mxu0 %v6423_v3  ;;  %v6219_v62 = vpack.c.bf16 %v4323_v34, %v4322_v33  ;;  %v6222_v44 = vpack.c.bf16 %v4445_v42, %v4444_v40  ;;  %v4657_v14 = vld [vmem:[%s7696_s9 + $0x8] sm:$0xff] }
0x1d0d   :  { %v3999_v56 = vsel %vm465_vm4, %v3839_v55, %v3832_v49  ;;  %v6228_v57 = vpack.c.bf16 %v4657_v14, %v4656_v43  ;;  %v4659_v49 = vld [vmem:[%s7696_s9 + $0x18] sm:$0xff]  ;;  %v6225_v55 = vpack.c.bf16 %v4447_v48, %v4446_v46 }
0x1d0f   :  { %6196 = vmatpush3.bf16.msra.mxu0 %v7246_v13  ;;  %v4164_v13 = vld [vmem:[#allocation2] sm:$0x3] }
0x1d10   :  { %6215 = vmatprep.subr.bf16.mxu0 %v6423_v3 }
0x1d12   :  { %5875 = vmatmul.mubr.msk.f32.vlgmr.msra.gmra.mrb[28].mxu0 %vm63_vm2, %v3999_v56 }
0x1d13   :  { %6217 = vmatpush3.bf16.msra.mxu0 %v6216_v22  ;;  %5918 = vmatprep.mubr.msk.f32.mxu0 %vm6424_vm1, %v6425_v11  ;;  %v6231_v22 = vpack.c.bf16 %v4659_v49, %v4658_v45 }
0x1d14   :  { %6218 = vmatprep.subr.bf16.mxu0 %v6423_v3 }
0x1d17   :  { %6220 = vmatpush3.bf16.msra.mxu0 %v6219_v62  ;;  %v4870_v62 = vld [vmem:[%s7697_s10 + $0x20] sm:$0xff] }
0x1d18   :  { %6227 = vmatprep.subr.bf16.mxu0 %v6423_v3 }
0x1d1a   :  { %5919 = vmatmul.mubr.msk.f32.vlgmr.msra.gmra.mrb[30].mxu0 %vm63_vm2, %v4164_v13  ;;  %v4871_v13 = vld [vmem:[%s7697_s10 + $0x28] sm:$0xff] }
0x1d1b   :  { %5940 = vmatprep.mubr.msk.f32.mxu0 %vm6424_vm1, %v6425_v11  ;;  %6229 = vmatpush3.bf16.msra.mxu0 %v6228_v57 }
0x1d1c   :  { %6230 = vmatprep.subr.bf16.mxu0 %v6423_v3 }
0x1d1f   :  { %6232 = vmatpush3.bf16.msra.mxu0 %v6231_v22 }
0x1d20   :  { %6251 = vmatprep.subr.bf16.mxu0 %v6423_v3 }
0x1d7c   :  { %v4415_v39 = vpop.permute.xlu1 %4414 }
0x1de5   :  { %v4068_v60 = vpop.f32.mrb[28].mxu0 }
0x1de6   :  { %6375 = vtanh.f32 %v4068_v60  ;;  %v5876_v2 = vpop.f32.mrb[29].mxu0  ;;  %v6234_v60 = vpack.c.bf16 %v4871_v13, %v4870_v62 }
0x1de7   :  { %v4872_v2 = vld [vmem:[%s7697_s10 + $0x30] sm:$0xff] }
0x1ded   :  { %v4393_v1 = vpop.f32.mrb[30].mxu0 }
0x1dee   :  { %v5920_v31 = vpop.f32.mrb[31].mxu0 }
0x1df0   :  { %v6376_v51 = vpop.eup %6375 }
0x1df1   :  { %4074 = vst.msk [vmem:[#allocation4] sm:$0x3] %vm46_vm0, %v6376_v51  ;;  %5886 = vmatmul.mubr.msk.f32.vlgmr.msra.gmra.mrb[24].mxu1 %vm63_vm2, %v6376_v51 }
0x1df2   :  { %6205 = vmatpush3.bf16.msra.mxu1 %v6204_v8  ;;  %5896 = vmatprep.mubr.msk.f32.mxu1 %vm6424_vm1, %v6425_v11 }
0x1df3   :  { %6206 = vmatprep.subr.bf16.mxu1 %v6423_v3 }
0x1df6   :  { %6208 = vmatpush3.bf16.msra.mxu1 %v6207_v7 }
0x1df7   :  { %6209 = vmatprep.subr.bf16.mxu1 %v6423_v3 }
0x1df8   :  { %v4163_v15 = vld [vmem:[#allocation4] sm:$0x3] }
0x1df9   :  { %5897 = vmatmul.mubr.msk.f32.vlgmr.msra.gmra.mrb[26].mxu1 %vm63_vm2, %v4163_v15 }
0x1dfa   :  { %6211 = vmatpush3.bf16.msra.mxu1 %v6210_v36  ;;  %5907 = vmatprep.mubr.msk.f32.mxu1 %vm6424_vm1, %v6425_v11 }
0x1dfb   :  { %6212 = vmatprep.subr.bf16.mxu1 %v6423_v3 }
0x1dfe   :  { %6214 = vmatpush3.bf16.msra.mxu1 %v6213_v17 }
0x1dff   :  { %6221 = vmatprep.subr.bf16.mxu1 %v6423_v3 }
0x1e01   :  { %5908 = vmatmul.mubr.msk.f32.vlgmr.msra.gmra.mrb[28].mxu1 %vm63_vm2, %v5254_v6 }
0x1e02   :  { %5929 = vmatprep.mubr.msk.f32.mxu1 %vm6424_vm1, %v6425_v11  ;;  %6223 = vmatpush3.bf16.msra.mxu1 %v6222_v44 }
0x1e03   :  { %6224 = vmatprep.subr.bf16.mxu1 %v6423_v3 }
0x1e06   :  { %6226 = vmatpush3.bf16.msra.mxu1 %v6225_v55 }
0x1e07   :  { %6233 = vmatprep.subr.bf16.mxu1 %v6423_v3 }
0x1ec4   :  { %v4155_v18 = vpop.f32.mrb[24].mxu1 }
0x1ec5   :  { %v4156_v21 = vadd.f32 %v7316_v50, %v4155_v18  ;;  %v5887_v23 = vpop.f32.mrb[25].mxu1  ;;  %v7563_v18 = vld [vmem:[%s7688_s1 + $0x8] sm:$0xff]  ;;  %s5192_s1 = sshll.u32 %s6431_s3, 4  ;;  %s5193_s1 = int_to_ptr.vmem [resolvable:$true] %s5192_s1 }
0x1ec6   :  { %p6404_p1 = scmp.lt.s32.totalorder %s5193_s1, %s5193_s1 }
0x1ec7   :  { %4160 = vst.msk [vmem:[#allocation5 + $0x6] sm:$0x3] %vm1081_vm7, %v4156_v21  ;;  %v7568_v21 = vld [vmem:[%s7689_s2 + $0x4] sm:$0xf] }
0x1ecc   :  { %v4243_v20 = vpop.f32.mrb[26].mxu1 }
0x1ecd   :  { %v5898_v32 = vpop.f32.mrb[27].mxu1 }
0x1ed4   :  { %v4316_v61 = vpop.f32.mrb[28].mxu1 }
0x1ed5   :  { %v4317_v35 = vadd.f32 %v4316_v61, %v4243_v20  ;;  %v5909_v5 = vpop.f32.mrb[29].mxu1 }
0x1ed7   :  { %v4397_v27 = vadd.f32 %v4393_v1, %v4317_v35  ;;  %v6237_v1 = vpack.c.bf16 %v4873_v41, %v4872_v2 }
0x1ed9   :  { %v4405_v28 = vadd.f32 %v5258_v59, %v4397_v27 }
0x1edb   :  { %6377 = vtanh.f32 %v4405_v28  ;;  %v5259_v30 = vmul.f32 -1.442695, %v4405_v28 }
0x1edd   :  { %6379 = vpow2.f32 %v5259_v30 }
0x1ee5   :  { %v6378_v26 = vpop.eup %6377 }
0x1ee6   :  { %4419 = vrot.lane.b32.xlu0 %v6378_v26, %s6426_s4 }
0x1ee7   :  { %v6380_v50 = vpop.eup %6379 }
0x1ee8   :  { %v4409_v54 = vadd.f32 1.0, %v6380_v50 }
0x1eea   :  { %6381 = vrcp.f32 %v4409_v54 }
0x1ef4   :  { %v6382_v19 = vpop.eup %6381 }
0x1ef5   :  { %v4417_v53 = vmul.f32 %v6382_v19, %v4415_v39 }
0x1f58   :  { %v4420_v37 = vpop.permute.xlu0 %4419 }
0x1f59   :  { %v4422_v29 = vmul.f32 %v6382_v19, %v4420_v37 }
0x1f5b   :  { %4424 = vrot.lane.b32.xlu0 %v4422_v29, %s6427_s22 }
0x1fcd   :  { %v4425_v12 = vpop.permute.xlu0 %4424 }
0x1fce   :  { %v7491_v38 = vadd.f32 %v4425_v12, %v4417_v53 }
0x1fd0   :  { %6383 = vtanh.f32 %v7491_v38 }
0x1fda   :  { %v6384_v33 = vpop.eup %6383 }
0x1fdb   :  { %4430 = vrot.lane.b32.xlu1 %v6384_v33, %s6426_s4 }
0x204d   :  { %v4431_v34 = vpop.permute.xlu1 %4430 }
0x204e   :  { %v4433_v56 = vmul.f32 %v6382_v19, %v4431_v34 }
0x2050   :  { %4435 = vrot.lane.b32.xlu0 %v4433_v56, %s6427_s22 }
0x20c2   :  { %v4436_v63 = vpop.permute.xlu0 %4435 }
0x20c3   :  { %4438 = vst.msk [vmem:[#allocation2] sm:$0x3] %vm46_vm0, %v4436_v63  ;;  %5930 = vmatmul.mubr.msk.f32.vlgmr.msra.gmra.mrb[30].mxu1 %vm63_vm2, %v4436_v63  ;;  %5941 = vmatmul.mubr.msk.f32.vlgmr.msra.gmra.mrb[32].mxu0 %vm63_vm2, %v4436_v63 }
0x20c4   :  { %6235 = vmatpush3.bf16.msra.mxu1 %v6234_v60  ;;  %5951 = vmatprep.mubr.msk.f32.mxu1 %vm6424_vm1, %v6425_v11 }
0x20c5   :  { %6236 = vmatprep.subr.bf16.mxu1 %v6423_v3  ;;  %5984 = vmatprep.mubr.msk.f32.mxu0 %vm6424_vm1, %v6425_v11 }
0x20c8   :  { %6238 = vmatpush3.bf16.msra.mxu1 %v6237_v1 }
0x20c9   :  { %6239 = vmatprep.subr.bf16.mxu1 %v6423_v3 }
0x20cb   :  { %5952 = vmatmul.mubr.msk.f32.vlgmr.msra.gmra.mrb[32].mxu1 %vm63_vm2, %v4436_v63 }
0x20cc   :  { %5962 = vmatprep.mubr.msk.f32.mxu1 %vm6424_vm1, %v6425_v11 }
0x2196   :  { %v4516_v31 = vpop.f32.mrb[30].mxu1  ;;  %v4726_v8 = vpop.f32.mrb[32].mxu0 }
0x2197   :  { %v4529_v4 = vrot.slane %v4516_v31, %v6675_v16  ;;  %v4739_v47 = vrot.slane %v4726_v8, %v6675_v16  ;;  %v5931_v51 = vpop.f32.mrb[31].mxu1  ;;  %v5942_v7 = vpop.f32.mrb[33].mxu0 }
0x2199   :  { %v4530_v24 = vcombine.high %v4529_v4, %v4529_v4  ;;  %v4537_v9 = vrot.slane %v4529_v4, %v6675_v16  ;;  %v4740_v36 = vcombine.high %v4739_v47, %v4739_v47  ;;  %v4747_v58 = vrot.slane %v4739_v47, %v6675_v16 }
0x219b   :  { %v4544_v15 = vrot.slane %v4530_v24, %v6675_v16  ;;  %v4548_v17 = vrot.slane %v4537_v9, %v6679_v25  ;;  %v4754_v6 = vrot.slane %v4740_v36, %v6675_v16  ;;  %v4758_v61 = vrot.slane %v4747_v58, %v6679_v25  ;;  %v7577_v16 = vld [vmem:[%s7689_s2] sm:$0xf] }
0x219d   :  { %v4555_v23 = vmul.f32 %v4548_v17, %v7555_v0  ;;  %v4552_v20 = vrot.slane %v4544_v15, %v6679_v25  ;;  %v4762_v32 = vrot.slane %v4754_v6, %v6679_v25  ;;  %v4765_v28 = vmul.f32 %v4758_v61, %v7577_v16 }
0x219f   :  { %v4557_v35 = vsel %vm63_vm2, %v4555_v23, 0.0  ;;  %v4556_v5 = vmul.f32 %v4552_v20, %v7563_v18  ;;  %v4766_v59 = vmul.f32 %v4762_v32, %v7568_v21  ;;  %v4767_v30 = vsel %vm661_vm3, %v4765_v28, 0.0 }
0x21a0   :  { %4558 = vadd.xlane.f32.xlu1 %v4557_v35 }
0x21a1   :  { %v4560_v27 = vsel %vm63_vm2, %v4556_v5, 0.0  ;;  %v4770_v26 = vsel %vm661_vm3, %v4766_v59, 0.0 }
0x21a2   :  { %4561 = vadd.xlane.f32.xlu0 %v4560_v27 }
0x21a4   :  { %4771 = vadd.xlane.f32.xlu1 %v4770_v26 }
0x21a6   :  { %4768 = vadd.xlane.f32.xlu0 %v4767_v30  ;;  %v4866_v30 = vld [vmem:[%s7697_s10] sm:$0xff] }
0x222d   :  { %v4559_v50 = vpop.xlane.xlu1 %4558 }
0x222e   :  { %v4568_v19 = vrot.slane %v4559_v50, %v6717_v52 }
0x222f   :  { %v4562_v54 = vpop.xlane.xlu0 %4561 }
0x2230   :  { %v4572_v37 = vrot.slane %v4562_v54, %v6717_v52 }
0x2231   :  { %v4772_v29 = vpop.xlane.xlu1 %4771 }
0x2232   :  { %v4573_v39 = vsel %vm465_vm4, %v4572_v37, %v4568_v19  ;;  %v4782_v40 = vrot.slane %v4772_v29, %v6717_v52 }
0x2233   :  { %v4769_v53 = vpop.xlane.xlu0 %4768  ;;  %v4575_v12 = vsel %vm468_vm5, %v4573_v39, -inf }
0x2234   :  { %v4778_v42 = vrot.slane %v4769_v53, %v6717_v52  ;;  %4576 = vmax.xlane.f32.xlu0 %v4575_v12 }
0x2236   :  { %v4783_v43 = vsel %vm465_vm4, %v4782_v40, %v4778_v42 }
0x2237   :  { %v4785_v44 = vsel %vm680_vm6, %v4783_v43, -inf }
0x2238   :  { %4786 = vmax.xlane.f32.xlu1 %v4785_v44 }
0x22c1   :  { %v4577_v14 = vpop.xlane.xlu0 %4576 }
0x22c2   :  { %v4582_v46 = vrot.slane %v4577_v14, %v6679_v25  ;;  %v4586_v48 = vrot.slane %v4577_v14, %v6727_v10 }
0x22c4   :  { %v4589_v57 = vsub.f32 %v4559_v50, %v4582_v46  ;;  %v4590_v45 = vsub.f32 %v4562_v54, %v4586_v48  ;;  %v4867_v50 = vld [vmem:[%s7697_s10 + $0x8] sm:$0xff] }
0x22c5   :  { %v4787_v49 = vpop.xlane.xlu1 %4786  ;;  %v6240_v54 = vpack.c.bf16 %v4867_v50, %v4866_v30 }
0x22c6   :  { %v4591_v55 = vmul.f32 1.442695, %v4589_v57  ;;  %v4593_v22 = vmul.f32 1.442695, %v4590_v45  ;;  %v4792_v33 = vrot.slane %v4787_v49, %v6679_v25  ;;  %v4796_v34 = vrot.slane %v4787_v49, %v6727_v10 }
0x22c7   :  { %6241 = vmatpush3.bf16.msra.mxu1 %v6240_v54 }
0x22c8   :  { %6385 = vpow2.f32 %v4591_v55  ;;  %v4799_v56 = vsub.f32 %v4769_v53, %v4792_v33  ;;  %v4800_v62 = vsub.f32 %v4772_v29, %v4796_v34  ;;  %6242 = vmatprep.subr.bf16.mxu1 %v6423_v3 }
0x22c9   :  { %6387 = vpow2.f32 %v4593_v22 }
0x22ca   :  { %v4801_v13 = vmul.f32 1.442695, %v4799_v56  ;;  %v4803_v60 = vmul.f32 1.442695, %v4800_v62 }
0x22cc   :  { %6389 = vpow2.f32 %v4801_v13 }
0x22cd   :  { %6391 = vpow2.f32 %v4803_v60 }
0x22d2   :  { %v6386_v2 = vpop.eup %6385 }
0x22d3   :  { %v6388_v41 = vpop.eup %6387  ;;  %4598 = vperm.xlu0 %6287, %v6386_v2  }
0x22d4   :  { %4601 = vperm.xlu1 %6288, %v6388_v41  }
0x22d6   :  { %v6390_v63 = vpop.eup %6389 }
0x22d7   :  { %v6392_v1 = vpop.eup %6391 }
0x22d8   :  { %4811 = vperm.xlu0 %6287, %v6392_v1   ;;  %4808 = vperm.xlu1 %6288, %v6390_v63  }
0x2352   :  { %v4599_v31 = vpop.permute.xlu0 %4598 }
0x2353   :  { %v4606_v8 = vrot.slane %v4599_v31, %v6717_v52  ;;  %v4602_v4 = vpop.permute.xlu1 %4601 }
0x2354   :  { %v4610_v47 = vrot.slane %v4602_v4, %v6717_v52 }
0x2356   :  { %v4611_v51 = vsel %vm465_vm4, %v4610_v47, %v4606_v8 }
0x2357   :  { %v4812_v7 = vpop.permute.xlu0 %4811  ;;  %v4809_v24 = vpop.permute.xlu1 %4808  ;;  %v4613_v9 = vsel %vm468_vm5, %v4611_v51, 0.0  ;;  %v5021_v51 = vld [vmem:[%s7697_s10 + $0x50] sm:$0xff] }
0x2358   :  { %v4820_v36 = vrot.slane %v4812_v7, %v6717_v52  ;;  %v4816_v58 = vrot.slane %v4809_v24, %v6717_v52  ;;  %4614 = vadd.xlane.f32.xlu1 %v4613_v9  ;;  %v5022_v7 = vld [vmem:[%s7697_s10 + $0x58] sm:$0xff] }
0x235a   :  { %v4821_v15 = vsel %vm465_vm4, %v4820_v36, %v4816_v58  ;;  %v6249_v58 = vpack.c.bf16 %v5022_v7, %v5021_v51 }
0x235b   :  { %v4823_v17 = vsel %vm680_vm6, %v4821_v15, 0.0 }
0x235c   :  { %4824 = vadd.xlane.f32.xlu0 %v4823_v17 }
0x23e5   :  { %v4615_v6 = vpop.xlane.xlu1 %4614 }
0x23e6   :  { %6393 = vrcp.f32 %v4615_v6 }
0x23e9   :  { %v4825_v23 = vpop.xlane.xlu0 %4824 }
0x23ea   :  { %6395 = vrcp.f32 %v4825_v23  ;;  %v5101_v23 = vld [vmem:[%s7698_s11] sm:$0xff] }
0x23f0   :  { %v6394_v20 = vpop.eup %6393 }
0x23f1   :  { %v4625_v32 = vrot.slane %v6394_v20, %v6727_v10  ;;  %v4621_v61 = vrot.slane %v6394_v20, %v6679_v25  ;;  %v5102_v20 = vld [vmem:[%s7698_s11 + $0x8] sm:$0xff] }
0x23f3   :  { %v4629_v35 = vmul.f32 %v6388_v41, %v4625_v32  ;;  %v4628_v5 = vmul.f32 %v6386_v2, %v4621_v61  ;;  %v6252_v32 = vpack.c.bf16 %v5102_v20, %v5101_v23  ;;  %v5104_v61 = vld [vmem:[%s7698_s11 + $0x18] sm:$0xff] }
0x23f4   :  { %v6396_v59 = vpop.eup %6395 }
0x23f5   :  { %4637 = vperm.xlu1 %6288, %v4629_v35   ;;  %4632 = vperm.xlu0 %6287, %v4628_v5   ;;  %v4831_v52 = vrot.slane %v6396_v59, %v6679_v25  ;;  %v4835_v27 = vrot.slane %v6396_v59, %v6727_v10  ;;  %v4868_v25 = vld [vmem:[%s7697_s10 + $0x10] sm:$0xff]  ;;  %v4869_v10 = vld [vmem:[%s7697_s10 + $0x18] sm:$0xff] }
0x23f6   :  { %v6243_v19 = vpack.c.bf16 %v4869_v10, %v4868_v25  ;;  %6253 = vmatpush3.bf16.msra.mxu0 %v6252_v32 }
0x23f7   :  { %v4838_v28 = vmul.f32 %v6390_v63, %v4831_v52  ;;  %v4839_v26 = vmul.f32 %v6392_v1, %v4835_v27  ;;  %6254 = vmatprep.subr.bf16.mxu0 %v6423_v3 }
0x23f8   :  { %6244 = vmatpush3.bf16.msra.mxu1 %v6243_v19 }
0x23f9   :  { %4842 = vperm.xlu1 %6288, %v4838_v28   ;;  %4847 = vperm.xlu0 %6287, %v4839_v26  }
0x23fa   :  { %6245 = vmatprep.subr.bf16.mxu1 %v6423_v3 }
0x23fd   :  { %4440 = vrot.lane.b32.xlu1 %v7491_v38, %s6430_s29 }
0x2474   :  { %v4638_v37 = vpop.permute.xlu1 %4637  ;;  %v4633_v29 = vpop.permute.xlu0 %4632 }
0x2475   :  { %v4641_v39 = vmul.f32 %v4638_v37, %v7563_v18  ;;  %v4640_v38 = vmul.f32 %v4633_v29, %v7555_v0 }
0x2477   :  { %v4649_v53 = vsel %vm63_vm2, %v4641_v39, 0.0  ;;  %v4642_v12 = vsel %vm63_vm2, %v4640_v38, 0.0 }
0x2478   :  { %v4650_v40 = vrot.slane %v4649_v53, 4  ;;  %v4643_v42 = vrot.slane %v4642_v12, 4  ;;  %v4843_v43 = vpop.permute.xlu1 %4842  ;;  %v4848_v44 = vpop.permute.xlu0 %4847 }
0x2479   :  { %v4850_v14 = vmul.f32 %v4843_v43, %v7577_v16  ;;  %v4851_v46 = vmul.f32 %v4848_v44, %v7568_v21  ;;  %v5019_v21 = vld [vmem:[%s7697_s10 + $0x40] sm:$0xff]  ;;  %v5020_v16 = vld [vmem:[%s7697_s10 + $0x48] sm:$0xff] }
0x247a   :  { %v4651_v48 = vadd.f32 %v4650_v40, %v4649_v53  ;;  %v4644_v57 = vadd.f32 %v4643_v42, %v4642_v12  ;;  %v6246_v1 = vpack.c.bf16 %v5020_v16, %v5019_v21 }
0x247b   :  { %v4852_v45 = vsel %vm661_vm3, %v4850_v14, 0.0  ;;  %v4859_v18 = vsel %vm661_vm3, %v4851_v46, 0.0 }
0x247c   :  { %v4652_v49 = vrot.slane %v4651_v48, 2  ;;  %v4645_v0 = vrot.slane %v4644_v57, 2  ;;  %v4853_v55 = vrot.slane %v4852_v45, 4  ;;  %v4860_v22 = vrot.slane %v4859_v18, 4  ;;  %v4441_v33 = vpop.permute.xlu1 %4440 }
0x247d   :  { %4443 = vst.msk [vmem:[#allocation3] sm:$0x3] %vm46_vm0, %v4441_v33 }
0x247e   :  { %v4653_v34 = vadd.f32 %v4652_v49, %v4651_v48  ;;  %v4646_v56 = vadd.f32 %v4645_v0, %v4644_v57  ;;  %v4854_v62 = vadd.f32 %v4853_v55, %v4852_v45  ;;  %v4861_v13 = vadd.f32 %v4860_v22, %v4859_v18 }
0x2480   :  { %v4654_v60 = vrot.slane %v4653_v34, 1  ;;  %v4647_v2 = vrot.slane %v4646_v56, 1  ;;  %v4855_v41 = vrot.slane %v4854_v62, 2  ;;  %v4862_v63 = vrot.slane %v4861_v13, 2 }
0x2482   :  { %v4655_v31 = vadd.f32 %v4654_v60, %v4653_v34  ;;  %v4648_v8 = vadd.f32 %v4647_v2, %v4646_v56  ;;  %v4856_v4 = vadd.f32 %v4855_v41, %v4854_v62  ;;  %v4863_v47 = vadd.f32 %v4862_v63, %v4861_v13 }
0x2484   :  { %v4857_v24 = vrot.slane %v4856_v4, 1  ;;  %v4864_v9 = vrot.slane %v4863_v47, 1  ;;  %v4946_v36 = vsel %vm465_vm4, %v4655_v31, %v4648_v8 }
0x2485   :  { %5963 = vmatmul.mubr.msk.f32.vlgmr.msra.gmra.mrb[32].mxu1 %vm63_vm2, %v4946_v36 }
0x2486   :  { %6247 = vmatpush3.bf16.msra.mxu1 %v6246_v1  ;;  %5973 = vmatprep.mubr.msk.f32.mxu1 %vm6424_vm1, %v6425_v11  ;;  %v4858_v15 = vadd.f32 %v4857_v24, %v4856_v4  ;;  %v4865_v17 = vadd.f32 %v4864_v9, %v4863_v47  ;;  %v5103_v11 = vld [vmem:[%s7698_s11 + $0x10] sm:$0xff]  ;;  %s6399_s11 = scalar_lea.vmem %s5193_s1, 160 }
0x2487   :  { %6248 = vmatprep.subr.bf16.mxu1 %v6423_v3  ;;  %v6255_v35 = vpack.c.bf16 %v5104_v61, %v5103_v11  ;;  %v5265_v3 = vld [vmem:[%s7699_s12] ss:$0 sm:$0xff]  ;;  %p6400_p0 = scmp.ne.s32.totalorder %s5193_s1, %s6399_s11  ;;  %p6405_p2 = scmp.lt.s32.totalorder %s6399_s11, %s6399_s11 }
0x2488   :  { %v5025_v6 = vsel %vm465_vm4, %v4865_v17, %v4858_v15 }
0x2489   :  { %6256 = vmatpush3.bf16.msra.mxu0 %v6255_v35  ;;  %p6406_p3 = por %p6405_p2, %p6404_p1 }
0x248a   :  { %6250 = vmatpush3.bf16.msra.mxu1 %v6249_v58 }
0x248b   :  { %p6407_p4 = pnand %p6406_p3, %p6400_p0 }
0x248d   :  { %5974 = vmatmul.mubr.msk.f32.vlgmr.msra.gmra.mrb[32].mxu1 %vm63_vm2, %v5025_v6 }
0x2560   :  { %v5094_v5 = vpop.f32.mrb[32].mxu1 }
0x2561   :  { %6397 = vtanh.f32 %v5094_v5  ;;  %v5975_v59 = vpop.f32.mrb[33].mxu1 }
0x256b   :  { %v6398_v52 = vpop.eup %6397 }
0x256c   :  { %5100 = vst.msk [vmem:[#allocation4] sm:$0x3] %vm46_vm0, %v6398_v52  ;;  %5985 = vmatmul.mubr.msk.f32.vlgmr.msra.gmra.mrb[34].mxu0 %vm63_vm2, %v6398_v52 }
0x263f   :  { %v5181_v27 = vpop.f32.mrb[34].mxu0 }
0x2640   :  { %v5182_v28 = vadd.f32 %v5265_v3, %v5181_v27  ;;  %v5986_v26 = vpop.f32.mrb[35].mxu0 }
0x2642   :  { %5186 = vst.msk [vmem:[#allocation5 + $0x8] sm:$0x3] %vm1081_vm7, %v5182_v28 }
0x2643   :  { %6410 = shalt.err (!%p6407_p4)
}
0x2644   :  { %s6411_s17 = scalar_lea.hbm %s7700_s13, 160 }
0x2645   :  { %p6412_p5 = scmp.ne.s32.totalorder %s7700_s13, %s6411_s17  ;;  %p6415_p6 = scmp.lt.u32.totalorder %s6411_s17, %s7700_s13 }
0x2647   :  { %p6417_p7 = pnand %p6415_p6, %p6412_p5 }
0x2649   :  { %6420 = shalt.err (!%p6417_p7)
}
0x264a   :  { %s6432_s21 = smov 2  }
0x264b   :  { %5198 = dma.vmem_to_hbm [thread:$0]  %s5193_s1, 160, %s7700_s13, [#allocation6], %s6427_s22, %s6427_s22, %s6432_s21  }
0x264c   :  { %6421 = dma.done.wait [#allocation6], 160  }
0x264d   :  { %6422 = vsyncadd [#allocation6], 4294967136 }
0x264e   :  { %5202 = vsyncpa [#allocation6], 1 }

</bundles_post_ra>
